<compile_context>
chip_gen: v7x
topology: tpu7x:2x2x1
jax: 0.10.0
libtpu: 0.0.40
codegen_flags: <defaults>
</compile_context>

<pallas_src>
import functools

import jax
import jax.numpy as jnp
from jax.experimental import pallas as pl
from jax.experimental.pallas import tpu as pltpu

LN_EPS = 1e-5
WEIGHT_DTYPE = jnp.bfloat16   # MXU operand dtype; accumulation stays float32
ACT_DTYPE = jnp.bfloat16      # activation streaming dtype (HBM <-> VMEM)


def _round_up(x, m):
    return ((x + m - 1) // m) * m


def _pick_bt(batch, seq, target_m=256):
    """Largest divisor of `batch` whose folded M = Bt*seq stays <= target_m.

    target_m=256 fills the v6e/v7x MXU rows (128 is already enough on v5e).
    When batch > Bt this naturally leaves >= 2 grid steps, which keeps both
    v7x TensorCores busy; when batch*seq <= target_m the whole problem is a
    single MXU pass anyway so a length-1 grid is fine.
    """
    bt = 1
    for cand in range(1, batch + 1):
        if batch % cand == 0 and cand * seq <= target_m:
            bt = cand
    return bt


# ----------------------------------------------------------------------------
# In-kernel helpers (operate on values, not refs)
# ----------------------------------------------------------------------------
def _add_layernorm(y, res, gamma, beta, e_true):
    """Residual add + LayerNorm over the TRUE (unpadded) feature width.

    Padded feature columns are zero everywhere by construction, so plain sums
    divided by e_true give exact moments; gamma/beta are zero-padded so padded
    output columns stay zero for the next stage.
    """
    z = y + res                                     # f32
    inv_e = 1.0 / e_true
    mean = jnp.sum(z, axis=-1, keepdims=True) * inv_e
    var = jnp.sum(z * z, axis=-1, keepdims=True) * inv_e - mean * mean
    return (z - mean) * jax.lax.rsqrt(var + LN_EPS) * gamma + beta


def _mha(xq2d, xkv2d, bt, sq, sk, wq, bq, wkv, bk, bv, wo, bo, n_heads):
    """Multi-head attention on a folded (bt*s, Ep) activation slab.

    xq2d : (bt*sq, Ep) bf16 query-side input
    xkv2d: (bt*sk, Ep) bf16 key/value-side input
    wq   : (Ep, Ep)  bf16, head-blocked output cols, 1/sqrt(hd) pre-folded
    wkv  : (Ep, 2Ep) bf16, packed K|V projection, head-blocked
    wo   : (Ep, Ep)  bf16, output projection (head-blocked input rows)
    """
    M, Ep = xq2d.shape
    H = n_heads
    hd = Ep // H            # padded head dim, multiple of 128
    cdt = wq.dtype

    # Big-M projections (f32 accumulation): M = bt*s rows feed the MXU.
    q = jnp.dot(xq2d, wq, preferred_element_type=jnp.float32) + bq       # (bt*sq, Ep)
    kv = jnp.dot(xkv2d, wkv, preferred_element_type=jnp.float32)         # (bt*sk, 2Ep)
    k = kv[:, :Ep] + bk
    v = kv[:, Ep:] + bv
    qc, kc, vc = q.astype(cdt), k.astype(cdt), v.astype(cdt)

    # Head split: hd is a multiple of 128 so every slice below is lane-tile
    # aligned -> pure layout, no cross-lane XLU shuffles.
    def split(x2d, s):
        return jnp.concatenate(
            [x2d[:, h * hd:(h + 1) * hd].reshape(bt, s, hd) for h in range(H)],
            axis=0)                                                        # (H*bt, s, hd)

    q3, k3, v3 = split(qc, sq), split(kc, sk), split(vc, sk)

    # Scores / softmax (f32 stats), batched over the fused head*batch axis.
    # TODO(synk): for long Sk switch to an online-softmax (flash) loop over
    # 256-wide KV tiles instead of materializing the full (H*bt,sq,sk) f32
    # score tensor -- required for v7x's 64 MiB VMEM at production Sk.
    s = jax.lax.dot_general(q3, k3, (((2,), (2,)), ((0,), (0,))),
                            preferred_element_type=jnp.float32)            # (H*bt, sq, sk)
    s = s - jnp.max(s, axis=-1, keepdims=True)
    p = jnp.exp(s)
    p = p * pl.reciprocal(jnp.sum(p, axis=-1, keepdims=True), approx=True)

    o = jax.lax.dot_general(p.astype(cdt), v3, (((2,), (1,)), ((0,), (0,))),
                            preferred_element_type=jnp.float32)            # (H*bt, sq, hd)
    o = o.astype(cdt)

    # Head merge: lane-aligned concat back to (M, Ep), then ONE full-K matmul
    # against wo (replaces H small K=hd matmuls + an H-way VPU reduction).
    om = jnp.concatenate(
        [o[h * bt:(h + 1) * bt].reshape(bt * sq, hd) for h in range(H)], axis=-1)
    return jnp.dot(om, wo, preferred_element_type=jnp.float32) + bo       # (M, Ep) f32


def _ffn(x2d, w1, b1, w2, b2):
    h = jnp.dot(x2d, w1, preferred_element_type=jnp.float32) + b1
    h = jnp.maximum(h, 0.0)
    return jnp.dot(h.astype(w2.dtype), w2, preferred_element_type=jnp.float32) + b2


# ----------------------------------------------------------------------------
# Fused decoder-block kernel (one grid step = Bt batch rows)
# ----------------------------------------------------------------------------
def _block_kernel(x_ref, ctx_ref,
                  wq_s_ref, wkv_s_ref, wo_s_ref,
                  wq_c_ref, wkv_c_ref, wo_c_ref,
                  w1_ref, w2_ref, vec_ref, b1_ref,
                  out_ref, *, n_heads, e_true):
    Bt, Sq, Ep = x_ref.shape
    _, Sk, _ = ctx_ref.shape

    # Packed bias / LayerNorm parameters: one (15, Ep) f32 array.
    vec = vec_ref[...]
    (bq_s, bk_s, bv_s, bo_s, g1, be1,
     bq_c, bk_c, bv_c, bo_c, g2, be2,
     bf2, g3, be3) = [vec[i:i + 1, :] for i in range(15)]

    x2 = x_ref[...].reshape(Bt * Sq, Ep)      # bf16, folded M = Bt*Sq rows
    c2 = ctx_ref[...].reshape(Bt * Sk, Ep)    # bf16

    # 1) self-attention -> +residual -> LN1
    sa = _mha(x2, x2, Bt, Sq, Sq, wq_s_ref[...], bq_s, wkv_s_ref[...], bk_s, bv_s,
              wo_s_ref[...], bo_s, n_heads)
    h1 = _add_layernorm(sa, x2.astype(jnp.float32), g1, be1, e_true)
    h1b = h1.astype(x2.dtype)                 # bf16 cast hoisted once per stage

    # 2) cross-attention -> +residual -> LN2
    ca = _mha(h1b, c2, Bt, Sq, Sk, wq_c_ref[...], bq_c, wkv_c_ref[...], bk_c, bv_c,
              wo_c_ref[...], bo_c, n_heads)
    h2 = _add_layernorm(ca, h1, g2, be2, e_true)
    h2b = h2.astype(x2.dtype)

    # 3) FFN -> +residual -> LN3
    f = _ffn(h2b, w1_ref[...], b1_ref[...], w2_ref[...], bf2)
    out = _add_layernorm(f, h2, g3, be3, e_true)
    out_ref[...] = out.reshape(Bt, Sq, Ep).astype(out_ref.dtype)


# ----------------------------------------------------------------------------
# Parameter init (true PyTorch shapes, f32) and packing into kernel operands
# ----------------------------------------------------------------------------
def init_params(key, embed_dim, n_heads, dim_ff):
    E, F = embed_dim, dim_ff
    assert E % n_heads == 0
    s = 0.05
    keys = iter(jax.random.split(key, 20))

    def rnd(shape):
        return jax.random.normal(next(keys), shape, jnp.float32) * s

    p = {}
    for pre in ("self", "cross"):
        p[f"{pre}_wq"], p[f"{pre}_wk"] = rnd((E, E)), rnd((E, E))
        p[f"{pre}_wv"], p[f"{pre}_wo"] = rnd((E, E)), rnd((E, E))
        p[f"{pre}_bq"], p[f"{pre}_bk"] = rnd((E,)), rnd((E,))
        p[f"{pre}_bv"], p[f"{pre}_bo"] = rnd((E,)), rnd((E,))
    p["w1"], p["b1"] = rnd((E, F)), rnd((F,))
    p["w2"], p["b2"] = rnd((F, E)), rnd((E,))
    for i in (1, 2, 3):
        p[f"ln{i}_g"] = jnp.ones((E,), jnp.float32)
        p[f"ln{i}_b"] = jnp.zeros((E,), jnp.float32)
    return p


def _pack_params(p, n_heads):
    """Pad to lane-aligned, head-blocked layout; fold scale; pack small vecs."""
    E = p["self_wq"].shape[0]
    F = p["w1"].shape[1]
    H = n_heads
    hd = E // H
    hd_pad = _round_up(hd, 128)          # lane-aligned per-head slices
    Ep, Fp = H * hd_pad, _round_up(F, 128)
    scale = 1.0 / float(hd) ** 0.5
    wdt = WEIGHT_DTYPE

    def hb_cols(w):      # (in, H*hd) -> (in, Ep): each head's cols at a 128-aligned offset
        return jnp.concatenate(
            [jnp.pad(w[:, h * hd:(h + 1) * hd], ((0, 0), (0, hd_pad - hd)))
             for h in range(H)], axis=1)

    def hb_rows(w):      # (H*hd, out) -> (Ep, out)
        return jnp.concatenate(
            [jnp.pad(w[h * hd:(h + 1) * hd, :], ((0, hd_pad - hd), (0, 0)))
             for h in range(H)], axis=0)

    def hb_vec(b):       # (H*hd,) -> (Ep,)
        return jnp.concatenate(
            [jnp.pad(b[h * hd:(h + 1) * hd], (0, hd_pad - hd)) for h in range(H)])

    def tail(b, n):      # (k,) -> (n,)
        return jnp.pad(b, (0, n - b.shape[0]))

    def attn(pre):
        wq = hb_cols(p[f"{pre}_wq"] * scale)            # 1/sqrt(hd) folded in
        wk = hb_cols(p[f"{pre}_wk"])
        wv = hb_cols(p[f"{pre}_wv"])
        wq = jnp.pad(wq, ((0, Ep - E), (0, 0))).astype(wdt)                  # (Ep, Ep)
        wkv = jnp.pad(jnp.concatenate([wk, wv], axis=1),
                      ((0, Ep - E), (0, 0))).astype(wdt)                     # (Ep, 2Ep)
        wo = jnp.pad(hb_rows(p[f"{pre}_wo"]), ((0, 0), (0, Ep - E))).astype(wdt)
        return (wq, wkv, wo,
                hb_vec(p[f"{pre}_bq"] * scale), hb_vec(p[f"{pre}_bk"]),
                hb_vec(p[f"{pre}_bv"]), tail(p[f"{pre}_bo"], Ep))

    wq_s, wkv_s, wo_s, bq_s, bk_s, bv_s, bo_s = attn("self")
    wq_c, wkv_c, wo_c, bq_c, bk_c, bv_c, bo_c = attn("cross")

    w1 = jnp.pad(p["w1"], ((0, Ep - E), (0, Fp - F))).astype(wdt)
    w2 = jnp.pad(p["w2"], ((0, Fp - F), (0, Ep - E))).astype(wdt)
    b1 = tail(p["b1"], Fp).reshape(1, Fp)

    vec = jnp.stack([
        bq_s, bk_s, bv_s, bo_s, tail(p["ln1_g"], Ep), tail(p["ln1_b"], Ep),
        bq_c, bk_c, bv_c, bo_c, tail(p["ln2_g"], Ep), tail(p["ln2_b"], Ep),
        tail(p["b2"], Ep), tail(p["ln3_g"], Ep), tail(p["ln3_b"], Ep)],
        axis=0).astype(jnp.float32)                                          # (15, Ep)

    weights = (wq_s, wkv_s, wo_s, wq_c, wkv_c, wo_c, w1, w2)
    return weights, vec, b1, Ep


def _const_spec(arr):
    # Full-array block, constant index map (weights stay resident across steps).
    # TODO(synk): at production sizes add pipeline_mode=pl.Buffered(1) here
    # (constant index_map => double-buffering is wasted VMEM on v7x) and tile
    # the FFN over F with an f32 accumulator for the W2 K-reduction.
    zeros = (0,) * arr.ndim
    return pl.BlockSpec(arr.shape, lambda b, _z=zeros: _z)


def cross_attention_block(params, x, context, n_heads):
    B, Sq, E = x.shape
    _, Sk, Ec = context.shape
    assert Ec == E and E % n_heads == 0

    weights, vec, b1, Ep = _pack_params(params, n_heads)

    # bf16 activation streaming + lane padding (Ep is a multiple of 128, so the
    # kernel's stores are lane-dense; padded columns are zero by construction).
    xp = jnp.pad(x.astype(ACT_DTYPE), ((0, 0), (0, 0), (0, Ep - E)))
    cp = jnp.pad(context.astype(ACT_DTYPE), ((0, 0), (0, 0), (0, Ep - E)))

    Bt = _pick_bt(B, Sq)                 # fold batch rows into the matmul M dim
    grid = (B // Bt,)

    in_specs = ([pl.BlockSpec((Bt, Sq, Ep), lambda b: (b, 0, 0)),
                 pl.BlockSpec((Bt, Sk, Ep), lambda b: (b, 0, 0))]
                + [_const_spec(w) for w in weights]
                + [_const_spec(vec), _const_spec(b1)])

    kernel = functools.partial(_block_kernel, n_heads=n_heads, e_true=E)

    out = pl.pallas_call(
        kernel,
        out_shape=jax.ShapeDtypeStruct((B, Sq, Ep), ACT_DTYPE),
        grid=grid,
        in_specs=in_specs,
        out_specs=pl.BlockSpec((Bt, Sq, Ep), lambda b: (b, 0, 0)),
        compiler_params=pltpu.CompilerParams(
            dimension_semantics=("parallel",),
            # Raise the 16/32 MiB default scoped-VMEM limit; stays within the
            # 64 MiB physical ceiling of v7x (plenty on v5e/v6e's 128 MiB).
            vmem_limit_bytes=64 * 1024 * 1024),
    )(xp, cp, *weights, vec, b1)

    return out[:, :, :E]                 # drop lane padding outside the kernel


if __name__ == "__main__":
    B, Sq, Sk = 2, 8, 16
    embed_dim, n_heads, dim_ff = 32, 4, 64

    key = jax.random.PRNGKey(0)
    kx, kc, kp = jax.random.split(key, 3)
    x = jax.random.normal(kx, (B, Sq, embed_dim), jnp.float32)
    context = jax.random.normal(kc, (B, Sk, embed_dim), jnp.float32)
    params = init_params(kp, embed_dim, n_heads, dim_ff)

    out = cross_attention_block(params, x, context, n_heads)
    out = jax.block_until_ready(out)
    assert out.shape == (B, Sq, embed_dim)
    assert bool(jnp.all(jnp.isfinite(out.astype(jnp.float32))))
    print("KERNEL_OK")
</pallas_src>

<mosaic_0001>
module attributes {stable_mosaic.version = 11 : i64} {
  func.func @_block_kernel(%arg0: i32, %arg1: memref<2x8x512xbf16, #tpu.memory_space<vmem>>, %arg2: memref<2x16x512xbf16, #tpu.memory_space<vmem>>, %arg3: memref<512x512xbf16, #tpu.memory_space<vmem>>, %arg4: memref<512x1024xbf16, #tpu.memory_space<vmem>>, %arg5: memref<512x512xbf16, #tpu.memory_space<vmem>>, %arg6: memref<512x512xbf16, #tpu.memory_space<vmem>>, %arg7: memref<512x1024xbf16, #tpu.memory_space<vmem>>, %arg8: memref<512x512xbf16, #tpu.memory_space<vmem>>, %arg9: memref<512x128xbf16, #tpu.memory_space<vmem>>, %arg10: memref<128x512xbf16, #tpu.memory_space<vmem>>, %arg11: memref<15x512xf32, #tpu.memory_space<vmem>>, %arg12: memref<1x128xf32, #tpu.memory_space<vmem>>, %arg13: memref<2x8x512xbf16, #tpu.memory_space<vmem>>) attributes {dimension_semantics = [#tpu.dimension_semantics<parallel>], iteration_bounds = array<i64: 1>, scalar_prefetch = 0 : i64, scratch_operands = 0 : i64, tpu.core_type = #tpu.core_type<tc>, window_params = [{transform_indices = @transform_0, window_bounds = array<i64: 2, 8, 512>}, {transform_indices = @transform_1, window_bounds = array<i64: 2, 16, 512>}, {pipeline_mode = #tpu.pipeline_mode<synchronous>, transform_indices = @transform_2, window_bounds = array<i64: 512, 512>}, {pipeline_mode = #tpu.pipeline_mode<synchronous>, transform_indices = @transform_3, window_bounds = array<i64: 512, 1024>}, {pipeline_mode = #tpu.pipeline_mode<synchronous>, transform_indices = @transform_4, window_bounds = array<i64: 512, 512>}, {pipeline_mode = #tpu.pipeline_mode<synchronous>, transform_indices = @transform_5, window_bounds = array<i64: 512, 512>}, {pipeline_mode = #tpu.pipeline_mode<synchronous>, transform_indices = @transform_6, window_bounds = array<i64: 512, 1024>}, {pipeline_mode = #tpu.pipeline_mode<synchronous>, transform_indices = @transform_7, window_bounds = array<i64: 512, 512>}, {pipeline_mode = #tpu.pipeline_mode<synchronous>, transform_indices = @transform_8, window_bounds = array<i64: 512, 128>}, {pipeline_mode = #tpu.pipeline_mode<synchronous>, transform_indices = @transform_9, window_bounds = array<i64: 128, 512>}, {pipeline_mode = #tpu.pipeline_mode<synchronous>, transform_indices = @transform_10, window_bounds = array<i64: 15, 512>}, {pipeline_mode = #tpu.pipeline_mode<synchronous>, transform_indices = @transform_11, window_bounds = array<i64: 1, 128>}, {transform_indices = @transform_12, window_bounds = array<i64: 2, 8, 512>}]} {
    %c0 = arith.constant 0 : index
    %c0_0 = arith.constant 0 : index
    %0 = vector.load %arg11[%c0, %c0_0] : memref<15x512xf32, #tpu.memory_space<vmem>>, vector<15x512xf32>
    %1 = vector.extract_strided_slice %0 {offsets = [0, 0], sizes = [1, 512], strides = [1, 1]} : vector<15x512xf32> to vector<1x512xf32>
    %2 = vector.extract_strided_slice %0 {offsets = [1, 0], sizes = [1, 512], strides = [1, 1]} : vector<15x512xf32> to vector<1x512xf32>
    %3 = vector.extract_strided_slice %0 {offsets = [2, 0], sizes = [1, 512], strides = [1, 1]} : vector<15x512xf32> to vector<1x512xf32>
    %4 = vector.extract_strided_slice %0 {offsets = [3, 0], sizes = [1, 512], strides = [1, 1]} : vector<15x512xf32> to vector<1x512xf32>
    %5 = vector.extract_strided_slice %0 {offsets = [4, 0], sizes = [1, 512], strides = [1, 1]} : vector<15x512xf32> to vector<1x512xf32>
    %6 = vector.extract_strided_slice %0 {offsets = [5, 0], sizes = [1, 512], strides = [1, 1]} : vector<15x512xf32> to vector<1x512xf32>
    %7 = vector.extract_strided_slice %0 {offsets = [6, 0], sizes = [1, 512], strides = [1, 1]} : vector<15x512xf32> to vector<1x512xf32>
    %8 = vector.extract_strided_slice %0 {offsets = [7, 0], sizes = [1, 512], strides = [1, 1]} : vector<15x512xf32> to vector<1x512xf32>
    %9 = vector.extract_strided_slice %0 {offsets = [8, 0], sizes = [1, 512], strides = [1, 1]} : vector<15x512xf32> to vector<1x512xf32>
    %10 = vector.extract_strided_slice %0 {offsets = [9, 0], sizes = [1, 512], strides = [1, 1]} : vector<15x512xf32> to vector<1x512xf32>
    %11 = vector.extract_strided_slice %0 {offsets = [10, 0], sizes = [1, 512], strides = [1, 1]} : vector<15x512xf32> to vector<1x512xf32>
    %12 = vector.extract_strided_slice %0 {offsets = [11, 0], sizes = [1, 512], strides = [1, 1]} : vector<15x512xf32> to vector<1x512xf32>
    %13 = vector.extract_strided_slice %0 {offsets = [12, 0], sizes = [1, 512], strides = [1, 1]} : vector<15x512xf32> to vector<1x512xf32>
    %14 = vector.extract_strided_slice %0 {offsets = [13, 0], sizes = [1, 512], strides = [1, 1]} : vector<15x512xf32> to vector<1x512xf32>
    %15 = vector.extract_strided_slice %0 {offsets = [14, 0], sizes = [1, 512], strides = [1, 1]} : vector<15x512xf32> to vector<1x512xf32>
    %c0_1 = arith.constant 0 : index
    %c0_2 = arith.constant 0 : index
    %c0_3 = arith.constant 0 : index
    %16 = vector.load %arg1[%c0_1, %c0_2, %c0_3] : memref<2x8x512xbf16, #tpu.memory_space<vmem>>, vector<2x8x512xbf16>
    %17 = vector.shape_cast %16 : vector<2x8x512xbf16> to vector<16x512xbf16>
    %c0_4 = arith.constant 0 : index
    %c0_5 = arith.constant 0 : index
    %c0_6 = arith.constant 0 : index
    %18 = vector.load %arg2[%c0_4, %c0_5, %c0_6] : memref<2x16x512xbf16, #tpu.memory_space<vmem>>, vector<2x16x512xbf16>
    %19 = vector.shape_cast %18 : vector<2x16x512xbf16> to vector<32x512xbf16>
    %c0_7 = arith.constant 0 : index
    %c0_8 = arith.constant 0 : index
    %20 = vector.load %arg3[%c0_7, %c0_8] : memref<512x512xbf16, #tpu.memory_space<vmem>>, vector<512x512xbf16>
    %c0_9 = arith.constant 0 : index
    %c0_10 = arith.constant 0 : index
    %21 = vector.load %arg4[%c0_9, %c0_10] : memref<512x1024xbf16, #tpu.memory_space<vmem>>, vector<512x1024xbf16>
    %c0_11 = arith.constant 0 : index
    %c0_12 = arith.constant 0 : index
    %22 = vector.load %arg5[%c0_11, %c0_12] : memref<512x512xbf16, #tpu.memory_space<vmem>>, vector<512x512xbf16>
    %cst = arith.constant dense<0.000000e+00> : vector<16x512xf32>
    %23 = tpu.matmul %17, %20, %cst {dimension_numbers = #tpu.dot_dimension_numbers<[1], [0], [0], [1], [0, 0, 1, 1], [], []>} : vector<16x512xbf16>, vector<512x512xbf16>, vector<16x512xf32> -> vector<16x512xf32>
    %24 = vector.broadcast %1 : vector<1x512xf32> to vector<16x512xf32>
    %25 = arith.addf %23, %24 : vector<16x512xf32>
    %cst_13 = arith.constant dense<0.000000e+00> : vector<16x1024xf32>
    %26 = tpu.matmul %17, %21, %cst_13 {dimension_numbers = #tpu.dot_dimension_numbers<[1], [0], [0], [1], [0, 0, 1, 1], [], []>} : vector<16x512xbf16>, vector<512x1024xbf16>, vector<16x1024xf32> -> vector<16x1024xf32>
    %27 = vector.extract_strided_slice %26 {offsets = [0, 0], sizes = [16, 512], strides = [1, 1]} : vector<16x1024xf32> to vector<16x512xf32>
    %28 = vector.broadcast %2 : vector<1x512xf32> to vector<16x512xf32>
    %29 = arith.addf %27, %28 : vector<16x512xf32>
    %30 = vector.extract_strided_slice %26 {offsets = [0, 512], sizes = [16, 512], strides = [1, 1]} : vector<16x1024xf32> to vector<16x512xf32>
    %31 = vector.broadcast %3 : vector<1x512xf32> to vector<16x512xf32>
    %32 = arith.addf %30, %31 : vector<16x512xf32>
    %33 = arith.truncf %25 : vector<16x512xf32> to vector<16x512xbf16>
    %34 = arith.truncf %29 : vector<16x512xf32> to vector<16x512xbf16>
    %35 = arith.truncf %32 : vector<16x512xf32> to vector<16x512xbf16>
    %36 = vector.extract_strided_slice %33 {offsets = [0, 0], sizes = [16, 128], strides = [1, 1]} : vector<16x512xbf16> to vector<16x128xbf16>
    %37 = vector.shape_cast %36 : vector<16x128xbf16> to vector<2x8x128xbf16>
    %38 = vector.extract_strided_slice %33 {offsets = [0, 128], sizes = [16, 128], strides = [1, 1]} : vector<16x512xbf16> to vector<16x128xbf16>
    %39 = vector.shape_cast %38 : vector<16x128xbf16> to vector<2x8x128xbf16>
    %40 = vector.extract_strided_slice %33 {offsets = [0, 256], sizes = [16, 128], strides = [1, 1]} : vector<16x512xbf16> to vector<16x128xbf16>
    %41 = vector.shape_cast %40 : vector<16x128xbf16> to vector<2x8x128xbf16>
    %42 = vector.extract_strided_slice %33 {offsets = [0, 384], sizes = [16, 128], strides = [1, 1]} : vector<16x512xbf16> to vector<16x128xbf16>
    %43 = vector.shape_cast %42 : vector<16x128xbf16> to vector<2x8x128xbf16>
    %44 = tpu.concatenate %37, %39, %41, %43 in 0 : vector<2x8x128xbf16>, vector<2x8x128xbf16>, vector<2x8x128xbf16>, vector<2x8x128xbf16> -> vector<8x8x128xbf16>
    %45 = vector.extract_strided_slice %34 {offsets = [0, 0], sizes = [16, 128], strides = [1, 1]} : vector<16x512xbf16> to vector<16x128xbf16>
    %46 = vector.shape_cast %45 : vector<16x128xbf16> to vector<2x8x128xbf16>
    %47 = vector.extract_strided_slice %34 {offsets = [0, 128], sizes = [16, 128], strides = [1, 1]} : vector<16x512xbf16> to vector<16x128xbf16>
    %48 = vector.shape_cast %47 : vector<16x128xbf16> to vector<2x8x128xbf16>
    %49 = vector.extract_strided_slice %34 {offsets = [0, 256], sizes = [16, 128], strides = [1, 1]} : vector<16x512xbf16> to vector<16x128xbf16>
    %50 = vector.shape_cast %49 : vector<16x128xbf16> to vector<2x8x128xbf16>
    %51 = vector.extract_strided_slice %34 {offsets = [0, 384], sizes = [16, 128], strides = [1, 1]} : vector<16x512xbf16> to vector<16x128xbf16>
    %52 = vector.shape_cast %51 : vector<16x128xbf16> to vector<2x8x128xbf16>
    %53 = tpu.concatenate %46, %48, %50, %52 in 0 : vector<2x8x128xbf16>, vector<2x8x128xbf16>, vector<2x8x128xbf16>, vector<2x8x128xbf16> -> vector<8x8x128xbf16>
    %54 = vector.extract_strided_slice %35 {offsets = [0, 0], sizes = [16, 128], strides = [1, 1]} : vector<16x512xbf16> to vector<16x128xbf16>
    %55 = vector.shape_cast %54 : vector<16x128xbf16> to vector<2x8x128xbf16>
    %56 = vector.extract_strided_slice %35 {offsets = [0, 128], sizes = [16, 128], strides = [1, 1]} : vector<16x512xbf16> to vector<16x128xbf16>
    %57 = vector.shape_cast %56 : vector<16x128xbf16> to vector<2x8x128xbf16>
    %58 = vector.extract_strided_slice %35 {offsets = [0, 256], sizes = [16, 128], strides = [1, 1]} : vector<16x512xbf16> to vector<16x128xbf16>
    %59 = vector.shape_cast %58 : vector<16x128xbf16> to vector<2x8x128xbf16>
    %60 = vector.extract_strided_slice %35 {offsets = [0, 384], sizes = [16, 128], strides = [1, 1]} : vector<16x512xbf16> to vector<16x128xbf16>
    %61 = vector.shape_cast %60 : vector<16x128xbf16> to vector<2x8x128xbf16>
    %62 = tpu.concatenate %55, %57, %59, %61 in 0 : vector<2x8x128xbf16>, vector<2x8x128xbf16>, vector<2x8x128xbf16>, vector<2x8x128xbf16> -> vector<8x8x128xbf16>
    %cst_14 = arith.constant dense<0.000000e+00> : vector<8x8x8xf32>
    %63 = tpu.matmul %44, %53, %cst_14 {dimension_numbers = #tpu.dot_dimension_numbers<[2], [2], [1], [1], [0, 0, 0, 1, 1, 1], [0], [0]>} : vector<8x8x128xbf16>, vector<8x8x128xbf16>, vector<8x8x8xf32> -> vector<8x8x8xf32>
    %cst_15 = arith.constant dense<0xFF800000> : vector<8x8xf32>
    %64 = vector.multi_reduction <maximumf>, %63, %cst_15 [2] : vector<8x8x8xf32> to vector<8x8xf32>
    %65 = vector.shape_cast %64 : vector<8x8xf32> to vector<8x8x1xf32>
    %66 = vector.broadcast %65 : vector<8x8x1xf32> to vector<8x8x8xf32>
    %67 = arith.subf %63, %66 : vector<8x8x8xf32>
    %68 = math.exp %67 : vector<8x8x8xf32>
    %cst_16 = arith.constant dense<0.000000e+00> : vector<8x8xf32>
    %69 = vector.multi_reduction <add>, %68, %cst_16 [2] : vector<8x8x8xf32> to vector<8x8xf32>
    %70 = vector.shape_cast %69 : vector<8x8xf32> to vector<8x8x1xf32>
    %71 = tpu.reciprocal %70 {approx = true} : vector<8x8x1xf32> -> vector<8x8x1xf32>
    %72 = vector.broadcast %71 : vector<8x8x1xf32> to vector<8x8x8xf32>
    %73 = arith.mulf %68, %72 : vector<8x8x8xf32>
    %74 = arith.truncf %73 : vector<8x8x8xf32> to vector<8x8x8xbf16>
    %cst_17 = arith.constant dense<0.000000e+00> : vector<8x8x128xf32>
    %75 = tpu.matmul %74, %62, %cst_17 {dimension_numbers = #tpu.dot_dimension_numbers<[2], [1], [1], [2], [0, 0, 0, 1, 1, 2], [0], [0]>} : vector<8x8x8xbf16>, vector<8x8x128xbf16>, vector<8x8x128xf32> -> vector<8x8x128xf32>
    %76 = arith.truncf %75 : vector<8x8x128xf32> to vector<8x8x128xbf16>
    %77 = vector.extract_strided_slice %76 {offsets = [0, 0, 0], sizes = [2, 8, 128], strides = [1, 1, 1]} : vector<8x8x128xbf16> to vector<2x8x128xbf16>
    %78 = vector.shape_cast %77 : vector<2x8x128xbf16> to vector<16x128xbf16>
    %79 = vector.extract_strided_slice %76 {offsets = [2, 0, 0], sizes = [2, 8, 128], strides = [1, 1, 1]} : vector<8x8x128xbf16> to vector<2x8x128xbf16>
    %80 = vector.shape_cast %79 : vector<2x8x128xbf16> to vector<16x128xbf16>
    %81 = vector.extract_strided_slice %76 {offsets = [4, 0, 0], sizes = [2, 8, 128], strides = [1, 1, 1]} : vector<8x8x128xbf16> to vector<2x8x128xbf16>
    %82 = vector.shape_cast %81 : vector<2x8x128xbf16> to vector<16x128xbf16>
    %83 = vector.extract_strided_slice %76 {offsets = [6, 0, 0], sizes = [2, 8, 128], strides = [1, 1, 1]} : vector<8x8x128xbf16> to vector<2x8x128xbf16>
    %84 = vector.shape_cast %83 : vector<2x8x128xbf16> to vector<16x128xbf16>
    %85 = tpu.concatenate %78, %80, %82, %84 in 1 : vector<16x128xbf16>, vector<16x128xbf16>, vector<16x128xbf16>, vector<16x128xbf16> -> vector<16x512xbf16>
    %cst_18 = arith.constant dense<0.000000e+00> : vector<16x512xf32>
    %86 = tpu.matmul %85, %22, %cst_18 {dimension_numbers = #tpu.dot_dimension_numbers<[1], [0], [0], [1], [0, 0, 1, 1], [], []>} : vector<16x512xbf16>, vector<512x512xbf16>, vector<16x512xf32> -> vector<16x512xf32>
    %87 = vector.broadcast %4 : vector<1x512xf32> to vector<16x512xf32>
    %88 = arith.addf %86, %87 : vector<16x512xf32>
    %89 = arith.extf %17 : vector<16x512xbf16> to vector<16x512xf32>
    %90 = arith.addf %88, %89 : vector<16x512xf32>
    %cst_19 = arith.constant dense<0.000000e+00> : vector<16xf32>
    %91 = vector.multi_reduction <add>, %90, %cst_19 [1] : vector<16x512xf32> to vector<16xf32>
    %92 = vector.shape_cast %91 : vector<16xf32> to vector<16x1xf32>
    %cst_20 = arith.constant 3.125000e-02 : f32
    %93 = vector.broadcast %cst_20 : f32 to vector<16x1xf32>
    %94 = arith.mulf %92, %93 : vector<16x1xf32>
    %95 = arith.mulf %90, %90 : vector<16x512xf32>
    %cst_21 = arith.constant dense<0.000000e+00> : vector<16xf32>
    %96 = vector.multi_reduction <add>, %95, %cst_21 [1] : vector<16x512xf32> to vector<16xf32>
    %97 = vector.shape_cast %96 : vector<16xf32> to vector<16x1xf32>
    %cst_22 = arith.constant 3.125000e-02 : f32
    %98 = vector.broadcast %cst_22 : f32 to vector<16x1xf32>
    %99 = arith.mulf %97, %98 : vector<16x1xf32>
    %100 = arith.mulf %94, %94 : vector<16x1xf32>
    %101 = arith.subf %99, %100 : vector<16x1xf32>
    %102 = vector.broadcast %94 : vector<16x1xf32> to vector<16x512xf32>
    %103 = arith.subf %90, %102 : vector<16x512xf32>
    %cst_23 = arith.constant 9.99999974E-6 : f32
    %104 = vector.broadcast %cst_23 : f32 to vector<16x1xf32>
    %105 = arith.addf %101, %104 : vector<16x1xf32>
    %106 = math.rsqrt %105 : vector<16x1xf32>
    %107 = vector.broadcast %106 : vector<16x1xf32> to vector<16x512xf32>
    %108 = arith.mulf %103, %107 : vector<16x512xf32>
    %109 = vector.broadcast %5 : vector<1x512xf32> to vector<16x512xf32>
    %110 = arith.mulf %108, %109 : vector<16x512xf32>
    %111 = vector.broadcast %6 : vector<1x512xf32> to vector<16x512xf32>
    %112 = arith.addf %110, %111 : vector<16x512xf32>
    %113 = arith.truncf %112 : vector<16x512xf32> to vector<16x512xbf16>
    %c0_24 = arith.constant 0 : index
    %c0_25 = arith.constant 0 : index
    %114 = vector.load %arg6[%c0_24, %c0_25] : memref<512x512xbf16, #tpu.memory_space<vmem>>, vector<512x512xbf16>
    %c0_26 = arith.constant 0 : index
    %c0_27 = arith.constant 0 : index
    %115 = vector.load %arg7[%c0_26, %c0_27] : memref<512x1024xbf16, #tpu.memory_space<vmem>>, vector<512x1024xbf16>
    %c0_28 = arith.constant 0 : index
    %c0_29 = arith.constant 0 : index
    %116 = vector.load %arg8[%c0_28, %c0_29] : memref<512x512xbf16, #tpu.memory_space<vmem>>, vector<512x512xbf16>
    %cst_30 = arith.constant dense<0.000000e+00> : vector<16x512xf32>
    %117 = tpu.matmul %113, %114, %cst_30 {dimension_numbers = #tpu.dot_dimension_numbers<[1], [0], [0], [1], [0, 0, 1, 1], [], []>} : vector<16x512xbf16>, vector<512x512xbf16>, vector<16x512xf32> -> vector<16x512xf32>
    %118 = vector.broadcast %7 : vector<1x512xf32> to vector<16x512xf32>
    %119 = arith.addf %117, %118 : vector<16x512xf32>
    %cst_31 = arith.constant dense<0.000000e+00> : vector<32x1024xf32>
    %120 = tpu.matmul %19, %115, %cst_31 {dimension_numbers = #tpu.dot_dimension_numbers<[1], [0], [0], [1], [0, 0, 1, 1], [], []>} : vector<32x512xbf16>, vector<512x1024xbf16>, vector<32x1024xf32> -> vector<32x1024xf32>
    %121 = vector.extract_strided_slice %120 {offsets = [0, 0], sizes = [32, 512], strides = [1, 1]} : vector<32x1024xf32> to vector<32x512xf32>
    %122 = vector.broadcast %8 : vector<1x512xf32> to vector<32x512xf32>
    %123 = arith.addf %121, %122 : vector<32x512xf32>
    %124 = vector.extract_strided_slice %120 {offsets = [0, 512], sizes = [32, 512], strides = [1, 1]} : vector<32x1024xf32> to vector<32x512xf32>
    %125 = vector.broadcast %9 : vector<1x512xf32> to vector<32x512xf32>
    %126 = arith.addf %124, %125 : vector<32x512xf32>
    %127 = arith.truncf %119 : vector<16x512xf32> to vector<16x512xbf16>
    %128 = arith.truncf %123 : vector<32x512xf32> to vector<32x512xbf16>
    %129 = arith.truncf %126 : vector<32x512xf32> to vector<32x512xbf16>
    %130 = vector.extract_strided_slice %127 {offsets = [0, 0], sizes = [16, 128], strides = [1, 1]} : vector<16x512xbf16> to vector<16x128xbf16>
    %131 = vector.shape_cast %130 : vector<16x128xbf16> to vector<2x8x128xbf16>
    %132 = vector.extract_strided_slice %127 {offsets = [0, 128], sizes = [16, 128], strides = [1, 1]} : vector<16x512xbf16> to vector<16x128xbf16>
    %133 = vector.shape_cast %132 : vector<16x128xbf16> to vector<2x8x128xbf16>
    %134 = vector.extract_strided_slice %127 {offsets = [0, 256], sizes = [16, 128], strides = [1, 1]} : vector<16x512xbf16> to vector<16x128xbf16>
    %135 = vector.shape_cast %134 : vector<16x128xbf16> to vector<2x8x128xbf16>
    %136 = vector.extract_strided_slice %127 {offsets = [0, 384], sizes = [16, 128], strides = [1, 1]} : vector<16x512xbf16> to vector<16x128xbf16>
    %137 = vector.shape_cast %136 : vector<16x128xbf16> to vector<2x8x128xbf16>
    %138 = tpu.concatenate %131, %133, %135, %137 in 0 : vector<2x8x128xbf16>, vector<2x8x128xbf16>, vector<2x8x128xbf16>, vector<2x8x128xbf16> -> vector<8x8x128xbf16>
    %139 = vector.extract_strided_slice %128 {offsets = [0, 0], sizes = [32, 128], strides = [1, 1]} : vector<32x512xbf16> to vector<32x128xbf16>
    %140 = vector.shape_cast %139 : vector<32x128xbf16> to vector<2x16x128xbf16>
    %141 = vector.extract_strided_slice %128 {offsets = [0, 128], sizes = [32, 128], strides = [1, 1]} : vector<32x512xbf16> to vector<32x128xbf16>
    %142 = vector.shape_cast %141 : vector<32x128xbf16> to vector<2x16x128xbf16>
    %143 = vector.extract_strided_slice %128 {offsets = [0, 256], sizes = [32, 128], strides = [1, 1]} : vector<32x512xbf16> to vector<32x128xbf16>
    %144 = vector.shape_cast %143 : vector<32x128xbf16> to vector<2x16x128xbf16>
    %145 = vector.extract_strided_slice %128 {offsets = [0, 384], sizes = [32, 128], strides = [1, 1]} : vector<32x512xbf16> to vector<32x128xbf16>
    %146 = vector.shape_cast %145 : vector<32x128xbf16> to vector<2x16x128xbf16>
    %147 = tpu.concatenate %140, %142, %144, %146 in 0 : vector<2x16x128xbf16>, vector<2x16x128xbf16>, vector<2x16x128xbf16>, vector<2x16x128xbf16> -> vector<8x16x128xbf16>
    %148 = vector.extract_strided_slice %129 {offsets = [0, 0], sizes = [32, 128], strides = [1, 1]} : vector<32x512xbf16> to vector<32x128xbf16>
    %149 = vector.shape_cast %148 : vector<32x128xbf16> to vector<2x16x128xbf16>
    %150 = vector.extract_strided_slice %129 {offsets = [0, 128], sizes = [32, 128], strides = [1, 1]} : vector<32x512xbf16> to vector<32x128xbf16>
    %151 = vector.shape_cast %150 : vector<32x128xbf16> to vector<2x16x128xbf16>
    %152 = vector.extract_strided_slice %129 {offsets = [0, 256], sizes = [32, 128], strides = [1, 1]} : vector<32x512xbf16> to vector<32x128xbf16>
    %153 = vector.shape_cast %152 : vector<32x128xbf16> to vector<2x16x128xbf16>
    %154 = vector.extract_strided_slice %129 {offsets = [0, 384], sizes = [32, 128], strides = [1, 1]} : vector<32x512xbf16> to vector<32x128xbf16>
    %155 = vector.shape_cast %154 : vector<32x128xbf16> to vector<2x16x128xbf16>
    %156 = tpu.concatenate %149, %151, %153, %155 in 0 : vector<2x16x128xbf16>, vector<2x16x128xbf16>, vector<2x16x128xbf16>, vector<2x16x128xbf16> -> vector<8x16x128xbf16>
    %cst_32 = arith.constant dense<0.000000e+00> : vector<8x8x16xf32>
    %157 = tpu.matmul %138, %147, %cst_32 {dimension_numbers = #tpu.dot_dimension_numbers<[2], [2], [1], [1], [0, 0, 0, 1, 1, 1], [0], [0]>} : vector<8x8x128xbf16>, vector<8x16x128xbf16>, vector<8x8x16xf32> -> vector<8x8x16xf32>
    %cst_33 = arith.constant dense<0xFF800000> : vector<8x8xf32>
    %158 = vector.multi_reduction <maximumf>, %157, %cst_33 [2] : vector<8x8x16xf32> to vector<8x8xf32>
    %159 = vector.shape_cast %158 : vector<8x8xf32> to vector<8x8x1xf32>
    %160 = vector.broadcast %159 : vector<8x8x1xf32> to vector<8x8x16xf32>
    %161 = arith.subf %157, %160 : vector<8x8x16xf32>
    %162 = math.exp %161 : vector<8x8x16xf32>
    %cst_34 = arith.constant dense<0.000000e+00> : vector<8x8xf32>
    %163 = vector.multi_reduction <add>, %162, %cst_34 [2] : vector<8x8x16xf32> to vector<8x8xf32>
    %164 = vector.shape_cast %163 : vector<8x8xf32> to vector<8x8x1xf32>
    %165 = tpu.reciprocal %164 {approx = true} : vector<8x8x1xf32> -> vector<8x8x1xf32>
    %166 = vector.broadcast %165 : vector<8x8x1xf32> to vector<8x8x16xf32>
    %167 = arith.mulf %162, %166 : vector<8x8x16xf32>
    %168 = arith.truncf %167 : vector<8x8x16xf32> to vector<8x8x16xbf16>
    %cst_35 = arith.constant dense<0.000000e+00> : vector<8x8x128xf32>
    %169 = tpu.matmul %168, %156, %cst_35 {dimension_numbers = #tpu.dot_dimension_numbers<[2], [1], [1], [2], [0, 0, 0, 1, 1, 2], [0], [0]>} : vector<8x8x16xbf16>, vector<8x16x128xbf16>, vector<8x8x128xf32> -> vector<8x8x128xf32>
    %170 = arith.truncf %169 : vector<8x8x128xf32> to vector<8x8x128xbf16>
    %171 = vector.extract_strided_slice %170 {offsets = [0, 0, 0], sizes = [2, 8, 128], strides = [1, 1, 1]} : vector<8x8x128xbf16> to vector<2x8x128xbf16>
    %172 = vector.shape_cast %171 : vector<2x8x128xbf16> to vector<16x128xbf16>
    %173 = vector.extract_strided_slice %170 {offsets = [2, 0, 0], sizes = [2, 8, 128], strides = [1, 1, 1]} : vector<8x8x128xbf16> to vector<2x8x128xbf16>
    %174 = vector.shape_cast %173 : vector<2x8x128xbf16> to vector<16x128xbf16>
    %175 = vector.extract_strided_slice %170 {offsets = [4, 0, 0], sizes = [2, 8, 128], strides = [1, 1, 1]} : vector<8x8x128xbf16> to vector<2x8x128xbf16>
    %176 = vector.shape_cast %175 : vector<2x8x128xbf16> to vector<16x128xbf16>
    %177 = vector.extract_strided_slice %170 {offsets = [6, 0, 0], sizes = [2, 8, 128], strides = [1, 1, 1]} : vector<8x8x128xbf16> to vector<2x8x128xbf16>
    %178 = vector.shape_cast %177 : vector<2x8x128xbf16> to vector<16x128xbf16>
    %179 = tpu.concatenate %172, %174, %176, %178 in 1 : vector<16x128xbf16>, vector<16x128xbf16>, vector<16x128xbf16>, vector<16x128xbf16> -> vector<16x512xbf16>
    %cst_36 = arith.constant dense<0.000000e+00> : vector<16x512xf32>
    %180 = tpu.matmul %179, %116, %cst_36 {dimension_numbers = #tpu.dot_dimension_numbers<[1], [0], [0], [1], [0, 0, 1, 1], [], []>} : vector<16x512xbf16>, vector<512x512xbf16>, vector<16x512xf32> -> vector<16x512xf32>
    %181 = vector.broadcast %10 : vector<1x512xf32> to vector<16x512xf32>
    %182 = arith.addf %180, %181 : vector<16x512xf32>
    %183 = arith.addf %182, %112 : vector<16x512xf32>
    %cst_37 = arith.constant dense<0.000000e+00> : vector<16xf32>
    %184 = vector.multi_reduction <add>, %183, %cst_37 [1] : vector<16x512xf32> to vector<16xf32>
    %185 = vector.shape_cast %184 : vector<16xf32> to vector<16x1xf32>
    %cst_38 = arith.constant 3.125000e-02 : f32
    %186 = vector.broadcast %cst_38 : f32 to vector<16x1xf32>
    %187 = arith.mulf %185, %186 : vector<16x1xf32>
    %188 = arith.mulf %183, %183 : vector<16x512xf32>
    %cst_39 = arith.constant dense<0.000000e+00> : vector<16xf32>
    %189 = vector.multi_reduction <add>, %188, %cst_39 [1] : vector<16x512xf32> to vector<16xf32>
    %190 = vector.shape_cast %189 : vector<16xf32> to vector<16x1xf32>
    %cst_40 = arith.constant 3.125000e-02 : f32
    %191 = vector.broadcast %cst_40 : f32 to vector<16x1xf32>
    %192 = arith.mulf %190, %191 : vector<16x1xf32>
    %193 = arith.mulf %187, %187 : vector<16x1xf32>
    %194 = arith.subf %192, %193 : vector<16x1xf32>
    %195 = vector.broadcast %187 : vector<16x1xf32> to vector<16x512xf32>
    %196 = arith.subf %183, %195 : vector<16x512xf32>
    %cst_41 = arith.constant 9.99999974E-6 : f32
    %197 = vector.broadcast %cst_41 : f32 to vector<16x1xf32>
    %198 = arith.addf %194, %197 : vector<16x1xf32>
    %199 = math.rsqrt %198 : vector<16x1xf32>
    %200 = vector.broadcast %199 : vector<16x1xf32> to vector<16x512xf32>
    %201 = arith.mulf %196, %200 : vector<16x512xf32>
    %202 = vector.broadcast %11 : vector<1x512xf32> to vector<16x512xf32>
    %203 = arith.mulf %201, %202 : vector<16x512xf32>
    %204 = vector.broadcast %12 : vector<1x512xf32> to vector<16x512xf32>
    %205 = arith.addf %203, %204 : vector<16x512xf32>
    %206 = arith.truncf %205 : vector<16x512xf32> to vector<16x512xbf16>
    %c0_42 = arith.constant 0 : index
    %c0_43 = arith.constant 0 : index
    %207 = vector.load %arg9[%c0_42, %c0_43] : memref<512x128xbf16, #tpu.memory_space<vmem>>, vector<512x128xbf16>
    %c0_44 = arith.constant 0 : index
    %c0_45 = arith.constant 0 : index
    %208 = vector.load %arg12[%c0_44, %c0_45] : memref<1x128xf32, #tpu.memory_space<vmem>>, vector<1x128xf32>
    %c0_46 = arith.constant 0 : index
    %c0_47 = arith.constant 0 : index
    %209 = vector.load %arg10[%c0_46, %c0_47] : memref<128x512xbf16, #tpu.memory_space<vmem>>, vector<128x512xbf16>
    %cst_48 = arith.constant dense<0.000000e+00> : vector<16x128xf32>
    %210 = tpu.matmul %206, %207, %cst_48 {dimension_numbers = #tpu.dot_dimension_numbers<[1], [0], [0], [1], [0, 0, 1, 1], [], []>} : vector<16x512xbf16>, vector<512x128xbf16>, vector<16x128xf32> -> vector<16x128xf32>
    %211 = vector.broadcast %208 : vector<1x128xf32> to vector<16x128xf32>
    %212 = arith.addf %210, %211 : vector<16x128xf32>
    %cst_49 = arith.constant 0.000000e+00 : f32
    %213 = vector.broadcast %cst_49 : f32 to vector<16x128xf32>
    %214 = arith.maximumf %212, %213 : vector<16x128xf32>
    %215 = arith.truncf %214 : vector<16x128xf32> to vector<16x128xbf16>
    %cst_50 = arith.constant dense<0.000000e+00> : vector<16x512xf32>
    %216 = tpu.matmul %215, %209, %cst_50 {dimension_numbers = #tpu.dot_dimension_numbers<[1], [0], [0], [1], [0, 0, 1, 1], [], []>} : vector<16x128xbf16>, vector<128x512xbf16>, vector<16x512xf32> -> vector<16x512xf32>
    %217 = vector.broadcast %13 : vector<1x512xf32> to vector<16x512xf32>
    %218 = arith.addf %216, %217 : vector<16x512xf32>
    %219 = arith.addf %218, %205 : vector<16x512xf32>
    %cst_51 = arith.constant dense<0.000000e+00> : vector<16xf32>
    %220 = vector.multi_reduction <add>, %219, %cst_51 [1] : vector<16x512xf32> to vector<16xf32>
    %221 = vector.shape_cast %220 : vector<16xf32> to vector<16x1xf32>
    %cst_52 = arith.constant 3.125000e-02 : f32
    %222 = vector.broadcast %cst_52 : f32 to vector<16x1xf32>
    %223 = arith.mulf %221, %222 : vector<16x1xf32>
    %224 = arith.mulf %219, %219 : vector<16x512xf32>
    %cst_53 = arith.constant dense<0.000000e+00> : vector<16xf32>
    %225 = vector.multi_reduction <add>, %224, %cst_53 [1] : vector<16x512xf32> to vector<16xf32>
    %226 = vector.shape_cast %225 : vector<16xf32> to vector<16x1xf32>
    %cst_54 = arith.constant 3.125000e-02 : f32
    %227 = vector.broadcast %cst_54 : f32 to vector<16x1xf32>
    %228 = arith.mulf %226, %227 : vector<16x1xf32>
    %229 = arith.mulf %223, %223 : vector<16x1xf32>
    %230 = arith.subf %228, %229 : vector<16x1xf32>
    %231 = vector.broadcast %223 : vector<16x1xf32> to vector<16x512xf32>
    %232 = arith.subf %219, %231 : vector<16x512xf32>
    %cst_55 = arith.constant 9.99999974E-6 : f32
    %233 = vector.broadcast %cst_55 : f32 to vector<16x1xf32>
    %234 = arith.addf %230, %233 : vector<16x1xf32>
    %235 = math.rsqrt %234 : vector<16x1xf32>
    %236 = vector.broadcast %235 : vector<16x1xf32> to vector<16x512xf32>
    %237 = arith.mulf %232, %236 : vector<16x512xf32>
    %238 = vector.broadcast %14 : vector<1x512xf32> to vector<16x512xf32>
    %239 = arith.mulf %237, %238 : vector<16x512xf32>
    %240 = vector.broadcast %15 : vector<1x512xf32> to vector<16x512xf32>
    %241 = arith.addf %239, %240 : vector<16x512xf32>
    %242 = vector.shape_cast %241 : vector<16x512xf32> to vector<2x8x512xf32>
    %243 = arith.truncf %242 : vector<2x8x512xf32> to vector<2x8x512xbf16>
    %c0_56 = arith.constant 0 : index
    %c0_57 = arith.constant 0 : index
    %c0_58 = arith.constant 0 : index
    %244 = vector.load %arg13[%c0_56, %c0_57, %c0_58] : memref<2x8x512xbf16, #tpu.memory_space<vmem>>, vector<2x8x512xbf16>
    tpu.vector_store %arg13[%c0_56, %c0_57, %c0_58], %243 {strides = array<i32>} : memref<2x8x512xbf16, #tpu.memory_space<vmem>>, vector<2x8x512xbf16>,
    return
  }
  func.func @transform_0(%arg0: i32) -> (i32, i32, i32) {
    %c0_i32 = arith.constant 0 : i32
    %c0_i32_0 = arith.constant 0 : i32
    %c0_i32_1 = arith.constant 0 : i32
    return %arg0, %c0_i32, %c0_i32_0 : i32, i32, i32
  }
  func.func @transform_1(%arg0: i32) -> (i32, i32, i32) {
    %c0_i32 = arith.constant 0 : i32
    %c0_i32_0 = arith.constant 0 : i32
    %c0_i32_1 = arith.constant 0 : i32
    return %arg0, %c0_i32, %c0_i32_0 : i32, i32, i32
  }
  func.func @transform_2(%arg0: i32) -> (i32, i32) {
    %c0_i32 = arith.constant 0 : i32
    %c0_i32_0 = arith.constant 0 : i32
    %c0_i32_1 = arith.constant 0 : i32
    return %c0_i32, %c0_i32_0 : i32, i32
  }
  func.func @transform_3(%arg0: i32) -> (i32, i32) {
    %c0_i32 = arith.constant 0 : i32
    %c0_i32_0 = arith.constant 0 : i32
    %c0_i32_1 = arith.constant 0 : i32
    return %c0_i32, %c0_i32_0 : i32, i32
  }
  func.func @transform_4(%arg0: i32) -> (i32, i32) {
    %c0_i32 = arith.constant 0 : i32
    %c0_i32_0 = arith.constant 0 : i32
    %c0_i32_1 = arith.constant 0 : i32
    return %c0_i32, %c0_i32_0 : i32, i32
  }
  func.func @transform_5(%arg0: i32) -> (i32, i32) {
    %c0_i32 = arith.constant 0 : i32
    %c0_i32_0 = arith.constant 0 : i32
    %c0_i32_1 = arith.constant 0 : i32
    return %c0_i32, %c0_i32_0 : i32, i32
  }
  func.func @transform_6(%arg0: i32) -> (i32, i32) {
    %c0_i32 = arith.constant 0 : i32
    %c0_i32_0 = arith.constant 0 : i32
    %c0_i32_1 = arith.constant 0 : i32
    return %c0_i32, %c0_i32_0 : i32, i32
  }
  func.func @transform_7(%arg0: i32) -> (i32, i32) {
    %c0_i32 = arith.constant 0 : i32
    %c0_i32_0 = arith.constant 0 : i32
    %c0_i32_1 = arith.constant 0 : i32
    return %c0_i32, %c0_i32_0 : i32, i32
  }
  func.func @transform_8(%arg0: i32) -> (i32, i32) {
    %c0_i32 = arith.constant 0 : i32
    %c0_i32_0 = arith.constant 0 : i32
    %c0_i32_1 = arith.constant 0 : i32
    return %c0_i32, %c0_i32_0 : i32, i32
  }
  func.func @transform_9(%arg0: i32) -> (i32, i32) {
    %c0_i32 = arith.constant 0 : i32
    %c0_i32_0 = arith.constant 0 : i32
    %c0_i32_1 = arith.constant 0 : i32
    return %c0_i32, %c0_i32_0 : i32, i32
  }
  func.func @transform_10(%arg0: i32) -> (i32, i32) {
    %c0_i32 = arith.constant 0 : i32
    %c0_i32_0 = arith.constant 0 : i32
    %c0_i32_1 = arith.constant 0 : i32
    return %c0_i32, %c0_i32_0 : i32, i32
  }
  func.func @transform_11(%arg0: i32) -> (i32, i32) {
    %c0_i32 = arith.constant 0 : i32
    %c0_i32_0 = arith.constant 0 : i32
    %c0_i32_1 = arith.constant 0 : i32
    return %c0_i32, %c0_i32_0 : i32, i32
  }
  func.func @transform_12(%arg0: i32) -> (i32, i32, i32) {
    %c0_i32 = arith.constant 0 : i32
    %c0_i32_0 = arith.constant 0 : i32
    %c0_i32_1 = arith.constant 0 : i32
    return %arg0, %c0_i32, %c0_i32_0 : i32, i32, i32
  }
}

</mosaic_0001>

<bundles_post_ra>
// kernel: tpu_custom_call.1
= control target key start
LH: loop header
LB: loop body
LE: loop exit
PB: predicated region body
PF: predicated region fallthrough
CT: control target
= control target key end

     0   :  { %17 = vsyncpa [#allocation3], 0  ;;  %s14800_s0 = inlined_call_operand.hbm [shape: bf16[2,8,512], index: 0, kind: input, shape index: {}]   ;;  %s14801_s1 = inlined_call_operand.hbm [shape: bf16[2,16,512], index: 1, kind: input, shape index: {}]   ;;  %s14802_s2 = inlined_call_operand.hbm [shape: bf16[512,512], index: 2, kind: input, shape index: {}]   ;;  %s14803_s3 = inlined_call_operand.hbm [shape: bf16[512,1024], index: 3, kind: input, shape index: {}]   ;;  %s14804_s4 = inlined_call_operand.hbm [shape: bf16[512,512], index: 4, kind: input, shape index: {}]   ;;  %s14805_s5 = inlined_call_operand.hbm [shape: bf16[512,512], index: 5, kind: input, shape index: {}]   ;;  %s14806_s6 = inlined_call_operand.hbm [shape: bf16[512,1024], index: 6, kind: input, shape index: {}]   ;;  %s14807_s7 = inlined_call_operand.hbm [shape: bf16[512,512], index: 7, kind: input, shape index: {}]   ;;  %s14808_s8 = inlined_call_operand.hbm [shape: bf16[512,128], index: 8, kind: input, shape index: {}]   ;;  %s14809_s9 = inlined_call_operand.hbm [shape: bf16[128,512], index: 9, kind: input, shape index: {}]   ;;  %s14810_s10 = inlined_call_operand.hbm [shape: f32[15,512], index: 10, kind: input, shape index: {}]   ;;  %s14811_s11 = inlined_call_operand.hbm [shape: f32[1,128], index: 11, kind: input, shape index: {}]   ;;  %s14812_s12 = inlined_call_operand.hbm [shape: bf16[2,8,512], index: 12, kind: output, shape index: {}]  }
   0x1   :  { %18 = vsyncpa [#allocation6], 0 }
   0x2   :  { %19 = vsyncpa [#allocation9], 0 }
   0x3   :  { %20 = vsyncpa [#allocation12], 0 }
   0x4   :  { %21 = vsyncpa [#allocation15], 0 }
   0x5   :  { %22 = vsyncpa [#allocation18], 0 }
   0x6   :  { %23 = vsyncpa [#allocation21], 0 }
   0x7   :  { %24 = vsyncpa [#allocation4], 0  ;;  %s13757_s21 = smov [#allocation5]   ;;  %s13758_s23 = smov [#allocation8]  }
   0x8   :  { %s42_s22 = sshll.u32 %s13757_s21, 4  ;;  %s66_s24 = sshll.u32 %s13758_s23, 4  ;;  %s43_s22 = int_to_ptr.vmem [resolvable:$true] %s42_s22  ;;  %s13844_s24 = int_to_ptr.vmem [resolvable:$true] %s66_s24 }
   0x9   :  { %s13455_s27 = scalar_lea.hbm %s14801_s1, 1024 }
   0xa   :  { %p13456_p0 = scmp.ne.s32.totalorder %s14801_s1, %s13455_s27  ;;  %p13459_p1 = scmp.lt.u32.totalorder %s13455_s27, %s14801_s1 }
   0xc   :  { %p13461_p2 = pnand %p13459_p1, %p13456_p0 }
   0xe   :  { %13464 = shalt.err (!%p13461_p2)
}
   0xf   :  { %s13465_s14 = scalar_lea.vmem %s43_s22, 1024  ;;  %p13470_p4 = scmp.lt.s32.totalorder %s43_s22, %s43_s22 }
  0x10   :  { %p13466_p3 = scmp.ne.s32.totalorder %s43_s22, %s13465_s14  ;;  %p13471_p5 = scmp.lt.s32.totalorder %s13465_s14, %s13465_s14 }
  0x12   :  { %p13472_p6 = por %p13471_p5, %p13470_p4 }
  0x14   :  { %p13473_p7 = pnand %p13472_p6, %p13466_p3 }
  0x16   :  { %13476 = shalt.err (!%p13473_p7)
}
  0x17   :  { %s13759_s15 = smov 256   ;;  %s13760_s16 = smov 16  }
  0x18   :  { %48 = dma.hbm_to_vmem [thread:$0]  %s14801_s1, 1024, %s43_s22, [#allocation6], %s13759_s15, %s13759_s15, %s13760_s16  }
  0x19   :  { %s13477_s21 = scalar_lea.hbm %s14803_s3, 32768 }
  0x1a   :  { %p13478_p8 = scmp.ne.s32.totalorder %s14803_s3, %s13477_s21  ;;  %p13481_p9 = scmp.lt.u32.totalorder %s13477_s21, %s14803_s3 }
  0x1c   :  { %p13483_p10 = pnand %p13481_p9, %p13478_p8 }
  0x1e   :  { %13486 = shalt.err (!%p13483_p10)
}
  0x1f   :  { %s13487_s28 = scalar_lea.vmem %s13844_s24, 32768  ;;  %p13492_p12 = scmp.lt.s32.totalorder %s13844_s24, %s13844_s24 }
  0x20   :  { %p13488_p11 = scmp.ne.s32.totalorder %s13844_s24, %s13487_s28  ;;  %p13493_p13 = scmp.lt.s32.totalorder %s13487_s28, %s13487_s28 }
  0x22   :  { %p13494_p0 = por %p13493_p13, %p13492_p12 }
  0x24   :  { %p13495_p1 = pnand %p13494_p0, %p13488_p11 }
  0x26   :  { %13498 = shalt.err (!%p13495_p1)
}
  0x27   :  { %s13761_s1 = smov 512   ;;  %s13762_s22 = smov 32  }
  0x28   :  { %72 = dma.hbm_to_vmem [thread:$0]  %s14803_s3, 32768, %s13844_s24, [#allocation9], %s13761_s1, %s13761_s1, %s13762_s22  }
  0x29   :  { %s13763_s13 = smov [#allocation11]   ;;  %s13764_s17 = smov [#allocation14]  }
  0x2a   :  { %s90_s14 = sshll.u32 %s13763_s13, 4  ;;  %s114_s18 = sshll.u32 %s13764_s17, 4  ;;  %s91_s14 = int_to_ptr.vmem [resolvable:$true] %s90_s14  ;;  %s13881_s18 = int_to_ptr.vmem [resolvable:$true] %s114_s18 }
  0x2b   :  { %s13499_s21 = scalar_lea.hbm %s14805_s5, 16384 }
  0x2c   :  { %p13500_p2 = scmp.ne.s32.totalorder %s14805_s5, %s13499_s21  ;;  %p13503_p3 = scmp.lt.u32.totalorder %s13499_s21, %s14805_s5 }
  0x2e   :  { %p13505_p4 = pnand %p13503_p3, %p13500_p2 }
  0x30   :  { %13508 = shalt.err (!%p13505_p4)
}
  0x31   :  { %s13509_s3 = scalar_lea.vmem %s91_s14, 16384  ;;  %p13514_p6 = scmp.lt.s32.totalorder %s91_s14, %s91_s14 }
  0x32   :  { %p13510_p5 = scmp.ne.s32.totalorder %s91_s14, %s13509_s3  ;;  %p13515_p7 = scmp.lt.s32.totalorder %s13509_s3, %s13509_s3 }
  0x34   :  { %p13516_p8 = por %p13515_p7, %p13514_p6 }
  0x36   :  { %p13517_p9 = pnand %p13516_p8, %p13510_p5 }
  0x38   :  { %13520 = shalt.err (!%p13517_p9)
}
  0x39   :  { %96 = dma.hbm_to_vmem [thread:$0]  %s14805_s5, 16384, %s91_s14, [#allocation12], %s13759_s15, %s13759_s15, %s13760_s16  }
  0x3a   :  { %s13521_s13 = scalar_lea.hbm %s14807_s7, 16384 }
  0x3b   :  { %p13522_p10 = scmp.ne.s32.totalorder %s14807_s7, %s13521_s13  ;;  %p13525_p11 = scmp.lt.u32.totalorder %s13521_s13, %s14807_s7 }
  0x3d   :  { %p13527_p12 = pnand %p13525_p11, %p13522_p10 }
  0x3f   :  { %13530 = shalt.err (!%p13527_p12)
}
  0x40   :  { %s13531_s23 = scalar_lea.vmem %s13881_s18, 16384  ;;  %p13536_p0 = scmp.lt.s32.totalorder %s13881_s18, %s13881_s18 }
  0x41   :  { %p13532_p13 = scmp.ne.s32.totalorder %s13881_s18, %s13531_s23  ;;  %p13537_p1 = scmp.lt.s32.totalorder %s13531_s23, %s13531_s23 }
  0x43   :  { %p13538_p2 = por %p13537_p1, %p13536_p0 }
  0x45   :  { %p13539_p3 = pnand %p13538_p2, %p13532_p13 }
  0x47   :  { %13542 = shalt.err (!%p13539_p3)
}
  0x48   :  { %120 = dma.hbm_to_vmem [thread:$0]  %s14807_s7, 16384, %s13881_s18, [#allocation15], %s13759_s15, %s13759_s15, %s13760_s16  }
  0x49   :  { %s13765_s25 = smov [#allocation17]   ;;  %s13766_s27 = smov [#allocation2]  }
  0x4a   :  { %s138_s26 = sshll.u32 %s13765_s25, 4  ;;  %s30_s3 = sshll.u32 %s13766_s27, 4  ;;  %s139_s26 = int_to_ptr.vmem [resolvable:$true] %s138_s26  ;;  %s13918_s3 = int_to_ptr.vmem [resolvable:$true] %s30_s3 }
  0x4b   :  { %s13543_s29 = scalar_lea.hbm %s14809_s9, 4096 }
  0x4c   :  { %p13544_p4 = scmp.ne.s32.totalorder %s14809_s9, %s13543_s29  ;;  %p13547_p5 = scmp.lt.u32.totalorder %s13543_s29, %s14809_s9 }
  0x4e   :  { %p13549_p6 = pnand %p13547_p5, %p13544_p4 }
  0x50   :  { %13552 = shalt.err (!%p13549_p6)
}
  0x51   :  { %s13553_s7 = scalar_lea.vmem %s139_s26, 4096  ;;  %p13558_p8 = scmp.lt.s32.totalorder %s139_s26, %s139_s26 }
  0x52   :  { %p13554_p7 = scmp.ne.s32.totalorder %s139_s26, %s13553_s7  ;;  %p13559_p9 = scmp.lt.s32.totalorder %s13553_s7, %s13553_s7 }
  0x54   :  { %p13560_p10 = por %p13559_p9, %p13558_p8 }
  0x56   :  { %p13561_p11 = pnand %p13560_p10, %p13554_p7 }
  0x58   :  { %13564 = shalt.err (!%p13561_p11)
}
  0x59   :  { %144 = dma.hbm_to_vmem [thread:$0]  %s14809_s9, 4096, %s139_s26, [#allocation18], %s13759_s15, %s13759_s15, %s13760_s16  }
  0x5a   :  { %s13565_s5 = scalar_lea.hbm %s14800_s0, 512 }
  0x5b   :  { %p13566_p12 = scmp.ne.s32.totalorder %s14800_s0, %s13565_s5  ;;  %p13569_p13 = scmp.lt.u32.totalorder %s13565_s5, %s14800_s0 }
  0x5d   :  { %p13571_p0 = pnand %p13569_p13, %p13566_p12 }
  0x5f   :  { %13574 = shalt.err (!%p13571_p0)
}
  0x60   :  { %s13575_s28 = scalar_lea.vmem %s13918_s3, 512  ;;  %p13580_p2 = scmp.lt.s32.totalorder %s13918_s3, %s13918_s3 }
  0x61   :  { %p13576_p1 = scmp.ne.s32.totalorder %s13918_s3, %s13575_s28  ;;  %p13581_p3 = scmp.lt.s32.totalorder %s13575_s28, %s13575_s28 }
  0x63   :  { %p13582_p4 = por %p13581_p3, %p13580_p2 }
  0x65   :  { %p13583_p5 = pnand %p13582_p4, %p13576_p1 }
  0x67   :  { %13586 = shalt.err (!%p13583_p5)
}
  0x68   :  { %36 = dma.hbm_to_vmem [thread:$0]  %s14800_s0, 512, %s13918_s3, [#allocation3], %s13759_s15, %s13759_s15, %s13760_s16  }
  0x69   :  { %s13767_s29 = smov [#allocation7]   ;;  %s13768_s13 = smov [#allocation10]  }
  0x6a   :  { %s54_s30 = sshll.u32 %s13767_s29, 4  ;;  %s78_s17 = sshll.u32 %s13768_s13, 4  ;;  %s55_s30 = int_to_ptr.vmem [resolvable:$true] %s54_s30  ;;  %s13955_s17 = int_to_ptr.vmem [resolvable:$true] %s78_s17 }
  0x6b   :  { %s13587_s18 = scalar_lea.hbm %s14802_s2, 16384 }
  0x6c   :  { %p13588_p6 = scmp.ne.s32.totalorder %s14802_s2, %s13587_s18  ;;  %p13591_p7 = scmp.lt.u32.totalorder %s13587_s18, %s14802_s2 }
  0x6e   :  { %p13593_p8 = pnand %p13591_p7, %p13588_p6 }
  0x70   :  { %13596 = shalt.err (!%p13593_p8)
}
  0x71   :  { %s13597_s0 = scalar_lea.vmem %s55_s30, 16384  ;;  %p13602_p10 = scmp.lt.s32.totalorder %s55_s30, %s55_s30 }
  0x72   :  { %p13598_p9 = scmp.ne.s32.totalorder %s55_s30, %s13597_s0  ;;  %p13603_p11 = scmp.lt.s32.totalorder %s13597_s0, %s13597_s0 }
  0x74   :  { %p13604_p12 = por %p13603_p11, %p13602_p10 }
  0x76   :  { %p13605_p13 = pnand %p13604_p12, %p13598_p9 }
  0x78   :  { %13608 = shalt.err (!%p13605_p13)
}
  0x79   :  { %60 = dma.hbm_to_vmem [thread:$0]  %s14802_s2, 16384, %s55_s30, [#allocation6], %s13759_s15, %s13759_s15, %s13760_s16  }
  0x7a   :  { %s13609_s24 = scalar_lea.hbm %s14804_s4, 16384 }
  0x7b   :  { %p13610_p0 = scmp.ne.s32.totalorder %s14804_s4, %s13609_s24  ;;  %p13613_p1 = scmp.lt.u32.totalorder %s13609_s24, %s14804_s4 }
  0x7d   :  { %p13615_p2 = pnand %p13613_p1, %p13610_p0 }
  0x7f   :  { %13618 = shalt.err (!%p13615_p2)
}
  0x80   :  { %s13619_s13 = scalar_lea.vmem %s13955_s17, 16384  ;;  %p13624_p4 = scmp.lt.s32.totalorder %s13955_s17, %s13955_s17 }
  0x81   :  { %p13620_p3 = scmp.ne.s32.totalorder %s13955_s17, %s13619_s13  ;;  %p13625_p5 = scmp.lt.s32.totalorder %s13619_s13, %s13619_s13 }
  0x83   :  { %p13626_p6 = por %p13625_p5, %p13624_p4 }
  0x85   :  { %p13627_p7 = pnand %p13626_p6, %p13620_p3 }
  0x87   :  { %13630 = shalt.err (!%p13627_p7)
}
  0x88   :  { %84 = dma.hbm_to_vmem [thread:$0]  %s14804_s4, 16384, %s13955_s17, [#allocation9], %s13759_s15, %s13759_s15, %s13760_s16  }
  0x89   :  { %s13769_s19 = smov [#allocation13]   ;;  %s13770_s18 = smov [#allocation16]  }
  0x8a   :  { %s102_s7 = sshll.u32 %s13769_s19, 4  ;;  %s126_s20 = sshll.u32 %s13770_s18, 4  ;;  %s103_s7 = int_to_ptr.vmem [resolvable:$true] %s102_s7  ;;  %s13992_s20 = int_to_ptr.vmem [resolvable:$true] %s126_s20 }
  0x8b   :  { %s13631_s5 = scalar_lea.hbm %s14806_s6, 32768 }
  0x8c   :  { %p13632_p8 = scmp.ne.s32.totalorder %s14806_s6, %s13631_s5  ;;  %p13635_p9 = scmp.lt.u32.totalorder %s13631_s5, %s14806_s6 }
  0x8e   :  { %p13637_p10 = pnand %p13635_p9, %p13632_p8 }
  0x90   :  { %13640 = shalt.err (!%p13637_p10)
}
  0x91   :  { %s13641_s4 = scalar_lea.vmem %s103_s7, 32768  ;;  %p13646_p12 = scmp.lt.s32.totalorder %s103_s7, %s103_s7 }
  0x92   :  { %p13642_p11 = scmp.ne.s32.totalorder %s103_s7, %s13641_s4  ;;  %p13647_p13 = scmp.lt.s32.totalorder %s13641_s4, %s13641_s4 }
  0x94   :  { %p13648_p0 = por %p13647_p13, %p13646_p12 }
  0x96   :  { %p13649_p1 = pnand %p13648_p0, %p13642_p11 }
  0x98   :  { %13652 = shalt.err (!%p13649_p1)
}
  0x99   :  { %108 = dma.hbm_to_vmem [thread:$0]  %s14806_s6, 32768, %s103_s7, [#allocation12], %s13761_s1, %s13761_s1, %s13762_s22  }
  0x9a   :  { %s13653_s9 = scalar_lea.hbm %s14808_s8, 4096 }
  0x9b   :  { %p13654_p2 = scmp.ne.s32.totalorder %s14808_s8, %s13653_s9  ;;  %p13657_p3 = scmp.lt.u32.totalorder %s13653_s9, %s14808_s8 }
  0x9d   :  { %p13659_p4 = pnand %p13657_p3, %p13654_p2 }
  0x9f   :  { %13662 = shalt.err (!%p13659_p4)
}
  0xa0   :  { %s13663_s30 = scalar_lea.vmem %s13992_s20, 4096  ;;  %p13668_p6 = scmp.lt.s32.totalorder %s13992_s20, %s13992_s20 }
  0xa1   :  { %p13664_p5 = scmp.ne.s32.totalorder %s13992_s20, %s13663_s30  ;;  %p13669_p7 = scmp.lt.s32.totalorder %s13663_s30, %s13663_s30 }
  0xa3   :  { %p13670_p8 = por %p13669_p7, %p13668_p6 }
  0xa5   :  { %p13671_p9 = pnand %p13670_p8, %p13664_p5 }
  0xa7   :  { %13674 = shalt.err (!%p13671_p9)
}
  0xa8   :  { %s13771_s6 = smov 64   ;;  %s13772_s19 = smov 4  }
  0xa9   :  { %132 = dma.hbm_to_vmem [thread:$0]  %s14808_s8, 4096, %s13992_s20, [#allocation15], %s13771_s6, %s13771_s6, %s13772_s19  }
  0xaa   :  { %s13773_s21 = smov [#allocation19]   ;;  %s13774_s5 = smov [#allocation20]  }
  0xab   :  { %s150_s23 = sshll.u32 %s13773_s21, 4  ;;  %s163_s0 = sshll.u32 %s13774_s5, 4  ;;  %s151_s23 = int_to_ptr.vmem [resolvable:$true] %s150_s23  ;;  %s164_s0 = int_to_ptr.vmem [resolvable:$true] %s163_s0 }
  0xac   :  { %s13675_s25 = scalar_lea.hbm %s14810_s10, 1024 }
  0xad   :  { %p13676_p10 = scmp.ne.s32.totalorder %s14810_s10, %s13675_s25  ;;  %p13679_p11 = scmp.lt.u32.totalorder %s13675_s25, %s14810_s10 }
  0xaf   :  { %p13681_p12 = pnand %p13679_p11, %p13676_p10 }
  0xb1   :  { %13684 = shalt.err (!%p13681_p12)
}
  0xb2   :  { %s13685_s8 = scalar_lea.vmem %s151_s23, 1024  ;;  %p13690_p0 = scmp.lt.s32.totalorder %s151_s23, %s151_s23 }
  0xb3   :  { %p13686_p13 = scmp.ne.s32.totalorder %s151_s23, %s13685_s8  ;;  %p13691_p1 = scmp.lt.s32.totalorder %s13685_s8, %s13685_s8 }
  0xb5   :  { %p13692_p2 = por %p13691_p1, %p13690_p0 }
  0xb7   :  { %p13693_p3 = pnand %p13692_p2, %p13686_p13 }
  0xb9   :  { %13696 = shalt.err (!%p13693_p3)
}
  0xba   :  { %156 = dma.hbm_to_vmem [thread:$0]  %s14810_s10, 1024, %s151_s23, [#allocation18], %s13761_s1, %s13761_s1, %s13762_s22  }
  0xbb   :  { %s13697_s29 = scalar_lea.hbm %s14811_s11, 16 }
  0xbc   :  { %p13698_p4 = scmp.ne.s32.totalorder %s14811_s11, %s13697_s29  ;;  %p13701_p5 = scmp.lt.u32.totalorder %s13697_s29, %s14811_s11 }
  0xbe   :  { %p13703_p6 = pnand %p13701_p5, %p13698_p4 }
  0xc0   :  { %13706 = shalt.err (!%p13703_p6)
}
  0xc1   :  { %s13707_s19 = scalar_lea.vmem %s164_s0, 16  ;;  %s13711_s7 = scalar_lea.vmem %s164_s0, 32 }
  0xc2   :  { %p13708_p7 = scmp.ne.s32.totalorder %s164_s0, %s13707_s19  ;;  %p13712_p8 = scmp.lt.s32.totalorder %s164_s0, %s164_s0 }
  0xc3   :  { %p13713_p9 = scmp.lt.s32.totalorder %s13711_s7, %s13707_s19 }
  0xc5   :  { %p13714_p10 = por %p13713_p9, %p13712_p8 }
  0xc7   :  { %p13715_p11 = pnand %p13714_p10, %p13708_p7 }
  0xc9   :  { %13718 = shalt.err (!%p13715_p11)
}
  0xca   :  { %166 = dma.hbm_to_vmem [thread:$0]  %s14811_s11, 16, %s164_s0, [#allocation21]  }
  0xcb   :  { %13741 = dma.done.wait [#allocation3], 512  }
  0xcc   :  { %13742 = vsyncadd [#allocation3], 4294966784 }
  0xcd   :  { %13743 = dma.done.wait [#allocation6], 17408  }
  0xce   :  { %13744 = vsyncadd [#allocation6], 4294949888 }
  0xcf   :  { %13745 = dma.done.wait [#allocation9], 49152  }
  0xd0   :  { %13746 = vsyncadd [#allocation9], 4294918144 }
  0xd1   :  { %13747 = dma.done.wait [#allocation12], 49152  }
  0xd2   :  { %13748 = vsyncadd [#allocation12], 4294918144 }
  0xd3   :  { %13749 = dma.done.wait [#allocation15], 20480  }
  0xd4   :  { %13750 = vsyncadd [#allocation15], 4294946816 }
  0xd5   :  { %13751 = dma.done.wait [#allocation18], 5120  }
  0xd6   :  { %13752 = vsyncadd [#allocation18], 4294962176 }
  0xd7   :  { %13753 = dma.done.wait [#allocation21], 16  }
  0xd8   :  { %13754 = vsyncadd [#allocation21], 4294967280  ;;  %v12499_v0 = vld [vmem:[#allocation7 + $0x4] ss:$16 sps:$4 sm:$0xff]   ;;  %v12501_v1 = vld [vmem:[#allocation7 + $0xc] ss:$16 sps:$4 sm:$0xff]  }
  0xd9   :  { %1412 = vmatprep.subr.bf16.mxu0 %v12499_v0  ;;  %v12503_v2 = vld [vmem:[#allocation7] ss:$16 sps:$4 sm:$0xff]   ;;  %v12504_v3 = vld [vmem:[#allocation7 + $0x8] ss:$16 sps:$4 sm:$0xff]   ;;  %1498 = vmatprep.subr.bf16.mxu1 %v12501_v1  ;;  %v12505_v4 = vld [vmem:[#allocation7 + $0x24] ss:$16 sps:$4 sm:$0xff]  }
  0xda   :  { %1413 = vmatpush1.bf16.msra.mxu0 %v12503_v2  ;;  %1499 = vmatpush1.bf16.msra.mxu1 %v12504_v3  ;;  %v12507_v5 = vld [vmem:[#allocation7 + $0x2c] ss:$16 sps:$4 sm:$0xff]   ;;  %v12509_v6 = vld [vmem:[#allocation7 + $0x20] ss:$16 sps:$4 sm:$0xff]   ;;  %v12510_v7 = vld [vmem:[#allocation7 + $0x28] ss:$16 sps:$4 sm:$0xff]  }
  0xdb   :  { %1414 = vmatprep.subr.bf16.mxu0 %v12505_v4  ;;  %1500 = vmatprep.subr.bf16.mxu1 %v12507_v5  ;;  %v12511_v8 = vld [vmem:[#allocation7 + $0x44] ss:$16 sps:$4 sm:$0xff]   ;;  %v12513_v9 = vld [vmem:[#allocation7 + $0x4c] ss:$16 sps:$4 sm:$0xff]   ;;  %v12515_v10 = vld [vmem:[#allocation7 + $0x40] ss:$16 sps:$4 sm:$0xff]  }
  0xdc   :  { %v12516_v11 = vld [vmem:[#allocation7 + $0x48] ss:$16 sps:$4 sm:$0xff]   ;;  %v12517_v12 = vld [vmem:[#allocation7 + $0x64] ss:$16 sps:$4 sm:$0xff]   ;;  %v12519_v13 = vld [vmem:[#allocation7 + $0x6c] ss:$16 sps:$4 sm:$0xff]  }
  0xdd   :  { %v12521_v14 = vld [vmem:[#allocation7 + $0x60] ss:$16 sps:$4 sm:$0xff]   ;;  %v12522_v15 = vld [vmem:[#allocation7 + $0x68] ss:$16 sps:$4 sm:$0xff]   ;;  %v12523_v16 = vld [vmem:[#allocation7 + $0x84] ss:$16 sps:$4 sm:$0xff]  }
  0xde   :  { %1415 = vmatpush1.bf16.msra.mxu0 %v12509_v6  ;;  %1501 = vmatpush1.bf16.msra.mxu1 %v12510_v7  ;;  %v12525_v17 = vld [vmem:[#allocation7 + $0x8c] ss:$16 sps:$4 sm:$0xff]   ;;  %v12527_v18 = vld [vmem:[#allocation7 + $0x80] ss:$16 sps:$4 sm:$0xff]   ;;  %v12528_v19 = vld [vmem:[#allocation7 + $0x88] ss:$16 sps:$4 sm:$0xff]  }
  0xdf   :  { %1416 = vmatprep.subr.bf16.mxu0 %v12511_v8  ;;  %1502 = vmatprep.subr.bf16.mxu1 %v12513_v9  ;;  %v12529_v20 = vld [vmem:[#allocation7 + $0xa4] ss:$16 sps:$4 sm:$0xff]   ;;  %v12531_v21 = vld [vmem:[#allocation7 + $0xac] ss:$16 sps:$4 sm:$0xff]   ;;  %v12533_v22 = vld [vmem:[#allocation7 + $0xa0] ss:$16 sps:$4 sm:$0xff]  }
  0xe0   :  { %v12534_v23 = vld [vmem:[#allocation7 + $0xa8] ss:$16 sps:$4 sm:$0xff]   ;;  %v12535_v24 = vld [vmem:[#allocation7 + $0xc4] ss:$16 sps:$4 sm:$0xff]   ;;  %v12537_v25 = vld [vmem:[#allocation7 + $0xcc] ss:$16 sps:$4 sm:$0xff]  }
  0xe1   :  { %v12539_v26 = vld [vmem:[#allocation7 + $0xc0] ss:$16 sps:$4 sm:$0xff]   ;;  %v12540_v27 = vld [vmem:[#allocation7 + $0xc8] ss:$16 sps:$4 sm:$0xff]   ;;  %v12541_v28 = vld [vmem:[#allocation7 + $0xe4] ss:$16 sps:$4 sm:$0xff]  }
  0xe2   :  { %1417 = vmatpush1.bf16.msra.mxu0 %v12515_v10  ;;  %1503 = vmatpush1.bf16.msra.mxu1 %v12516_v11  ;;  %v12543_v29 = vld [vmem:[#allocation7 + $0xec] ss:$16 sps:$4 sm:$0xff]   ;;  %v12545_v30 = vld [vmem:[#allocation7 + $0xe0] ss:$16 sps:$4 sm:$0xff]   ;;  %v12546_v31 = vld [vmem:[#allocation7 + $0xe8] ss:$16 sps:$4 sm:$0xff]  }
  0xe3   :  { %1418 = vmatprep.subr.bf16.mxu0 %v12517_v12  ;;  %1504 = vmatprep.subr.bf16.mxu1 %v12519_v13  ;;  %v12547_v32 = vld [vmem:[#allocation7 + $0x104] ss:$16 sps:$4 sm:$0xff]   ;;  %v12549_v33 = vld [vmem:[#allocation7 + $0x10c] ss:$16 sps:$4 sm:$0xff]   ;;  %v12551_v34 = vld [vmem:[#allocation7 + $0x100] ss:$16 sps:$4 sm:$0xff]  }
  0xe4   :  { %v12552_v35 = vld [vmem:[#allocation7 + $0x108] ss:$16 sps:$4 sm:$0xff]   ;;  %v12553_v36 = vld [vmem:[#allocation7 + $0x124] ss:$16 sps:$4 sm:$0xff]   ;;  %v12555_v37 = vld [vmem:[#allocation7 + $0x12c] ss:$16 sps:$4 sm:$0xff]  }
  0xe5   :  { %v12557_v38 = vld [vmem:[#allocation7 + $0x120] ss:$16 sps:$4 sm:$0xff]   ;;  %v12558_v39 = vld [vmem:[#allocation7 + $0x128] ss:$16 sps:$4 sm:$0xff]   ;;  %v12559_v40 = vld [vmem:[#allocation7 + $0x144] ss:$16 sps:$4 sm:$0xff]  }
  0xe6   :  { %1419 = vmatpush1.bf16.msra.mxu0 %v12521_v14  ;;  %1505 = vmatpush1.bf16.msra.mxu1 %v12522_v15  ;;  %v12561_v41 = vld [vmem:[#allocation7 + $0x14c] ss:$16 sps:$4 sm:$0xff]   ;;  %v12563_v42 = vld [vmem:[#allocation7 + $0x140] ss:$16 sps:$4 sm:$0xff]   ;;  %v12564_v43 = vld [vmem:[#allocation7 + $0x148] ss:$16 sps:$4 sm:$0xff]  }
  0xe7   :  { %1420 = vmatprep.subr.bf16.mxu0 %v12523_v16  ;;  %1506 = vmatprep.subr.bf16.mxu1 %v12525_v17  ;;  %v12565_v44 = vld [vmem:[#allocation7 + $0x164] ss:$16 sps:$4 sm:$0xff]   ;;  %v12567_v45 = vld [vmem:[#allocation7 + $0x16c] ss:$16 sps:$4 sm:$0xff]   ;;  %v12569_v48 = vld [vmem:[#allocation7 + $0x160] ss:$16 sps:$4 sm:$0xff]  }
  0xe8   :  { %v212_v46 = vld [vmem:[#allocation2] sm:$0xff]  ;;  %v214_v47 = vld [vmem:[#allocation2 + $0x10] sm:$0xff]  ;;  %v12570_v49 = vld [vmem:[#allocation7 + $0x168] ss:$16 sps:$4 sm:$0xff]   ;;  %vm13776_vm0 = vmmov 0   ;;  %vm3764_vm1 = vcmask 1043456  }
  0xe9   :  { %v14053_v50 = vcombine.high %v212_v46, %v214_v47  ;;  %v12571_v51 = vld [vmem:[#allocation7 + $0x184] ss:$16 sps:$4 sm:$0xff]   ;;  %v12573_v52 = vld [vmem:[#allocation7 + $0x18c] ss:$16 sps:$4 sm:$0xff]   ;;  %v12575_v53 = vld [vmem:[#allocation7 + $0x180] ss:$16 sps:$4 sm:$0xff]   ;;  %v14057_v5 = vcombine.low %v212_v46, %v214_v47 }
  0xea   :  { %1421 = vmatpush1.bf16.msra.mxu0 %v12527_v18  ;;  %1507 = vmatpush1.bf16.msra.mxu1 %v12528_v19  ;;  %v12576_v54 = vld [vmem:[#allocation7 + $0x188] ss:$16 sps:$4 sm:$0xff]   ;;  %v12577_v55 = vld [vmem:[#allocation7 + $0x1a4] ss:$16 sps:$4 sm:$0xff]   ;;  %v12579_v56 = vld [vmem:[#allocation7 + $0x1ac] ss:$16 sps:$4 sm:$0xff]  }
  0xeb   :  { %1422 = vmatprep.subr.bf16.mxu0 %v12529_v20  ;;  %1508 = vmatprep.subr.bf16.mxu1 %v12531_v21  ;;  %v12581_v57 = vld [vmem:[#allocation7 + $0x1a0] ss:$16 sps:$4 sm:$0xff]   ;;  %v12582_v58 = vld [vmem:[#allocation7 + $0x1a8] ss:$16 sps:$4 sm:$0xff]   ;;  %v12583_v59 = vld [vmem:[#allocation7 + $0x1c4] ss:$16 sps:$4 sm:$0xff]  }
  0xec   :  { %1444 = vmatprep.mubr.bf16.mxu0 %v14053_v50  ;;  %1530 = vmatprep.mubr.bf16.mxu1 %v14053_v50  ;;  %v12585_v60 = vld [vmem:[#allocation7 + $0x1cc] ss:$16 sps:$4 sm:$0xff]   ;;  %v12587_v61 = vld [vmem:[#allocation7 + $0x1c0] ss:$16 sps:$4 sm:$0xff]   ;;  %v12588_v62 = vld [vmem:[#allocation7 + $0x1c8] ss:$16 sps:$4 sm:$0xff]  }
  0xed   :  { %v12589_v63 = vld [vmem:[#allocation7 + $0x1e4] ss:$16 sps:$4 sm:$0xff]   ;;  %v12591_v0 = vld [vmem:[#allocation7 + $0x1ec] ss:$16 sps:$4 sm:$0xff]   ;;  %v12593_v1 = vld [vmem:[#allocation7 + $0x1e0] ss:$16 sps:$4 sm:$0xff]  }
  0xee   :  { %1423 = vmatpush1.bf16.msra.mxu0 %v12533_v22  ;;  %1509 = vmatpush1.bf16.msra.mxu1 %v12534_v23  ;;  %v12594_v2 = vld [vmem:[#allocation7 + $0x1e8] ss:$16 sps:$4 sm:$0xff]   ;;  %v12598_v3 = vld [vmem:[#allocation7 + $0x204] ss:$16 sps:$4 sm:$0xff]   ;;  %v12601_v4 = vld [vmem:[#allocation7 + $0x20c] ss:$16 sps:$4 sm:$0xff]  }
  0xef   :  { %1424 = vmatprep.subr.bf16.mxu0 %v12535_v24  ;;  %1510 = vmatprep.subr.bf16.mxu1 %v12537_v25  ;;  %v12596_v6 = vld [vmem:[#allocation7 + $0x200] ss:$16 sps:$4 sm:$0xff]   ;;  %v12599_v7 = vld [vmem:[#allocation7 + $0x208] ss:$16 sps:$4 sm:$0xff]   ;;  %v12605_v8 = vld [vmem:[#allocation7 + $0x224] ss:$16 sps:$4 sm:$0xff]  }
  0xf0   :  { %v12608_v9 = vld [vmem:[#allocation7 + $0x22c] ss:$16 sps:$4 sm:$0xff]   ;;  %v12603_v10 = vld [vmem:[#allocation7 + $0x220] ss:$16 sps:$4 sm:$0xff]   ;;  %v12606_v11 = vld [vmem:[#allocation7 + $0x228] ss:$16 sps:$4 sm:$0xff]  }
  0xf1   :  { %v12611_v12 = vld [vmem:[#allocation7 + $0x244] ss:$16 sps:$4 sm:$0xff]   ;;  %v12614_v13 = vld [vmem:[#allocation7 + $0x24c] ss:$16 sps:$4 sm:$0xff]   ;;  %v12609_v14 = vld [vmem:[#allocation7 + $0x240] ss:$16 sps:$4 sm:$0xff]  }
  0xf2   :  { %1425 = vmatpush1.bf16.msra.mxu0 %v12539_v26  ;;  %1511 = vmatpush1.bf16.msra.mxu1 %v12540_v27  ;;  %v12612_v15 = vld [vmem:[#allocation7 + $0x248] ss:$16 sps:$4 sm:$0xff]   ;;  %v12617_v16 = vld [vmem:[#allocation7 + $0x264] ss:$16 sps:$4 sm:$0xff]   ;;  %v12620_v17 = vld [vmem:[#allocation7 + $0x26c] ss:$16 sps:$4 sm:$0xff]  }
  0xf3   :  { %1426 = vmatprep.subr.bf16.mxu0 %v12541_v28  ;;  %1512 = vmatprep.subr.bf16.mxu1 %v12543_v29  ;;  %v12615_v18 = vld [vmem:[#allocation7 + $0x260] ss:$16 sps:$4 sm:$0xff]   ;;  %v12618_v19 = vld [vmem:[#allocation7 + $0x268] ss:$16 sps:$4 sm:$0xff]   ;;  %v12623_v20 = vld [vmem:[#allocation7 + $0x284] ss:$16 sps:$4 sm:$0xff]  }
  0xf4   :  { %v12626_v21 = vld [vmem:[#allocation7 + $0x28c] ss:$16 sps:$4 sm:$0xff]   ;;  %v12621_v22 = vld [vmem:[#allocation7 + $0x280] ss:$16 sps:$4 sm:$0xff]   ;;  %v12624_v23 = vld [vmem:[#allocation7 + $0x288] ss:$16 sps:$4 sm:$0xff]  }
  0xf5   :  { %v12629_v24 = vld [vmem:[#allocation7 + $0x2a4] ss:$16 sps:$4 sm:$0xff]   ;;  %v12632_v25 = vld [vmem:[#allocation7 + $0x2ac] ss:$16 sps:$4 sm:$0xff]   ;;  %v12627_v26 = vld [vmem:[#allocation7 + $0x2a0] ss:$16 sps:$4 sm:$0xff]  }
  0xf6   :  { %1427 = vmatpush1.bf16.msra.mxu0 %v12545_v30  ;;  %1513 = vmatpush1.bf16.msra.mxu1 %v12546_v31  ;;  %v12630_v27 = vld [vmem:[#allocation7 + $0x2a8] ss:$16 sps:$4 sm:$0xff]   ;;  %v12635_v28 = vld [vmem:[#allocation7 + $0x2c4] ss:$16 sps:$4 sm:$0xff]   ;;  %v12638_v29 = vld [vmem:[#allocation7 + $0x2cc] ss:$16 sps:$4 sm:$0xff]  }
  0xf7   :  { %1428 = vmatprep.subr.bf16.mxu0 %v12547_v32  ;;  %1514 = vmatprep.subr.bf16.mxu1 %v12549_v33  ;;  %v14061_v30 = vld [vmem:[#allocation2 + $0x8] sm:$0xff]  ;;  %v14063_v31 = vld [vmem:[#allocation2 + $0x18] sm:$0xff]  ;;  %v12633_v33 = vld [vmem:[#allocation7 + $0x2c0] ss:$16 sps:$4 sm:$0xff]   ;;  %vm3664_vm2 = vcmask 64512   ;;  %vm8630_vm3 = vcmask 130048  }
  0xf8   :  { %v14067_v32 = vcombine.high %v14061_v30, %v14063_v31  ;;  %v12654_v46 = vld [vmem:[#allocation7 + $0x328] ss:$16 sps:$4 sm:$0xff]   ;;  %v12659_v47 = vld [vmem:[#allocation7 + $0x344] ss:$16 sps:$4 sm:$0xff]   ;;  %s13778_s11 = smov [#allocation22]  }
  0xf9   :  { %s10842_s22 = sshll.u32 %s13778_s11, 4  ;;  %s10843_s22 = int_to_ptr.vmem [resolvable:$true] %s10842_s22 }
  0xfa   :  { %1429 = vmatpush1.bf16.msra.mxu0 %v12551_v34  ;;  %1515 = vmatpush1.bf16.msra.mxu1 %v12552_v35  ;;  %v12636_v34 = vld [vmem:[#allocation7 + $0x2c8] ss:$16 sps:$4 sm:$0xff]   ;;  %v12641_v35 = vld [vmem:[#allocation7 + $0x2e4] ss:$16 sps:$4 sm:$0xff]   ;;  %s13719_s18 = scalar_lea.vmem %s10843_s22, 512  ;;  %p13724_p13 = scmp.lt.s32.totalorder %s10843_s22, %s10843_s22 }
  0xfb   :  { %1430 = vmatprep.subr.bf16.mxu0 %v12553_v36  ;;  %1516 = vmatprep.subr.bf16.mxu1 %v12555_v37  ;;  %v12644_v36 = vld [vmem:[#allocation7 + $0x2ec] ss:$16 sps:$4 sm:$0xff]   ;;  %v12639_v37 = vld [vmem:[#allocation7 + $0x2e0] ss:$16 sps:$4 sm:$0xff]   ;;  %p13720_p12 = scmp.ne.s32.totalorder %s10843_s22, %s13719_s18  ;;  %p13725_p0 = scmp.lt.s32.totalorder %s13719_s18, %s13719_s18 }
  0xfd   :  { %p13726_p1 = por %p13725_p0, %p13724_p13 }
  0xfe   :  { %1431 = vmatpush1.bf16.msra.mxu0 %v12557_v38  ;;  %1517 = vmatpush1.bf16.msra.mxu1 %v12558_v39  ;;  %v12642_v38 = vld [vmem:[#allocation7 + $0x2e8] ss:$16 sps:$4 sm:$0xff]   ;;  %v12647_v39 = vld [vmem:[#allocation7 + $0x304] ss:$16 sps:$4 sm:$0xff]  }
  0xff   :  { %1432 = vmatprep.subr.bf16.mxu0 %v12559_v40  ;;  %1518 = vmatprep.subr.bf16.mxu1 %v12561_v41  ;;  %v12650_v40 = vld [vmem:[#allocation7 + $0x30c] ss:$16 sps:$4 sm:$0xff]   ;;  %v12645_v41 = vld [vmem:[#allocation7 + $0x300] ss:$16 sps:$4 sm:$0xff]   ;;  %p13727_p2 = pnand %p13726_p1, %p13720_p12 }
 0x102   :  { %1433 = vmatpush1.bf16.msra.mxu0 %v12563_v42  ;;  %1519 = vmatpush1.bf16.msra.mxu1 %v12564_v43  ;;  %v12648_v42 = vld [vmem:[#allocation7 + $0x308] ss:$16 sps:$4 sm:$0xff]   ;;  %v12653_v43 = vld [vmem:[#allocation7 + $0x324] ss:$16 sps:$4 sm:$0xff]  }
 0x103   :  { %1434 = vmatprep.subr.bf16.mxu0 %v12565_v44  ;;  %1520 = vmatprep.subr.bf16.mxu1 %v12567_v45  ;;  %v12656_v44 = vld [vmem:[#allocation7 + $0x32c] ss:$16 sps:$4 sm:$0xff]   ;;  %v12651_v45 = vld [vmem:[#allocation7 + $0x320] ss:$16 sps:$4 sm:$0xff]  }
 0x106   :  { %1435 = vmatpush1.bf16.msra.mxu0 %v12569_v48  ;;  %1521 = vmatpush1.bf16.msra.mxu1 %v12570_v49  ;;  %v12662_v48 = vld [vmem:[#allocation7 + $0x34c] ss:$16 sps:$4 sm:$0xff]   ;;  %v12657_v49 = vld [vmem:[#allocation7 + $0x340] ss:$16 sps:$4 sm:$0xff]  }
 0x107   :  { %1436 = vmatprep.subr.bf16.mxu0 %v12571_v51  ;;  %1522 = vmatprep.subr.bf16.mxu1 %v12573_v52  ;;  %v12660_v51 = vld [vmem:[#allocation7 + $0x348] ss:$16 sps:$4 sm:$0xff]   ;;  %v12665_v52 = vld [vmem:[#allocation7 + $0x364] ss:$16 sps:$4 sm:$0xff]  }
 0x10a   :  { %1437 = vmatpush1.bf16.msra.mxu0 %v12575_v53  ;;  %1523 = vmatpush1.bf16.msra.mxu1 %v12576_v54  ;;  %v12668_v53 = vld [vmem:[#allocation7 + $0x36c] ss:$16 sps:$4 sm:$0xff]   ;;  %v12663_v54 = vld [vmem:[#allocation7 + $0x360] ss:$16 sps:$4 sm:$0xff]  }
 0x10b   :  { %1438 = vmatprep.subr.bf16.mxu0 %v12577_v55  ;;  %1524 = vmatprep.subr.bf16.mxu1 %v12579_v56  ;;  %v12666_v55 = vld [vmem:[#allocation7 + $0x368] ss:$16 sps:$4 sm:$0xff]   ;;  %v12671_v56 = vld [vmem:[#allocation7 + $0x384] ss:$16 sps:$4 sm:$0xff]  }
 0x10e   :  { %1439 = vmatpush1.bf16.msra.mxu0 %v12581_v57  ;;  %1525 = vmatpush1.bf16.msra.mxu1 %v12582_v58  ;;  %v12674_v57 = vld [vmem:[#allocation7 + $0x38c] ss:$16 sps:$4 sm:$0xff]   ;;  %v12669_v58 = vld [vmem:[#allocation7 + $0x380] ss:$16 sps:$4 sm:$0xff]  }
 0x10f   :  { %1440 = vmatprep.subr.bf16.mxu0 %v12583_v59  ;;  %1526 = vmatprep.subr.bf16.mxu1 %v12585_v60  ;;  %v12672_v59 = vld [vmem:[#allocation7 + $0x388] ss:$16 sps:$4 sm:$0xff]   ;;  %v12677_v60 = vld [vmem:[#allocation7 + $0x3a4] ss:$16 sps:$4 sm:$0xff]  }
 0x112   :  { %1441 = vmatpush1.bf16.msra.mxu0 %v12587_v61  ;;  %1527 = vmatpush1.bf16.msra.mxu1 %v12588_v62  ;;  %v12680_v61 = vld [vmem:[#allocation7 + $0x3ac] ss:$16 sps:$4 sm:$0xff]   ;;  %v12675_v62 = vld [vmem:[#allocation7 + $0x3a0] ss:$16 sps:$4 sm:$0xff]  }
 0x113   :  { %1442 = vmatprep.subr.bf16.mxu0 %v12589_v63  ;;  %1528 = vmatprep.subr.bf16.mxu1 %v12591_v0  ;;  %v12678_v63 = vld [vmem:[#allocation7 + $0x3a8] ss:$16 sps:$4 sm:$0xff]   ;;  %v12683_v0 = vld [vmem:[#allocation7 + $0x3c4] ss:$16 sps:$4 sm:$0xff]  }
 0x116   :  { %1443 = vmatpush1.bf16.msra.mxu0 %v12593_v1  ;;  %1529 = vmatpush1.bf16.msra.mxu1 %v12594_v2  ;;  %v12686_v1 = vld [vmem:[#allocation7 + $0x3cc] ss:$16 sps:$4 sm:$0xff]   ;;  %v12681_v2 = vld [vmem:[#allocation7 + $0x3c0] ss:$16 sps:$4 sm:$0xff]  }
 0x117   :  { %1455 = vmatprep.subr.bf16.mxu0 %v12598_v3  ;;  %1541 = vmatprep.subr.bf16.mxu1 %v12601_v4  ;;  %v12684_v3 = vld [vmem:[#allocation7 + $0x3c8] ss:$16 sps:$4 sm:$0xff]   ;;  %v12689_v4 = vld [vmem:[#allocation7 + $0x3e4] ss:$16 sps:$4 sm:$0xff]  }
 0x119   :  { %1445 = vmatmul.mubr.bf16.vlgmr.msra.gmra.mrb[0].mxu0 %v14057_v5  ;;  %1531 = vmatmul.mubr.bf16.vlgmr.msra.gmra.mrb[0].mxu1 %v14057_v5 }
 0x11a   :  { %1456 = vmatpush1.bf16.msra.mxu0 %v12596_v6  ;;  %1542 = vmatpush1.bf16.msra.mxu1 %v12599_v7  ;;  %v12692_v6 = vld [vmem:[#allocation7 + $0x3ec] ss:$16 sps:$4 sm:$0xff]   ;;  %v352_v7 = vld [vmem:[#allocation8] sm:$0xff] }
 0x11b   :  { %1457 = vmatprep.subr.bf16.mxu0 %v12605_v8  ;;  %1543 = vmatprep.subr.bf16.mxu1 %v12608_v9  ;;  %v356_v8 = vld [vmem:[#allocation8 + $0x20] sm:$0xff]  ;;  %v353_v9 = vld [vmem:[#allocation8 + $0x8] sm:$0xff] }
 0x11c   :  { %1487 = vmatprep.mubr.bf16.mxu0 %v14067_v32  ;;  %1573 = vmatprep.mubr.bf16.mxu1 %v14067_v32 }
 0x11e   :  { %1458 = vmatpush1.bf16.msra.mxu0 %v12603_v10  ;;  %1544 = vmatpush1.bf16.msra.mxu1 %v12606_v11  ;;  %v357_v10 = vld [vmem:[#allocation8 + $0x28] sm:$0xff]  ;;  %v12687_v11 = vld [vmem:[#allocation7 + $0x3e0] ss:$16 sps:$4 sm:$0xff]  }
 0x11f   :  { %1459 = vmatprep.subr.bf16.mxu0 %v12611_v12  ;;  %1545 = vmatprep.subr.bf16.mxu1 %v12614_v13  ;;  %v12690_v12 = vld [vmem:[#allocation7 + $0x3e8] ss:$16 sps:$4 sm:$0xff]   ;;  %v10993_v13 = vcombine.high %v352_v7, %v356_v8 }
 0x122   :  { %1460 = vmatpush1.bf16.msra.mxu0 %v12609_v14  ;;  %1546 = vmatpush1.bf16.msra.mxu1 %v12612_v15  ;;  %v10995_v14 = vcombine.high %v353_v9, %v357_v10  ;;  %v360_v15 = vld [vmem:[#allocation8 + $0x40] sm:$0xff] }
 0x123   :  { %1461 = vmatprep.subr.bf16.mxu0 %v12617_v16  ;;  %1547 = vmatprep.subr.bf16.mxu1 %v12620_v17  ;;  %v364_v16 = vld [vmem:[#allocation8 + $0x60] sm:$0xff]  ;;  %v361_v17 = vld [vmem:[#allocation8 + $0x48] sm:$0xff] }
 0x126   :  { %1462 = vmatpush1.bf16.msra.mxu0 %v12615_v18  ;;  %1548 = vmatpush1.bf16.msra.mxu1 %v12618_v19  ;;  %v365_v18 = vld [vmem:[#allocation8 + $0x68] sm:$0xff]  ;;  %v14073_v19 = vcombine.low %v14061_v30, %v14063_v31  ;;  %v376_v30 = vld [vmem:[#allocation8 + $0xc0] sm:$0xff] }
 0x127   :  { %1463 = vmatprep.subr.bf16.mxu0 %v12623_v20  ;;  %1549 = vmatprep.subr.bf16.mxu1 %v12626_v21  ;;  %v10992_v20 = vcombine.low %v352_v7, %v356_v8  ;;  %v10994_v21 = vcombine.low %v353_v9, %v357_v10  ;;  %v380_v31 = vld [vmem:[#allocation8 + $0xe0] sm:$0xff] }
 0x128   :  { %v416_v9 = vld [vmem:[#allocation8 + $0x200] sm:$0xff] }
 0x129   :  { %v420_v10 = vld [vmem:[#allocation8 + $0x220] sm:$0xff] }
 0x12a   :  { %1464 = vmatpush1.bf16.msra.mxu0 %v12621_v22  ;;  %1550 = vmatpush1.bf16.msra.mxu1 %v12624_v23  ;;  %v368_v22 = vld [vmem:[#allocation8 + $0x80] sm:$0xff] }
 0x12b   :  { %1465 = vmatprep.subr.bf16.mxu0 %v12629_v24  ;;  %1551 = vmatprep.subr.bf16.mxu1 %v12632_v25  ;;  %v372_v23 = vld [vmem:[#allocation8 + $0xa0] sm:$0xff]  ;;  %v369_v24 = vld [vmem:[#allocation8 + $0x88] sm:$0xff]  ;;  %v11001_v25 = vcombine.high %v360_v15, %v364_v16 }
 0x12e   :  { %1466 = vmatpush1.bf16.msra.mxu0 %v12627_v26  ;;  %1552 = vmatpush1.bf16.msra.mxu1 %v12630_v27  ;;  %v11003_v26 = vcombine.high %v361_v17, %v365_v18  ;;  %v373_v27 = vld [vmem:[#allocation8 + $0xa8] sm:$0xff] }
 0x12f   :  { %1467 = vmatprep.subr.bf16.mxu0 %v12635_v28  ;;  %1553 = vmatprep.subr.bf16.mxu1 %v12638_v29  ;;  %v11000_v28 = vcombine.low %v360_v15, %v364_v16  ;;  %v11002_v29 = vcombine.low %v361_v17, %v365_v18  ;;  %v424_v17 = vld [vmem:[#allocation8 + $0x240] sm:$0xff] }
 0x130   :  { %v428_v18 = vld [vmem:[#allocation8 + $0x260] sm:$0xff] }
 0x132   :  { %1468 = vmatpush1.bf16.msra.mxu0 %v12633_v33  ;;  %1554 = vmatpush1.bf16.msra.mxu1 %v12636_v34  ;;  %v11009_v33 = vcombine.high %v368_v22, %v372_v23  ;;  %v11011_v34 = vcombine.high %v369_v24, %v373_v27 }
 0x133   :  { %1469 = vmatprep.subr.bf16.mxu0 %v12641_v35  ;;  %1555 = vmatprep.subr.bf16.mxu1 %v12644_v36  ;;  %v377_v35 = vld [vmem:[#allocation8 + $0xc8] sm:$0xff] }
 0x134   :  { %v381_v36 = vld [vmem:[#allocation8 + $0xe8] sm:$0xff] }
 0x136   :  { %1470 = vmatpush1.bf16.msra.mxu0 %v12639_v37  ;;  %1556 = vmatpush1.bf16.msra.mxu1 %v12642_v38  ;;  %v11008_v37 = vcombine.low %v368_v22, %v372_v23  ;;  %v11010_v38 = vcombine.low %v369_v24, %v373_v27  ;;  %v425_v22 = vld [vmem:[#allocation8 + $0x248] sm:$0xff]  ;;  %v11056_v24 = vcombine.low %v416_v9, %v420_v10  ;;  %v436_v27 = vld [vmem:[#allocation8 + $0x2a0] sm:$0xff] }
 0x137   :  { %1471 = vmatprep.subr.bf16.mxu0 %v12647_v39  ;;  %1557 = vmatprep.subr.bf16.mxu1 %v12650_v40  ;;  %v384_v39 = vld [vmem:[#allocation8 + $0x100] sm:$0xff]  ;;  %v429_v23 = vld [vmem:[#allocation8 + $0x268] sm:$0xff] }
 0x138   :  { %v388_v40 = vld [vmem:[#allocation8 + $0x120] sm:$0xff] }
 0x13a   :  { %1472 = vmatpush1.bf16.msra.mxu0 %v12645_v41  ;;  %1558 = vmatpush1.bf16.msra.mxu1 %v12648_v42  ;;  %v11017_v41 = vcombine.high %v376_v30, %v380_v31  ;;  %v11019_v42 = vcombine.high %v377_v35, %v381_v36 }
 0x13b   :  { %1473 = vmatprep.subr.bf16.mxu0 %v12653_v43  ;;  %1559 = vmatprep.subr.bf16.mxu1 %v12656_v44  ;;  %v385_v43 = vld [vmem:[#allocation8 + $0x108] sm:$0xff] }
 0x13c   :  { %v389_v44 = vld [vmem:[#allocation8 + $0x128] sm:$0xff] }
 0x13e   :  { %1474 = vmatpush1.bf16.msra.mxu0 %v12651_v45  ;;  %1560 = vmatpush1.bf16.msra.mxu1 %v12654_v46  ;;  %v11016_v45 = vcombine.low %v376_v30, %v380_v31  ;;  %v11018_v46 = vcombine.low %v377_v35, %v381_v36  ;;  %v433_v30 = vld [vmem:[#allocation8 + $0x288] sm:$0xff]  ;;  %v440_v35 = vld [vmem:[#allocation8 + $0x2c0] sm:$0xff] }
 0x13f   :  { %1475 = vmatprep.subr.bf16.mxu0 %v12659_v47  ;;  %1561 = vmatprep.subr.bf16.mxu1 %v12662_v48  ;;  %v392_v47 = vld [vmem:[#allocation8 + $0x140] sm:$0xff]  ;;  %v437_v31 = vld [vmem:[#allocation8 + $0x2a8] sm:$0xff] }
 0x140   :  { %v396_v48 = vld [vmem:[#allocation8 + $0x160] sm:$0xff] }
 0x141   :  { %v444_v36 = vld [vmem:[#allocation8 + $0x2e0] sm:$0xff] }
 0x142   :  { %1476 = vmatpush1.bf16.msra.mxu0 %v12657_v49  ;;  %1562 = vmatpush1.bf16.msra.mxu1 %v12660_v51  ;;  %v11025_v49 = vcombine.high %v384_v39, %v388_v40  ;;  %v11027_v51 = vcombine.high %v385_v43, %v389_v44 }
 0x143   :  { %1477 = vmatprep.subr.bf16.mxu0 %v12665_v52  ;;  %1563 = vmatprep.subr.bf16.mxu1 %v12668_v53  ;;  %v393_v52 = vld [vmem:[#allocation8 + $0x148] sm:$0xff] }
 0x144   :  { %v397_v53 = vld [vmem:[#allocation8 + $0x168] sm:$0xff] }
 0x146   :  { %1478 = vmatpush1.bf16.msra.mxu0 %v12663_v54  ;;  %1564 = vmatpush1.bf16.msra.mxu1 %v12666_v55  ;;  %v11024_v54 = vcombine.low %v384_v39, %v388_v40  ;;  %v11026_v55 = vcombine.low %v385_v43, %v389_v44  ;;  %v441_v39 = vld [vmem:[#allocation8 + $0x2c8] sm:$0xff]  ;;  %v448_v43 = vld [vmem:[#allocation8 + $0x300] sm:$0xff] }
 0x147   :  { %1479 = vmatprep.subr.bf16.mxu0 %v12671_v56  ;;  %1565 = vmatprep.subr.bf16.mxu1 %v12674_v57  ;;  %v400_v56 = vld [vmem:[#allocation8 + $0x180] sm:$0xff]  ;;  %v445_v40 = vld [vmem:[#allocation8 + $0x2e8] sm:$0xff] }
 0x148   :  { %v404_v57 = vld [vmem:[#allocation8 + $0x1a0] sm:$0xff] }
 0x149   :  { %v11040_v7 = vcombine.low %v400_v56, %v404_v57  ;;  %v452_v44 = vld [vmem:[#allocation8 + $0x320] sm:$0xff] }
 0x14a   :  { %1480 = vmatpush1.bf16.msra.mxu0 %v12669_v58  ;;  %1566 = vmatpush1.bf16.msra.mxu1 %v12672_v59  ;;  %v11033_v58 = vcombine.high %v392_v47, %v396_v48  ;;  %v11035_v59 = vcombine.high %v393_v52, %v397_v53 }
 0x14b   :  { %1481 = vmatprep.subr.bf16.mxu0 %v12677_v60  ;;  %1567 = vmatprep.subr.bf16.mxu1 %v12680_v61  ;;  %v401_v60 = vld [vmem:[#allocation8 + $0x188] sm:$0xff] }
 0x14c   :  { %v405_v61 = vld [vmem:[#allocation8 + $0x1a8] sm:$0xff] }
 0x14d   :  { %v11042_v8 = vcombine.low %v401_v60, %v405_v61 }
 0x14e   :  { %1482 = vmatpush1.bf16.msra.mxu0 %v12675_v62  ;;  %1568 = vmatpush1.bf16.msra.mxu1 %v12678_v63  ;;  %v11032_v62 = vcombine.low %v392_v47, %v396_v48  ;;  %v11034_v63 = vcombine.low %v393_v52, %v397_v53  ;;  %v449_v47 = vld [vmem:[#allocation8 + $0x308] sm:$0xff]  ;;  %v456_v52 = vld [vmem:[#allocation8 + $0x340] sm:$0xff] }
 0x14f   :  { %1483 = vmatprep.subr.bf16.mxu0 %v12683_v0  ;;  %1569 = vmatprep.subr.bf16.mxu1 %v12686_v1  ;;  %v408_v0 = vld [vmem:[#allocation8 + $0x1c0] sm:$0xff]  ;;  %v453_v48 = vld [vmem:[#allocation8 + $0x328] sm:$0xff] }
 0x150   :  { %v412_v1 = vld [vmem:[#allocation8 + $0x1e0] sm:$0xff] }
 0x151   :  { %v11048_v15 = vcombine.low %v408_v0, %v412_v1  ;;  %v460_v53 = vld [vmem:[#allocation8 + $0x360] sm:$0xff] }
 0x152   :  { %1484 = vmatpush1.bf16.msra.mxu0 %v12681_v2  ;;  %1570 = vmatpush1.bf16.msra.mxu1 %v12684_v3  ;;  %v11041_v2 = vcombine.high %v400_v56, %v404_v57  ;;  %v11043_v3 = vcombine.high %v401_v60, %v405_v61  ;;  %v457_v56 = vld [vmem:[#allocation8 + $0x348] sm:$0xff]  ;;  %v464_v60 = vld [vmem:[#allocation8 + $0x380] sm:$0xff] }
 0x153   :  { %1485 = vmatprep.subr.bf16.mxu0 %v12689_v4  ;;  %1571 = vmatprep.subr.bf16.mxu1 %v12692_v6  ;;  %v409_v4 = vld [vmem:[#allocation8 + $0x1c8] sm:$0xff]  ;;  %v468_v61 = vld [vmem:[#allocation8 + $0x3a0] sm:$0xff] }
 0x154   :  { %v413_v6 = vld [vmem:[#allocation8 + $0x1e8] sm:$0xff] }
 0x155   :  { %v11050_v16 = vcombine.low %v409_v4, %v413_v6  ;;  %v461_v57 = vld [vmem:[#allocation8 + $0x368] sm:$0xff] }
 0x156   :  { %1486 = vmatpush1.bf16.msra.mxu0 %v12687_v11  ;;  %1572 = vmatpush1.bf16.msra.mxu1 %v12690_v12  ;;  %v11049_v11 = vcombine.high %v408_v0, %v412_v1  ;;  %v11051_v12 = vcombine.high %v409_v4, %v413_v6  ;;  %v465_v0 = vld [vmem:[#allocation8 + $0x388] sm:$0xff]  ;;  %v472_v4 = vld [vmem:[#allocation8 + $0x3c0] sm:$0xff] }
 0x157   :  { %2864 = vmatprep.subr.bf16.mxu0 %v10993_v13  ;;  %2950 = vmatprep.subr.bf16.mxu1 %v10995_v14  ;;  %v417_v13 = vld [vmem:[#allocation8 + $0x208] sm:$0xff]  ;;  %v476_v6 = vld [vmem:[#allocation8 + $0x3e0] sm:$0xff] }
 0x158   :  { %v421_v14 = vld [vmem:[#allocation8 + $0x228] sm:$0xff] }
 0x159   :  { %1488 = vmatmul.mubr.bf16.vlgmr.msra.gmra.mrb[0].mxu0 %v14073_v19  ;;  %1574 = vmatmul.mubr.bf16.vlgmr.msra.gmra.mrb[0].mxu1 %v14073_v19  ;;  %v469_v1 = vld [vmem:[#allocation8 + $0x3a8] sm:$0xff] }
 0x15a   :  { %2865 = vmatpush1.bf16.msra.mxu0 %v10992_v20  ;;  %2951 = vmatpush1.bf16.msra.mxu1 %v10994_v21  ;;  %v11057_v20 = vcombine.high %v416_v9, %v420_v10  ;;  %v11059_v21 = vcombine.high %v417_v13, %v421_v14  ;;  %v473_v9 = vld [vmem:[#allocation8 + $0x3c8] sm:$0xff] }
 0x15b   :  { %2866 = vmatprep.subr.bf16.mxu0 %v11001_v25  ;;  %2952 = vmatprep.subr.bf16.mxu1 %v11003_v26  ;;  %v11058_v25 = vcombine.low %v417_v13, %v421_v14  ;;  %v432_v26 = vld [vmem:[#allocation8 + $0x280] sm:$0xff]  ;;  %v477_v10 = vld [vmem:[#allocation8 + $0x3e8] sm:$0xff] }
 0x15c   :  { %2896 = vmatprep.mubr.bf16.mxu0 %v14053_v50  ;;  %2982 = vmatprep.mubr.bf16.mxu1 %v14053_v50  ;;  %v480_v13 = vld [vmem:[#allocation8 + $0x400] sm:$0xff] }
 0x15d   :  { %v484_v14 = vld [vmem:[#allocation8 + $0x420] sm:$0xff] }
 0x15e   :  { %2867 = vmatpush1.bf16.msra.mxu0 %v11000_v28  ;;  %2953 = vmatpush1.bf16.msra.mxu1 %v11002_v29  ;;  %v11065_v28 = vcombine.high %v424_v17, %v428_v18  ;;  %v11067_v29 = vcombine.high %v425_v22, %v429_v23 }
 0x15f   :  { %2868 = vmatprep.subr.bf16.mxu0 %v11009_v33  ;;  %2954 = vmatprep.subr.bf16.mxu1 %v11011_v34  ;;  %v11064_v33 = vcombine.low %v424_v17, %v428_v18  ;;  %v11066_v34 = vcombine.low %v425_v22, %v429_v23  ;;  %v481_v17 = vld [vmem:[#allocation8 + $0x408] sm:$0xff]  ;;  %v488_v22 = vld [vmem:[#allocation8 + $0x440] sm:$0xff] }
 0x160   :  { %v485_v18 = vld [vmem:[#allocation8 + $0x428] sm:$0xff]  ;;  %v492_v23 = vld [vmem:[#allocation8 + $0x460] sm:$0xff] }
 0x162   :  { %2869 = vmatpush1.bf16.msra.mxu0 %v11008_v37  ;;  %2955 = vmatpush1.bf16.msra.mxu1 %v11010_v38  ;;  %v11073_v37 = vcombine.high %v432_v26, %v436_v27  ;;  %v11075_v38 = vcombine.high %v433_v30, %v437_v31 }
 0x163   :  { %2870 = vmatprep.subr.bf16.mxu0 %v11017_v41  ;;  %2956 = vmatprep.subr.bf16.mxu1 %v11019_v42  ;;  %v11072_v41 = vcombine.low %v432_v26, %v436_v27  ;;  %v11074_v42 = vcombine.low %v433_v30, %v437_v31  ;;  %v489_v26 = vld [vmem:[#allocation8 + $0x448] sm:$0xff]  ;;  %v496_v30 = vld [vmem:[#allocation8 + $0x480] sm:$0xff] }
 0x164   :  { %v493_v27 = vld [vmem:[#allocation8 + $0x468] sm:$0xff]  ;;  %v500_v31 = vld [vmem:[#allocation8 + $0x4a0] sm:$0xff] }
 0x166   :  { %2871 = vmatpush1.bf16.msra.mxu0 %v11016_v45  ;;  %2957 = vmatpush1.bf16.msra.mxu1 %v11018_v46  ;;  %v11081_v45 = vcombine.high %v440_v35, %v444_v36  ;;  %v11083_v46 = vcombine.high %v441_v39, %v445_v40 }
 0x167   :  { %2872 = vmatprep.subr.bf16.mxu0 %v11025_v49  ;;  %2958 = vmatprep.subr.bf16.mxu1 %v11027_v51  ;;  %v11080_v49 = vcombine.low %v440_v35, %v444_v36  ;;  %v11082_v51 = vcombine.low %v441_v39, %v445_v40  ;;  %v497_v35 = vld [vmem:[#allocation8 + $0x488] sm:$0xff]  ;;  %v504_v39 = vld [vmem:[#allocation8 + $0x4c0] sm:$0xff] }
 0x168   :  { %v501_v36 = vld [vmem:[#allocation8 + $0x4a8] sm:$0xff]  ;;  %v508_v40 = vld [vmem:[#allocation8 + $0x4e0] sm:$0xff] }
 0x16a   :  { %2873 = vmatpush1.bf16.msra.mxu0 %v11024_v54  ;;  %2959 = vmatpush1.bf16.msra.mxu1 %v11026_v55  ;;  %v11089_v54 = vcombine.high %v448_v43, %v452_v44  ;;  %v11091_v55 = vcombine.high %v449_v47, %v453_v48 }
 0x16b   :  { %2874 = vmatprep.subr.bf16.mxu0 %v11033_v58  ;;  %2960 = vmatprep.subr.bf16.mxu1 %v11035_v59  ;;  %v11088_v58 = vcombine.low %v448_v43, %v452_v44  ;;  %v11090_v59 = vcombine.low %v449_v47, %v453_v48  ;;  %v11137_v43 = vcombine.high %v496_v30, %v500_v31  ;;  %v512_v47 = vld [vmem:[#allocation8 + $0x500] sm:$0xff] }
 0x16c   :  { %v11139_v44 = vcombine.high %v497_v35, %v501_v36  ;;  %v516_v48 = vld [vmem:[#allocation8 + $0x520] sm:$0xff] }
 0x16e   :  { %2875 = vmatpush1.bf16.msra.mxu0 %v11032_v62  ;;  %2961 = vmatpush1.bf16.msra.mxu1 %v11034_v63  ;;  %v11097_v62 = vcombine.high %v456_v52, %v460_v53  ;;  %v11099_v63 = vcombine.high %v457_v56, %v461_v57 }
 0x16f   :  { %2876 = vmatprep.subr.bf16.mxu0 %v11041_v2  ;;  %2962 = vmatprep.subr.bf16.mxu1 %v11043_v3  ;;  %v11096_v2 = vcombine.low %v456_v52, %v460_v53  ;;  %v11098_v3 = vcombine.low %v457_v56, %v461_v57  ;;  %v11145_v52 = vcombine.high %v504_v39, %v508_v40  ;;  %v520_v56 = vld [vmem:[#allocation8 + $0x540] sm:$0xff] }
 0x170   :  { %v524_v57 = vld [vmem:[#allocation8 + $0x560] sm:$0xff] }
 0x172   :  { %2877 = vmatpush1.bf16.msra.mxu0 %v11040_v7  ;;  %2963 = vmatpush1.bf16.msra.mxu1 %v11042_v8  ;;  %v11105_v7 = vcombine.high %v464_v60, %v468_v61  ;;  %v11107_v8 = vcombine.high %v465_v0, %v469_v1 }
 0x173   :  { %2878 = vmatprep.subr.bf16.mxu0 %v11049_v11  ;;  %2964 = vmatprep.subr.bf16.mxu1 %v11051_v12  ;;  %v11104_v11 = vcombine.low %v464_v60, %v468_v61  ;;  %v11106_v12 = vcombine.low %v465_v0, %v469_v1  ;;  %v11153_v60 = vcombine.high %v512_v47, %v516_v48  ;;  %v528_v0 = vld [vmem:[#allocation8 + $0x580] sm:$0xff] }
 0x174   :  { %v532_v1 = vld [vmem:[#allocation8 + $0x5a0] sm:$0xff] }
 0x176   :  { %2879 = vmatpush1.bf16.msra.mxu0 %v11048_v15  ;;  %2965 = vmatpush1.bf16.msra.mxu1 %v11050_v16  ;;  %v11113_v15 = vcombine.high %v472_v4, %v476_v6  ;;  %v11115_v16 = vcombine.high %v473_v9, %v477_v10 }
 0x177   :  { %2880 = vmatprep.subr.bf16.mxu0 %v11057_v20  ;;  %2966 = vmatprep.subr.bf16.mxu1 %v11059_v21  ;;  %v11112_v20 = vcombine.low %v472_v4, %v476_v6  ;;  %v11114_v21 = vcombine.low %v473_v9, %v477_v10  ;;  %v11161_v4 = vcombine.high %v520_v56, %v524_v57 }
 0x178   :  { %v11169_v9 = vcombine.high %v528_v0, %v532_v1 }
 0x17a   :  { %2881 = vmatpush1.bf16.msra.mxu0 %v11056_v24  ;;  %2967 = vmatpush1.bf16.msra.mxu1 %v11058_v25  ;;  %v11121_v24 = vcombine.high %v480_v13, %v484_v14  ;;  %v11123_v25 = vcombine.high %v481_v17, %v485_v18 }
 0x17b   :  { %2882 = vmatprep.subr.bf16.mxu0 %v11065_v28  ;;  %2968 = vmatprep.subr.bf16.mxu1 %v11067_v29  ;;  %v11120_v28 = vcombine.low %v480_v13, %v484_v14  ;;  %v11122_v29 = vcombine.low %v481_v17, %v485_v18  ;;  %v537_v13 = vld [vmem:[#allocation8 + $0x5c8] sm:$0xff]  ;;  %v544_v17 = vld [vmem:[#allocation8 + $0x600] sm:$0xff] }
 0x17c   :  { %v541_v14 = vld [vmem:[#allocation8 + $0x5e8] sm:$0xff]  ;;  %v548_v18 = vld [vmem:[#allocation8 + $0x620] sm:$0xff] }
 0x17e   :  { %2883 = vmatpush1.bf16.msra.mxu0 %v11064_v33  ;;  %2969 = vmatpush1.bf16.msra.mxu1 %v11066_v34  ;;  %v11129_v33 = vcombine.high %v488_v22, %v492_v23  ;;  %v11131_v34 = vcombine.high %v489_v26, %v493_v27 }
 0x17f   :  { %2884 = vmatprep.subr.bf16.mxu0 %v11073_v37  ;;  %2970 = vmatprep.subr.bf16.mxu1 %v11075_v38  ;;  %v11128_v37 = vcombine.low %v488_v22, %v492_v23  ;;  %v11130_v38 = vcombine.low %v489_v26, %v493_v27  ;;  %v11179_v22 = vcombine.high %v537_v13, %v541_v14  ;;  %v549_v23 = vld [vmem:[#allocation8 + $0x628] sm:$0xff] }
 0x180   :  { %v11185_v26 = vcombine.high %v544_v17, %v548_v18 }
 0x182   :  { %2885 = vmatpush1.bf16.msra.mxu0 %v11072_v41  ;;  %2971 = vmatpush1.bf16.msra.mxu1 %v11074_v42  ;;  %v505_v41 = vld [vmem:[#allocation8 + $0x4c8] sm:$0xff] }
 0x183   :  { %2886 = vmatprep.subr.bf16.mxu0 %v11081_v45  ;;  %2972 = vmatprep.subr.bf16.mxu1 %v11083_v46  ;;  %v509_v42 = vld [vmem:[#allocation8 + $0x4e8] sm:$0xff]  ;;  %v11136_v45 = vcombine.low %v496_v30, %v500_v31  ;;  %v11138_v46 = vcombine.low %v497_v35, %v501_v36 }
 0x184   :  { %v11147_v53 = vcombine.high %v505_v41, %v509_v42  ;;  %v553_v30 = vld [vmem:[#allocation8 + $0x648] sm:$0xff] }
 0x185   :  { %v557_v31 = vld [vmem:[#allocation8 + $0x668] sm:$0xff] }
 0x186   :  { %2887 = vmatpush1.bf16.msra.mxu0 %v11080_v49  ;;  %2973 = vmatpush1.bf16.msra.mxu1 %v11082_v51  ;;  %v513_v49 = vld [vmem:[#allocation8 + $0x508] sm:$0xff]  ;;  %v11195_v36 = vcombine.high %v553_v30, %v557_v31 }
 0x187   :  { %2888 = vmatprep.subr.bf16.mxu0 %v11089_v54  ;;  %2974 = vmatprep.subr.bf16.mxu1 %v11091_v55  ;;  %v517_v51 = vld [vmem:[#allocation8 + $0x528] sm:$0xff]  ;;  %v11144_v54 = vcombine.low %v504_v39, %v508_v40  ;;  %v11146_v55 = vcombine.low %v505_v41, %v509_v42  ;;  %v11194_v42 = vcombine.low %v553_v30, %v557_v31  ;;  %v362_v30 = vld [vmem:[#allocation8 + $0x50] sm:$0xff] }
 0x188   :  { %v11155_v61 = vcombine.high %v513_v49, %v517_v51  ;;  %v561_v39 = vld [vmem:[#allocation8 + $0x688] sm:$0xff]  ;;  %v366_v31 = vld [vmem:[#allocation8 + $0x70] sm:$0xff] }
 0x189   :  { %v565_v40 = vld [vmem:[#allocation8 + $0x6a8] sm:$0xff] }
 0x18a   :  { %2889 = vmatpush1.bf16.msra.mxu0 %v11088_v58  ;;  %2975 = vmatpush1.bf16.msra.mxu1 %v11090_v59  ;;  %v521_v58 = vld [vmem:[#allocation8 + $0x548] sm:$0xff] }
 0x18b   :  { %2890 = vmatprep.subr.bf16.mxu0 %v11097_v62  ;;  %2976 = vmatprep.subr.bf16.mxu1 %v11099_v63  ;;  %v525_v59 = vld [vmem:[#allocation8 + $0x568] sm:$0xff]  ;;  %v11152_v62 = vcombine.low %v512_v47, %v516_v48  ;;  %v11154_v63 = vcombine.low %v513_v49, %v517_v51  ;;  %v11202_v51 = vcombine.low %v561_v39, %v565_v40 }
 0x18c   :  { %v11163_v6 = vcombine.high %v521_v58, %v525_v59  ;;  %v569_v47 = vld [vmem:[#allocation8 + $0x6c8] sm:$0xff] }
 0x18d   :  { %v573_v48 = vld [vmem:[#allocation8 + $0x6e8] sm:$0xff] }
 0x18e   :  { %2891 = vmatpush1.bf16.msra.mxu0 %v11096_v2  ;;  %2977 = vmatpush1.bf16.msra.mxu1 %v11098_v3  ;;  %v529_v2 = vld [vmem:[#allocation8 + $0x588] sm:$0xff] }
 0x18f   :  { %2892 = vmatprep.subr.bf16.mxu0 %v11105_v7  ;;  %2978 = vmatprep.subr.bf16.mxu1 %v11107_v8  ;;  %v533_v3 = vld [vmem:[#allocation8 + $0x5a8] sm:$0xff]  ;;  %v11160_v7 = vcombine.low %v520_v56, %v524_v57  ;;  %v11162_v8 = vcombine.low %v521_v58, %v525_v59  ;;  %v11210_v59 = vcombine.low %v569_v47, %v573_v48 }
 0x190   :  { %v11171_v10 = vcombine.high %v529_v2, %v533_v3  ;;  %v577_v56 = vld [vmem:[#allocation8 + $0x708] sm:$0xff] }
 0x191   :  { %v581_v57 = vld [vmem:[#allocation8 + $0x728] sm:$0xff] }
 0x192   :  { %2893 = vmatpush1.bf16.msra.mxu0 %v11104_v11  ;;  %2979 = vmatpush1.bf16.msra.mxu1 %v11106_v12  ;;  %v536_v11 = vld [vmem:[#allocation8 + $0x5c0] sm:$0xff] }
 0x193   :  { %2894 = vmatprep.subr.bf16.mxu0 %v11113_v15  ;;  %2980 = vmatprep.subr.bf16.mxu1 %v11115_v16  ;;  %v540_v12 = vld [vmem:[#allocation8 + $0x5e0] sm:$0xff]  ;;  %v11168_v15 = vcombine.low %v528_v0, %v532_v1  ;;  %v11170_v16 = vcombine.low %v529_v2, %v533_v3  ;;  %v585_v0 = vld [vmem:[#allocation8 + $0x748] sm:$0xff]  ;;  %v11218_v3 = vcombine.low %v577_v56, %v581_v57 }
 0x194   :  { %v589_v1 = vld [vmem:[#allocation8 + $0x768] sm:$0xff] }
 0x196   :  { %2895 = vmatpush1.bf16.msra.mxu0 %v11112_v20  ;;  %2981 = vmatpush1.bf16.msra.mxu1 %v11114_v21  ;;  %v545_v20 = vld [vmem:[#allocation8 + $0x608] sm:$0xff]  ;;  %v11177_v21 = vcombine.high %v536_v11, %v540_v12 }
 0x197   :  { %2907 = vmatprep.subr.bf16.mxu0 %v11121_v24  ;;  %2993 = vmatprep.subr.bf16.mxu1 %v11123_v25  ;;  %v11176_v24 = vcombine.low %v536_v11, %v540_v12  ;;  %v11178_v25 = vcombine.low %v537_v13, %v541_v14  ;;  %v11187_v27 = vcombine.high %v545_v20, %v549_v23  ;;  %v600_v13 = vld [vmem:[#allocation8 + $0x7c0] sm:$0xff] }
 0x198   :  { %v11226_v12 = vcombine.low %v585_v0, %v589_v1  ;;  %v604_v14 = vld [vmem:[#allocation8 + $0x7e0] sm:$0xff] }
 0x199   :  { %2897 = vmatmul.mubr.bf16.vlgmr.msra.gmra.mrb[4].mxu0 %v14057_v5  ;;  %2983 = vmatmul.mubr.bf16.vlgmr.msra.gmra.mrb[4].mxu1 %v14057_v5 }
 0x19a   :  { %2908 = vmatpush1.bf16.msra.mxu0 %v11120_v28  ;;  %2994 = vmatpush1.bf16.msra.mxu1 %v11122_v29  ;;  %v552_v28 = vld [vmem:[#allocation8 + $0x640] sm:$0xff] }
 0x19b   :  { %2909 = vmatprep.subr.bf16.mxu0 %v11129_v33  ;;  %2995 = vmatprep.subr.bf16.mxu1 %v11131_v34  ;;  %v556_v29 = vld [vmem:[#allocation8 + $0x660] sm:$0xff]  ;;  %v11184_v33 = vcombine.low %v544_v17, %v548_v18  ;;  %v11186_v34 = vcombine.low %v545_v20, %v549_v23  ;;  %v601_v17 = vld [vmem:[#allocation8 + $0x7c8] sm:$0xff]  ;;  %v358_v23 = vld [vmem:[#allocation8 + $0x30] sm:$0xff] }
 0x19c   :  { %2939 = vmatprep.mubr.bf16.mxu0 %v14067_v32  ;;  %3025 = vmatprep.mubr.bf16.mxu1 %v14067_v32  ;;  %v11193_v35 = vcombine.high %v552_v28, %v556_v29  ;;  %v11192_v41 = vcombine.low %v552_v28, %v556_v29  ;;  %v605_v18 = vld [vmem:[#allocation8 + $0x7e8] sm:$0xff]  ;;  %v11240_v28 = vcombine.low %v600_v13, %v604_v14 }
 0x19d   :  { %v11242_v29 = vcombine.low %v601_v17, %v605_v18 }
 0x19e   :  { %2910 = vmatpush1.bf16.msra.mxu0 %v11128_v37  ;;  %2996 = vmatpush1.bf16.msra.mxu1 %v11130_v38  ;;  %v560_v37 = vld [vmem:[#allocation8 + $0x680] sm:$0xff] }
 0x19f   :  { %2911 = vmatprep.subr.bf16.mxu0 %v11137_v43  ;;  %2997 = vmatprep.subr.bf16.mxu1 %v11139_v44  ;;  %v564_v38 = vld [vmem:[#allocation8 + $0x6a0] sm:$0xff] }
 0x1a0   :  { %v568_v43 = vld [vmem:[#allocation8 + $0x6c0] sm:$0xff]  ;;  %v11200_v49 = vcombine.low %v560_v37, %v564_v38 }
 0x1a1   :  { %v572_v44 = vld [vmem:[#allocation8 + $0x6e0] sm:$0xff] }
 0x1a2   :  { %2912 = vmatpush1.bf16.msra.mxu0 %v11136_v45  ;;  %2998 = vmatpush1.bf16.msra.mxu1 %v11138_v46  ;;  %v11201_v45 = vcombine.high %v560_v37, %v564_v38  ;;  %v11203_v46 = vcombine.high %v561_v39, %v565_v40  ;;  %v11208_v58 = vcombine.low %v568_v43, %v572_v44  ;;  %v370_v39 = vld [vmem:[#allocation8 + $0x90] sm:$0xff] }
 0x1a3   :  { %2913 = vmatprep.subr.bf16.mxu0 %v11145_v52  ;;  %2999 = vmatprep.subr.bf16.mxu1 %v11147_v53  ;;  %v576_v52 = vld [vmem:[#allocation8 + $0x700] sm:$0xff]  ;;  %v374_v40 = vld [vmem:[#allocation8 + $0xb0] sm:$0xff] }
 0x1a4   :  { %v580_v53 = vld [vmem:[#allocation8 + $0x720] sm:$0xff] }
 0x1a5   :  { %v11216_v2 = vcombine.low %v576_v52, %v580_v53 }
 0x1a6   :  { %2914 = vmatpush1.bf16.msra.mxu0 %v11144_v54  ;;  %3000 = vmatpush1.bf16.msra.mxu1 %v11146_v55  ;;  %v11209_v54 = vcombine.high %v568_v43, %v572_v44  ;;  %v11211_v55 = vcombine.high %v569_v47, %v573_v48  ;;  %v11005_v43 = vcombine.high %v362_v30, %v366_v31  ;;  %v378_v47 = vld [vmem:[#allocation8 + $0xd0] sm:$0xff] }
 0x1a7   :  { %2915 = vmatprep.subr.bf16.mxu0 %v11153_v60  ;;  %3001 = vmatprep.subr.bf16.mxu1 %v11155_v61  ;;  %v584_v60 = vld [vmem:[#allocation8 + $0x740] sm:$0xff]  ;;  %v382_v48 = vld [vmem:[#allocation8 + $0xf0] sm:$0xff] }
 0x1a8   :  { %v588_v61 = vld [vmem:[#allocation8 + $0x760] sm:$0xff] }
 0x1a9   :  { %v11224_v11 = vcombine.low %v584_v60, %v588_v61 }
 0x1aa   :  { %2916 = vmatpush1.bf16.msra.mxu0 %v11152_v62  ;;  %3002 = vmatpush1.bf16.msra.mxu1 %v11154_v63  ;;  %v11217_v62 = vcombine.high %v576_v52, %v580_v53  ;;  %v11219_v63 = vcombine.high %v577_v56, %v581_v57  ;;  %v11013_v52 = vcombine.high %v370_v39, %v374_v40  ;;  %v386_v56 = vld [vmem:[#allocation8 + $0x110] sm:$0xff] }
 0x1ab   :  { %2917 = vmatprep.subr.bf16.mxu0 %v11161_v4  ;;  %3003 = vmatprep.subr.bf16.mxu1 %v11163_v6  ;;  %v592_v4 = vld [vmem:[#allocation8 + $0x780] sm:$0xff]  ;;  %v390_v57 = vld [vmem:[#allocation8 + $0x130] sm:$0xff] }
 0x1ac   :  { %v596_v6 = vld [vmem:[#allocation8 + $0x7a0] sm:$0xff] }
 0x1ad   :  { %v11232_v20 = vcombine.low %v592_v4, %v596_v6 }
 0x1ae   :  { %2918 = vmatpush1.bf16.msra.mxu0 %v11160_v7  ;;  %3004 = vmatpush1.bf16.msra.mxu1 %v11162_v8  ;;  %v11225_v7 = vcombine.high %v584_v60, %v588_v61  ;;  %v11227_v8 = vcombine.high %v585_v0, %v589_v1  ;;  %v11021_v60 = vcombine.high %v378_v47, %v382_v48  ;;  %v394_v0 = vld [vmem:[#allocation8 + $0x150] sm:$0xff] }
 0x1af   :  { %2919 = vmatprep.subr.bf16.mxu0 %v11169_v9  ;;  %3005 = vmatprep.subr.bf16.mxu1 %v11171_v10  ;;  %v593_v9 = vld [vmem:[#allocation8 + $0x788] sm:$0xff]  ;;  %v398_v1 = vld [vmem:[#allocation8 + $0x170] sm:$0xff] }
 0x1b0   :  { %v597_v10 = vld [vmem:[#allocation8 + $0x7a8] sm:$0xff] }
 0x1b2   :  { %2920 = vmatpush1.bf16.msra.mxu0 %v11168_v15  ;;  %3006 = vmatpush1.bf16.msra.mxu1 %v11170_v16  ;;  %v11233_v15 = vcombine.high %v592_v4, %v596_v6  ;;  %v11235_v16 = vcombine.high %v593_v9, %v597_v10  ;;  %v11028_v6 = vcombine.low %v386_v56, %v390_v57 }
 0x1b3   :  { %2921 = vmatprep.subr.bf16.mxu0 %v11177_v21  ;;  %3007 = vmatprep.subr.bf16.mxu1 %v11179_v22  ;;  %v11234_v21 = vcombine.low %v593_v9, %v597_v10  ;;  %v354_v22 = vld [vmem:[#allocation8 + $0x10] sm:$0xff]  ;;  %v403_v10 = vld [vmem:[#allocation8 + $0x198] sm:$0xff] }
 0x1b4   :  { %v10996_v37 = vcombine.low %v354_v22, %v358_v23  ;;  %v406_v9 = vld [vmem:[#allocation8 + $0x1b0] sm:$0xff] }
 0x1b6   :  { %2922 = vmatpush1.bf16.msra.mxu0 %v11176_v24  ;;  %3008 = vmatpush1.bf16.msra.mxu1 %v11178_v25  ;;  %v11241_v24 = vcombine.high %v600_v13, %v604_v14  ;;  %v11243_v25 = vcombine.high %v601_v17, %v605_v18  ;;  %v11036_v14 = vcombine.low %v394_v0, %v398_v1  ;;  %v414_v17 = vld [vmem:[#allocation8 + $0x1f0] sm:$0xff]  ;;  %v411_v18 = vld [vmem:[#allocation8 + $0x1d8] sm:$0xff] }
 0x1b7   :  { %2923 = vmatprep.subr.bf16.mxu0 %v11185_v26  ;;  %3009 = vmatprep.subr.bf16.mxu1 %v11187_v27  ;;  %v355_v26 = vld [vmem:[#allocation8 + $0x18] sm:$0xff] }
 0x1b8   :  { %v359_v27 = vld [vmem:[#allocation8 + $0x38] sm:$0xff] }
 0x1b9   :  { %v10998_v38 = vcombine.low %v355_v26, %v359_v27 }
 0x1ba   :  { %2924 = vmatpush1.bf16.msra.mxu0 %v11184_v33  ;;  %3010 = vmatpush1.bf16.msra.mxu1 %v11186_v34  ;;  %v10997_v33 = vcombine.high %v354_v22, %v358_v23  ;;  %v10999_v34 = vcombine.high %v355_v26, %v359_v27  ;;  %v422_v26 = vld [vmem:[#allocation8 + $0x230] sm:$0xff]  ;;  %v419_v27 = vld [vmem:[#allocation8 + $0x218] sm:$0xff] }
 0x1bb   :  { %2925 = vmatprep.subr.bf16.mxu0 %v11193_v35  ;;  %3011 = vmatprep.subr.bf16.mxu1 %v11195_v36  ;;  %v363_v35 = vld [vmem:[#allocation8 + $0x58] sm:$0xff] }
 0x1bc   :  { %v367_v36 = vld [vmem:[#allocation8 + $0x78] sm:$0xff] }
 0x1bd   :  { %v11007_v44 = vcombine.high %v363_v35, %v367_v36 }
 0x1be   :  { %2926 = vmatpush1.bf16.msra.mxu0 %v11192_v41  ;;  %3012 = vmatpush1.bf16.msra.mxu1 %v11194_v42  ;;  %v371_v41 = vld [vmem:[#allocation8 + $0x98] sm:$0xff] }
 0x1bf   :  { %2927 = vmatprep.subr.bf16.mxu0 %v11201_v45  ;;  %3013 = vmatprep.subr.bf16.mxu1 %v11203_v46  ;;  %v375_v42 = vld [vmem:[#allocation8 + $0xb8] sm:$0xff]  ;;  %v11004_v45 = vcombine.low %v362_v30, %v366_v31  ;;  %v11006_v46 = vcombine.low %v363_v35, %v367_v36  ;;  %v430_v35 = vld [vmem:[#allocation8 + $0x270] sm:$0xff] }
 0x1c0   :  { %v11015_v53 = vcombine.high %v371_v41, %v375_v42  ;;  %v427_v36 = vld [vmem:[#allocation8 + $0x258] sm:$0xff] }
 0x1c2   :  { %2928 = vmatpush1.bf16.msra.mxu0 %v11200_v49  ;;  %3014 = vmatpush1.bf16.msra.mxu1 %v11202_v51  ;;  %v379_v49 = vld [vmem:[#allocation8 + $0xd8] sm:$0xff] }
 0x1c3   :  { %2929 = vmatprep.subr.bf16.mxu0 %v11209_v54  ;;  %3015 = vmatprep.subr.bf16.mxu1 %v11211_v55  ;;  %v383_v51 = vld [vmem:[#allocation8 + $0xf8] sm:$0xff]  ;;  %v11012_v54 = vcombine.low %v370_v39, %v374_v40  ;;  %v11014_v55 = vcombine.low %v371_v41, %v375_v42  ;;  %v434_v42 = vld [vmem:[#allocation8 + $0x290] sm:$0xff] }
 0x1c4   :  { %v11023_v61 = vcombine.high %v379_v49, %v383_v51 }
 0x1c6   :  { %2930 = vmatpush1.bf16.msra.mxu0 %v11208_v58  ;;  %3016 = vmatpush1.bf16.msra.mxu1 %v11210_v59  ;;  %v387_v58 = vld [vmem:[#allocation8 + $0x118] sm:$0xff] }
 0x1c7   :  { %2931 = vmatprep.subr.bf16.mxu0 %v11217_v62  ;;  %3017 = vmatprep.subr.bf16.mxu1 %v11219_v63  ;;  %v391_v59 = vld [vmem:[#allocation8 + $0x138] sm:$0xff]  ;;  %v11020_v62 = vcombine.low %v378_v47, %v382_v48  ;;  %v11022_v63 = vcombine.low %v379_v49, %v383_v51  ;;  %v442_v51 = vld [vmem:[#allocation8 + $0x2d0] sm:$0xff] }
 0x1c8   :  { %v11031_v4 = vcombine.high %v387_v58, %v391_v59 }
 0x1ca   :  { %2932 = vmatpush1.bf16.msra.mxu0 %v11216_v2  ;;  %3018 = vmatpush1.bf16.msra.mxu1 %v11218_v3  ;;  %v395_v2 = vld [vmem:[#allocation8 + $0x158] sm:$0xff]  ;;  %v11029_v3 = vcombine.high %v386_v56, %v390_v57 }
 0x1cb   :  { %2933 = vmatprep.subr.bf16.mxu0 %v11225_v7  ;;  %3019 = vmatprep.subr.bf16.mxu1 %v11227_v8  ;;  %v11030_v7 = vcombine.low %v387_v58, %v391_v59  ;;  %v402_v8 = vld [vmem:[#allocation8 + $0x190] sm:$0xff] }
 0x1cc   :  { %v11044_v23 = vcombine.low %v402_v8, %v406_v9  ;;  %v450_v59 = vld [vmem:[#allocation8 + $0x310] sm:$0xff] }
 0x1ce   :  { %2934 = vmatpush1.bf16.msra.mxu0 %v11224_v11  ;;  %3020 = vmatpush1.bf16.msra.mxu1 %v11226_v12  ;;  %v407_v11 = vld [vmem:[#allocation8 + $0x1b8] sm:$0xff]  ;;  %v11037_v12 = vcombine.high %v394_v0, %v398_v1 }
 0x1cf   :  { %2935 = vmatprep.subr.bf16.mxu0 %v11233_v15  ;;  %3021 = vmatprep.subr.bf16.mxu1 %v11235_v16  ;;  %v410_v16 = vld [vmem:[#allocation8 + $0x1d0] sm:$0xff]  ;;  %v11047_v22 = vcombine.high %v403_v10, %v407_v11 }
 0x1d0   :  { %v11052_v31 = vcombine.low %v410_v16, %v414_v17 }
 0x1d2   :  { %2936 = vmatpush1.bf16.msra.mxu0 %v11232_v20  ;;  %3022 = vmatpush1.bf16.msra.mxu1 %v11234_v21  ;;  %v415_v20 = vld [vmem:[#allocation8 + $0x1f8] sm:$0xff]  ;;  %v11045_v21 = vcombine.high %v402_v8, %v406_v9 }
 0x1d3   :  { %2937 = vmatprep.subr.bf16.mxu0 %v11241_v24  ;;  %3023 = vmatprep.subr.bf16.mxu1 %v11243_v25  ;;  %v11046_v24 = vcombine.low %v403_v10, %v407_v11  ;;  %v418_v25 = vld [vmem:[#allocation8 + $0x210] sm:$0xff]  ;;  %v11055_v30 = vcombine.high %v411_v18, %v415_v20 }
 0x1d4   :  { %v11060_v40 = vcombine.low %v418_v25, %v422_v26  ;;  %v466_v11 = vld [vmem:[#allocation8 + $0x390] sm:$0xff] }
 0x1d6   :  { %2938 = vmatpush1.bf16.msra.mxu0 %v11240_v28  ;;  %3024 = vmatpush1.bf16.msra.mxu1 %v11242_v29  ;;  %v423_v28 = vld [vmem:[#allocation8 + $0x238] sm:$0xff]  ;;  %v11053_v29 = vcombine.high %v410_v16, %v414_v17 }
 0x1d7   :  { %3036 = vmatprep.subr.bf16.mxu0 %v10997_v33  ;;  %3122 = vmatprep.subr.bf16.mxu1 %v10999_v34  ;;  %v11054_v33 = vcombine.low %v411_v18, %v415_v20  ;;  %v426_v34 = vld [vmem:[#allocation8 + $0x250] sm:$0xff]  ;;  %v11063_v39 = vcombine.high %v419_v27, %v423_v28  ;;  %v11062_v41 = vcombine.low %v419_v27, %v423_v28 }
 0x1d8   :  { %v11068_v48 = vcombine.low %v426_v34, %v430_v35  ;;  %v474_v20 = vld [vmem:[#allocation8 + $0x3d0] sm:$0xff] }
 0x1d9   :  { %2940 = vmatmul.mubr.bf16.vlgmr.msra.gmra.mrb[4].mxu0 %v14073_v19  ;;  %3026 = vmatmul.mubr.bf16.vlgmr.msra.gmra.mrb[4].mxu1 %v14073_v19  ;;  %v482_v28 = vld [vmem:[#allocation8 + $0x410] sm:$0xff] }
 0x1da   :  { %3037 = vmatpush1.bf16.msra.mxu0 %v10996_v37  ;;  %3123 = vmatpush1.bf16.msra.mxu1 %v10998_v38  ;;  %v431_v37 = vld [vmem:[#allocation8 + $0x278] sm:$0xff]  ;;  %v11061_v38 = vcombine.high %v418_v25, %v422_v26 }
 0x1db   :  { %3038 = vmatprep.subr.bf16.mxu0 %v11005_v43  ;;  %3124 = vmatprep.subr.bf16.mxu1 %v11007_v44  ;;  %v438_v43 = vld [vmem:[#allocation8 + $0x2b0] sm:$0xff]  ;;  %v435_v44 = vld [vmem:[#allocation8 + $0x298] sm:$0xff]  ;;  %v11071_v47 = vcombine.high %v427_v36, %v431_v37  ;;  %v11070_v49 = vcombine.low %v427_v36, %v431_v37 }
 0x1dc   :  { %3068 = vmatprep.mubr.bf16.mxu0 %v14053_v50  ;;  %3154 = vmatprep.mubr.bf16.mxu1 %v14053_v50  ;;  %v399_v50 = vld [vmem:[#allocation8 + $0x178] sm:$0xff]  ;;  %v11076_v57 = vcombine.low %v434_v42, %v438_v43  ;;  %v490_v37 = vld [vmem:[#allocation8 + $0x450] sm:$0xff] }
 0x1dd   :  { %v11039_v13 = vcombine.high %v395_v2, %v399_v50  ;;  %v11038_v15 = vcombine.low %v395_v2, %v399_v50  ;;  %v458_v50 = vld [vmem:[#allocation8 + $0x350] sm:$0xff] }
 0x1de   :  { %3039 = vmatpush1.bf16.msra.mxu0 %v11004_v45  ;;  %3125 = vmatpush1.bf16.msra.mxu1 %v11006_v46  ;;  %v439_v45 = vld [vmem:[#allocation8 + $0x2b8] sm:$0xff]  ;;  %v11069_v46 = vcombine.high %v426_v34, %v430_v35 }
 0x1df   :  { %3040 = vmatprep.subr.bf16.mxu0 %v11013_v52  ;;  %3126 = vmatprep.subr.bf16.mxu1 %v11015_v53  ;;  %v446_v52 = vld [vmem:[#allocation8 + $0x2f0] sm:$0xff]  ;;  %v443_v53 = vld [vmem:[#allocation8 + $0x2d8] sm:$0xff]  ;;  %v11079_v56 = vcombine.high %v435_v44, %v439_v45  ;;  %v11078_v58 = vcombine.low %v435_v44, %v439_v45 }
 0x1e0   :  { %v11084_v1 = vcombine.low %v442_v51, %v446_v52  ;;  %v498_v45 = vld [vmem:[#allocation8 + $0x490] sm:$0xff] }
 0x1e2   :  { %3041 = vmatpush1.bf16.msra.mxu0 %v11012_v54  ;;  %3127 = vmatpush1.bf16.msra.mxu1 %v11014_v55  ;;  %v447_v54 = vld [vmem:[#allocation8 + $0x2f8] sm:$0xff]  ;;  %v11077_v55 = vcombine.high %v434_v42, %v438_v43 }
 0x1e3   :  { %3042 = vmatprep.subr.bf16.mxu0 %v11021_v60  ;;  %3128 = vmatprep.subr.bf16.mxu1 %v11023_v61  ;;  %v454_v60 = vld [vmem:[#allocation8 + $0x330] sm:$0xff]  ;;  %v451_v61 = vld [vmem:[#allocation8 + $0x318] sm:$0xff]  ;;  %v11087_v0 = vcombine.high %v443_v53, %v447_v54  ;;  %v11086_v2 = vcombine.low %v443_v53, %v447_v54 }
 0x1e4   :  { %v11092_v9 = vcombine.low %v450_v59, %v454_v60  ;;  %v506_v54 = vld [vmem:[#allocation8 + $0x4d0] sm:$0xff] }
 0x1e6   :  { %3043 = vmatpush1.bf16.msra.mxu0 %v11020_v62  ;;  %3129 = vmatpush1.bf16.msra.mxu1 %v11022_v63  ;;  %v455_v62 = vld [vmem:[#allocation8 + $0x338] sm:$0xff]  ;;  %v11085_v63 = vcombine.high %v442_v51, %v446_v52 }
 0x1e7   :  { %3044 = vmatprep.subr.bf16.mxu0 %v11029_v3  ;;  %3130 = vmatprep.subr.bf16.mxu1 %v11031_v4  ;;  %v462_v3 = vld [vmem:[#allocation8 + $0x370] sm:$0xff]  ;;  %v459_v4 = vld [vmem:[#allocation8 + $0x358] sm:$0xff]  ;;  %v11095_v8 = vcombine.high %v451_v61, %v455_v62  ;;  %v11094_v10 = vcombine.low %v451_v61, %v455_v62 }
 0x1e8   :  { %v11100_v17 = vcombine.low %v458_v50, %v462_v3  ;;  %v514_v61 = vld [vmem:[#allocation8 + $0x510] sm:$0xff] }
 0x1e9   :  { %v518_v62 = vld [vmem:[#allocation8 + $0x530] sm:$0xff] }
 0x1ea   :  { %3045 = vmatpush1.bf16.msra.mxu0 %v11028_v6  ;;  %3131 = vmatpush1.bf16.msra.mxu1 %v11030_v7  ;;  %v463_v6 = vld [vmem:[#allocation8 + $0x378] sm:$0xff]  ;;  %v11093_v7 = vcombine.high %v450_v59, %v454_v60 }
 0x1eb   :  { %3046 = vmatprep.subr.bf16.mxu0 %v11037_v12  ;;  %3132 = vmatprep.subr.bf16.mxu1 %v11039_v13  ;;  %v470_v12 = vld [vmem:[#allocation8 + $0x3b0] sm:$0xff]  ;;  %v467_v13 = vld [vmem:[#allocation8 + $0x398] sm:$0xff]  ;;  %v11103_v16 = vcombine.high %v459_v4, %v463_v6  ;;  %v11102_v18 = vcombine.low %v459_v4, %v463_v6 }
 0x1ec   :  { %v11108_v26 = vcombine.low %v466_v11, %v470_v12  ;;  %v522_v4 = vld [vmem:[#allocation8 + $0x550] sm:$0xff] }
 0x1ed   :  { %v526_v6 = vld [vmem:[#allocation8 + $0x570] sm:$0xff] }
 0x1ee   :  { %3047 = vmatpush1.bf16.msra.mxu0 %v11036_v14  ;;  %3133 = vmatpush1.bf16.msra.mxu1 %v11038_v15  ;;  %v471_v14 = vld [vmem:[#allocation8 + $0x3b8] sm:$0xff]  ;;  %v11101_v15 = vcombine.high %v458_v50, %v462_v3 }
 0x1ef   :  { %3048 = vmatprep.subr.bf16.mxu0 %v11045_v21  ;;  %3134 = vmatprep.subr.bf16.mxu1 %v11047_v22  ;;  %v478_v21 = vld [vmem:[#allocation8 + $0x3f0] sm:$0xff]  ;;  %v475_v22 = vld [vmem:[#allocation8 + $0x3d8] sm:$0xff]  ;;  %v11111_v25 = vcombine.high %v467_v13, %v471_v14  ;;  %v11110_v27 = vcombine.low %v467_v13, %v471_v14 }
 0x1f0   :  { %v11116_v35 = vcombine.low %v474_v20, %v478_v21  ;;  %v530_v14 = vld [vmem:[#allocation8 + $0x590] sm:$0xff] }
 0x1f2   :  { %3049 = vmatpush1.bf16.msra.mxu0 %v11044_v23  ;;  %3135 = vmatpush1.bf16.msra.mxu1 %v11046_v24  ;;  %v479_v23 = vld [vmem:[#allocation8 + $0x3f8] sm:$0xff]  ;;  %v11109_v24 = vcombine.high %v466_v11, %v470_v12  ;;  %v11165_v12 = vcombine.high %v522_v4, %v526_v6 }
 0x1f3   :  { %3050 = vmatprep.subr.bf16.mxu0 %v11053_v29  ;;  %3136 = vmatprep.subr.bf16.mxu1 %v11055_v30  ;;  %v486_v29 = vld [vmem:[#allocation8 + $0x430] sm:$0xff]  ;;  %v483_v30 = vld [vmem:[#allocation8 + $0x418] sm:$0xff]  ;;  %v11119_v34 = vcombine.high %v475_v22, %v479_v23  ;;  %v11118_v36 = vcombine.low %v475_v22, %v479_v23 }
 0x1f4   :  { %v11124_v43 = vcombine.low %v482_v28, %v486_v29  ;;  %v538_v22 = vld [vmem:[#allocation8 + $0x5d0] sm:$0xff] }
 0x1f6   :  { %3051 = vmatpush1.bf16.msra.mxu0 %v11052_v31  ;;  %3137 = vmatpush1.bf16.msra.mxu1 %v11054_v33  ;;  %v487_v31 = vld [vmem:[#allocation8 + $0x438] sm:$0xff]  ;;  %v11117_v33 = vcombine.high %v474_v20, %v478_v21 }
 0x1f7   :  { %3052 = vmatprep.subr.bf16.mxu0 %v11061_v38  ;;  %3138 = vmatprep.subr.bf16.mxu1 %v11063_v39  ;;  %v494_v38 = vld [vmem:[#allocation8 + $0x470] sm:$0xff]  ;;  %v491_v39 = vld [vmem:[#allocation8 + $0x458] sm:$0xff]  ;;  %v11127_v42 = vcombine.high %v483_v30, %v487_v31  ;;  %v11126_v44 = vcombine.low %v483_v30, %v487_v31 }
 0x1f8   :  { %v11132_v52 = vcombine.low %v490_v37, %v494_v38 }
 0x1fa   :  { %3053 = vmatpush1.bf16.msra.mxu0 %v11060_v40  ;;  %3139 = vmatpush1.bf16.msra.mxu1 %v11062_v41  ;;  %v495_v40 = vld [vmem:[#allocation8 + $0x478] sm:$0xff]  ;;  %v11125_v41 = vcombine.high %v482_v28, %v486_v29 }
 0x1fb   :  { %3054 = vmatprep.subr.bf16.mxu0 %v11069_v46  ;;  %3140 = vmatprep.subr.bf16.mxu1 %v11071_v47  ;;  %v502_v46 = vld [vmem:[#allocation8 + $0x4b0] sm:$0xff]  ;;  %v499_v47 = vld [vmem:[#allocation8 + $0x498] sm:$0xff]  ;;  %v11135_v51 = vcombine.high %v491_v39, %v495_v40  ;;  %v11134_v53 = vcombine.low %v491_v39, %v495_v40 }
 0x1fc   :  { %v11140_v60 = vcombine.low %v498_v45, %v502_v46  ;;  %v543_v28 = vld [vmem:[#allocation8 + $0x5f8] sm:$0xff]  ;;  %v546_v39 = vld [vmem:[#allocation8 + $0x610] sm:$0xff] }
 0x1fe   :  { %3055 = vmatpush1.bf16.msra.mxu0 %v11068_v48  ;;  %3141 = vmatpush1.bf16.msra.mxu1 %v11070_v49  ;;  %v503_v48 = vld [vmem:[#allocation8 + $0x4b8] sm:$0xff]  ;;  %v11133_v49 = vcombine.high %v490_v37, %v494_v38 }
 0x1ff   :  { %3056 = vmatprep.subr.bf16.mxu0 %v11077_v55  ;;  %3142 = vmatprep.subr.bf16.mxu1 %v11079_v56  ;;  %v510_v55 = vld [vmem:[#allocation8 + $0x4f0] sm:$0xff]  ;;  %v507_v56 = vld [vmem:[#allocation8 + $0x4d8] sm:$0xff]  ;;  %v11143_v59 = vcombine.high %v499_v47, %v503_v48 }
 0x200   :  { %v11148_v50 = vcombine.low %v506_v54, %v510_v55 }
 0x202   :  { %3057 = vmatpush1.bf16.msra.mxu0 %v11076_v57  ;;  %3143 = vmatpush1.bf16.msra.mxu1 %v11078_v58  ;;  %v511_v57 = vld [vmem:[#allocation8 + $0x4f8] sm:$0xff]  ;;  %v11141_v58 = vcombine.high %v498_v45, %v502_v46 }
 0x203   :  { %3058 = vmatprep.subr.bf16.mxu0 %v11085_v63  ;;  %3144 = vmatprep.subr.bf16.mxu1 %v11087_v0  ;;  %v515_v63 = vld [vmem:[#allocation8 + $0x518] sm:$0xff]  ;;  %v11150_v3 = vcombine.low %v507_v56, %v511_v57 }
 0x204   :  { %v519_v0 = vld [vmem:[#allocation8 + $0x538] sm:$0xff] }
 0x205   :  { %v11158_v11 = vcombine.low %v515_v63, %v519_v0 }
 0x206   :  { %3059 = vmatpush1.bf16.msra.mxu0 %v11084_v1  ;;  %3145 = vmatpush1.bf16.msra.mxu1 %v11086_v2  ;;  %v11149_v1 = vcombine.high %v506_v54, %v510_v55  ;;  %v11151_v2 = vcombine.high %v507_v56, %v511_v57  ;;  %v562_v56 = vld [vmem:[#allocation8 + $0x690] sm:$0xff] }
 0x207   :  { %3060 = vmatprep.subr.bf16.mxu0 %v11093_v7  ;;  %3146 = vmatprep.subr.bf16.mxu1 %v11095_v8  ;;  %v523_v7 = vld [vmem:[#allocation8 + $0x558] sm:$0xff]  ;;  %v11157_v8 = vcombine.high %v514_v61, %v518_v62 }
 0x20a   :  { %3061 = vmatpush1.bf16.msra.mxu0 %v11092_v9  ;;  %3147 = vmatpush1.bf16.msra.mxu1 %v11094_v10  ;;  %v11159_v9 = vcombine.high %v515_v63, %v519_v0  ;;  %v11156_v10 = vcombine.low %v514_v61, %v518_v62  ;;  %v570_v63 = vld [vmem:[#allocation8 + $0x6d0] sm:$0xff] }
 0x20b   :  { %3062 = vmatprep.subr.bf16.mxu0 %v11101_v15  ;;  %3148 = vmatprep.subr.bf16.mxu1 %v11103_v16  ;;  %v534_v15 = vld [vmem:[#allocation8 + $0x5b0] sm:$0xff]  ;;  %v531_v16 = vld [vmem:[#allocation8 + $0x598] sm:$0xff] }
 0x20c   :  { %v11173_v21 = vcombine.high %v530_v14, %v534_v15 }
 0x20e   :  { %3063 = vmatpush1.bf16.msra.mxu0 %v11100_v17  ;;  %3149 = vmatpush1.bf16.msra.mxu1 %v11102_v18  ;;  %v535_v17 = vld [vmem:[#allocation8 + $0x5b8] sm:$0xff]  ;;  %v11164_v18 = vcombine.low %v522_v4, %v526_v6 }
 0x20f   :  { %3064 = vmatprep.subr.bf16.mxu0 %v11109_v24  ;;  %3150 = vmatprep.subr.bf16.mxu1 %v11111_v25  ;;  %v542_v25 = vld [vmem:[#allocation8 + $0x5f0] sm:$0xff] }
 0x210   :  { %v11181_v38 = vcombine.high %v538_v22, %v542_v25 }
 0x212   :  { %3065 = vmatpush1.bf16.msra.mxu0 %v11108_v26  ;;  %3151 = vmatpush1.bf16.msra.mxu1 %v11110_v27  ;;  %v11175_v26 = vcombine.high %v531_v16, %v535_v17  ;;  %v539_v27 = vld [vmem:[#allocation8 + $0x5d8] sm:$0xff] }
 0x213   :  { %3066 = vmatprep.subr.bf16.mxu0 %v11117_v33  ;;  %3152 = vmatprep.subr.bf16.mxu1 %v11119_v34  ;;  %v11172_v34 = vcombine.low %v530_v14, %v534_v15  ;;  %v11183_v40 = vcombine.high %v539_v27, %v543_v28  ;;  %v11182_v45 = vcombine.low %v539_v27, %v543_v28  ;;  %v586_v14 = vld [vmem:[#allocation8 + $0x750] sm:$0xff]  ;;  %v595_v28 = vld [vmem:[#allocation8 + $0x798] sm:$0xff] }
 0x214   :  { %v598_v27 = vld [vmem:[#allocation8 + $0x7b0] sm:$0xff] }
 0x216   :  { %3067 = vmatpush1.bf16.msra.mxu0 %v11116_v35  ;;  %3153 = vmatpush1.bf16.msra.mxu1 %v11118_v36  ;;  %v11174_v35 = vcombine.low %v531_v16, %v535_v17  ;;  %v590_v16 = vld [vmem:[#allocation8 + $0x770] sm:$0xff]  ;;  %v587_v17 = vld [vmem:[#allocation8 + $0x758] sm:$0xff] }
 0x217   :  { %3079 = vmatprep.subr.bf16.mxu0 %v11125_v41  ;;  %3165 = vmatprep.subr.bf16.mxu1 %v11127_v42  ;;  %v550_v41 = vld [vmem:[#allocation8 + $0x630] sm:$0xff]  ;;  %v547_v42 = vld [vmem:[#allocation8 + $0x618] sm:$0xff] }
 0x218   :  { %v11189_v46 = vcombine.high %v546_v39, %v550_v41 }
 0x219   :  { %3069 = vmatmul.mubr.bf16.vlgmr.msra.gmra.mrb[8].mxu0 %v14057_v5  ;;  %3155 = vmatmul.mubr.bf16.vlgmr.msra.gmra.mrb[8].mxu1 %v14057_v5  ;;  %v11142_v5 = vcombine.low %v499_v47, %v503_v48  ;;  %v554_v47 = vld [vmem:[#allocation8 + $0x650] sm:$0xff] }
 0x21a   :  { %3080 = vmatpush1.bf16.msra.mxu0 %v11124_v43  ;;  %3166 = vmatpush1.bf16.msra.mxu1 %v11126_v44  ;;  %v551_v43 = vld [vmem:[#allocation8 + $0x638] sm:$0xff]  ;;  %v11180_v44 = vcombine.low %v538_v22, %v542_v25  ;;  %v11229_v22 = vcombine.high %v586_v14, %v590_v16  ;;  %v594_v25 = vld [vmem:[#allocation8 + $0x790] sm:$0xff] }
 0x21b   :  { %3081 = vmatprep.subr.bf16.mxu0 %v11133_v49  ;;  %3167 = vmatprep.subr.bf16.mxu1 %v11135_v51  ;;  %v11191_v48 = vcombine.high %v547_v42, %v551_v43  ;;  %v558_v49 = vld [vmem:[#allocation8 + $0x670] sm:$0xff]  ;;  %v555_v51 = vld [vmem:[#allocation8 + $0x658] sm:$0xff]  ;;  %v11190_v54 = vcombine.low %v547_v42, %v551_v43 }
 0x21c   :  { %3111 = vmatprep.mubr.bf16.mxu0 %v14067_v32  ;;  %3197 = vmatprep.mubr.bf16.mxu1 %v14067_v32  ;;  %v527_v32 = vld [vmem:[#allocation8 + $0x578] sm:$0xff]  ;;  %v11197_v55 = vcombine.high %v554_v47, %v558_v49  ;;  %v606_v42 = vld [vmem:[#allocation8 + $0x7f0] sm:$0xff] }
 0x21d   :  { %v11167_v13 = vcombine.high %v523_v7, %v527_v32  ;;  %v11166_v20 = vcombine.low %v523_v7, %v527_v32  ;;  %v578_v7 = vld [vmem:[#allocation8 + $0x710] sm:$0xff]  ;;  %v603_v43 = vld [vmem:[#allocation8 + $0x7d8] sm:$0xff] }
 0x21e   :  { %3082 = vmatpush1.bf16.msra.mxu0 %v11132_v52  ;;  %3168 = vmatpush1.bf16.msra.mxu1 %v11134_v53  ;;  %v559_v52 = vld [vmem:[#allocation8 + $0x678] sm:$0xff]  ;;  %v11188_v53 = vcombine.low %v546_v39, %v550_v41  ;;  %v11237_v39 = vcombine.high %v594_v25, %v598_v27 }
 0x21f   :  { %3083 = vmatprep.subr.bf16.mxu0 %v11141_v58  ;;  %3169 = vmatprep.subr.bf16.mxu1 %v11143_v59  ;;  %v11199_v57 = vcombine.high %v555_v51, %v559_v52  ;;  %v566_v58 = vld [vmem:[#allocation8 + $0x6b0] sm:$0xff]  ;;  %v563_v59 = vld [vmem:[#allocation8 + $0x698] sm:$0xff]  ;;  %v11198_v61 = vcombine.low %v555_v51, %v559_v52  ;;  %v13775_v52 = vmov 0.0  }
 0x220   :  { %v11205_v62 = vcombine.high %v562_v56, %v566_v58 }
 0x222   :  { %3084 = vmatpush1.bf16.msra.mxu0 %v11140_v60  ;;  %3170 = vmatpush1.bf16.msra.mxu1 %v11142_v5  ;;  %v567_v60 = vld [vmem:[#allocation8 + $0x6b8] sm:$0xff]  ;;  %v11196_v5 = vcombine.low %v554_v47, %v558_v49 }
 0x223   :  { %3085 = vmatprep.subr.bf16.mxu0 %v11149_v1  ;;  %3171 = vmatprep.subr.bf16.mxu1 %v11151_v2  ;;  %v11207_v0 = vcombine.high %v563_v59, %v567_v60  ;;  %v574_v1 = vld [vmem:[#allocation8 + $0x6f0] sm:$0xff]  ;;  %v571_v2 = vld [vmem:[#allocation8 + $0x6d8] sm:$0xff]  ;;  %v11206_v4 = vcombine.low %v563_v59, %v567_v60 }
 0x224   :  { %v11213_v6 = vcombine.high %v570_v63, %v574_v1 }
 0x226   :  { %3086 = vmatpush1.bf16.msra.mxu0 %v11148_v50  ;;  %3172 = vmatpush1.bf16.msra.mxu1 %v11150_v3  ;;  %v575_v50 = vld [vmem:[#allocation8 + $0x6f8] sm:$0xff]  ;;  %v11204_v3 = vcombine.low %v562_v56, %v566_v58  ;;  %v14120_v56 = vld [vmem:[#allocation19] sm:$0xff] }
 0x227   :  { %3087 = vmatprep.subr.bf16.mxu0 %v11157_v8  ;;  %3173 = vmatprep.subr.bf16.mxu1 %v11159_v9  ;;  %v11215_v32 = vcombine.high %v571_v2, %v575_v50  ;;  %v582_v8 = vld [vmem:[#allocation8 + $0x730] sm:$0xff]  ;;  %v579_v9 = vld [vmem:[#allocation8 + $0x718] sm:$0xff] }
 0x22a   :  { %3088 = vmatpush1.bf16.msra.mxu0 %v11156_v10  ;;  %3174 = vmatpush1.bf16.msra.mxu1 %v11158_v11  ;;  %v583_v10 = vld [vmem:[#allocation8 + $0x738] sm:$0xff]  ;;  %v11212_v11 = vcombine.low %v570_v63, %v574_v1  ;;  %v14129_v63 = vld [vmem:[#allocation19 + $0x8] sm:$0xff] }
 0x22b   :  { %3089 = vmatprep.subr.bf16.mxu0 %v11165_v12  ;;  %3175 = vmatprep.subr.bf16.mxu1 %v11167_v13  ;;  %v11214_v12 = vcombine.low %v571_v2, %v575_v50  ;;  %v11221_v13 = vcombine.high %v578_v7, %v582_v8  ;;  %v11223_v15 = vcombine.high %v579_v9, %v583_v10 }
 0x22c   :  { %v14091_v23 = vpop.f32.mrb[0].mxu0  ;;  %v14093_v24 = vpop.f32.mrb[0].mxu1 }
 0x22d   :  { %v14095_v29 = vpop.f32.mrb[1].mxu0  ;;  %v14097_v30 = vpop.f32.mrb[1].mxu1 }
 0x22e   :  { %v14099_v31 = vpop.f32.mrb[2].mxu0  ;;  %v14101_v33 = vpop.f32.mrb[2].mxu1  ;;  %3090 = vmatpush1.bf16.msra.mxu0 %v11164_v18  ;;  %3176 = vmatpush1.bf16.msra.mxu1 %v11166_v20  ;;  %v591_v18 = vld [vmem:[#allocation8 + $0x778] sm:$0xff]  ;;  %v11220_v20 = vcombine.low %v578_v7, %v582_v8 }
 0x22f   :  { %v14103_v36 = vpop.f32.mrb[3].mxu0  ;;  %v14105_v37 = vpop.f32.mrb[3].mxu1  ;;  %3091 = vmatprep.subr.bf16.mxu0 %v11173_v21  ;;  %3177 = vmatprep.subr.bf16.mxu1 %v11175_v26  ;;  %v11222_v21 = vcombine.low %v579_v9, %v583_v10  ;;  %v11231_v26 = vcombine.high %v587_v17, %v591_v18 }
 0x232   :  { %3092 = vmatpush1.bf16.msra.mxu0 %v11172_v34  ;;  %3178 = vmatpush1.bf16.msra.mxu1 %v11174_v35  ;;  %v599_v34 = vld [vmem:[#allocation8 + $0x7b8] sm:$0xff]  ;;  %v11228_v35 = vcombine.low %v586_v14, %v590_v16 }
 0x233   :  { %3093 = vmatprep.subr.bf16.mxu0 %v11181_v38  ;;  %3179 = vmatprep.subr.bf16.mxu1 %v11183_v40  ;;  %v11230_v38 = vcombine.low %v587_v17, %v591_v18  ;;  %v602_v40 = vld [vmem:[#allocation8 + $0x7d0] sm:$0xff]  ;;  %v11239_v41 = vcombine.high %v595_v28, %v599_v34 }
 0x234   :  { %v11245_v47 = vcombine.high %v602_v40, %v606_v42  ;;  %v11244_v49 = vcombine.low %v602_v40, %v606_v42 }
 0x236   :  { %3094 = vmatpush1.bf16.msra.mxu0 %v11180_v44  ;;  %3180 = vmatpush1.bf16.msra.mxu1 %v11182_v45  ;;  %v607_v44 = vld [vmem:[#allocation8 + $0x7f8] sm:$0xff]  ;;  %v11236_v45 = vcombine.low %v594_v25, %v598_v27 }
 0x237   :  { %3095 = vmatprep.subr.bf16.mxu0 %v11189_v46  ;;  %3181 = vmatprep.subr.bf16.mxu1 %v11191_v48  ;;  %v11238_v46 = vcombine.low %v595_v28, %v599_v34  ;;  %v11247_v48 = vcombine.high %v603_v43, %v607_v44  ;;  %v11246_v51 = vcombine.low %v603_v43, %v607_v44  ;;  %v207_v25 = vld [vmem:[#allocation19 + $0x18] sm:$0xff] }
 0x23a   :  { %3096 = vmatpush1.bf16.msra.mxu0 %v11188_v53  ;;  %3182 = vmatpush1.bf16.msra.mxu1 %v11190_v54  ;;  %v736_v53 = vlaneseq }
 0x23b   :  { %3097 = vmatprep.subr.bf16.mxu0 %v11197_v55  ;;  %3183 = vmatprep.subr.bf16.mxu1 %v11199_v57 }
 0x23c   :  { %v14115_v54 = vshrl.u32 %v736_v53, 7 }
 0x23e   :  { %3098 = vmatpush1.bf16.msra.mxu0 %v11196_v5  ;;  %3184 = vmatpush1.bf16.msra.mxu1 %v11198_v61  ;;  %v14118_v55 = vsub.s32 1, %v14115_v54 }
 0x23f   :  { %3099 = vmatprep.subr.bf16.mxu0 %v11205_v62  ;;  %3185 = vmatprep.subr.bf16.mxu1 %v11207_v0 }
 0x240   :  { %v3211_v57 = vrot.slane %v14120_v56, %v14118_v55  ;;  %v3215_v50 = vrot.slane %v14129_v63, %v14118_v55 }
 0x242   :  { %3100 = vmatpush1.bf16.msra.mxu0 %v11204_v3  ;;  %3186 = vmatpush1.bf16.msra.mxu1 %v11206_v4 }
 0x243   :  { %3101 = vmatprep.subr.bf16.mxu0 %v11213_v6  ;;  %3187 = vmatprep.subr.bf16.mxu1 %v11215_v32 }
 0x246   :  { %3102 = vmatpush1.bf16.msra.mxu0 %v11212_v11  ;;  %3188 = vmatpush1.bf16.msra.mxu1 %v11214_v12  ;;  %v206_v12 = vld [vmem:[#allocation19 + $0x10] sm:$0xff] }
 0x247   :  { %3103 = vmatprep.subr.bf16.mxu0 %v11221_v13  ;;  %3189 = vmatprep.subr.bf16.mxu1 %v11223_v15  ;;  %v3219_v14 = vrot.slane %v206_v12, %v14118_v55 }
 0x24a   :  { %3104 = vmatpush1.bf16.msra.mxu0 %v11220_v20  ;;  %3190 = vmatpush1.bf16.msra.mxu1 %v11222_v21 }
 0x24b   :  { %3105 = vmatprep.subr.bf16.mxu0 %v11229_v22  ;;  %3191 = vmatprep.subr.bf16.mxu1 %v11231_v26 }
 0x24e   :  { %3106 = vmatpush1.bf16.msra.mxu0 %v11228_v35  ;;  %3192 = vmatpush1.bf16.msra.mxu1 %v11230_v38 }
 0x24f   :  { %3107 = vmatprep.subr.bf16.mxu0 %v11237_v39  ;;  %3193 = vmatprep.subr.bf16.mxu1 %v11239_v41 }
 0x252   :  { %3108 = vmatpush1.bf16.msra.mxu0 %v11236_v45  ;;  %3194 = vmatpush1.bf16.msra.mxu1 %v11238_v46 }
 0x253   :  { %3109 = vmatprep.subr.bf16.mxu0 %v11245_v47  ;;  %3195 = vmatprep.subr.bf16.mxu1 %v11247_v48 }
 0x256   :  { %3110 = vmatpush1.bf16.msra.mxu0 %v11244_v49  ;;  %3196 = vmatpush1.bf16.msra.mxu1 %v11246_v51 }
 0x257   :  { %12173 = vmatprep.subr.bf16.mxu0 %v13775_v52  ;;  %12179 = vmatprep.subr.bf16.mxu1 %v13775_v52 }
 0x259   :  { %3112 = vmatmul.mubr.bf16.vlgmr.msra.gmra.mrb[8].mxu0 %v14073_v19  ;;  %3198 = vmatmul.mubr.bf16.vlgmr.msra.gmra.mrb[8].mxu1 %v14073_v19  ;;  %v14125_v19 = vsub.s32 0, %v14115_v54 }
 0x25a   :  { %12175 = vmatprep.mubr.msk.bf16.mxu0 %vm13776_vm0, %v13775_v52  ;;  %12181 = vmatprep.mubr.msk.bf16.mxu1 %vm13776_vm0, %v13775_v52 }
 0x25b   :  { %v739_v62 = vrot.slane %v14120_v56, %v14125_v19  ;;  %v743_v13 = vrot.slane %v14129_v63, %v14125_v19  ;;  %v747_v21 = vrot.slane %v206_v12, %v14125_v19  ;;  %v751_v40 = vrot.slane %v207_v25, %v14125_v19 }
 0x25d   :  { %v12365_v32 = vadd.f32 %v14091_v23, %v739_v62  ;;  %v12367_v9 = vadd.f32 %v14099_v31, %v739_v62  ;;  %v12366_v31 = vadd.f32 %v14095_v29, %v743_v13  ;;  %v12368_v18 = vadd.f32 %v14103_v36, %v743_v13 }
 0x25e   :  { %v3223_v29 = vrot.slane %v207_v25, %v14118_v55  ;;  %v12369_v34 = vadd.f32 %v14093_v24, %v747_v21  ;;  %v12371_v35 = vadd.f32 %v14101_v33, %v747_v21  ;;  %v12370_v43 = vadd.f32 %v14097_v30, %v751_v40 }
 0x25f   :  { %v12021_v11 = vpack.c.bf16 %v12365_v32, %v12365_v32  ;;  %v12022_v16 = vpack.c.bf16 %v12367_v9, %v12367_v9  ;;  %v12023_v22 = vpack.c.bf16 %v12366_v31, %v12366_v31  ;;  %v12024_v27 = vpack.c.bf16 %v12368_v18, %v12368_v18 }
 0x260   :  { %v12025_v39 = vpack.c.bf16 %v12369_v34, %v12369_v34  ;;  %v12026_v42 = vpack.c.bf16 %v12371_v35, %v12371_v35  ;;  %v12372_v33 = vadd.f32 %v14105_v37, %v751_v40  ;;  %v12027_v44 = vpack.c.bf16 %v12370_v43, %v12370_v43 }
 0x261   :  { %v14172_v30 = vsub.s32 2, %v14115_v54 }
 0x262   :  { %v12028_v45 = vpack.c.bf16 %v12372_v33, %v12372_v33 }
 0x263   :  { %v3235_v46 = vrot.slane %v14120_v56, %v14172_v30  ;;  %v3243_v37 = vrot.slane %v206_v12, %v14172_v30  ;;  %v3239_v47 = vrot.slane %v14129_v63, %v14172_v30  ;;  %v3247_v48 = vrot.slane %v207_v25, %v14172_v30 }
 0x2ac   :  { %v2941_v58 = vpop.f32.mrb[4].mxu0  ;;  %v3027_v59 = vpop.f32.mrb[4].mxu1 }
 0x2ad   :  { %v3224_v60 = vadd.f32 %v3211_v57, %v2941_v58  ;;  %v2943_v5 = vpop.f32.mrb[5].mxu0  ;;  %v3029_v61 = vpop.f32.mrb[5].mxu1  ;;  %v3226_v17 = vadd.f32 %v3219_v14, %v3027_v59 }
 0x2ae   :  { %v2945_v0 = vpop.f32.mrb[6].mxu0  ;;  %v3031_v1 = vpop.f32.mrb[6].mxu1  ;;  %v3225_v8 = vadd.f32 %v3215_v50, %v2943_v5  ;;  %v3227_v36 = vadd.f32 %v3223_v29, %v3029_v61 }
 0x2af   :  { %v12029_v2 = vpack.c.bf16 %v3224_v60, %v3224_v60  ;;  %v3228_v3 = vadd.f32 %v3211_v57, %v2945_v0  ;;  %v2947_v4 = vpop.f32.mrb[7].mxu0  ;;  %v3033_v6 = vpop.f32.mrb[7].mxu1  ;;  %v3230_v20 = vadd.f32 %v3219_v14, %v3031_v1  ;;  %v12033_v26 = vpack.c.bf16 %v3226_v17, %v3226_v17 }
 0x2b0   :  { %v3229_v10 = vadd.f32 %v3215_v50, %v2947_v4  ;;  %v12031_v15 = vpack.c.bf16 %v3225_v8, %v3225_v8  ;;  %v3231_v38 = vadd.f32 %v3223_v29, %v3033_v6  ;;  %v12035_v41 = vpack.c.bf16 %v3227_v36, %v3227_v36 }
 0x2b1   :  { %v12030_v7 = vpack.c.bf16 %v3228_v3, %v3228_v3  ;;  %12174 = vmatpush3.bf16.xpose.msra.mxu0 %v12029_v2  ;;  %v12034_v28 = vpack.c.bf16 %v3230_v20, %v3230_v20 }
 0x2b2   :  { %12185 = vmatprep.subr.bf16.mxu0 %v13775_v52  ;;  %v12032_v23 = vpack.c.bf16 %v3229_v10, %v3229_v10  ;;  %v12036_v24 = vpack.c.bf16 %v3231_v38, %v3231_v38 }
 0x2b3   :  { %12180 = vmatpush3.bf16.xpose.msra.mxu1 %v12030_v7 }
 0x2b4   :  { %12191 = vmatprep.subr.bf16.mxu1 %v13775_v52 }
 0x2b8   :  { %12176 = vmatmul.mubr.bf16.vlgmr.msra.gmra.mrb[12].mxu0 %v12021_v11 }
 0x2b9   :  { %12186 = vmatpush3.bf16.xpose.msra.mxu0 %v12031_v15  ;;  %12187 = vmatprep.mubr.msk.bf16.mxu0 %vm13776_vm0, %v13775_v52 }
 0x2ba   :  { %12182 = vmatmul.mubr.bf16.vlgmr.msra.gmra.mrb[12].mxu1 %v12022_v16  ;;  %12197 = vmatprep.subr.bf16.mxu0 %v13775_v52 }
 0x2bb   :  { %12192 = vmatpush3.bf16.xpose.msra.mxu1 %v12032_v23  ;;  %12193 = vmatprep.mubr.msk.bf16.mxu1 %vm13776_vm0, %v13775_v52 }
 0x2bc   :  { %12203 = vmatprep.subr.bf16.mxu1 %v13775_v52 }
 0x2c0   :  { %12188 = vmatmul.mubr.bf16.vlgmr.msra.gmra.mrb[16].mxu0 %v12023_v22 }
 0x2c1   :  { %12198 = vmatpush3.bf16.xpose.msra.mxu0 %v12033_v26  ;;  %12199 = vmatprep.mubr.msk.bf16.mxu0 %vm13776_vm0, %v13775_v52 }
 0x2c2   :  { %12194 = vmatmul.mubr.bf16.vlgmr.msra.gmra.mrb[16].mxu1 %v12024_v27  ;;  %12209 = vmatprep.subr.bf16.mxu0 %v13775_v52 }
 0x2c3   :  { %12204 = vmatpush3.bf16.xpose.msra.mxu1 %v12034_v28  ;;  %12205 = vmatprep.mubr.msk.bf16.mxu1 %vm13776_vm0, %v13775_v52 }
 0x2c4   :  { %12215 = vmatprep.subr.bf16.mxu1 %v13775_v52 }
 0x2c8   :  { %12200 = vmatmul.mubr.bf16.vlgmr.msra.gmra.mrb[20].mxu0 %v12025_v39 }
 0x2c9   :  { %12210 = vmatpush3.bf16.xpose.msra.mxu0 %v12035_v41  ;;  %12211 = vmatprep.mubr.msk.bf16.mxu0 %vm13776_vm0, %v13775_v52 }
 0x2ca   :  { %12206 = vmatmul.mubr.bf16.vlgmr.msra.gmra.mrb[20].mxu1 %v12026_v42  ;;  %12221 = vmatprep.subr.bf16.mxu0 %v13775_v52 }
 0x2cb   :  { %12216 = vmatpush3.bf16.xpose.msra.mxu1 %v12036_v24  ;;  %12217 = vmatprep.mubr.msk.bf16.mxu1 %vm13776_vm0, %v13775_v52 }
 0x2cc   :  { %12227 = vmatprep.subr.bf16.mxu1 %v13775_v52 }
 0x2d0   :  { %12212 = vmatmul.mubr.bf16.vlgmr.msra.gmra.mrb[24].mxu0 %v12027_v44 }
 0x2d1   :  { %12223 = vmatprep.mubr.msk.bf16.mxu0 %vm13776_vm0, %v13775_v52 }
 0x2d2   :  { %12218 = vmatmul.mubr.bf16.vlgmr.msra.gmra.mrb[24].mxu1 %v12028_v45 }
 0x2d3   :  { %12229 = vmatprep.mubr.msk.bf16.mxu1 %vm13776_vm0, %v13775_v52 }
 0x32c   :  { %v3113_v49 = vpop.f32.mrb[8].mxu0  ;;  %v3199_v51 = vpop.f32.mrb[8].mxu1 }
 0x32d   :  { %v3248_v53 = vadd.f32 %v3235_v46, %v3113_v49  ;;  %v3115_v57 = vpop.f32.mrb[9].mxu0  ;;  %v3250_v58 = vadd.f32 %v3243_v37, %v3199_v51  ;;  %v3201_v59 = vpop.f32.mrb[9].mxu1 }
 0x32e   :  { %v3249_v60 = vadd.f32 %v3239_v47, %v3115_v57  ;;  %v3117_v5 = vpop.f32.mrb[10].mxu0  ;;  %v3251_v61 = vadd.f32 %v3247_v48, %v3201_v59  ;;  %v3203_v62 = vpop.f32.mrb[10].mxu1 }
 0x32f   :  { %v12037_v0 = vpack.c.bf16 %v3248_v53, %v3248_v53  ;;  %v3252_v56 = vadd.f32 %v3235_v46, %v3117_v5  ;;  %v3119_v1 = vpop.f32.mrb[11].mxu0  ;;  %v12041_v2 = vpack.c.bf16 %v3250_v58, %v3250_v58  ;;  %v3254_v50 = vadd.f32 %v3243_v37, %v3203_v62  ;;  %v3205_v3 = vpop.f32.mrb[11].mxu1 }
 0x330   :  { %v12039_v63 = vpack.c.bf16 %v3249_v60, %v3249_v60  ;;  %v3253_v4 = vadd.f32 %v3239_v47, %v3119_v1  ;;  %v12043_v6 = vpack.c.bf16 %v3251_v61, %v3251_v61  ;;  %v3255_v7 = vadd.f32 %v3247_v48, %v3205_v3 }
 0x331   :  { %v3766_v32 = vsel %vm3764_vm1, %v12037_v0, 0  ;;  %v12038_v8 = vpack.c.bf16 %v3252_v56, %v3252_v56  ;;  %v14182_v9 = vsel %vm3764_vm1, %v12041_v2, 0  ;;  %v12042_v10 = vpack.c.bf16 %v3254_v50, %v3254_v50 }
 0x332   :  { %v14185_v11 = vsel %vm3764_vm1, %v12039_v63, 0  ;;  %v12040_v12 = vpack.c.bf16 %v3253_v4, %v3253_v4  ;;  %v14188_v13 = vsel %vm3764_vm1, %v12043_v6, 0  ;;  %v12044_v14 = vpack.c.bf16 %v3255_v7, %v3255_v7  ;;  %12222 = vmatpush3.bf16.msra.mxu0 %v3766_v32 }
 0x333   :  { %v3812_v15 = vsel %vm3764_vm1, %v12038_v8, 0  ;;  %v14192_v16 = vsel %vm3764_vm1, %v12042_v10, 0  ;;  %12233 = vmatprep.subr.bf16.mxu0 %v13775_v52 }
 0x334   :  { %v14196_v23 = vsel %vm3764_vm1, %v12040_v12, 0  ;;  %v14199_v31 = vsel %vm3764_vm1, %v12044_v14, 0  ;;  %12228 = vmatpush3.bf16.msra.mxu1 %v3812_v15 }
 0x335   :  { %12239 = vmatprep.subr.bf16.mxu1 %v13775_v52 }
 0x38b   :  { %v3378_v17 = vpop.f32.mrb[12].mxu0 }
 0x38c   :  { %v12177_v18 = vpop.f32.mrb[13].mxu0  ;;  %v3665_v20 = vsel %vm3664_vm2, %v3378_v17, -inf }
 0x38d   :  { %v3418_v21 = vpop.f32.mrb[12].mxu1  ;;  %3666 = vmax.xlane.f32.xlu0 %v3665_v20  ;;  %v3381_v22 = vpop.f32.mrb[14].mxu0 }
 0x38e   :  { %v12178_v25 = vpop.f32.mrb[15].mxu0  ;;  %v12183_v26 = vpop.f32.mrb[13].mxu1  ;;  %v3668_v28 = vsel %vm3664_vm2, %v3418_v21, -inf }
 0x38f   :  { %v3421_v29 = vpop.f32.mrb[14].mxu1 }
 0x390   :  { %v12184_v27 = vpop.f32.mrb[15].mxu1 }
 0x391   :  { %3669 = vmax.xlane.f32.xlu0 %v3668_v28 }
 0x393   :  { %v3458_v34 = vpop.f32.mrb[16].mxu0 }
 0x394   :  { %v12189_v36 = vpop.f32.mrb[17].mxu0  ;;  %v3671_v35 = vsel %vm3664_vm2, %v3458_v34, -inf }
 0x395   :  { %v3498_v38 = vpop.f32.mrb[16].mxu1  ;;  %3672 = vmax.xlane.f32.xlu1 %v3671_v35  ;;  %v3461_v39 = vpop.f32.mrb[18].mxu0 }
 0x396   :  { %v12190_v40 = vpop.f32.mrb[19].mxu0  ;;  %v12195_v41 = vpop.f32.mrb[17].mxu1  ;;  %v3674_v43 = vsel %vm3664_vm2, %v3498_v38, -inf }
 0x397   :  { %v3501_v42 = vpop.f32.mrb[18].mxu1 }
 0x398   :  { %v12196_v24 = vpop.f32.mrb[19].mxu1 }
 0x399   :  { %3675 = vmax.xlane.f32.xlu1 %v3674_v43 }
 0x39b   :  { %v3538_v33 = vpop.f32.mrb[20].mxu0 }
 0x39c   :  { %v12201_v44 = vpop.f32.mrb[21].mxu0  ;;  %v3677_v45 = vsel %vm3664_vm2, %v3538_v33, -inf }
 0x39d   :  { %v3578_v46 = vpop.f32.mrb[20].mxu1  ;;  %3678 = vmax.xlane.f32.xlu0 %v3677_v45  ;;  %v3541_v37 = vpop.f32.mrb[22].mxu0 }
 0x39e   :  { %v12202_v47 = vpop.f32.mrb[23].mxu0  ;;  %v12207_v48 = vpop.f32.mrb[21].mxu1  ;;  %v3680_v49 = vsel %vm3664_vm2, %v3578_v46, -inf }
 0x39f   :  { %v3581_v51 = vpop.f32.mrb[22].mxu1  ;;  %3681 = vmax.xlane.f32.xlu1 %v3680_v49 }
 0x3a0   :  { %v12208_v53 = vpop.f32.mrb[23].mxu1 }
 0x3a3   :  { %v3618_v57 = vpop.f32.mrb[24].mxu0 }
 0x3a4   :  { %v12213_v58 = vpop.f32.mrb[25].mxu0  ;;  %v3683_v59 = vsel %vm3664_vm2, %v3618_v57, -inf }
 0x3a5   :  { %v3658_v60 = vpop.f32.mrb[24].mxu1  ;;  %3684 = vmax.xlane.f32.xlu0 %v3683_v59  ;;  %v3621_v5 = vpop.f32.mrb[26].mxu0 }
 0x3a6   :  { %v12214_v61 = vpop.f32.mrb[27].mxu0  ;;  %v12219_v62 = vpop.f32.mrb[25].mxu1  ;;  %v3686_v0 = vsel %vm3664_vm2, %v3658_v60, -inf }
 0x3a7   :  { %v3661_v56 = vpop.f32.mrb[26].mxu1  ;;  %3687 = vmax.xlane.f32.xlu1 %v3686_v0 }
 0x3a8   :  { %v12220_v1 = vpop.f32.mrb[27].mxu1 }
 0x41a   :  { %v3667_v2 = vpop.xlane.xlu0 %3666 }
 0x41b   :  { %v3689_v50 = vsub.f32 %v3378_v17, %v3667_v2 }
 0x41d   :  { %v3697_v3 = vmul.f32 1.442695, %v3689_v50 }
 0x41e   :  { %v3670_v63 = vpop.xlane.xlu0 %3669 }
 0x41f   :  { %13363 = vpow2.f32 %v3697_v3  ;;  %v3690_v4 = vsub.f32 %v3418_v21, %v3670_v63 }
 0x421   :  { %v3699_v6 = vmul.f32 1.442695, %v3690_v4 }
 0x422   :  { %v3673_v7 = vpop.xlane.xlu1 %3672 }
 0x423   :  { %13365 = vpow2.f32 %v3699_v6  ;;  %v3691_v32 = vsub.f32 %v3458_v34, %v3673_v7 }
 0x425   :  { %v3701_v8 = vmul.f32 1.442695, %v3691_v32 }
 0x426   :  { %v3676_v10 = vpop.xlane.xlu1 %3675 }
 0x427   :  { %13367 = vpow2.f32 %v3701_v8  ;;  %v3692_v12 = vsub.f32 %v3498_v38, %v3676_v10  ;;  %v12697_v10 = vld [vmem:[#allocation10 + $0x4] ss:$16 sps:$4 sm:$0xff]  }
 0x429   :  { %v13364_v14 = vpop.eup %13363  ;;  %v3703_v15 = vmul.f32 1.442695, %v3692_v12 }
 0x42a   :  { %v3679_v18 = vpop.xlane.xlu0 %3678  ;;  %v3713_v20 = vsel %vm3664_vm2, %v13364_v14, 0.0 }
 0x42b   :  { %13369 = vpow2.f32 %v3703_v15  ;;  %v3693_v22 = vsub.f32 %v3538_v33, %v3679_v18  ;;  %3714 = vadd.xlane.f32.xlu0 %v3713_v20  ;;  %v12695_v20 = vld [vmem:[#allocation10] ss:$16 sps:$4 sm:$0xff]  }
 0x42c   :  { %v3682_v17 = vpop.xlane.xlu1 %3681 }
 0x42d   :  { %v13366_v25 = vpop.eup %13365  ;;  %v3705_v26 = vmul.f32 1.442695, %v3693_v22  ;;  %v3694_v21 = vsub.f32 %v3578_v46, %v3682_v17  ;;  %v12703_v17 = vld [vmem:[#allocation10 + $0x24] ss:$16 sps:$4 sm:$0xff]  }
 0x42e   :  { %v3716_v29 = vsel %vm3664_vm2, %v13366_v25, 0.0 }
 0x42f   :  { %13371 = vpow2.f32 %v3705_v26  ;;  %v3707_v27 = vmul.f32 1.442695, %v3694_v21  ;;  %3717 = vadd.xlane.f32.xlu1 %v3716_v29  ;;  %v12701_v26 = vld [vmem:[#allocation10 + $0x20] ss:$16 sps:$4 sm:$0xff]   ;;  %v12706_v29 = vld [vmem:[#allocation10 + $0x2c] ss:$16 sps:$4 sm:$0xff]  }
 0x431   :  { %v13368_v28 = vpop.eup %13367  ;;  %13373 = vpow2.f32 %v3707_v27  ;;  %v12709_v27 = vld [vmem:[#allocation10 + $0x44] ss:$16 sps:$4 sm:$0xff]  }
 0x432   :  { %v3685_v34 = vpop.xlane.xlu0 %3684  ;;  %v3719_v36 = vsel %vm3664_vm2, %v13368_v28, 0.0 }
 0x433   :  { %v3695_v35 = vsub.f32 %v3618_v57, %v3685_v34  ;;  %3720 = vadd.xlane.f32.xlu0 %v3719_v36  ;;  %v12712_v34 = vld [vmem:[#allocation10 + $0x4c] ss:$16 sps:$4 sm:$0xff]   ;;  %v12715_v36 = vld [vmem:[#allocation10 + $0x64] ss:$16 sps:$4 sm:$0xff]  }
 0x434   :  { %v3688_v38 = vpop.xlane.xlu1 %3687 }
 0x435   :  { %v13370_v39 = vpop.eup %13369  ;;  %v3709_v40 = vmul.f32 1.442695, %v3695_v35  ;;  %v3696_v41 = vsub.f32 %v3658_v60, %v3688_v38  ;;  %v12710_v35 = vld [vmem:[#allocation10 + $0x48] ss:$16 sps:$4 sm:$0xff]   ;;  %v12713_v38 = vld [vmem:[#allocation10 + $0x60] ss:$16 sps:$4 sm:$0xff]  }
 0x436   :  { %v3722_v42 = vsel %vm3664_vm2, %v13370_v39, 0.0 }
 0x437   :  { %13375 = vpow2.f32 %v3709_v40  ;;  %v3711_v24 = vmul.f32 1.442695, %v3696_v41  ;;  %3723 = vadd.xlane.f32.xlu1 %v3722_v42  ;;  %v12721_v40 = vld [vmem:[#allocation10 + $0x84] ss:$16 sps:$4 sm:$0xff]   ;;  %v12716_v41 = vld [vmem:[#allocation10 + $0x68] ss:$16 sps:$4 sm:$0xff]  }
 0x438   :  { %v12719_v42 = vld [vmem:[#allocation10 + $0x80] ss:$16 sps:$4 sm:$0xff]  }
 0x439   :  { %v13372_v43 = vpop.eup %13371  ;;  %13377 = vpow2.f32 %v3711_v24  ;;  %v12724_v24 = vld [vmem:[#allocation10 + $0x8c] ss:$16 sps:$4 sm:$0xff]  }
 0x43a   :  { %v3725_v33 = vsel %vm3664_vm2, %v13372_v43, 0.0 }
 0x43b   :  { %v13374_v44 = vpop.eup %13373  ;;  %3726 = vadd.xlane.f32.xlu0 %v3725_v33  ;;  %v12722_v33 = vld [vmem:[#allocation10 + $0x88] ss:$16 sps:$4 sm:$0xff]  }
 0x43c   :  { %v3728_v45 = vsel %vm3664_vm2, %v13374_v44, 0.0 }
 0x43d   :  { %3729 = vadd.xlane.f32.xlu1 %v3728_v45  ;;  %v12730_v45 = vld [vmem:[#allocation10 + $0xac] ss:$16 sps:$4 sm:$0xff]  }
 0x441   :  { %v14216_v46 = vpop.eup %13375 }
 0x442   :  { %v3731_v37 = vsel %vm3664_vm2, %v14216_v46, 0.0 }
 0x443   :  { %v14220_v47 = vpop.eup %13377  ;;  %3732 = vadd.xlane.f32.xlu0 %v3731_v37  ;;  %v12728_v37 = vld [vmem:[#allocation10 + $0xa8] ss:$16 sps:$4 sm:$0xff]  }
 0x444   :  { %v3734_v48 = vsel %vm3664_vm2, %v14220_v47, 0.0 }
 0x445   :  { %3735 = vadd.xlane.f32.xlu1 %v3734_v48  ;;  %v12736_v48 = vld [vmem:[#allocation10 + $0xcc] ss:$16 sps:$4 sm:$0xff]  }
 0x4b8   :  { %v3715_v49 = vpop.xlane.xlu0 %3714 }
 0x4b9   :  { %13379 = vrcp.f32 %v3715_v49  ;;  %v12739_v49 = vld [vmem:[#allocation10 + $0xe4] ss:$16 sps:$4 sm:$0xff]  }
 0x4bc   :  { %v3718_v51 = vpop.xlane.xlu1 %3717 }
 0x4bd   :  { %13381 = vrcp.f32 %v3718_v51  ;;  %v12734_v51 = vld [vmem:[#allocation10 + $0xc8] ss:$16 sps:$4 sm:$0xff]  }
 0x4c0   :  { %v3721_v53 = vpop.xlane.xlu0 %3720 }
 0x4c1   :  { %13383 = vrcp.f32 %v3721_v53  ;;  %v12737_v53 = vld [vmem:[#allocation10 + $0xe0] ss:$16 sps:$4 sm:$0xff]  }
 0x4c3   :  { %v13380_v57 = vpop.eup %13379 }
 0x4c4   :  { %v3745_v58 = vmul.f32 %v13380_v57, %v13364_v14  ;;  %v3724_v59 = vpop.xlane.xlu1 %3723  ;;  %v12700_v14 = vld [vmem:[#allocation10 + $0xc] ss:$16 sps:$4 sm:$0xff]  }
 0x4c5   :  { %13385 = vrcp.f32 %v3724_v59  ;;  %v12742_v57 = vld [vmem:[#allocation10 + $0xec] ss:$16 sps:$4 sm:$0xff]   ;;  %v12740_v59 = vld [vmem:[#allocation10 + $0xe8] ss:$16 sps:$4 sm:$0xff]  }
 0x4c6   :  { %v3753_v60 = vpack.c.bf16 %v3745_v58, %v3745_v58  ;;  %v12745_v58 = vld [vmem:[#allocation10 + $0x104] ss:$16 sps:$4 sm:$0xff]  }
 0x4c7   :  { %v13382_v5 = vpop.eup %13381 }
 0x4c8   :  { %v3746_v61 = vmul.f32 %v13382_v5, %v13366_v25  ;;  %12224 = vmatmul.mubr.msk.bf16.vlgmr.msra.gmra.mrb[28].mxu0 %vm3664_vm2, %v3753_v60  ;;  %v3727_v62 = vpop.xlane.xlu0 %3726  ;;  %v12698_v25 = vld [vmem:[#allocation10 + $0x8] ss:$16 sps:$4 sm:$0xff]   ;;  %v12743_v60 = vld [vmem:[#allocation10 + $0x100] ss:$16 sps:$4 sm:$0xff]   ;;  %v12748_v5 = vld [vmem:[#allocation10 + $0x10c] ss:$16 sps:$4 sm:$0xff]  }
 0x4c9   :  { %12234 = vmatpush3.bf16.msra.mxu0 %v14185_v11  ;;  %13387 = vrcp.f32 %v3727_v62  ;;  %12235 = vmatprep.mubr.msk.bf16.mxu0 %vm13776_vm0, %v13775_v52  ;;  %v12746_v62 = vld [vmem:[#allocation10 + $0x108] ss:$16 sps:$4 sm:$0xff]  }
 0x4ca   :  { %v3730_v0 = vpop.xlane.xlu1 %3729  ;;  %v3754_v56 = vpack.c.bf16 %v3746_v61, %v3746_v61  ;;  %12245 = vmatprep.subr.bf16.mxu0 %v13775_v52  ;;  %v12751_v61 = vld [vmem:[#allocation10 + $0x124] ss:$16 sps:$4 sm:$0xff]  }
 0x4cb   :  { %v13384_v1 = vpop.eup %13383  ;;  %13389 = vrcp.f32 %v3730_v0  ;;  %v12749_v0 = vld [vmem:[#allocation10 + $0x120] ss:$16 sps:$4 sm:$0xff]  }
 0x4cc   :  { %v3747_v2 = vmul.f32 %v13384_v1, %v13368_v28  ;;  %12230 = vmatmul.mubr.msk.bf16.vlgmr.msra.gmra.mrb[28].mxu1 %vm3664_vm2, %v3754_v56  ;;  %v12707_v28 = vld [vmem:[#allocation10 + $0x40] ss:$16 sps:$4 sm:$0xff]   ;;  %v12754_v56 = vld [vmem:[#allocation10 + $0x12c] ss:$16 sps:$4 sm:$0xff]   ;;  %v12757_v1 = vld [vmem:[#allocation10 + $0x144] ss:$16 sps:$4 sm:$0xff]  }
 0x4cd   :  { %12240 = vmatpush3.bf16.msra.mxu1 %v14196_v23  ;;  %12241 = vmatprep.mubr.msk.bf16.mxu1 %vm13776_vm0, %v13775_v52 }
 0x4ce   :  { %v3755_v50 = vpack.c.bf16 %v3747_v2, %v3747_v2  ;;  %12251 = vmatprep.subr.bf16.mxu1 %v13775_v52  ;;  %v12752_v2 = vld [vmem:[#allocation10 + $0x128] ss:$16 sps:$4 sm:$0xff]  }
 0x4cf   :  { %v13386_v11 = vpop.eup %13385 }
 0x4d0   :  { %v3748_v3 = vmul.f32 %v13386_v11, %v13370_v39  ;;  %12236 = vmatmul.mubr.msk.bf16.vlgmr.msra.gmra.mrb[32].mxu0 %vm3664_vm2, %v3755_v50  ;;  %v3733_v63 = vpop.xlane.xlu0 %3732  ;;  %v12718_v39 = vld [vmem:[#allocation10 + $0x6c] ss:$16 sps:$4 sm:$0xff]   ;;  %v12755_v50 = vld [vmem:[#allocation10 + $0x140] ss:$16 sps:$4 sm:$0xff]  }
 0x4d1   :  { %12246 = vmatpush3.bf16.msra.mxu0 %v14182_v9  ;;  %13391 = vrcp.f32 %v3733_v63  ;;  %12247 = vmatprep.mubr.msk.bf16.mxu0 %vm13776_vm0, %v13775_v52  ;;  %v12760_v11 = vld [vmem:[#allocation10 + $0x14c] ss:$16 sps:$4 sm:$0xff]   ;;  %v12758_v63 = vld [vmem:[#allocation10 + $0x148] ss:$16 sps:$4 sm:$0xff]  }
 0x4d2   :  { %v3736_v4 = vpop.xlane.xlu1 %3735  ;;  %v3756_v6 = vpack.c.bf16 %v3748_v3, %v3748_v3  ;;  %12257 = vmatprep.subr.bf16.mxu0 %v13775_v52  ;;  %v12763_v3 = vld [vmem:[#allocation10 + $0x164] ss:$16 sps:$4 sm:$0xff]  }
 0x4d3   :  { %v13388_v23 = vpop.eup %13387  ;;  %13393 = vrcp.f32 %v3736_v4  ;;  %v12761_v4 = vld [vmem:[#allocation10 + $0x160] ss:$16 sps:$4 sm:$0xff]  }
 0x4d4   :  { %v3749_v7 = vmul.f32 %v13388_v23, %v13372_v43  ;;  %12242 = vmatmul.mubr.msk.bf16.vlgmr.msra.gmra.mrb[32].mxu1 %vm3664_vm2, %v3756_v6  ;;  %v12727_v43 = vld [vmem:[#allocation10 + $0xa4] ss:$16 sps:$4 sm:$0xff]   ;;  %v12766_v6 = vld [vmem:[#allocation10 + $0x16c] ss:$16 sps:$4 sm:$0xff]  }
 0x4d5   :  { %v13390_v32 = vpop.eup %13389  ;;  %12252 = vmatpush3.bf16.msra.mxu1 %v14192_v16  ;;  %12253 = vmatprep.mubr.msk.bf16.mxu1 %vm13776_vm0, %v13775_v52  ;;  %v12769_v23 = vld [vmem:[#allocation10 + $0x184] ss:$16 sps:$4 sm:$0xff]  }
 0x4d6   :  { %v3750_v9 = vmul.f32 %v13390_v32, %v13374_v44  ;;  %v3757_v8 = vpack.c.bf16 %v3749_v7, %v3749_v7  ;;  %12263 = vmatprep.subr.bf16.mxu1 %v13775_v52  ;;  %v12725_v44 = vld [vmem:[#allocation10 + $0xa0] ss:$16 sps:$4 sm:$0xff]   ;;  %v12764_v7 = vld [vmem:[#allocation10 + $0x168] ss:$16 sps:$4 sm:$0xff]  }
 0x4d7   :  { %v12767_v32 = vld [vmem:[#allocation10 + $0x180] ss:$16 sps:$4 sm:$0xff]  }
 0x4d8   :  { %12248 = vmatmul.mubr.msk.bf16.vlgmr.msra.gmra.mrb[36].mxu0 %vm3664_vm2, %v3757_v8  ;;  %v3758_v12 = vpack.c.bf16 %v3750_v9, %v3750_v9  ;;  %v12772_v9 = vld [vmem:[#allocation10 + $0x18c] ss:$16 sps:$4 sm:$0xff]   ;;  %v12770_v8 = vld [vmem:[#allocation10 + $0x188] ss:$16 sps:$4 sm:$0xff]  }
 0x4d9   :  { %12258 = vmatpush3.bf16.msra.mxu0 %v14188_v13  ;;  %12259 = vmatprep.mubr.msk.bf16.mxu0 %vm13776_vm0, %v13775_v52 }
 0x4da   :  { %4818 = vmatprep.subr.bf16.mxu0 %v12697_v10  ;;  %v12775_v10 = vld [vmem:[#allocation10 + $0x1a4] ss:$16 sps:$4 sm:$0xff]  }
 0x4db   :  { %v13392_v15 = vpop.eup %13391 }
 0x4dc   :  { %v3751_v16 = vmul.f32 %v13392_v15, %v14216_v46  ;;  %12254 = vmatmul.mubr.msk.bf16.vlgmr.msra.gmra.mrb[36].mxu1 %vm3664_vm2, %v3758_v12  ;;  %v12733_v46 = vld [vmem:[#allocation10 + $0xc4] ss:$16 sps:$4 sm:$0xff]   ;;  %v12778_v12 = vld [vmem:[#allocation10 + $0x1ac] ss:$16 sps:$4 sm:$0xff]   ;;  %v12776_v15 = vld [vmem:[#allocation10 + $0x1a8] ss:$16 sps:$4 sm:$0xff]  }
 0x4dd   :  { %v13394_v18 = vpop.eup %13393  ;;  %12264 = vmatpush3.bf16.msra.mxu1 %v14199_v31  ;;  %12265 = vmatprep.mubr.msk.bf16.mxu1 %vm13776_vm0, %v13775_v52  ;;  %v12704_v31 = vld [vmem:[#allocation10 + $0x28] ss:$16 sps:$4 sm:$0xff]  }
 0x4de   :  { %v3752_v13 = vmul.f32 %v13394_v18, %v14220_v47  ;;  %v3759_v22 = vpack.c.bf16 %v3751_v16, %v3751_v16  ;;  %4904 = vmatprep.subr.bf16.mxu1 %v12700_v14  ;;  %v12731_v47 = vld [vmem:[#allocation10 + $0xc0] ss:$16 sps:$4 sm:$0xff]   ;;  %v12781_v16 = vld [vmem:[#allocation10 + $0x1c4] ss:$16 sps:$4 sm:$0xff]   ;;  %v12784_v18 = vld [vmem:[#allocation10 + $0x1cc] ss:$16 sps:$4 sm:$0xff]  }
 0x4df   :  { %v12773_v14 = vld [vmem:[#allocation10 + $0x1a0] ss:$16 sps:$4 sm:$0xff]  }
 0x4e0   :  { %12260 = vmatmul.mubr.msk.bf16.vlgmr.msra.gmra.mrb[40].mxu0 %vm3664_vm2, %v3759_v22  ;;  %v3760_v21 = vpack.c.bf16 %v3752_v13, %v3752_v13  ;;  %v12782_v13 = vld [vmem:[#allocation10 + $0x1c8] ss:$16 sps:$4 sm:$0xff]   ;;  %v12787_v22 = vld [vmem:[#allocation10 + $0x1e4] ss:$16 sps:$4 sm:$0xff]  }
 0x4e1   :  { %4819 = vmatpush1.bf16.msra.mxu0 %v12695_v20  ;;  %v12779_v20 = vld [vmem:[#allocation10 + $0x1c0] ss:$16 sps:$4 sm:$0xff]  }
 0x4e2   :  { %4820 = vmatprep.subr.bf16.mxu0 %v12703_v17  ;;  %v12790_v17 = vld [vmem:[#allocation10 + $0x1ec] ss:$16 sps:$4 sm:$0xff]  }
 0x4e4   :  { %12266 = vmatmul.mubr.msk.bf16.vlgmr.msra.gmra.mrb[40].mxu1 %vm3664_vm2, %v3760_v21  ;;  %v12793_v21 = vld [vmem:[#allocation10 + $0x204] ss:$16 sps:$4 sm:$0xff]  }
 0x4e5   :  { %4905 = vmatpush1.bf16.msra.mxu1 %v12698_v25  ;;  %4821 = vmatpush1.bf16.msra.mxu0 %v12701_v26  ;;  %v12785_v25 = vld [vmem:[#allocation10 + $0x1e0] ss:$16 sps:$4 sm:$0xff]   ;;  %v12788_v26 = vld [vmem:[#allocation10 + $0x1e8] ss:$16 sps:$4 sm:$0xff]  }
 0x4e6   :  { %4906 = vmatprep.subr.bf16.mxu1 %v12706_v29  ;;  %4822 = vmatprep.subr.bf16.mxu0 %v12709_v27  ;;  %v12796_v29 = vld [vmem:[#allocation10 + $0x20c] ss:$16 sps:$4 sm:$0xff]  }
 0x4e9   :  { %4907 = vmatpush1.bf16.msra.mxu1 %v12704_v31  ;;  %4823 = vmatpush1.bf16.msra.mxu0 %v12707_v28 }
 0x4ea   :  { %4908 = vmatprep.subr.bf16.mxu1 %v12712_v34  ;;  %4824 = vmatprep.subr.bf16.mxu0 %v12715_v36 }
 0x4ed   :  { %4909 = vmatpush1.bf16.msra.mxu1 %v12710_v35  ;;  %4825 = vmatpush1.bf16.msra.mxu0 %v12713_v38 }
 0x4ee   :  { %4910 = vmatprep.subr.bf16.mxu1 %v12718_v39  ;;  %4826 = vmatprep.subr.bf16.mxu0 %v12721_v40 }
 0x4f1   :  { %4911 = vmatpush1.bf16.msra.mxu1 %v12716_v41  ;;  %4827 = vmatpush1.bf16.msra.mxu0 %v12719_v42 }
 0x4f2   :  { %4912 = vmatprep.subr.bf16.mxu1 %v12724_v24  ;;  %4828 = vmatprep.subr.bf16.mxu0 %v12727_v43 }
 0x4f5   :  { %4913 = vmatpush1.bf16.msra.mxu1 %v12722_v33  ;;  %4829 = vmatpush1.bf16.msra.mxu0 %v12725_v44 }
 0x4f6   :  { %4914 = vmatprep.subr.bf16.mxu1 %v12730_v45  ;;  %4830 = vmatprep.subr.bf16.mxu0 %v12733_v46  ;;  %v12791_v46 = vld [vmem:[#allocation10 + $0x200] ss:$16 sps:$4 sm:$0xff]  }
 0x4f9   :  { %4915 = vmatpush1.bf16.msra.mxu1 %v12728_v37  ;;  %4831 = vmatpush1.bf16.msra.mxu0 %v12731_v47  ;;  %v12794_v37 = vld [vmem:[#allocation10 + $0x208] ss:$16 sps:$4 sm:$0xff]  }
 0x4fa   :  { %4916 = vmatprep.subr.bf16.mxu1 %v12736_v48  ;;  %4832 = vmatprep.subr.bf16.mxu0 %v12739_v49  ;;  %v12799_v48 = vld [vmem:[#allocation10 + $0x224] ss:$16 sps:$4 sm:$0xff]   ;;  %v12802_v49 = vld [vmem:[#allocation10 + $0x22c] ss:$16 sps:$4 sm:$0xff]  }
 0x4fd   :  { %4917 = vmatpush1.bf16.msra.mxu1 %v12734_v51  ;;  %4833 = vmatpush1.bf16.msra.mxu0 %v12737_v53 }
 0x4fe   :  { %4918 = vmatprep.subr.bf16.mxu1 %v12742_v57  ;;  %4834 = vmatprep.subr.bf16.mxu0 %v12745_v58  ;;  %v12797_v58 = vld [vmem:[#allocation10 + $0x220] ss:$16 sps:$4 sm:$0xff]  }
 0x501   :  { %4919 = vmatpush1.bf16.msra.mxu1 %v12740_v59  ;;  %4835 = vmatpush1.bf16.msra.mxu0 %v12743_v60  ;;  %v12800_v59 = vld [vmem:[#allocation10 + $0x228] ss:$16 sps:$4 sm:$0xff]  }
 0x502   :  { %4920 = vmatprep.subr.bf16.mxu1 %v12748_v5  ;;  %4836 = vmatprep.subr.bf16.mxu0 %v12751_v61  ;;  %v12805_v5 = vld [vmem:[#allocation10 + $0x244] ss:$16 sps:$4 sm:$0xff]   ;;  %v12808_v61 = vld [vmem:[#allocation10 + $0x24c] ss:$16 sps:$4 sm:$0xff]  }
 0x505   :  { %4921 = vmatpush1.bf16.msra.mxu1 %v12746_v62  ;;  %4837 = vmatpush1.bf16.msra.mxu0 %v12749_v0 }
 0x506   :  { %4922 = vmatprep.subr.bf16.mxu1 %v12754_v56  ;;  %4838 = vmatprep.subr.bf16.mxu0 %v12757_v1 }
 0x509   :  { %4923 = vmatpush1.bf16.msra.mxu1 %v12752_v2  ;;  %4839 = vmatpush1.bf16.msra.mxu0 %v12755_v50  ;;  %v12803_v2 = vld [vmem:[#allocation10 + $0x240] ss:$16 sps:$4 sm:$0xff]   ;;  %v12806_v50 = vld [vmem:[#allocation10 + $0x248] ss:$16 sps:$4 sm:$0xff]  }
 0x50a   :  { %4924 = vmatprep.subr.bf16.mxu1 %v12760_v11  ;;  %4840 = vmatprep.subr.bf16.mxu0 %v12763_v3  ;;  %v12811_v3 = vld [vmem:[#allocation10 + $0x264] ss:$16 sps:$4 sm:$0xff]  }
 0x50d   :  { %4925 = vmatpush1.bf16.msra.mxu1 %v12758_v63  ;;  %4841 = vmatpush1.bf16.msra.mxu0 %v12761_v4  ;;  %v12814_v63 = vld [vmem:[#allocation10 + $0x26c] ss:$16 sps:$4 sm:$0xff]  }
 0x50e   :  { %4926 = vmatprep.subr.bf16.mxu1 %v12766_v6  ;;  %4842 = vmatprep.subr.bf16.mxu0 %v12769_v23 }
 0x511   :  { %4927 = vmatpush1.bf16.msra.mxu1 %v12764_v7  ;;  %4843 = vmatpush1.bf16.msra.mxu0 %v12767_v32  ;;  %v12809_v7 = vld [vmem:[#allocation10 + $0x260] ss:$16 sps:$4 sm:$0xff]   ;;  %v12812_v32 = vld [vmem:[#allocation10 + $0x268] ss:$16 sps:$4 sm:$0xff]  }
 0x512   :  { %4928 = vmatprep.subr.bf16.mxu1 %v12772_v9  ;;  %4844 = vmatprep.subr.bf16.mxu0 %v12775_v10  ;;  %v12820_v10 = vld [vmem:[#allocation10 + $0x28c] ss:$16 sps:$4 sm:$0xff]  }
 0x515   :  { %4929 = vmatpush1.bf16.msra.mxu1 %v12770_v8  ;;  %4845 = vmatpush1.bf16.msra.mxu0 %v12773_v14  ;;  %v12817_v8 = vld [vmem:[#allocation10 + $0x284] ss:$16 sps:$4 sm:$0xff]  }
 0x516   :  { %4930 = vmatprep.subr.bf16.mxu1 %v12778_v12  ;;  %4846 = vmatprep.subr.bf16.mxu0 %v12781_v16 }
 0x519   :  { %4931 = vmatpush1.bf16.msra.mxu1 %v12776_v15  ;;  %4847 = vmatpush1.bf16.msra.mxu0 %v12779_v20  ;;  %v12818_v20 = vld [vmem:[#allocation10 + $0x288] ss:$16 sps:$4 sm:$0xff]  }
 0x51a   :  { %4932 = vmatprep.subr.bf16.mxu1 %v12784_v18  ;;  %4848 = vmatprep.subr.bf16.mxu0 %v12787_v22  ;;  %v12815_v18 = vld [vmem:[#allocation10 + $0x280] ss:$16 sps:$4 sm:$0xff]   ;;  %v12823_v22 = vld [vmem:[#allocation10 + $0x2a4] ss:$16 sps:$4 sm:$0xff]  }
 0x51d   :  { %4933 = vmatpush1.bf16.msra.mxu1 %v12782_v13  ;;  %4849 = vmatpush1.bf16.msra.mxu0 %v12785_v25 }
 0x51e   :  { %4934 = vmatprep.subr.bf16.mxu1 %v12790_v17  ;;  %4861 = vmatprep.subr.bf16.mxu0 %v12793_v21  ;;  %v12826_v17 = vld [vmem:[#allocation10 + $0x2ac] ss:$16 sps:$4 sm:$0xff]   ;;  %v12824_v21 = vld [vmem:[#allocation10 + $0x2a8] ss:$16 sps:$4 sm:$0xff]  }
 0x521   :  { %4935 = vmatpush1.bf16.msra.mxu1 %v12788_v26  ;;  %v12821_v26 = vld [vmem:[#allocation10 + $0x2a0] ss:$16 sps:$4 sm:$0xff]  }
 0x522   :  { %4947 = vmatprep.subr.bf16.mxu1 %v12796_v29  ;;  %v12829_v29 = vld [vmem:[#allocation10 + $0x2c4] ss:$16 sps:$4 sm:$0xff]  }
 0x59b   :  { %v3802_v27 = vpop.f32.mrb[28].mxu0 }
 0x59c   :  { %v12225_v31 = vpop.f32.mrb[29].mxu0 }
 0x59d   :  { %v3805_v28 = vpop.f32.mrb[30].mxu0  ;;  %v12827_v31 = vld [vmem:[#allocation10 + $0x2c0] ss:$16 sps:$4 sm:$0xff]  }
 0x59e   :  { %v12226_v34 = vpop.f32.mrb[31].mxu0  ;;  %v12830_v28 = vld [vmem:[#allocation10 + $0x2c8] ss:$16 sps:$4 sm:$0xff]  }
 0x59f   :  { %v3848_v36 = vpop.f32.mrb[28].mxu1  ;;  %v12835_v34 = vld [vmem:[#allocation10 + $0x2e4] ss:$16 sps:$4 sm:$0xff]  }
 0x5a0   :  { %v12045_v35 = vpack.c.bf16 %v3848_v36, %v3802_v27  ;;  %v12231_v38 = vpop.f32.mrb[29].mxu1  ;;  %v12832_v27 = vld [vmem:[#allocation10 + $0x2cc] ss:$16 sps:$4 sm:$0xff]  }
 0x5a1   :  { %v3851_v39 = vpop.f32.mrb[30].mxu1  ;;  %v12838_v36 = vld [vmem:[#allocation10 + $0x2ec] ss:$16 sps:$4 sm:$0xff]   ;;  %v12836_v38 = vld [vmem:[#allocation10 + $0x2e8] ss:$16 sps:$4 sm:$0xff]  }
 0x5a2   :  { %v12232_v40 = vpop.f32.mrb[31].mxu1  ;;  %v12841_v39 = vld [vmem:[#allocation10 + $0x304] ss:$16 sps:$4 sm:$0xff]  }
 0x5a3   :  { %v3894_v41 = vpop.f32.mrb[32].mxu0  ;;  %v12844_v40 = vld [vmem:[#allocation10 + $0x30c] ss:$16 sps:$4 sm:$0xff]  }
 0x5a4   :  { %v12237_v42 = vpop.f32.mrb[33].mxu0 }
 0x5a5   :  { %v3897_v24 = vpop.f32.mrb[34].mxu0  ;;  %v12842_v42 = vld [vmem:[#allocation10 + $0x308] ss:$16 sps:$4 sm:$0xff]  }
 0x5a6   :  { %v12238_v43 = vpop.f32.mrb[35].mxu0  ;;  %v12847_v24 = vld [vmem:[#allocation10 + $0x324] ss:$16 sps:$4 sm:$0xff]  }
 0x5a7   :  { %v3940_v33 = vpop.f32.mrb[32].mxu1  ;;  %v12850_v43 = vld [vmem:[#allocation10 + $0x32c] ss:$16 sps:$4 sm:$0xff]  }
 0x5a8   :  { %v12046_v44 = vpack.c.bf16 %v3940_v33, %v3894_v41  ;;  %v12243_v45 = vpop.f32.mrb[33].mxu1  ;;  %v12839_v41 = vld [vmem:[#allocation10 + $0x300] ss:$16 sps:$4 sm:$0xff]  }
 0x5a9   :  { %v3943_v47 = vpop.f32.mrb[34].mxu1  ;;  %v12845_v33 = vld [vmem:[#allocation10 + $0x320] ss:$16 sps:$4 sm:$0xff]   ;;  %v12853_v45 = vld [vmem:[#allocation10 + $0x344] ss:$16 sps:$4 sm:$0xff]  }
 0x5aa   :  { %v12244_v51 = vpop.f32.mrb[35].mxu1  ;;  %4850 = vmatprep.mubr.bf16.mxu0 %v12046_v44  ;;  %4936 = vmatprep.mubr.bf16.mxu1 %v12046_v44  ;;  %v12848_v44 = vld [vmem:[#allocation10 + $0x328] ss:$16 sps:$4 sm:$0xff]  }
 0x5ab   :  { %v3986_v53 = vpop.f32.mrb[36].mxu0  ;;  %4851 = vmatmul.mubr.bf16.vlgmr.msra.gmra.mrb[44].mxu0 %v12045_v35  ;;  %4937 = vmatmul.mubr.bf16.vlgmr.msra.gmra.mrb[44].mxu1 %v12045_v35  ;;  %v12833_v35 = vld [vmem:[#allocation10 + $0x2e0] ss:$16 sps:$4 sm:$0xff]   ;;  %v12854_v47 = vld [vmem:[#allocation10 + $0x348] ss:$16 sps:$4 sm:$0xff]  }
 0x5ac   :  { %4862 = vmatpush1.bf16.msra.mxu0 %v12791_v46  ;;  %4948 = vmatpush1.bf16.msra.mxu1 %v12794_v37  ;;  %v12249_v57 = vpop.f32.mrb[37].mxu0  ;;  %v12856_v46 = vld [vmem:[#allocation10 + $0x34c] ss:$16 sps:$4 sm:$0xff]   ;;  %v12851_v37 = vld [vmem:[#allocation10 + $0x340] ss:$16 sps:$4 sm:$0xff]  }
 0x5ad   :  { %v3989_v60 = vpop.f32.mrb[38].mxu0  ;;  %4863 = vmatprep.subr.bf16.mxu0 %v12799_v48  ;;  %4949 = vmatprep.subr.bf16.mxu1 %v12802_v49  ;;  %v12859_v48 = vld [vmem:[#allocation10 + $0x364] ss:$16 sps:$4 sm:$0xff]   ;;  %v12862_v49 = vld [vmem:[#allocation10 + $0x36c] ss:$16 sps:$4 sm:$0xff]  }
 0x5ae   :  { %v12250_v62 = vpop.f32.mrb[39].mxu0  ;;  %v12857_v51 = vld [vmem:[#allocation10 + $0x360] ss:$16 sps:$4 sm:$0xff]   ;;  %v12865_v57 = vld [vmem:[#allocation10 + $0x384] ss:$16 sps:$4 sm:$0xff]  }
 0x5af   :  { %v4032_v0 = vpop.f32.mrb[36].mxu1  ;;  %v12866_v60 = vld [vmem:[#allocation10 + $0x388] ss:$16 sps:$4 sm:$0xff]   ;;  %v12869_v62 = vld [vmem:[#allocation10 + $0x3a0] ss:$16 sps:$4 sm:$0xff]  }
 0x5b0   :  { %v14256_v56 = vpack.c.bf16 %v4032_v0, %v3986_v53  ;;  %4864 = vmatpush1.bf16.msra.mxu0 %v12797_v58  ;;  %4950 = vmatpush1.bf16.msra.mxu1 %v12800_v59  ;;  %v12255_v1 = vpop.f32.mrb[37].mxu1  ;;  %v12860_v53 = vld [vmem:[#allocation10 + $0x368] ss:$16 sps:$4 sm:$0xff]   ;;  %v12868_v58 = vld [vmem:[#allocation10 + $0x38c] ss:$16 sps:$4 sm:$0xff]  }
 0x5b1   :  { %v4035_v11 = vpop.f32.mrb[38].mxu1  ;;  %4865 = vmatprep.subr.bf16.mxu0 %v12805_v5  ;;  %4951 = vmatprep.subr.bf16.mxu1 %v12808_v61  ;;  %v12863_v59 = vld [vmem:[#allocation10 + $0x380] ss:$16 sps:$4 sm:$0xff]   ;;  %v12871_v5 = vld [vmem:[#allocation10 + $0x3a4] ss:$16 sps:$4 sm:$0xff]  }
 0x5b2   :  { %v12256_v4 = vpop.f32.mrb[39].mxu1  ;;  %v12874_v61 = vld [vmem:[#allocation10 + $0x3ac] ss:$16 sps:$4 sm:$0xff]   ;;  %v12872_v0 = vld [vmem:[#allocation10 + $0x3a8] ss:$16 sps:$4 sm:$0xff]  }
 0x5b3   :  { %v4078_v6 = vpop.f32.mrb[40].mxu0  ;;  %v12877_v1 = vld [vmem:[#allocation10 + $0x3c4] ss:$16 sps:$4 sm:$0xff]   ;;  %v12878_v11 = vld [vmem:[#allocation10 + $0x3c8] ss:$16 sps:$4 sm:$0xff]  }
 0x5b4   :  { %4866 = vmatpush1.bf16.msra.mxu0 %v12803_v2  ;;  %4952 = vmatpush1.bf16.msra.mxu1 %v12806_v50  ;;  %v12261_v23 = vpop.f32.mrb[41].mxu0  ;;  %v12880_v2 = vld [vmem:[#allocation10 + $0x3cc] ss:$16 sps:$4 sm:$0xff]   ;;  %v12875_v50 = vld [vmem:[#allocation10 + $0x3c0] ss:$16 sps:$4 sm:$0xff]  }
 0x5b5   :  { %v4081_v9 = vpop.f32.mrb[42].mxu0  ;;  %4867 = vmatprep.subr.bf16.mxu0 %v12811_v3  ;;  %4953 = vmatprep.subr.bf16.mxu1 %v12814_v63  ;;  %v12883_v3 = vld [vmem:[#allocation10 + $0x3e4] ss:$16 sps:$4 sm:$0xff]   ;;  %v12886_v63 = vld [vmem:[#allocation10 + $0x3ec] ss:$16 sps:$4 sm:$0xff]  }
 0x5b6   :  { %v12262_v12 = vpop.f32.mrb[43].mxu0  ;;  %v12881_v4 = vld [vmem:[#allocation10 + $0x3e0] ss:$16 sps:$4 sm:$0xff]   ;;  %v12892_v9 = vld [vmem:[#allocation11 + $0xc] ss:$16 sps:$4 sm:$0xff]  }
 0x5b7   :  { %v4124_v14 = vpop.f32.mrb[40].mxu1  ;;  %v12887_v23 = vld [vmem:[#allocation11] ss:$16 sps:$4 sm:$0xff]  }
 0x5b8   :  { %v12048_v15 = vpack.c.bf16 %v4124_v14, %v4078_v6  ;;  %4868 = vmatpush1.bf16.msra.mxu0 %v12809_v7  ;;  %4954 = vmatpush1.bf16.msra.mxu1 %v12812_v32  ;;  %v12267_v16 = vpop.f32.mrb[41].mxu1  ;;  %v12884_v6 = vld [vmem:[#allocation10 + $0x3e8] ss:$16 sps:$4 sm:$0xff]   ;;  %v12889_v7 = vld [vmem:[#allocation11 + $0x4] ss:$16 sps:$4 sm:$0xff]  }
 0x5b9   :  { %v4127_v13 = vpop.f32.mrb[42].mxu1  ;;  %4869 = vmatprep.subr.bf16.mxu0 %v12817_v8  ;;  %4955 = vmatprep.subr.bf16.mxu1 %v12820_v10  ;;  %v12890_v32 = vld [vmem:[#allocation11 + $0x8] ss:$16 sps:$4 sm:$0xff]   ;;  %v12895_v8 = vld [vmem:[#allocation11 + $0x24] ss:$16 sps:$4 sm:$0xff]  }
 0x5ba   :  { %v12268_v25 = vpop.f32.mrb[43].mxu1  ;;  %4893 = vmatprep.mubr.bf16.mxu0 %v12048_v15  ;;  %4979 = vmatprep.mubr.bf16.mxu1 %v12048_v15  ;;  %v12898_v10 = vld [vmem:[#allocation11 + $0x2c] ss:$16 sps:$4 sm:$0xff]   ;;  %v12893_v12 = vld [vmem:[#allocation11 + $0x20] ss:$16 sps:$4 sm:$0xff]  }
 0x5bb   :  { %v12896_v14 = vld [vmem:[#allocation11 + $0x28] ss:$16 sps:$4 sm:$0xff]   ;;  %v12901_v15 = vld [vmem:[#allocation11 + $0x44] ss:$16 sps:$4 sm:$0xff]   ;;  %v12904_v16 = vld [vmem:[#allocation11 + $0x4c] ss:$16 sps:$4 sm:$0xff]  }
 0x5bc   :  { %4870 = vmatpush1.bf16.msra.mxu0 %v12815_v18  ;;  %4956 = vmatpush1.bf16.msra.mxu1 %v12818_v20  ;;  %v12899_v18 = vld [vmem:[#allocation11 + $0x40] ss:$16 sps:$4 sm:$0xff]   ;;  %v12907_v20 = vld [vmem:[#allocation11 + $0x64] ss:$16 sps:$4 sm:$0xff]   ;;  %v12910_v13 = vld [vmem:[#allocation11 + $0x6c] ss:$16 sps:$4 sm:$0xff]  }
 0x5bd   :  { %4871 = vmatprep.subr.bf16.mxu0 %v12823_v22  ;;  %4957 = vmatprep.subr.bf16.mxu1 %v12826_v17  ;;  %v12905_v22 = vld [vmem:[#allocation11 + $0x60] ss:$16 sps:$4 sm:$0xff]   ;;  %v12908_v17 = vld [vmem:[#allocation11 + $0x68] ss:$16 sps:$4 sm:$0xff]   ;;  %v12913_v25 = vld [vmem:[#allocation11 + $0x84] ss:$16 sps:$4 sm:$0xff]  }
 0x5c0   :  { %4872 = vmatpush1.bf16.msra.mxu0 %v12821_v26  ;;  %4958 = vmatpush1.bf16.msra.mxu1 %v12824_v21  ;;  %v12916_v26 = vld [vmem:[#allocation11 + $0x8c] ss:$16 sps:$4 sm:$0xff]   ;;  %v12911_v21 = vld [vmem:[#allocation11 + $0x80] ss:$16 sps:$4 sm:$0xff]  }
 0x5c1   :  { %4873 = vmatprep.subr.bf16.mxu0 %v12829_v29  ;;  %4959 = vmatprep.subr.bf16.mxu1 %v12832_v27  ;;  %v12914_v29 = vld [vmem:[#allocation11 + $0x88] ss:$16 sps:$4 sm:$0xff]   ;;  %v12919_v27 = vld [vmem:[#allocation11 + $0xa4] ss:$16 sps:$4 sm:$0xff]  }
 0x5c4   :  { %4874 = vmatpush1.bf16.msra.mxu0 %v12827_v31  ;;  %4960 = vmatpush1.bf16.msra.mxu1 %v12830_v28  ;;  %v12922_v31 = vld [vmem:[#allocation11 + $0xac] ss:$16 sps:$4 sm:$0xff]   ;;  %v12917_v28 = vld [vmem:[#allocation11 + $0xa0] ss:$16 sps:$4 sm:$0xff]  }
 0x5c5   :  { %4875 = vmatprep.subr.bf16.mxu0 %v12835_v34  ;;  %4961 = vmatprep.subr.bf16.mxu1 %v12838_v36  ;;  %v12920_v34 = vld [vmem:[#allocation11 + $0xa8] ss:$16 sps:$4 sm:$0xff]   ;;  %v12925_v36 = vld [vmem:[#allocation11 + $0xc4] ss:$16 sps:$4 sm:$0xff]  }
 0x5c8   :  { %4876 = vmatpush1.bf16.msra.mxu0 %v12833_v35  ;;  %4962 = vmatpush1.bf16.msra.mxu1 %v12836_v38  ;;  %v12928_v35 = vld [vmem:[#allocation11 + $0xcc] ss:$16 sps:$4 sm:$0xff]   ;;  %v12923_v38 = vld [vmem:[#allocation11 + $0xc0] ss:$16 sps:$4 sm:$0xff]  }
 0x5c9   :  { %4877 = vmatprep.subr.bf16.mxu0 %v12841_v39  ;;  %4963 = vmatprep.subr.bf16.mxu1 %v12844_v40  ;;  %v12926_v39 = vld [vmem:[#allocation11 + $0xc8] ss:$16 sps:$4 sm:$0xff]   ;;  %v12931_v40 = vld [vmem:[#allocation11 + $0xe4] ss:$16 sps:$4 sm:$0xff]  }
 0x5cc   :  { %4878 = vmatpush1.bf16.msra.mxu0 %v12839_v41  ;;  %4964 = vmatpush1.bf16.msra.mxu1 %v12842_v42  ;;  %v12934_v41 = vld [vmem:[#allocation11 + $0xec] ss:$16 sps:$4 sm:$0xff]   ;;  %v12929_v42 = vld [vmem:[#allocation11 + $0xe0] ss:$16 sps:$4 sm:$0xff]  }
 0x5cd   :  { %4879 = vmatprep.subr.bf16.mxu0 %v12847_v24  ;;  %4965 = vmatprep.subr.bf16.mxu1 %v12850_v43  ;;  %v12932_v24 = vld [vmem:[#allocation11 + $0xe8] ss:$16 sps:$4 sm:$0xff]   ;;  %v12937_v43 = vld [vmem:[#allocation11 + $0x104] ss:$16 sps:$4 sm:$0xff]  }
 0x5d0   :  { %4880 = vmatpush1.bf16.msra.mxu0 %v12845_v33  ;;  %4966 = vmatpush1.bf16.msra.mxu1 %v12848_v44  ;;  %v12940_v33 = vld [vmem:[#allocation11 + $0x10c] ss:$16 sps:$4 sm:$0xff]   ;;  %v12935_v44 = vld [vmem:[#allocation11 + $0x100] ss:$16 sps:$4 sm:$0xff]  }
 0x5d1   :  { %4881 = vmatprep.subr.bf16.mxu0 %v12853_v45  ;;  %4967 = vmatprep.subr.bf16.mxu1 %v12856_v46  ;;  %v12938_v45 = vld [vmem:[#allocation11 + $0x108] ss:$16 sps:$4 sm:$0xff]   ;;  %v14261_v46 = vsub.s32 3, %v14115_v54 }
 0x5d4   :  { %4882 = vmatpush1.bf16.msra.mxu0 %v12851_v37  ;;  %4968 = vmatpush1.bf16.msra.mxu1 %v12854_v47  ;;  %v14263_v37 = vld [vmem:[#allocation19] sm:$0xff] }
 0x5d5   :  { %4883 = vmatprep.subr.bf16.mxu0 %v12859_v48  ;;  %4969 = vmatprep.subr.bf16.mxu1 %v12862_v49  ;;  %v4165_v47 = vrot.slane %v14263_v37, %v14261_v46  ;;  %v14267_v48 = vld [vmem:[#allocation19 + $0x10] sm:$0xff] }
 0x5d6   :  { %v4173_v49 = vrot.slane %v14267_v48, %v14261_v46 }
 0x5d8   :  { %4884 = vmatpush1.bf16.msra.mxu0 %v12857_v51  ;;  %4970 = vmatpush1.bf16.msra.mxu1 %v12860_v53  ;;  %v14271_v51 = vld [vmem:[#allocation19 + $0x8] sm:$0xff] }
 0x5d9   :  { %4885 = vmatprep.subr.bf16.mxu0 %v12865_v57  ;;  %4971 = vmatprep.subr.bf16.mxu1 %v12868_v58  ;;  %v4169_v53 = vrot.slane %v14271_v51, %v14261_v46  ;;  %v14275_v57 = vld [vmem:[#allocation19 + $0x18] sm:$0xff] }
 0x5da   :  { %v4177_v58 = vrot.slane %v14275_v57, %v14261_v46 }
 0x5dc   :  { %4886 = vmatpush1.bf16.msra.mxu0 %v12863_v59  ;;  %4972 = vmatpush1.bf16.msra.mxu1 %v12866_v60  ;;  %v13443_v59 = vld [vmem:[#allocation2] sm:$0xff] }
 0x5dd   :  { %4887 = vmatprep.subr.bf16.mxu0 %v12871_v5  ;;  %4973 = vmatprep.subr.bf16.mxu1 %v12874_v61  ;;  %v4990_v60 = vunpack.c.l.bf16 %v13443_v59  ;;  %v13444_v5 = vld [vmem:[#allocation2 + $0x8] sm:$0xff] }
 0x5de   :  { %v4992_v61 = vunpack.c.l.bf16 %v13444_v5 }
 0x5e0   :  { %4888 = vmatpush1.bf16.msra.mxu0 %v12869_v62  ;;  %4974 = vmatpush1.bf16.msra.mxu1 %v12872_v0 }
 0x5e1   :  { %4889 = vmatprep.subr.bf16.mxu0 %v12877_v1  ;;  %4975 = vmatprep.subr.bf16.mxu1 %v12880_v2  ;;  %v4991_v1 = vunpack.c.h.bf16 %v13443_v59 }
 0x5e4   :  { %4890 = vmatpush1.bf16.msra.mxu0 %v12875_v50  ;;  %4976 = vmatpush1.bf16.msra.mxu1 %v12878_v11 }
 0x5e5   :  { %4891 = vmatprep.subr.bf16.mxu0 %v12883_v3  ;;  %4977 = vmatprep.subr.bf16.mxu1 %v12886_v63  ;;  %v13445_v63 = vld [vmem:[#allocation2 + $0x10] sm:$0xff] }
 0x5e8   :  { %4892 = vmatpush1.bf16.msra.mxu0 %v12881_v4  ;;  %4978 = vmatpush1.bf16.msra.mxu1 %v12884_v6  ;;  %v4994_v4 = vunpack.c.l.bf16 %v13445_v63  ;;  %v13446_v6 = vld [vmem:[#allocation2 + $0x18] sm:$0xff] }
 0x5e9   :  { %6282 = vmatprep.subr.bf16.mxu0 %v12889_v7  ;;  %6368 = vmatprep.subr.bf16.mxu1 %v12892_v9  ;;  %v4993_v9 = vunpack.c.h.bf16 %v13444_v5  ;;  %v12943_v5 = vld [vmem:[#allocation11 + $0x124] ss:$16 sps:$4 sm:$0xff]  }
 0x5eb   :  { %4894 = vmatmul.mubr.bf16.vlgmr.msra.gmra.mrb[44].mxu0 %v14256_v56  ;;  %4980 = vmatmul.mubr.bf16.vlgmr.msra.gmra.mrb[44].mxu1 %v14256_v56  ;;  %v12902_v56 = vld [vmem:[#allocation11 + $0x48] ss:$16 sps:$4 sm:$0xff]  }
 0x5ec   :  { %6283 = vmatpush1.bf16.msra.mxu0 %v12887_v23  ;;  %6369 = vmatpush1.bf16.msra.mxu1 %v12890_v32  ;;  %v4996_v23 = vunpack.c.l.bf16 %v13446_v6 }
 0x5ed   :  { %6284 = vmatprep.subr.bf16.mxu0 %v12895_v8  ;;  %6370 = vmatprep.subr.bf16.mxu1 %v12898_v10 }
 0x5f0   :  { %6285 = vmatpush1.bf16.msra.mxu0 %v12893_v12  ;;  %6371 = vmatpush1.bf16.msra.mxu1 %v12896_v14  ;;  %v4995_v12 = vunpack.c.h.bf16 %v13445_v63  ;;  %v12958_v63 = vld [vmem:[#allocation11 + $0x16c] ss:$16 sps:$4 sm:$0xff]  }
 0x5f1   :  { %6286 = vmatprep.subr.bf16.mxu0 %v12901_v15  ;;  %6372 = vmatprep.subr.bf16.mxu1 %v12904_v16 }
 0x5f4   :  { %6287 = vmatpush1.bf16.msra.mxu0 %v12899_v18  ;;  %6373 = vmatpush1.bf16.msra.mxu1 %v12902_v56 }
 0x5f5   :  { %6288 = vmatprep.subr.bf16.mxu0 %v12907_v20  ;;  %6374 = vmatprep.subr.bf16.mxu1 %v12910_v13 }
 0x5f8   :  { %6289 = vmatpush1.bf16.msra.mxu0 %v12905_v22  ;;  %6375 = vmatpush1.bf16.msra.mxu1 %v12908_v17  ;;  %v4997_v17 = vunpack.c.h.bf16 %v13446_v6  ;;  %v12956_v6 = vld [vmem:[#allocation11 + $0x168] ss:$16 sps:$4 sm:$0xff]  }
 0x5f9   :  { %6290 = vmatprep.subr.bf16.mxu0 %v12913_v25  ;;  %6376 = vmatprep.subr.bf16.mxu1 %v12916_v26 }
 0x5fc   :  { %6291 = vmatpush1.bf16.msra.mxu0 %v12911_v21  ;;  %6377 = vmatpush1.bf16.msra.mxu1 %v12914_v29 }
 0x5fd   :  { %6292 = vmatprep.subr.bf16.mxu0 %v12919_v27  ;;  %6378 = vmatprep.subr.bf16.mxu1 %v12922_v31 }
 0x600   :  { %6293 = vmatpush1.bf16.msra.mxu0 %v12917_v28  ;;  %6379 = vmatpush1.bf16.msra.mxu1 %v12920_v34 }
 0x601   :  { %6294 = vmatprep.subr.bf16.mxu0 %v12925_v36  ;;  %6380 = vmatprep.subr.bf16.mxu1 %v12928_v35 }
 0x604   :  { %6295 = vmatpush1.bf16.msra.mxu0 %v12923_v38  ;;  %6381 = vmatpush1.bf16.msra.mxu1 %v12926_v39 }
 0x605   :  { %6296 = vmatprep.subr.bf16.mxu0 %v12931_v40  ;;  %6382 = vmatprep.subr.bf16.mxu1 %v12934_v41 }
 0x608   :  { %6297 = vmatpush1.bf16.msra.mxu0 %v12929_v42  ;;  %6383 = vmatpush1.bf16.msra.mxu1 %v12932_v24 }
 0x609   :  { %6298 = vmatprep.subr.bf16.mxu0 %v12937_v43  ;;  %6384 = vmatprep.subr.bf16.mxu1 %v12940_v33 }
 0x60c   :  { %6299 = vmatpush1.bf16.msra.mxu0 %v12935_v44  ;;  %6385 = vmatpush1.bf16.msra.mxu1 %v12938_v45 }
 0x60d   :  { %6300 = vmatprep.subr.bf16.mxu0 %v12943_v5 }
 0x6be   :  { %v4895_v62 = vpop.f32.mrb[44].mxu0  ;;  %v4981_v0 = vpop.f32.mrb[44].mxu1 }
 0x6bf   :  { %v12373_v2 = vadd.f32 %v4895_v62, %v4165_v47  ;;  %v12377_v50 = vadd.f32 %v4981_v0, %v4173_v49  ;;  %v4897_v11 = vpop.f32.mrb[45].mxu0  ;;  %v4983_v3 = vpop.f32.mrb[45].mxu1  ;;  %v12941_v62 = vld [vmem:[#allocation11 + $0x120] ss:$16 sps:$4 sm:$0xff]   ;;  %v12944_v0 = vld [vmem:[#allocation11 + $0x128] ss:$16 sps:$4 sm:$0xff]  }
 0x6c0   :  { %v12374_v7 = vadd.f32 %v4897_v11, %v4169_v53  ;;  %v12378_v32 = vadd.f32 %v4983_v3, %v4177_v58  ;;  %v4899_v8 = vpop.f32.mrb[46].mxu0  ;;  %v4985_v10 = vpop.f32.mrb[46].mxu1  ;;  %6301 = vmatpush1.bf16.msra.mxu0 %v12941_v62  ;;  %v12950_v11 = vld [vmem:[#allocation11 + $0x148] ss:$16 sps:$4 sm:$0xff]   ;;  %v12955_v3 = vld [vmem:[#allocation11 + $0x164] ss:$16 sps:$4 sm:$0xff]  }
 0x6c1   :  { %v14279_v14 = vadd.f32 %v12373_v2, %v4990_v60  ;;  %v14281_v15 = vadd.f32 %v12377_v50, %v4992_v61  ;;  %v12375_v16 = vadd.f32 %v4899_v8, %v4165_v47  ;;  %v12379_v18 = vadd.f32 %v4985_v10, %v4173_v49  ;;  %v4901_v56 = vpop.f32.mrb[47].mxu0  ;;  %v4987_v20 = vpop.f32.mrb[47].mxu1  ;;  %v12946_v61 = vld [vmem:[#allocation11 + $0x12c] ss:$16 sps:$4 sm:$0xff]   ;;  %v12947_v50 = vld [vmem:[#allocation11 + $0x140] ss:$16 sps:$4 sm:$0xff]  }
 0x6c2   :  { %v14283_v13 = vadd.f32 %v12374_v7, %v4991_v1  ;;  %v12376_v22 = vadd.f32 %v4901_v56, %v4169_v53  ;;  %v12380_v29 = vadd.f32 %v4987_v20, %v4177_v58  ;;  %v14297_v34 = vadd.f32 %v12378_v32, %v4993_v9  ;;  %6386 = vmatprep.subr.bf16.mxu1 %v12946_v61  ;;  %v12949_v1 = vld [vmem:[#allocation11 + $0x144] ss:$16 sps:$4 sm:$0xff]   ;;  %v12952_v2 = vld [vmem:[#allocation11 + $0x14c] ss:$16 sps:$4 sm:$0xff]   ;;  %v12959_v7 = vld [vmem:[#allocation11 + $0x180] ss:$16 sps:$4 sm:$0xff]  }
 0x6c3   :  { %v5018_v25 = vmul.f32 %v14279_v14, %v14279_v14  ;;  %v14287_v26 = vadd.f32 %v12375_v16, %v4994_v4  ;;  %v14289_v21 = vadd.f32 %v12379_v18, %v4996_v23  ;;  %v5020_v35 = vmul.f32 %v14281_v15, %v14281_v15  ;;  %6387 = vmatpush1.bf16.msra.mxu1 %v12944_v0  ;;  %v12953_v4 = vld [vmem:[#allocation11 + $0x160] ss:$16 sps:$4 sm:$0xff]   ;;  %v12961_v23 = vld [vmem:[#allocation11 + $0x184] ss:$16 sps:$4 sm:$0xff]   ;;  %v12962_v32 = vld [vmem:[#allocation11 + $0x188] ss:$16 sps:$4 sm:$0xff]  }
 0x6c4   :  { %v5019_v27 = vmul.f32 %v14283_v13, %v14283_v13  ;;  %v14293_v31 = vadd.f32 %v12376_v22, %v4995_v12  ;;  %v5006_v28 = vadd.f32 %v14283_v13, %v14279_v14  ;;  %v14308_v42 = vadd.f32 %v12380_v29, %v4997_v17  ;;  %6302 = vmatprep.subr.bf16.mxu0 %v12949_v1  ;;  %v12964_v9 = vld [vmem:[#allocation11 + $0x18c] ss:$16 sps:$4 sm:$0xff]   ;;  %v12967_v8 = vld [vmem:[#allocation11 + $0x1a4] ss:$16 sps:$4 sm:$0xff]   ;;  %v12965_v12 = vld [vmem:[#allocation11 + $0x1a0] ss:$16 sps:$4 sm:$0xff]  }
 0x6c5   :  { %v5022_v36 = vmul.f32 %v14287_v26, %v14287_v26  ;;  %v5024_v24 = vmul.f32 %v14289_v21, %v14289_v21  ;;  %v5021_v49 = vmul.f32 %v14297_v34, %v14297_v34  ;;  %6388 = vmatprep.subr.bf16.mxu1 %v12952_v2  ;;  %6303 = vmatpush1.bf16.msra.mxu0 %v12947_v50  ;;  %v12970_v10 = vld [vmem:[#allocation11 + $0x1ac] ss:$16 sps:$4 sm:$0xff]   ;;  %v12968_v16 = vld [vmem:[#allocation11 + $0x1a8] ss:$16 sps:$4 sm:$0xff]   ;;  %v12973_v18 = vld [vmem:[#allocation11 + $0x1c4] ss:$16 sps:$4 sm:$0xff]  }
 0x6c6   :  { %v5023_v38 = vmul.f32 %v14293_v31, %v14293_v31  ;;  %v5007_v39 = vadd.f32 %v5006_v28, %v14281_v15  ;;  %v5011_v40 = vadd.f32 %v14293_v31, %v14287_v26  ;;  %v5026_v41 = vadd.f32 %v5019_v27, %v5018_v25  ;;  %6304 = vmatprep.subr.bf16.mxu0 %v12955_v3  ;;  %v12976_v56 = vld [vmem:[#allocation11 + $0x1cc] ss:$16 sps:$4 sm:$0xff]   ;;  %v12971_v20 = vld [vmem:[#allocation11 + $0x1c0] ss:$16 sps:$4 sm:$0xff]   ;;  %v12974_v22 = vld [vmem:[#allocation11 + $0x1c8] ss:$16 sps:$4 sm:$0xff]  }
 0x6c7   :  { %v5025_v59 = vmul.f32 %v14308_v42, %v14308_v42  ;;  %6389 = vmatpush1.bf16.msra.mxu1 %v12950_v11  ;;  %v12979_v17 = vld [vmem:[#allocation11 + $0x1e4] ss:$16 sps:$4 sm:$0xff]   ;;  %v12982_v25 = vld [vmem:[#allocation11 + $0x1ec] ss:$16 sps:$4 sm:$0xff]   ;;  %v12977_v29 = vld [vmem:[#allocation11 + $0x1e0] ss:$16 sps:$4 sm:$0xff]  }
 0x6c8   :  { %v5008_v43 = vadd.f32 %v5007_v39, %v14297_v34  ;;  %v5012_v33 = vadd.f32 %v5011_v40, %v14289_v21  ;;  %v5027_v44 = vadd.f32 %v5026_v41, %v5020_v35  ;;  %v5031_v45 = vadd.f32 %v5023_v38, %v5022_v36  ;;  %6390 = vmatprep.subr.bf16.mxu1 %v12958_v63  ;;  %v12980_v27 = vld [vmem:[#allocation11 + $0x1e8] ss:$16 sps:$4 sm:$0xff]   ;;  %v12985_v28 = vld [vmem:[#allocation11 + $0x204] ss:$16 sps:$4 sm:$0xff]   ;;  %v12988_v36 = vld [vmem:[#allocation11 + $0x20c] ss:$16 sps:$4 sm:$0xff]  }
 0x6c9   :  { %6305 = vmatpush1.bf16.msra.mxu0 %v12953_v4 }
 0x6ca   :  { %5009 = vadd.xlane.f32.xlu0 %v5008_v43  ;;  %v5013_v47 = vadd.f32 %v5012_v33, %v14308_v42  ;;  %v5032_v53 = vadd.f32 %v5031_v45, %v5024_v24  ;;  %v5028_v58 = vadd.f32 %v5027_v44, %v5021_v49  ;;  %6306 = vmatprep.subr.bf16.mxu0 %v12961_v23 }
 0x6cb   :  { %6391 = vmatpush1.bf16.msra.mxu1 %v12956_v6 }
 0x6cc   :  { %5014 = vadd.xlane.f32.xlu1 %v5013_v47  ;;  %v5033_v60 = vadd.f32 %v5032_v53, %v5025_v59  ;;  %6392 = vmatprep.subr.bf16.mxu1 %v12964_v9  ;;  %v14320_v59 = vsub.s32 4, %v14115_v54 }
 0x6cd   :  { %6307 = vmatpush1.bf16.msra.mxu0 %v12959_v7 }
 0x6ce   :  { %5029 = vadd.xlane.f32.xlu0 %v5028_v58  ;;  %6308 = vmatprep.subr.bf16.mxu0 %v12967_v8  ;;  %v5069_v5 = vrot.slane %v14271_v51, %v14320_v59  ;;  %v5065_v1 = vrot.slane %v14263_v37, %v14320_v59  ;;  %v5077_v63 = vrot.slane %v14275_v57, %v14320_v59 }
 0x6cf   :  { %6393 = vmatpush1.bf16.msra.mxu1 %v12962_v32 }
 0x6d0   :  { %5034 = vadd.xlane.f32.xlu1 %v5033_v60  ;;  %6394 = vmatprep.subr.bf16.mxu1 %v12970_v10  ;;  %v14323_v60 = vsub.s32 5, %v14115_v54 }
 0x6d1   :  { %6309 = vmatpush1.bf16.msra.mxu0 %v12965_v12 }
 0x6d2   :  { %6310 = vmatprep.subr.bf16.mxu0 %v12973_v18  ;;  %v5093_v11 = vrot.slane %v14271_v51, %v14323_v60 }
 0x6d3   :  { %6395 = vmatpush1.bf16.msra.mxu1 %v12968_v16 }
 0x6d4   :  { %6396 = vmatprep.subr.bf16.mxu1 %v12976_v56 }
 0x6d5   :  { %6311 = vmatpush1.bf16.msra.mxu0 %v12971_v20 }
 0x6d6   :  { %6312 = vmatprep.subr.bf16.mxu0 %v12979_v17 }
 0x6d7   :  { %6397 = vmatpush1.bf16.msra.mxu1 %v12974_v22 }
 0x6d8   :  { %6398 = vmatprep.subr.bf16.mxu1 %v12982_v25 }
 0x6d9   :  { %6313 = vmatpush1.bf16.msra.mxu0 %v12977_v29  ;;  %v12983_v29 = vld [vmem:[#allocation11 + $0x200] ss:$16 sps:$4 sm:$0xff]  }
 0x6da   :  { %6325 = vmatprep.subr.bf16.mxu0 %v12985_v28 }
 0x6db   :  { %6399 = vmatpush1.bf16.msra.mxu1 %v12980_v27  ;;  %v12986_v27 = vld [vmem:[#allocation11 + $0x208] ss:$16 sps:$4 sm:$0xff]  }
 0x6dc   :  { %6411 = vmatprep.subr.bf16.mxu1 %v12988_v36 }
 0x757   :  { %v5010_v35 = vpop.xlane.xlu0 %5009 }
 0x758   :  { %v5016_v38 = vmul.f32 0.03125, %v5010_v35  ;;  %v12994_v35 = vld [vmem:[#allocation11 + $0x22c] ss:$16 sps:$4 sm:$0xff]  }
 0x759   :  { %v5015_v39 = vpop.xlane.xlu1 %5014 }
 0x75a   :  { %v5017_v40 = vmul.f32 0.03125, %v5015_v39  ;;  %v5038_v24 = vmul.f32 %v5016_v38, %v5016_v38  ;;  %v5042_v61 = vsub.f32 %v14279_v14, %v5016_v38  ;;  %v5044_v62 = vsub.f32 %v14281_v15, %v5016_v38  ;;  %v12989_v39 = vld [vmem:[#allocation11 + $0x220] ss:$16 sps:$4 sm:$0xff]  }
 0x75b   :  { %v5030_v41 = vpop.xlane.xlu0 %5029  ;;  %v5043_v0 = vsub.f32 %v14283_v13, %v5016_v38  ;;  %v5045_v3 = vsub.f32 %v14297_v34, %v5016_v38 }
 0x75c   :  { %v5036_v43 = vmul.f32 0.03125, %v5030_v41  ;;  %v5039_v45 = vmul.f32 %v5017_v40, %v5017_v40  ;;  %v5046_v50 = vsub.f32 %v14287_v26, %v5017_v40  ;;  %v5047_v14 = vsub.f32 %v14293_v31, %v5017_v40  ;;  %v12997_v41 = vld [vmem:[#allocation11 + $0x244] ss:$16 sps:$4 sm:$0xff]  }
 0x75d   :  { %v5035_v33 = vpop.xlane.xlu1 %5034  ;;  %v5048_v23 = vsub.f32 %v14289_v21, %v5017_v40  ;;  %v5089_v26 = vrot.slane %v14263_v37, %v14323_v60  ;;  %v5049_v7 = vsub.f32 %v14308_v42, %v5017_v40  ;;  %v5101_v21 = vrot.slane %v14275_v57, %v14323_v60  ;;  %v12991_v57 = vld [vmem:[#allocation11 + $0x224] ss:$16 sps:$4 sm:$0xff]   ;;  %v12992_v40 = vld [vmem:[#allocation11 + $0x228] ss:$16 sps:$4 sm:$0xff]  }
 0x75e   :  { %v5040_v44 = vsub.f32 %v5036_v43, %v5038_v24  ;;  %v5037_v47 = vmul.f32 0.03125, %v5035_v33  ;;  %v13000_v24 = vld [vmem:[#allocation11 + $0x24c] ss:$16 sps:$4 sm:$0xff]   ;;  %v12995_v43 = vld [vmem:[#allocation11 + $0x240] ss:$16 sps:$4 sm:$0xff]  }
 0x75f   :  { %v12998_v33 = vld [vmem:[#allocation11 + $0x248] ss:$16 sps:$4 sm:$0xff]  }
 0x760   :  { %v5050_v49 = vadd.f32 1e-05, %v5040_v44  ;;  %v5041_v53 = vsub.f32 %v5037_v47, %v5039_v45  ;;  %v13003_v44 = vld [vmem:[#allocation11 + $0x264] ss:$16 sps:$4 sm:$0xff]   ;;  %v13006_v45 = vld [vmem:[#allocation11 + $0x26c] ss:$16 sps:$4 sm:$0xff]  }
 0x761   :  { %v13001_v47 = vld [vmem:[#allocation11 + $0x260] ss:$16 sps:$4 sm:$0xff]  }
 0x762   :  { %13395 = vrsqrt.f32 %v5050_v49  ;;  %v5051_v58 = vadd.f32 1e-05, %v5041_v53  ;;  %v13004_v49 = vld [vmem:[#allocation11 + $0x268] ss:$16 sps:$4 sm:$0xff]   ;;  %v13009_v53 = vld [vmem:[#allocation11 + $0x284] ss:$16 sps:$4 sm:$0xff]  }
 0x764   :  { %13397 = vrsqrt.f32 %v5051_v58  ;;  %v13012_v58 = vld [vmem:[#allocation11 + $0x28c] ss:$16 sps:$4 sm:$0xff]  }
 0x76c   :  { %v13396_v2 = vpop.eup %13395 }
 0x76d   :  { %v5055_v4 = vmul.f32 %v13396_v2, %v5043_v0  ;;  %v5054_v15 = vmul.f32 %v13396_v2, %v5042_v61  ;;  %v14339_v6 = vmul.f32 %v13396_v2, %v5044_v62  ;;  %v5057_v51 = vmul.f32 %v13396_v2, %v5045_v3  ;;  %v13010_v61 = vld [vmem:[#allocation11 + $0x288] ss:$16 sps:$4 sm:$0xff]   ;;  %v13015_v62 = vld [vmem:[#allocation11 + $0x2a4] ss:$16 sps:$4 sm:$0xff]   ;;  %v13018_v0 = vld [vmem:[#allocation11 + $0x2ac] ss:$16 sps:$4 sm:$0xff]  }
 0x76e   :  { %v13398_v13 = vpop.eup %13397  ;;  %v13016_v2 = vld [vmem:[#allocation11 + $0x2a8] ss:$16 sps:$4 sm:$0xff]   ;;  %v13019_v3 = vld [vmem:[#allocation11 + $0x2c0] ss:$16 sps:$4 sm:$0xff]  }
 0x76f   :  { %v5059_v32 = vmul.f32 %v13398_v13, %v5047_v14  ;;  %v5079_v34 = vmul.f32 %v5069_v5, %v5055_v4  ;;  %v5058_v9 = vmul.f32 %v13398_v13, %v5046_v50  ;;  %v5078_v8 = vmul.f32 %v5065_v1, %v5054_v15  ;;  %v13021_v50 = vld [vmem:[#allocation11 + $0x2c4] ss:$16 sps:$4 sm:$0xff]   ;;  %v13030_v4 = vld [vmem:[#allocation11 + $0x2ec] ss:$16 sps:$4 sm:$0xff]   ;;  %v13025_v15 = vld [vmem:[#allocation11 + $0x2e0] ss:$16 sps:$4 sm:$0xff]  }
 0x770   :  { %v5061_v10 = vmul.f32 %v13398_v13, %v5049_v7  ;;  %v14345_v12 = vmul.f32 %v13398_v13, %v5048_v23  ;;  %v5081_v18 = vmul.f32 %v5077_v63, %v5057_v51  ;;  %v13027_v14 = vld [vmem:[#allocation11 + $0x2e4] ss:$16 sps:$4 sm:$0xff]   ;;  %v13028_v13 = vld [vmem:[#allocation11 + $0x2e8] ss:$16 sps:$4 sm:$0xff]   ;;  %v13031_v7 = vld [vmem:[#allocation11 + $0x300] ss:$16 sps:$4 sm:$0xff]  }
 0x771   :  { %v5083_v31 = vmul.f32 %v5069_v5, %v5059_v32  ;;  %v5082_v16 = vmul.f32 %v5065_v1, %v5058_v9  ;;  %v14349_v20 = vadd.f32 %v5093_v11, %v5079_v34  ;;  %v14353_v42 = vadd.f32 %v5089_v26, %v5078_v8  ;;  %v13007_v5 = vld [vmem:[#allocation11 + $0x280] ss:$16 sps:$4 sm:$0xff]   ;;  %v13033_v23 = vld [vmem:[#allocation11 + $0x304] ss:$16 sps:$4 sm:$0xff]   ;;  %v13034_v51 = vld [vmem:[#allocation11 + $0x308] ss:$16 sps:$4 sm:$0xff]  }
 0x772   :  { %v5085_v56 = vmul.f32 %v5077_v63, %v5061_v10  ;;  %v14363_v36 = vadd.f32 %v5101_v21, %v5081_v18  ;;  %v13013_v1 = vld [vmem:[#allocation11 + $0x2a0] ss:$16 sps:$4 sm:$0xff]   ;;  %v13022_v63 = vld [vmem:[#allocation11 + $0x2c8] ss:$16 sps:$4 sm:$0xff]   ;;  %v13039_v32 = vld [vmem:[#allocation11 + $0x324] ss:$16 sps:$4 sm:$0xff]  }
 0x773   :  { %v14351_v37 = vadd.f32 %v5093_v11, %v5083_v31  ;;  %v14355_v22 = vadd.f32 %v5089_v26, %v5082_v16  ;;  %v13024_v11 = vld [vmem:[#allocation11 + $0x2cc] ss:$16 sps:$4 sm:$0xff]   ;;  %v13037_v9 = vld [vmem:[#allocation11 + $0x320] ss:$16 sps:$4 sm:$0xff]   ;;  %v13040_v8 = vld [vmem:[#allocation11 + $0x328] ss:$16 sps:$4 sm:$0xff]  }
 0x774   :  { %v14357_v17 = vadd.f32 %v5101_v21, %v5085_v56  ;;  %v13036_v26 = vld [vmem:[#allocation11 + $0x30c] ss:$16 sps:$4 sm:$0xff]   ;;  %v13045_v10 = vld [vmem:[#allocation11 + $0x344] ss:$16 sps:$4 sm:$0xff]   ;;  %v13043_v16 = vld [vmem:[#allocation11 + $0x340] ss:$16 sps:$4 sm:$0xff]  }
 0x775   :  { %v5111_v25 = vpack.c.bf16 %v14351_v37, %v14349_v20  ;;  %v5110_v28 = vpack.c.bf16 %v14355_v22, %v14353_v42  ;;  %v13042_v34 = vld [vmem:[#allocation11 + $0x32c] ss:$16 sps:$4 sm:$0xff]   ;;  %v13046_v18 = vld [vmem:[#allocation11 + $0x348] ss:$16 sps:$4 sm:$0xff]   ;;  %v13051_v56 = vld [vmem:[#allocation11 + $0x364] ss:$16 sps:$4 sm:$0xff]  }
 0x776   :  { %v5113_v38 = vpack.c.bf16 %v14357_v17, %v14363_v36  ;;  %v13048_v31 = vld [vmem:[#allocation11 + $0x34c] ss:$16 sps:$4 sm:$0xff]  }
 0x777   :  { %6314 = vmatprep.mubr.bf16.mxu0 %v5111_v25  ;;  %6400 = vmatprep.mubr.bf16.mxu1 %v5111_v25  ;;  %v13054_v21 = vld [vmem:[#allocation11 + $0x36c] ss:$16 sps:$4 sm:$0xff]   ;;  %v13049_v25 = vld [vmem:[#allocation11 + $0x360] ss:$16 sps:$4 sm:$0xff]  }
 0x778   :  { %6315 = vmatmul.mubr.bf16.vlgmr.msra.gmra.mrb[48].mxu0 %v5110_v28  ;;  %6401 = vmatmul.mubr.bf16.vlgmr.msra.gmra.mrb[48].mxu1 %v5110_v28  ;;  %v13060_v28 = vld [vmem:[#allocation11 + $0x38c] ss:$16 sps:$4 sm:$0xff]  }
 0x779   :  { %6326 = vmatpush1.bf16.msra.mxu0 %v12983_v29  ;;  %6412 = vmatpush1.bf16.msra.mxu1 %v12986_v27  ;;  %v13052_v29 = vld [vmem:[#allocation11 + $0x368] ss:$16 sps:$4 sm:$0xff]   ;;  %v13057_v27 = vld [vmem:[#allocation11 + $0x384] ss:$16 sps:$4 sm:$0xff]  }
 0x77a   :  { %6357 = vmatprep.mubr.bf16.mxu0 %v5113_v38  ;;  %6443 = vmatprep.mubr.bf16.mxu1 %v5113_v38  ;;  %v13063_v38 = vld [vmem:[#allocation11 + $0x3a4] ss:$16 sps:$4 sm:$0xff]  }
 0x77b   :  { %6327 = vmatprep.subr.bf16.mxu0 %v12991_v57  ;;  %6413 = vmatprep.subr.bf16.mxu1 %v12994_v35  ;;  %v13055_v57 = vld [vmem:[#allocation11 + $0x380] ss:$16 sps:$4 sm:$0xff]   ;;  %v13058_v35 = vld [vmem:[#allocation11 + $0x388] ss:$16 sps:$4 sm:$0xff]  }
 0x77d   :  { %6328 = vmatpush1.bf16.msra.mxu0 %v12989_v39  ;;  %6414 = vmatpush1.bf16.msra.mxu1 %v12992_v40  ;;  %v13066_v39 = vld [vmem:[#allocation11 + $0x3ac] ss:$16 sps:$4 sm:$0xff]   ;;  %v13061_v40 = vld [vmem:[#allocation11 + $0x3a0] ss:$16 sps:$4 sm:$0xff]  }
 0x77e   :  { %6329 = vmatprep.subr.bf16.mxu0 %v12997_v41  ;;  %6415 = vmatprep.subr.bf16.mxu1 %v13000_v24  ;;  %v13064_v41 = vld [vmem:[#allocation11 + $0x3a8] ss:$16 sps:$4 sm:$0xff]   ;;  %v13069_v24 = vld [vmem:[#allocation11 + $0x3c4] ss:$16 sps:$4 sm:$0xff]  }
 0x781   :  { %6330 = vmatpush1.bf16.msra.mxu0 %v12995_v43  ;;  %6416 = vmatpush1.bf16.msra.mxu1 %v12998_v33  ;;  %v13072_v43 = vld [vmem:[#allocation11 + $0x3cc] ss:$16 sps:$4 sm:$0xff]   ;;  %v5073_v33 = vrot.slane %v14267_v48, %v14320_v59 }
 0x782   :  { %6331 = vmatprep.subr.bf16.mxu0 %v13003_v44  ;;  %6417 = vmatprep.subr.bf16.mxu1 %v13006_v45  ;;  %v13067_v44 = vld [vmem:[#allocation11 + $0x3c0] ss:$16 sps:$4 sm:$0xff]   ;;  %v13070_v45 = vld [vmem:[#allocation11 + $0x3c8] ss:$16 sps:$4 sm:$0xff]  }
 0x785   :  { %6332 = vmatpush1.bf16.msra.mxu0 %v13001_v47  ;;  %6418 = vmatpush1.bf16.msra.mxu1 %v13004_v49  ;;  %v13075_v47 = vld [vmem:[#allocation11 + $0x3e4] ss:$16 sps:$4 sm:$0xff]   ;;  %v13078_v49 = vld [vmem:[#allocation11 + $0x3ec] ss:$16 sps:$4 sm:$0xff]  }
 0x786   :  { %6333 = vmatprep.subr.bf16.mxu0 %v13009_v53  ;;  %6419 = vmatprep.subr.bf16.mxu1 %v13012_v58  ;;  %v5084_v53 = vmul.f32 %v5073_v33, %v14345_v12  ;;  %v5242_v58 = vld [vmem:[#allocation13] sm:$0xff] }
 0x789   :  { %6334 = vmatpush1.bf16.msra.mxu0 %v13007_v5  ;;  %6420 = vmatpush1.bf16.msra.mxu1 %v13010_v61  ;;  %v5246_v5 = vld [vmem:[#allocation13 + $0x20] sm:$0xff]  ;;  %v5243_v61 = vld [vmem:[#allocation13 + $0x8] sm:$0xff] }
 0x78a   :  { %6335 = vmatprep.subr.bf16.mxu0 %v13015_v62  ;;  %6421 = vmatprep.subr.bf16.mxu1 %v13018_v0  ;;  %v5247_v62 = vld [vmem:[#allocation13 + $0x28] sm:$0xff]  ;;  %v5080_v0 = vmul.f32 %v5073_v33, %v14339_v6  ;;  %v11548_v6 = vcombine.low %v5242_v58, %v5246_v5 }
 0x78b   :  { %v11551_v12 = vcombine.high %v5243_v61, %v5247_v62 }
 0x78d   :  { %6336 = vmatpush1.bf16.msra.mxu0 %v13013_v1  ;;  %6422 = vmatpush1.bf16.msra.mxu1 %v13016_v2  ;;  %v5097_v1 = vrot.slane %v14267_v48, %v14323_v60  ;;  %v13073_v2 = vld [vmem:[#allocation11 + $0x3e0] ss:$16 sps:$4 sm:$0xff]   ;;  %v11550_v48 = vcombine.low %v5243_v61, %v5247_v62 }
 0x78e   :  { %6337 = vmatprep.subr.bf16.mxu0 %v13021_v50  ;;  %6423 = vmatprep.subr.bf16.mxu1 %v13024_v11  ;;  %v13076_v50 = vld [vmem:[#allocation11 + $0x3e8] ss:$16 sps:$4 sm:$0xff]   ;;  %v5290_v62 = vld [vmem:[#allocation13 + $0x180] sm:$0xff] }
 0x78f   :  { %v14373_v11 = vadd.f32 %v5097_v1, %v5084_v53  ;;  %v5287_v53 = vld [vmem:[#allocation13 + $0x168] sm:$0xff] }
 0x791   :  { %6338 = vmatpush1.bf16.msra.mxu0 %v13019_v3  ;;  %6424 = vmatpush1.bf16.msra.mxu1 %v13022_v63  ;;  %v11549_v3 = vcombine.high %v5242_v58, %v5246_v5  ;;  %v5250_v63 = vld [vmem:[#allocation13 + $0x40] sm:$0xff] }
 0x792   :  { %6339 = vmatprep.subr.bf16.mxu0 %v13027_v14  ;;  %6425 = vmatprep.subr.bf16.mxu1 %v13030_v4  ;;  %v5254_v14 = vld [vmem:[#allocation13 + $0x60] sm:$0xff]  ;;  %v5251_v4 = vld [vmem:[#allocation13 + $0x48] sm:$0xff] }
 0x795   :  { %6340 = vmatpush1.bf16.msra.mxu0 %v13025_v15  ;;  %6426 = vmatpush1.bf16.msra.mxu1 %v13028_v13  ;;  %v5255_v15 = vld [vmem:[#allocation13 + $0x68] sm:$0xff]  ;;  %v14375_v13 = vadd.f32 %v5097_v1, %v5080_v0  ;;  %v5294_v1 = vld [vmem:[#allocation13 + $0x1a0] sm:$0xff] }
 0x796   :  { %6341 = vmatprep.subr.bf16.mxu0 %v13033_v23  ;;  %6427 = vmatprep.subr.bf16.mxu1 %v13036_v26  ;;  %v11557_v26 = vcombine.high %v5250_v63, %v5254_v14 }
 0x797   :  { %v5112_v23 = vpack.c.bf16 %v14373_v11, %v14375_v13 }
 0x799   :  { %6342 = vmatpush1.bf16.msra.mxu0 %v13031_v7  ;;  %6428 = vmatpush1.bf16.msra.mxu1 %v13034_v51  ;;  %v5258_v7 = vld [vmem:[#allocation13 + $0x80] sm:$0xff] }
 0x79a   :  { %6343 = vmatprep.subr.bf16.mxu0 %v13039_v32  ;;  %6429 = vmatprep.subr.bf16.mxu1 %v13042_v34  ;;  %v5262_v51 = vld [vmem:[#allocation13 + $0xa0] sm:$0xff]  ;;  %v11559_v32 = vcombine.high %v5251_v4, %v5255_v15  ;;  %v5259_v34 = vld [vmem:[#allocation13 + $0x88] sm:$0xff] }
 0x79d   :  { %6344 = vmatpush1.bf16.msra.mxu0 %v13037_v9  ;;  %6430 = vmatpush1.bf16.msra.mxu1 %v13040_v8  ;;  %v5263_v9 = vld [vmem:[#allocation13 + $0xa8] sm:$0xff]  ;;  %v14379_v8 = vld [vmem:[#allocation5 + $0x4] ss:$16 sps:$4 sm:$0xff]  }
 0x79e   :  { %6345 = vmatprep.subr.bf16.mxu0 %v13045_v10  ;;  %6431 = vmatprep.subr.bf16.mxu1 %v13048_v31  ;;  %v11556_v10 = vcombine.low %v5250_v63, %v5254_v14  ;;  %v11558_v31 = vcombine.low %v5251_v4, %v5255_v15  ;;  %v5298_v14 = vld [vmem:[#allocation13 + $0x1c0] sm:$0xff] }
 0x79f   :  { %v5302_v15 = vld [vmem:[#allocation13 + $0x1e0] sm:$0xff] }
 0x7a1   :  { %6346 = vmatpush1.bf16.msra.mxu0 %v13043_v16  ;;  %6432 = vmatpush1.bf16.msra.mxu1 %v13046_v18  ;;  %v11565_v16 = vcombine.high %v5258_v7, %v5262_v51  ;;  %v5266_v18 = vld [vmem:[#allocation13 + $0xc0] sm:$0xff] }
 0x7a2   :  { %6347 = vmatprep.subr.bf16.mxu0 %v13051_v56  ;;  %6433 = vmatprep.subr.bf16.mxu1 %v13054_v21  ;;  %v11567_v56 = vcombine.high %v5259_v34, %v5263_v9  ;;  %v5270_v21 = vld [vmem:[#allocation13 + $0xe0] sm:$0xff] }
 0x7a5   :  { %6348 = vmatpush1.bf16.msra.mxu0 %v13049_v25  ;;  %6434 = vmatpush1.bf16.msra.mxu1 %v13052_v29  ;;  %v5267_v25 = vld [vmem:[#allocation13 + $0xc8] sm:$0xff] }
 0x7a6   :  { %6349 = vmatprep.subr.bf16.mxu0 %v13057_v27  ;;  %6435 = vmatprep.subr.bf16.mxu1 %v13060_v28  ;;  %v5271_v29 = vld [vmem:[#allocation13 + $0xe8] sm:$0xff]  ;;  %v11564_v27 = vcombine.low %v5258_v7, %v5262_v51  ;;  %v11566_v28 = vcombine.low %v5259_v34, %v5263_v9  ;;  %v11605_v7 = vcombine.high %v5298_v14, %v5302_v15  ;;  %v5306_v51 = vld [vmem:[#allocation13 + $0x200] sm:$0xff] }
 0x7a7   :  { %v5310_v34 = vld [vmem:[#allocation13 + $0x220] sm:$0xff]  ;;  %v5307_v9 = vld [vmem:[#allocation13 + $0x208] sm:$0xff] }
 0x7a9   :  { %6350 = vmatpush1.bf16.msra.mxu0 %v13055_v57  ;;  %6436 = vmatpush1.bf16.msra.mxu1 %v13058_v35  ;;  %v11573_v57 = vcombine.high %v5266_v18, %v5270_v21  ;;  %v5274_v35 = vld [vmem:[#allocation13 + $0x100] sm:$0xff] }
 0x7aa   :  { %6351 = vmatprep.subr.bf16.mxu0 %v13063_v38  ;;  %6437 = vmatprep.subr.bf16.mxu1 %v13066_v39  ;;  %v11575_v38 = vcombine.high %v5267_v25, %v5271_v29  ;;  %v5278_v39 = vld [vmem:[#allocation13 + $0x120] sm:$0xff] }
 0x7ab   :  { %v11581_v33 = vcombine.high %v5274_v35, %v5278_v39  ;;  %v11580_v58 = vcombine.low %v5274_v35, %v5278_v39 }
 0x7ad   :  { %6352 = vmatpush1.bf16.msra.mxu0 %v13061_v40  ;;  %6438 = vmatpush1.bf16.msra.mxu1 %v13064_v41  ;;  %v5275_v40 = vld [vmem:[#allocation13 + $0x108] sm:$0xff] }
 0x7ae   :  { %6353 = vmatprep.subr.bf16.mxu0 %v13069_v24  ;;  %6439 = vmatprep.subr.bf16.mxu1 %v13072_v43  ;;  %v5279_v41 = vld [vmem:[#allocation13 + $0x128] sm:$0xff]  ;;  %v11572_v24 = vcombine.low %v5266_v18, %v5270_v21  ;;  %v11574_v43 = vcombine.low %v5267_v25, %v5271_v29  ;;  %v11613_v18 = vcombine.high %v5306_v51, %v5310_v34  ;;  %v5318_v25 = vld [vmem:[#allocation13 + $0x260] sm:$0xff] }
 0x7af   :  { %v11582_v5 = vcombine.low %v5275_v40, %v5279_v41  ;;  %v5315_v29 = vld [vmem:[#allocation13 + $0x248] sm:$0xff] }
 0x7b1   :  { %6354 = vmatpush1.bf16.msra.mxu0 %v13067_v44  ;;  %6440 = vmatpush1.bf16.msra.mxu1 %v13070_v45  ;;  %v5282_v44 = vld [vmem:[#allocation13 + $0x140] sm:$0xff]  ;;  %v11583_v45 = vcombine.high %v5275_v40, %v5279_v41  ;;  %v5323_v41 = vld [vmem:[#allocation13 + $0x288] sm:$0xff] }
 0x7b2   :  { %6355 = vmatprep.subr.bf16.mxu0 %v13075_v47  ;;  %6441 = vmatprep.subr.bf16.mxu1 %v13078_v49  ;;  %v5286_v47 = vld [vmem:[#allocation13 + $0x160] sm:$0xff]  ;;  %v5283_v49 = vld [vmem:[#allocation13 + $0x148] sm:$0xff] }
 0x7b3   :  { %v11589_v61 = vcombine.high %v5282_v44, %v5286_v47  ;;  %v11591_v0 = vcombine.high %v5283_v49, %v5287_v53  ;;  %v11590_v63 = vcombine.low %v5283_v49, %v5287_v53  ;;  %v5326_v40 = vld [vmem:[#allocation13 + $0x2a0] sm:$0xff]  ;;  %v5331_v53 = vld [vmem:[#allocation13 + $0x2c8] sm:$0xff] }
 0x7b4   :  { %v5334_v49 = vld [vmem:[#allocation13 + $0x2e0] sm:$0xff] }
 0x7b5   :  { %6356 = vmatpush1.bf16.msra.mxu0 %v13073_v2  ;;  %6442 = vmatpush1.bf16.msra.mxu1 %v13076_v50  ;;  %v5291_v2 = vld [vmem:[#allocation13 + $0x188] sm:$0xff] }
 0x7b6   :  { %7774 = vmatprep.subr.bf16.mxu0 %v11549_v3  ;;  %7880 = vmatprep.subr.bf16.mxu1 %v11551_v12  ;;  %v5295_v50 = vld [vmem:[#allocation13 + $0x1a8] sm:$0xff]  ;;  %v11588_v3 = vcombine.low %v5282_v44, %v5286_v47  ;;  %v11597_v12 = vcombine.high %v5290_v62, %v5294_v1 }
 0x7b7   :  { %v11599_v4 = vcombine.high %v5291_v2, %v5295_v50 }
 0x7b8   :  { %6358 = vmatmul.mubr.bf16.vlgmr.msra.gmra.mrb[48].mxu0 %v5112_v23  ;;  %6444 = vmatmul.mubr.bf16.vlgmr.msra.gmra.mrb[48].mxu1 %v5112_v23  ;;  %v11596_v23 = vcombine.low %v5290_v62, %v5294_v1 }
 0x7b9   :  { %7775 = vmatpush1.bf16.msra.mxu0 %v11548_v6  ;;  %7881 = vmatpush1.bf16.msra.mxu1 %v11550_v48  ;;  %v5299_v6 = vld [vmem:[#allocation13 + $0x1c8] sm:$0xff] }
 0x7ba   :  { %7776 = vmatprep.subr.bf16.mxu0 %v11557_v26  ;;  %7882 = vmatprep.subr.bf16.mxu1 %v11559_v32  ;;  %v5303_v48 = vld [vmem:[#allocation13 + $0x1e8] sm:$0xff]  ;;  %v11598_v26 = vcombine.low %v5291_v2, %v5295_v50  ;;  %v5342_v2 = vld [vmem:[#allocation13 + $0x320] sm:$0xff] }
 0x7bb   :  { %7806 = vmatprep.mubr.bf16.mxu0 %v14379_v8  ;;  %7912 = vmatprep.mubr.bf16.mxu1 %v14379_v8  ;;  %v11607_v32 = vcombine.high %v5299_v6, %v5303_v48  ;;  %v5339_v50 = vld [vmem:[#allocation13 + $0x308] sm:$0xff] }
 0x7bd   :  { %7777 = vmatpush1.bf16.msra.mxu0 %v11556_v10  ;;  %7883 = vmatpush1.bf16.msra.mxu1 %v11558_v31  ;;  %v5311_v10 = vld [vmem:[#allocation13 + $0x228] sm:$0xff]  ;;  %v11604_v31 = vcombine.low %v5298_v14, %v5302_v15 }
 0x7be   :  { %7778 = vmatprep.subr.bf16.mxu0 %v11565_v16  ;;  %7884 = vmatprep.subr.bf16.mxu1 %v11567_v56  ;;  %v11606_v16 = vcombine.low %v5299_v6, %v5303_v48  ;;  %v5314_v56 = vld [vmem:[#allocation13 + $0x240] sm:$0xff]  ;;  %v11615_v21 = vcombine.high %v5307_v9, %v5311_v10  ;;  %v5347_v48 = vld [vmem:[#allocation13 + $0x348] sm:$0xff] }
 0x7bf   :  { %v11621_v35 = vcombine.high %v5314_v56, %v5318_v25  ;;  %v5350_v6 = vld [vmem:[#allocation13 + $0x360] sm:$0xff] }
 0x7c1   :  { %7779 = vmatpush1.bf16.msra.mxu0 %v11564_v27  ;;  %7885 = vmatpush1.bf16.msra.mxu1 %v11566_v28  ;;  %v5319_v27 = vld [vmem:[#allocation13 + $0x268] sm:$0xff]  ;;  %v11612_v28 = vcombine.low %v5306_v51, %v5310_v34 }
 0x7c2   :  { %7780 = vmatprep.subr.bf16.mxu0 %v11573_v57  ;;  %7886 = vmatprep.subr.bf16.mxu1 %v11575_v38  ;;  %v11614_v57 = vcombine.low %v5307_v9, %v5311_v10  ;;  %v5322_v38 = vld [vmem:[#allocation13 + $0x280] sm:$0xff]  ;;  %v11623_v39 = vcombine.high %v5315_v29, %v5319_v27  ;;  %v5355_v10 = vld [vmem:[#allocation13 + $0x388] sm:$0xff] }
 0x7c3   :  { %v11629_v44 = vcombine.high %v5322_v38, %v5326_v40  ;;  %v5358_v9 = vld [vmem:[#allocation13 + $0x3a0] sm:$0xff] }
 0x7c5   :  { %7781 = vmatpush1.bf16.msra.mxu0 %v11572_v24  ;;  %7887 = vmatpush1.bf16.msra.mxu1 %v11574_v43  ;;  %v5327_v24 = vld [vmem:[#allocation13 + $0x2a8] sm:$0xff]  ;;  %v11620_v43 = vcombine.low %v5314_v56, %v5318_v25 }
 0x7c6   :  { %7782 = vmatprep.subr.bf16.mxu0 %v11581_v33  ;;  %7888 = vmatprep.subr.bf16.mxu1 %v11583_v45  ;;  %v11622_v33 = vcombine.low %v5315_v29, %v5319_v27  ;;  %v5330_v45 = vld [vmem:[#allocation13 + $0x2c0] sm:$0xff]  ;;  %v11631_v47 = vcombine.high %v5323_v41, %v5327_v24  ;;  %v5363_v27 = vld [vmem:[#allocation13 + $0x3c8] sm:$0xff] }
 0x7c7   :  { %v11637_v62 = vcombine.high %v5330_v45, %v5334_v49  ;;  %v5366_v29 = vld [vmem:[#allocation13 + $0x3e0] sm:$0xff] }
 0x7c9   :  { %7783 = vmatpush1.bf16.msra.mxu0 %v11580_v58  ;;  %7889 = vmatpush1.bf16.msra.mxu1 %v11582_v5  ;;  %v5335_v58 = vld [vmem:[#allocation13 + $0x2e8] sm:$0xff]  ;;  %v11628_v5 = vcombine.low %v5322_v38, %v5326_v40 }
 0x7ca   :  { %7784 = vmatprep.subr.bf16.mxu0 %v11589_v61  ;;  %7890 = vmatprep.subr.bf16.mxu1 %v11591_v0  ;;  %v11630_v61 = vcombine.low %v5323_v41, %v5327_v24  ;;  %v5338_v0 = vld [vmem:[#allocation13 + $0x300] sm:$0xff]  ;;  %v11639_v1 = vcombine.high %v5331_v53, %v5335_v58  ;;  %v5371_v24 = vld [vmem:[#allocation13 + $0x408] sm:$0xff] }
 0x7cb   :  { %v11645_v14 = vcombine.high %v5338_v0, %v5342_v2  ;;  %v5374_v41 = vld [vmem:[#allocation13 + $0x420] sm:$0xff] }
 0x7cd   :  { %7785 = vmatpush1.bf16.msra.mxu0 %v11588_v3  ;;  %7891 = vmatpush1.bf16.msra.mxu1 %v11590_v63  ;;  %v5343_v3 = vld [vmem:[#allocation13 + $0x328] sm:$0xff]  ;;  %v11636_v63 = vcombine.low %v5330_v45, %v5334_v49 }
 0x7ce   :  { %7786 = vmatprep.subr.bf16.mxu0 %v11597_v12  ;;  %7892 = vmatprep.subr.bf16.mxu1 %v11599_v4  ;;  %v11638_v12 = vcombine.low %v5331_v53, %v5335_v58  ;;  %v5346_v4 = vld [vmem:[#allocation13 + $0x340] sm:$0xff]  ;;  %v11647_v15 = vcombine.high %v5339_v50, %v5343_v3  ;;  %v5379_v58 = vld [vmem:[#allocation13 + $0x448] sm:$0xff] }
 0x7cf   :  { %v11653_v51 = vcombine.high %v5346_v4, %v5350_v6  ;;  %v5382_v53 = vld [vmem:[#allocation13 + $0x460] sm:$0xff] }
 0x7d1   :  { %7787 = vmatpush1.bf16.msra.mxu0 %v11596_v23  ;;  %7893 = vmatpush1.bf16.msra.mxu1 %v11598_v26  ;;  %v5351_v23 = vld [vmem:[#allocation13 + $0x368] sm:$0xff]  ;;  %v11644_v26 = vcombine.low %v5338_v0, %v5342_v2  ;;  %v5386_v2 = vld [vmem:[#allocation13 + $0x480] sm:$0xff] }
 0x7d2   :  { %7788 = vmatprep.subr.bf16.mxu0 %v11605_v7  ;;  %7894 = vmatprep.subr.bf16.mxu1 %v11607_v32  ;;  %v11646_v7 = vcombine.low %v5339_v50, %v5343_v3  ;;  %v5354_v32 = vld [vmem:[#allocation13 + $0x380] sm:$0xff]  ;;  %v11655_v34 = vcombine.high %v5347_v48, %v5351_v23 }
 0x7d3   :  { %v11661_v56 = vcombine.high %v5354_v32, %v5358_v9  ;;  %v5390_v50 = vld [vmem:[#allocation13 + $0x4a0] sm:$0xff] }
 0x7d5   :  { %7789 = vmatpush1.bf16.msra.mxu0 %v11604_v31  ;;  %7895 = vmatpush1.bf16.msra.mxu1 %v11606_v16  ;;  %v5359_v31 = vld [vmem:[#allocation13 + $0x3a8] sm:$0xff]  ;;  %v11652_v16 = vcombine.low %v5346_v4, %v5350_v6  ;;  %v11693_v6 = vcombine.high %v5386_v2, %v5390_v50 }
 0x7d6   :  { %7790 = vmatprep.subr.bf16.mxu0 %v11613_v18  ;;  %7896 = vmatprep.subr.bf16.mxu1 %v11615_v21  ;;  %v11654_v18 = vcombine.low %v5347_v48, %v5351_v23  ;;  %v5362_v21 = vld [vmem:[#allocation13 + $0x3c0] sm:$0xff]  ;;  %v11663_v25 = vcombine.high %v5355_v10, %v5359_v31 }
 0x7d7   :  { %v11669_v38 = vcombine.high %v5362_v21, %v5366_v29  ;;  %v5394_v48 = vld [vmem:[#allocation13 + $0x4c0] sm:$0xff] }
 0x7d9   :  { %7791 = vmatpush1.bf16.msra.mxu0 %v11612_v28  ;;  %7897 = vmatpush1.bf16.msra.mxu1 %v11614_v57  ;;  %v5367_v28 = vld [vmem:[#allocation13 + $0x3e8] sm:$0xff]  ;;  %v11660_v57 = vcombine.low %v5354_v32, %v5358_v9  ;;  %v14391_v32 = vld [vmem:[#allocation5 + $0x20] ss:$16 sps:$4 sm:$0xff]  }
 0x7da   :  { %7792 = vmatprep.subr.bf16.mxu0 %v11621_v35  ;;  %7898 = vmatprep.subr.bf16.mxu1 %v11623_v39  ;;  %v11662_v35 = vcombine.low %v5355_v10, %v5359_v31  ;;  %v5370_v39 = vld [vmem:[#allocation13 + $0x400] sm:$0xff]  ;;  %v11671_v40 = vcombine.high %v5363_v27, %v5367_v28 }
 0x7db   :  { %v11677_v45 = vcombine.high %v5370_v39, %v5374_v41  ;;  %v5402_v31 = vld [vmem:[#allocation13 + $0x500] sm:$0xff] }
 0x7dd   :  { %7793 = vmatpush1.bf16.msra.mxu0 %v11620_v43  ;;  %7899 = vmatpush1.bf16.msra.mxu1 %v11622_v33  ;;  %v5375_v43 = vld [vmem:[#allocation13 + $0x428] sm:$0xff]  ;;  %v11668_v33 = vcombine.low %v5362_v21, %v5366_v29 }
 0x7de   :  { %7794 = vmatprep.subr.bf16.mxu0 %v11629_v44  ;;  %7900 = vmatprep.subr.bf16.mxu1 %v11631_v47  ;;  %v11670_v44 = vcombine.low %v5363_v27, %v5367_v28  ;;  %v5378_v47 = vld [vmem:[#allocation13 + $0x440] sm:$0xff]  ;;  %v11679_v49 = vcombine.high %v5371_v24, %v5375_v43  ;;  %v11678_v0 = vcombine.low %v5371_v24, %v5375_v43  ;;  %v5407_v21 = vld [vmem:[#allocation13 + $0x528] sm:$0xff] }
 0x7df   :  { %v11684_v4 = vcombine.low %v5378_v47, %v5382_v53 }
 0x7e1   :  { %7795 = vmatpush1.bf16.msra.mxu0 %v11628_v5  ;;  %7901 = vmatpush1.bf16.msra.mxu1 %v11630_v61  ;;  %v5383_v5 = vld [vmem:[#allocation13 + $0x468] sm:$0xff]  ;;  %v14383_v61 = vld [vmem:[#allocation5] ss:$16 sps:$4 sm:$0xff]  }
 0x7e2   :  { %7796 = vmatprep.subr.bf16.mxu0 %v11637_v62  ;;  %7902 = vmatprep.subr.bf16.mxu1 %v11639_v1  ;;  %v11676_v62 = vcombine.low %v5370_v39, %v5374_v41  ;;  %v11685_v1 = vcombine.high %v5378_v47, %v5382_v53  ;;  %v11687_v3 = vcombine.high %v5379_v58, %v5383_v5  ;;  %v5411_v39 = vld [vmem:[#allocation13 + $0x548] sm:$0xff] }
 0x7e3   :  { %v5419_v47 = vld [vmem:[#allocation13 + $0x588] sm:$0xff] }
 0x7e5   :  { %7797 = vmatpush1.bf16.msra.mxu0 %v11636_v63  ;;  %7903 = vmatpush1.bf16.msra.mxu1 %v11638_v12  ;;  %v5387_v63 = vld [vmem:[#allocation13 + $0x488] sm:$0xff] }
 0x7e6   :  { %7798 = vmatprep.subr.bf16.mxu0 %v11645_v14  ;;  %7904 = vmatprep.subr.bf16.mxu1 %v11647_v15  ;;  %v5391_v12 = vld [vmem:[#allocation13 + $0x4a8] sm:$0xff]  ;;  %v14385_v14 = vld [vmem:[#allocation5 + $0x24] ss:$16 sps:$4 sm:$0xff]   ;;  %v11686_v15 = vcombine.low %v5379_v58, %v5383_v5 }
 0x7e7   :  { %v11695_v23 = vcombine.high %v5387_v63, %v5391_v12  ;;  %v11694_v9 = vcombine.low %v5387_v63, %v5391_v12 }
 0x7e9   :  { %7799 = vmatpush1.bf16.msra.mxu0 %v11644_v26  ;;  %7905 = vmatpush1.bf16.msra.mxu1 %v11646_v7  ;;  %v5398_v26 = vld [vmem:[#allocation13 + $0x4e0] sm:$0xff]  ;;  %v5395_v7 = vld [vmem:[#allocation13 + $0x4c8] sm:$0xff] }
 0x7ea   :  { %7800 = vmatprep.subr.bf16.mxu0 %v11653_v51  ;;  %7906 = vmatprep.subr.bf16.mxu1 %v11655_v34  ;;  %v5399_v51 = vld [vmem:[#allocation13 + $0x4e8] sm:$0xff]  ;;  %v11692_v34 = vcombine.low %v5386_v2, %v5390_v50  ;;  %v11701_v10 = vcombine.high %v5394_v48, %v5398_v26  ;;  %v11700_v29 = vcombine.low %v5394_v48, %v5398_v26 }
 0x7eb   :  { %v11702_v27 = vcombine.low %v5395_v7, %v5399_v51  ;;  %v5427_v2 = vld [vmem:[#allocation13 + $0x5c8] sm:$0xff] }
 0x7ec   :  { %v5431_v50 = vld [vmem:[#allocation13 + $0x5e8] sm:$0xff] }
 0x7ed   :  { %7801 = vmatpush1.bf16.msra.mxu0 %v11652_v16  ;;  %7907 = vmatpush1.bf16.msra.mxu1 %v11654_v18  ;;  %v5406_v16 = vld [vmem:[#allocation13 + $0x520] sm:$0xff]  ;;  %v11703_v18 = vcombine.high %v5395_v7, %v5399_v51  ;;  %v5435_v48 = vld [vmem:[#allocation13 + $0x608] sm:$0xff]  ;;  %v11734_v7 = vcombine.low %v5427_v2, %v5431_v50 }
 0x7ee   :  { %7802 = vmatprep.subr.bf16.mxu0 %v11661_v56  ;;  %7908 = vmatprep.subr.bf16.mxu1 %v11663_v25  ;;  %v5403_v56 = vld [vmem:[#allocation13 + $0x508] sm:$0xff]  ;;  %v11709_v28 = vcombine.high %v5402_v31, %v5406_v16  ;;  %v11708_v41 = vcombine.low %v5402_v31, %v5406_v16 }
 0x7ef   :  { %v14393_v25 = vld [vmem:[#allocation5 + $0xc] ss:$16 sps:$4 sm:$0xff]   ;;  %v11710_v24 = vcombine.low %v5403_v56, %v5407_v21 }
 0x7f0   :  { %v5443_v31 = vld [vmem:[#allocation13 + $0x648] sm:$0xff] }
 0x7f1   :  { %7803 = vmatpush1.bf16.msra.mxu0 %v11660_v57  ;;  %7909 = vmatpush1.bf16.msra.mxu1 %v11662_v35  ;;  %v5410_v57 = vld [vmem:[#allocation13 + $0x540] sm:$0xff]  ;;  %v11711_v35 = vcombine.high %v5403_v56, %v5407_v21  ;;  %v5447_v16 = vld [vmem:[#allocation13 + $0x668] sm:$0xff] }
 0x7f2   :  { %7804 = vmatprep.subr.bf16.mxu0 %v11669_v38  ;;  %7910 = vmatprep.subr.bf16.mxu1 %v11671_v40  ;;  %v5414_v38 = vld [vmem:[#allocation13 + $0x560] sm:$0xff]  ;;  %v5415_v40 = vld [vmem:[#allocation13 + $0x568] sm:$0xff] }
 0x7f3   :  { %v11717_v43 = vcombine.high %v5410_v57, %v5414_v38  ;;  %v11716_v53 = vcombine.low %v5410_v57, %v5414_v38  ;;  %v11718_v58 = vcombine.low %v5411_v39, %v5415_v40  ;;  %v5451_v57 = vld [vmem:[#allocation13 + $0x688] sm:$0xff] }
 0x7f5   :  { %7805 = vmatpush1.bf16.msra.mxu0 %v11668_v33  ;;  %7911 = vmatpush1.bf16.msra.mxu1 %v11670_v44  ;;  %v5418_v33 = vld [vmem:[#allocation13 + $0x580] sm:$0xff]  ;;  %v11719_v44 = vcombine.high %v5411_v39, %v5415_v40  ;;  %v11750_v39 = vcombine.low %v5443_v31, %v5447_v16 }
 0x7f6   :  { %7827 = vmatprep.subr.bf16.mxu0 %v11677_v45  ;;  %7933 = vmatprep.subr.bf16.mxu1 %v11679_v49  ;;  %v5422_v45 = vld [vmem:[#allocation13 + $0x5a0] sm:$0xff]  ;;  %v5423_v49 = vld [vmem:[#allocation13 + $0x5a8] sm:$0xff] }
 0x7f7   :  { %v11725_v5 = vcombine.high %v5418_v33, %v5422_v45  ;;  %v11726_v63 = vcombine.low %v5419_v47, %v5423_v49 }
 0x7f8   :  { %7807 = vmatmul.mubr.bf16.vlgmr.msra.gmra.mrb[52].mxu0 %v14383_v61  ;;  %7913 = vmatmul.mubr.bf16.vlgmr.msra.gmra.mrb[52].mxu1 %v14383_v61 }
 0x7f9   :  { %7828 = vmatpush1.bf16.msra.mxu0 %v11676_v62  ;;  %7934 = vmatpush1.bf16.msra.mxu1 %v11678_v0  ;;  %v5426_v62 = vld [vmem:[#allocation13 + $0x5c0] sm:$0xff]  ;;  %v11727_v0 = vcombine.high %v5419_v47, %v5423_v49 }
 0x7fa   :  { %7829 = vmatprep.subr.bf16.mxu0 %v11685_v1  ;;  %7935 = vmatprep.subr.bf16.mxu1 %v11687_v3  ;;  %v5430_v1 = vld [vmem:[#allocation13 + $0x5e0] sm:$0xff]  ;;  %v11724_v3 = vcombine.low %v5418_v33, %v5422_v45  ;;  %v5459_v33 = vld [vmem:[#allocation13 + $0x6c8] sm:$0xff] }
 0x7fb   :  { %7816 = vmatprep.mubr.bf16.mxu0 %v14385_v14  ;;  %7922 = vmatprep.mubr.bf16.mxu1 %v14385_v14  ;;  %v11733_v12 = vcombine.high %v5426_v62, %v5430_v1  ;;  %v11732_v26 = vcombine.low %v5426_v62, %v5430_v1  ;;  %v5467_v62 = vld [vmem:[#allocation13 + $0x708] sm:$0xff] }
 0x7fd   :  { %7830 = vmatpush1.bf16.msra.mxu0 %v11684_v4  ;;  %7936 = vmatpush1.bf16.msra.mxu1 %v11686_v15  ;;  %v5434_v4 = vld [vmem:[#allocation13 + $0x600] sm:$0xff]  ;;  %v11735_v15 = vcombine.high %v5427_v2, %v5431_v50 }
 0x7fe   :  { %7831 = vmatprep.subr.bf16.mxu0 %v11693_v6  ;;  %7937 = vmatprep.subr.bf16.mxu1 %v11695_v23  ;;  %v5438_v6 = vld [vmem:[#allocation13 + $0x620] sm:$0xff]  ;;  %v5439_v23 = vld [vmem:[#allocation13 + $0x628] sm:$0xff] }
 0x7ff   :  { %v11741_v51 = vcombine.high %v5434_v4, %v5438_v6  ;;  %v11742_v56 = vcombine.low %v5435_v48, %v5439_v23 }
 0x800   :  { %7817 = vmatmul.mubr.bf16.gmra.mrb[56].mxu0 %v14391_v32  ;;  %7923 = vmatmul.mubr.bf16.gmra.mrb[56].mxu1 %v14391_v32 }
 0x801   :  { %7832 = vmatpush1.bf16.msra.mxu0 %v11692_v34  ;;  %7938 = vmatpush1.bf16.msra.mxu1 %v11694_v9  ;;  %v5442_v34 = vld [vmem:[#allocation13 + $0x640] sm:$0xff]  ;;  %v11743_v9 = vcombine.high %v5435_v48, %v5439_v23 }
 0x802   :  { %7833 = vmatprep.subr.bf16.mxu0 %v11701_v10  ;;  %7939 = vmatprep.subr.bf16.mxu1 %v11703_v18  ;;  %v5446_v10 = vld [vmem:[#allocation13 + $0x660] sm:$0xff]  ;;  %v11740_v18 = vcombine.low %v5434_v4, %v5438_v6  ;;  %v5475_v4 = vld [vmem:[#allocation13 + $0x748] sm:$0xff] }
 0x803   :  { %7859 = vmatprep.mubr.bf16.mxu0 %v14393_v25  ;;  %7965 = vmatprep.mubr.bf16.mxu1 %v14393_v25  ;;  %v11749_v21 = vcombine.high %v5442_v34, %v5446_v10  ;;  %v11748_v38 = vcombine.low %v5442_v34, %v5446_v10  ;;  %v5483_v34 = vld [vmem:[#allocation13 + $0x788] sm:$0xff] }
 0x805   :  { %7834 = vmatpush1.bf16.msra.mxu0 %v11700_v29  ;;  %7940 = vmatpush1.bf16.msra.mxu1 %v11702_v27  ;;  %v5450_v29 = vld [vmem:[#allocation13 + $0x680] sm:$0xff]  ;;  %v11751_v27 = vcombine.high %v5443_v31, %v5447_v16 }
 0x806   :  { %7835 = vmatprep.subr.bf16.mxu0 %v11709_v28  ;;  %7941 = vmatprep.subr.bf16.mxu1 %v11711_v35  ;;  %v5454_v28 = vld [vmem:[#allocation13 + $0x6a0] sm:$0xff]  ;;  %v5455_v35 = vld [vmem:[#allocation13 + $0x6a8] sm:$0xff] }
 0x807   :  { %v11757_v40 = vcombine.high %v5450_v29, %v5454_v28  ;;  %v11756_v45 = vcombine.low %v5450_v29, %v5454_v28  ;;  %v11758_v47 = vcombine.low %v5451_v57, %v5455_v35  ;;  %v5491_v29 = vld [vmem:[#allocation13 + $0x7c8] sm:$0xff] }
 0x809   :  { %7836 = vmatpush1.bf16.msra.mxu0 %v11708_v41  ;;  %7942 = vmatpush1.bf16.msra.mxu1 %v11710_v24  ;;  %v5458_v41 = vld [vmem:[#allocation13 + $0x6c0] sm:$0xff]  ;;  %v11759_v24 = vcombine.high %v5451_v57, %v5455_v35 }
 0x80a   :  { %7837 = vmatprep.subr.bf16.mxu0 %v11717_v43  ;;  %7943 = vmatprep.subr.bf16.mxu1 %v11719_v44  ;;  %v5462_v43 = vld [vmem:[#allocation13 + $0x6e0] sm:$0xff]  ;;  %v5463_v44 = vld [vmem:[#allocation13 + $0x6e8] sm:$0xff] }
 0x80b   :  { %v11765_v49 = vcombine.high %v5458_v41, %v5462_v43  ;;  %v11764_v1 = vcombine.low %v5458_v41, %v5462_v43  ;;  %v11766_v2 = vcombine.low %v5459_v33, %v5463_v44  ;;  %v5245_v41 = vld [vmem:[#allocation13 + $0x18] sm:$0xff] }
 0x80d   :  { %7838 = vmatpush1.bf16.msra.mxu0 %v11716_v53  ;;  %7944 = vmatpush1.bf16.msra.mxu1 %v11718_v58  ;;  %v5466_v53 = vld [vmem:[#allocation13 + $0x700] sm:$0xff]  ;;  %v11767_v58 = vcombine.high %v5459_v33, %v5463_v44 }
 0x80e   :  { %7839 = vmatprep.subr.bf16.mxu0 %v11725_v5  ;;  %7945 = vmatprep.subr.bf16.mxu1 %v11727_v0  ;;  %v5470_v5 = vld [vmem:[#allocation13 + $0x720] sm:$0xff]  ;;  %v5471_v0 = vld [vmem:[#allocation13 + $0x728] sm:$0xff] }
 0x80f   :  { %v11773_v50 = vcombine.high %v5466_v53, %v5470_v5  ;;  %v11772_v6 = vcombine.low %v5466_v53, %v5470_v5  ;;  %v11774_v48 = vcombine.low %v5467_v62, %v5471_v0  ;;  %v5256_v53 = vld [vmem:[#allocation13 + $0x70] sm:$0xff]  ;;  %v5257_v5 = vld [vmem:[#allocation13 + $0x78] sm:$0xff] }
 0x811   :  { %7840 = vmatpush1.bf16.msra.mxu0 %v11724_v3  ;;  %7946 = vmatpush1.bf16.msra.mxu1 %v11726_v63  ;;  %v5474_v3 = vld [vmem:[#allocation13 + $0x740] sm:$0xff]  ;;  %v11775_v63 = vcombine.high %v5467_v62, %v5471_v0  ;;  %v14401_v62 = vld [vmem:[#allocation5 + $0x2c] ss:$16 sps:$4 sm:$0xff]  }
 0x812   :  { %7841 = vmatprep.subr.bf16.mxu0 %v11733_v12  ;;  %7947 = vmatprep.subr.bf16.mxu1 %v11735_v15  ;;  %v5478_v12 = vld [vmem:[#allocation13 + $0x760] sm:$0xff]  ;;  %v5479_v15 = vld [vmem:[#allocation13 + $0x768] sm:$0xff] }
 0x813   :  { %v11781_v23 = vcombine.high %v5474_v3, %v5478_v12  ;;  %v11780_v10 = vcombine.low %v5474_v3, %v5478_v12  ;;  %v11782_v31 = vcombine.low %v5475_v4, %v5479_v15  ;;  %v5260_v3 = vld [vmem:[#allocation13 + $0x90] sm:$0xff]  ;;  %v5261_v12 = vld [vmem:[#allocation13 + $0x98] sm:$0xff] }
 0x815   :  { %7842 = vmatpush1.bf16.msra.mxu0 %v11732_v26  ;;  %7948 = vmatpush1.bf16.msra.mxu1 %v11734_v7  ;;  %v5482_v26 = vld [vmem:[#allocation13 + $0x780] sm:$0xff]  ;;  %v11783_v7 = vcombine.high %v5475_v4, %v5479_v15  ;;  %v5265_v4 = vld [vmem:[#allocation13 + $0xb8] sm:$0xff] }
 0x816   :  { %7843 = vmatprep.subr.bf16.mxu0 %v11741_v51  ;;  %7949 = vmatprep.subr.bf16.mxu1 %v11743_v9  ;;  %v5486_v51 = vld [vmem:[#allocation13 + $0x7a0] sm:$0xff]  ;;  %v5487_v9 = vld [vmem:[#allocation13 + $0x7a8] sm:$0xff] }
 0x817   :  { %v11789_v16 = vcombine.high %v5482_v26, %v5486_v51  ;;  %v11788_v28 = vcombine.low %v5482_v26, %v5486_v51  ;;  %v11790_v57 = vcombine.low %v5483_v34, %v5487_v9  ;;  %v11571_v26 = vcombine.high %v5261_v12, %v5265_v4  ;;  %v5272_v51 = vld [vmem:[#allocation13 + $0xf0] sm:$0xff] }
 0x819   :  { %7844 = vmatpush1.bf16.msra.mxu0 %v11740_v18  ;;  %7950 = vmatpush1.bf16.msra.mxu1 %v11742_v56  ;;  %v5490_v18 = vld [vmem:[#allocation13 + $0x7c0] sm:$0xff]  ;;  %v11791_v56 = vcombine.high %v5483_v34, %v5487_v9  ;;  %v5269_v34 = vld [vmem:[#allocation13 + $0xd8] sm:$0xff] }
 0x81a   :  { %7845 = vmatprep.subr.bf16.mxu0 %v11749_v21  ;;  %7951 = vmatprep.subr.bf16.mxu1 %v11751_v27  ;;  %v5494_v21 = vld [vmem:[#allocation13 + $0x7e0] sm:$0xff]  ;;  %v5495_v27 = vld [vmem:[#allocation13 + $0x7e8] sm:$0xff]  ;;  %v5273_v9 = vld [vmem:[#allocation13 + $0xf8] sm:$0xff] }
 0x81b   :  { %v11797_v35 = vcombine.high %v5490_v18, %v5494_v21  ;;  %v11796_v43 = vcombine.low %v5490_v18, %v5494_v21  ;;  %v11798_v33 = vcombine.low %v5491_v29, %v5495_v27  ;;  %v11579_v18 = vcombine.high %v5269_v34, %v5273_v9  ;;  %v5280_v21 = vld [vmem:[#allocation13 + $0x130] sm:$0xff] }
 0x81d   :  { %7846 = vmatpush1.bf16.msra.mxu0 %v11748_v38  ;;  %7952 = vmatpush1.bf16.msra.mxu1 %v11750_v39  ;;  %v11799_v38 = vcombine.high %v5491_v29, %v5495_v27  ;;  %v5244_v39 = vld [vmem:[#allocation13 + $0x10] sm:$0xff]  ;;  %v5277_v29 = vld [vmem:[#allocation13 + $0x118] sm:$0xff] }
 0x81e   :  { %7847 = vmatprep.subr.bf16.mxu0 %v11757_v40  ;;  %7953 = vmatprep.subr.bf16.mxu1 %v11759_v24  ;;  %v5248_v40 = vld [vmem:[#allocation13 + $0x30] sm:$0xff]  ;;  %v5249_v24 = vld [vmem:[#allocation13 + $0x38] sm:$0xff] }
 0x81f   :  { %v11553_v44 = vcombine.high %v5244_v39, %v5248_v40  ;;  %v11552_v0 = vcombine.low %v5244_v39, %v5248_v40  ;;  %v5281_v27 = vld [vmem:[#allocation13 + $0x138] sm:$0xff]  ;;  %v5284_v39 = vld [vmem:[#allocation13 + $0x150] sm:$0xff] }
 0x820   :  { %v5288_v40 = vld [vmem:[#allocation13 + $0x170] sm:$0xff] }
 0x821   :  { %7848 = vmatpush1.bf16.msra.mxu0 %v11756_v45  ;;  %7954 = vmatpush1.bf16.msra.mxu1 %v11758_v47  ;;  %v11555_v45 = vcombine.high %v5245_v41, %v5249_v24  ;;  %v14399_v47 = vld [vmem:[#allocation5 + $0x8] ss:$16 sps:$4 sm:$0xff]  }
 0x822   :  { %7849 = vmatprep.subr.bf16.mxu0 %v11765_v49  ;;  %7955 = vmatprep.subr.bf16.mxu1 %v11767_v58  ;;  %v5252_v49 = vld [vmem:[#allocation13 + $0x50] sm:$0xff]  ;;  %v5253_v58 = vld [vmem:[#allocation13 + $0x58] sm:$0xff] }
 0x823   :  { %v11560_v15 = vcombine.low %v5252_v49, %v5256_v53 }
 0x825   :  { %7850 = vmatpush1.bf16.msra.mxu0 %v11764_v1  ;;  %7956 = vmatpush1.bf16.msra.mxu1 %v11766_v2  ;;  %v11554_v1 = vcombine.low %v5245_v41, %v5249_v24  ;;  %v11561_v2 = vcombine.high %v5252_v49, %v5256_v53  ;;  %v5285_v41 = vld [vmem:[#allocation13 + $0x158] sm:$0xff]  ;;  %v5296_v49 = vld [vmem:[#allocation13 + $0x1b0] sm:$0xff] }
 0x826   :  { %7851 = vmatprep.subr.bf16.mxu0 %v11773_v50  ;;  %7957 = vmatprep.subr.bf16.mxu1 %v11775_v63  ;;  %v11563_v50 = vcombine.high %v5253_v58, %v5257_v5  ;;  %v5264_v63 = vld [vmem:[#allocation13 + $0xb0] sm:$0xff]  ;;  %v5289_v24 = vld [vmem:[#allocation13 + $0x178] sm:$0xff] }
 0x827   :  { %v5293_v53 = vld [vmem:[#allocation13 + $0x198] sm:$0xff] }
 0x829   :  { %7852 = vmatpush1.bf16.msra.mxu0 %v11772_v6  ;;  %7958 = vmatpush1.bf16.msra.mxu1 %v11774_v48  ;;  %v11562_v6 = vcombine.low %v5253_v58, %v5257_v5  ;;  %v14407_v48 = vld [vmem:[#allocation5 + $0x28] ss:$16 sps:$4 sm:$0xff]   ;;  %v11592_v5 = vcombine.low %v5284_v39, %v5288_v40 }
 0x82a   :  { %7853 = vmatprep.subr.bf16.mxu0 %v11781_v23  ;;  %7959 = vmatprep.subr.bf16.mxu1 %v11783_v7  ;;  %v11569_v23 = vcombine.high %v5260_v3, %v5264_v63  ;;  %v5268_v7 = vld [vmem:[#allocation13 + $0xd0] sm:$0xff]  ;;  %v5297_v58 = vld [vmem:[#allocation13 + $0x1b8] sm:$0xff] }
 0x82d   :  { %7854 = vmatpush1.bf16.msra.mxu0 %v11780_v10  ;;  %7960 = vmatpush1.bf16.msra.mxu1 %v11782_v31  ;;  %v11568_v10 = vcombine.low %v5260_v3, %v5264_v63  ;;  %v11570_v31 = vcombine.low %v5261_v12, %v5265_v4  ;;  %v5304_v3 = vld [vmem:[#allocation13 + $0x1f0] sm:$0xff]  ;;  %v5301_v63 = vld [vmem:[#allocation13 + $0x1d8] sm:$0xff] }
 0x82e   :  { %7855 = vmatprep.subr.bf16.mxu0 %v11789_v16  ;;  %7961 = vmatprep.subr.bf16.mxu1 %v11791_v56  ;;  %v11577_v16 = vcombine.high %v5268_v7, %v5272_v51  ;;  %v5276_v56 = vld [vmem:[#allocation13 + $0x110] sm:$0xff]  ;;  %v5305_v12 = vld [vmem:[#allocation13 + $0x1f8] sm:$0xff] }
 0x831   :  { %7856 = vmatpush1.bf16.msra.mxu0 %v11788_v28  ;;  %7962 = vmatpush1.bf16.msra.mxu1 %v11790_v57  ;;  %v11576_v28 = vcombine.low %v5268_v7, %v5272_v51  ;;  %v11578_v57 = vcombine.low %v5269_v34, %v5273_v9  ;;  %v5312_v7 = vld [vmem:[#allocation13 + $0x230] sm:$0xff]  ;;  %v5309_v51 = vld [vmem:[#allocation13 + $0x218] sm:$0xff] }
 0x832   :  { %7857 = vmatprep.subr.bf16.mxu0 %v11797_v35  ;;  %7963 = vmatprep.subr.bf16.mxu1 %v11799_v38  ;;  %v11585_v35 = vcombine.high %v5276_v56, %v5280_v21  ;;  %v11587_v38 = vcombine.high %v5277_v29, %v5281_v27  ;;  %v5313_v34 = vld [vmem:[#allocation13 + $0x238] sm:$0xff] }
 0x835   :  { %7858 = vmatpush1.bf16.msra.mxu0 %v11796_v43  ;;  %7964 = vmatpush1.bf16.msra.mxu1 %v11798_v33  ;;  %v11584_v43 = vcombine.low %v5276_v56, %v5280_v21  ;;  %v11586_v33 = vcombine.low %v5277_v29, %v5281_v27  ;;  %v5320_v56 = vld [vmem:[#allocation13 + $0x270] sm:$0xff]  ;;  %v5317_v21 = vld [vmem:[#allocation13 + $0x258] sm:$0xff] }
 0x836   :  { %7986 = vmatprep.subr.bf16.mxu0 %v11553_v44  ;;  %8092 = vmatprep.subr.bf16.mxu1 %v11555_v45  ;;  %v11593_v44 = vcombine.high %v5284_v39, %v5288_v40  ;;  %v5292_v45 = vld [vmem:[#allocation13 + $0x190] sm:$0xff]  ;;  %v5321_v29 = vld [vmem:[#allocation13 + $0x278] sm:$0xff] }
 0x837   :  { %v11600_v4 = vcombine.low %v5292_v45, %v5296_v49  ;;  %v5328_v39 = vld [vmem:[#allocation13 + $0x2b0] sm:$0xff]  ;;  %v5325_v40 = vld [vmem:[#allocation13 + $0x298] sm:$0xff] }
 0x838   :  { %7860 = vmatmul.mubr.bf16.vlgmr.msra.gmra.mrb[52].mxu0 %v14399_v47  ;;  %7966 = vmatmul.mubr.bf16.vlgmr.msra.gmra.mrb[52].mxu1 %v14399_v47 }
 0x839   :  { %7869 = vmatprep.mubr.bf16.mxu0 %v14401_v62  ;;  %7975 = vmatprep.mubr.bf16.mxu1 %v14401_v62 }
 0x83a   :  { %7987 = vmatpush1.bf16.msra.mxu0 %v11552_v0  ;;  %8093 = vmatpush1.bf16.msra.mxu1 %v11554_v1  ;;  %v11594_v0 = vcombine.low %v5285_v41, %v5289_v24  ;;  %v11601_v1 = vcombine.high %v5292_v45, %v5296_v49  ;;  %v5336_v45 = vld [vmem:[#allocation13 + $0x2f0] sm:$0xff]  ;;  %v5333_v49 = vld [vmem:[#allocation13 + $0x2d8] sm:$0xff] }
 0x83b   :  { %7988 = vmatprep.subr.bf16.mxu0 %v11561_v2  ;;  %8094 = vmatprep.subr.bf16.mxu1 %v11563_v50  ;;  %v11603_v2 = vcombine.high %v5293_v53, %v5297_v58  ;;  %v5300_v50 = vld [vmem:[#allocation13 + $0x1d0] sm:$0xff] }
 0x83c   :  { %v11608_v9 = vcombine.low %v5300_v50, %v5304_v3 }
 0x83e   :  { %7989 = vmatpush1.bf16.msra.mxu0 %v11560_v15  ;;  %8095 = vmatpush1.bf16.msra.mxu1 %v11562_v6  ;;  %v11602_v15 = vcombine.low %v5293_v53, %v5297_v58  ;;  %v11609_v6 = vcombine.high %v5300_v50, %v5304_v3  ;;  %v5337_v53 = vld [vmem:[#allocation13 + $0x2f8] sm:$0xff]  ;;  %v5344_v50 = vld [vmem:[#allocation13 + $0x330] sm:$0xff] }
 0x83f   :  { %7990 = vmatprep.subr.bf16.mxu0 %v11569_v23  ;;  %8096 = vmatprep.subr.bf16.mxu1 %v11571_v26  ;;  %v11611_v23 = vcombine.high %v5301_v63, %v5305_v12  ;;  %v5308_v26 = vld [vmem:[#allocation13 + $0x210] sm:$0xff]  ;;  %v5341_v3 = vld [vmem:[#allocation13 + $0x318] sm:$0xff] }
 0x840   :  { %7870 = vmatmul.mubr.bf16.gmra.mrb[56].mxu0 %v14407_v48  ;;  %7976 = vmatmul.mubr.bf16.gmra.mrb[56].mxu1 %v14407_v48  ;;  %v11616_v27 = vcombine.low %v5308_v26, %v5312_v7 }
 0x841   :  { %8018 = vmatprep.mubr.bf16.mxu0 %v14379_v8  ;;  %8124 = vmatprep.mubr.bf16.mxu1 %v14379_v8  ;;  %v11595_v8 = vcombine.high %v5285_v41, %v5289_v24  ;;  %v5329_v41 = vld [vmem:[#allocation13 + $0x2b8] sm:$0xff] }
 0x842   :  { %7991 = vmatpush1.bf16.msra.mxu0 %v11568_v10  ;;  %8097 = vmatpush1.bf16.msra.mxu1 %v11570_v31  ;;  %v11610_v10 = vcombine.low %v5301_v63, %v5305_v12  ;;  %v11617_v31 = vcombine.high %v5308_v26, %v5312_v7  ;;  %v5345_v63 = vld [vmem:[#allocation13 + $0x338] sm:$0xff]  ;;  %v5352_v26 = vld [vmem:[#allocation13 + $0x370] sm:$0xff] }
 0x843   :  { %7992 = vmatprep.subr.bf16.mxu0 %v11577_v16  ;;  %8098 = vmatprep.subr.bf16.mxu1 %v11579_v18  ;;  %v11619_v16 = vcombine.high %v5309_v51, %v5313_v34  ;;  %v5316_v18 = vld [vmem:[#allocation13 + $0x250] sm:$0xff]  ;;  %v5349_v7 = vld [vmem:[#allocation13 + $0x358] sm:$0xff] }
 0x844   :  { %v11624_v24 = vcombine.low %v5316_v18, %v5320_v56 }
 0x846   :  { %7993 = vmatpush1.bf16.msra.mxu0 %v11576_v28  ;;  %8099 = vmatpush1.bf16.msra.mxu1 %v11578_v57  ;;  %v11618_v28 = vcombine.low %v5309_v51, %v5313_v34  ;;  %v11625_v57 = vcombine.high %v5316_v18, %v5320_v56  ;;  %v5353_v51 = vld [vmem:[#allocation13 + $0x378] sm:$0xff]  ;;  %v5360_v18 = vld [vmem:[#allocation13 + $0x3b0] sm:$0xff] }
 0x847   :  { %7994 = vmatprep.subr.bf16.mxu0 %v11585_v35  ;;  %8100 = vmatprep.subr.bf16.mxu1 %v11587_v38  ;;  %v11627_v35 = vcombine.high %v5317_v21, %v5321_v29  ;;  %v5324_v38 = vld [vmem:[#allocation13 + $0x290] sm:$0xff]  ;;  %v5357_v56 = vld [vmem:[#allocation13 + $0x398] sm:$0xff] }
 0x848   :  { %v11632_v58 = vcombine.low %v5324_v38, %v5328_v39 }
 0x84a   :  { %7995 = vmatpush1.bf16.msra.mxu0 %v11584_v43  ;;  %8101 = vmatpush1.bf16.msra.mxu1 %v11586_v33  ;;  %v11626_v43 = vcombine.low %v5317_v21, %v5321_v29  ;;  %v11633_v33 = vcombine.high %v5324_v38, %v5328_v39  ;;  %v5361_v21 = vld [vmem:[#allocation13 + $0x3b8] sm:$0xff]  ;;  %v5368_v38 = vld [vmem:[#allocation13 + $0x3f0] sm:$0xff] }
 0x84b   :  { %7996 = vmatprep.subr.bf16.mxu0 %v11593_v44  ;;  %8102 = vmatprep.subr.bf16.mxu1 %v11595_v8  ;;  %v11635_v44 = vcombine.high %v5325_v40, %v5329_v41  ;;  %v5332_v8 = vld [vmem:[#allocation13 + $0x2d0] sm:$0xff]  ;;  %v5365_v39 = vld [vmem:[#allocation13 + $0x3d8] sm:$0xff] }
 0x84c   :  { %v11640_v12 = vcombine.low %v5332_v8, %v5336_v45 }
 0x84e   :  { %7997 = vmatpush1.bf16.msra.mxu0 %v11592_v5  ;;  %8103 = vmatpush1.bf16.msra.mxu1 %v11594_v0  ;;  %v11634_v5 = vcombine.low %v5325_v40, %v5329_v41  ;;  %v11641_v0 = vcombine.high %v5332_v8, %v5336_v45  ;;  %v5369_v40 = vld [vmem:[#allocation13 + $0x3f8] sm:$0xff]  ;;  %v5376_v8 = vld [vmem:[#allocation13 + $0x430] sm:$0xff] }
 0x84f   :  { %7998 = vmatprep.subr.bf16.mxu0 %v11601_v1  ;;  %8104 = vmatprep.subr.bf16.mxu1 %v11603_v2  ;;  %v11643_v1 = vcombine.high %v5333_v49, %v5337_v53  ;;  %v5340_v2 = vld [vmem:[#allocation13 + $0x310] sm:$0xff]  ;;  %v5373_v45 = vld [vmem:[#allocation13 + $0x418] sm:$0xff] }
 0x850   :  { %v11648_v34 = vcombine.low %v5340_v2, %v5344_v50 }
 0x852   :  { %7999 = vmatpush1.bf16.msra.mxu0 %v11600_v4  ;;  %8105 = vmatpush1.bf16.msra.mxu1 %v11602_v15  ;;  %v11642_v4 = vcombine.low %v5333_v49, %v5337_v53  ;;  %v11649_v15 = vcombine.high %v5340_v2, %v5344_v50  ;;  %v5377_v49 = vld [vmem:[#allocation13 + $0x438] sm:$0xff]  ;;  %v5384_v2 = vld [vmem:[#allocation13 + $0x470] sm:$0xff] }
 0x853   :  { %8000 = vmatprep.subr.bf16.mxu0 %v11609_v6  ;;  %8106 = vmatprep.subr.bf16.mxu1 %v11611_v23  ;;  %v11651_v6 = vcombine.high %v5341_v3, %v5345_v63  ;;  %v5348_v23 = vld [vmem:[#allocation13 + $0x350] sm:$0xff]  ;;  %v5381_v50 = vld [vmem:[#allocation13 + $0x458] sm:$0xff] }
 0x854   :  { %v11656_v29 = vcombine.low %v5348_v23, %v5352_v26 }
 0x856   :  { %8001 = vmatpush1.bf16.msra.mxu0 %v11608_v9  ;;  %8107 = vmatpush1.bf16.msra.mxu1 %v11610_v10  ;;  %v11650_v9 = vcombine.low %v5341_v3, %v5345_v63  ;;  %v11657_v10 = vcombine.high %v5348_v23, %v5352_v26  ;;  %v5385_v3 = vld [vmem:[#allocation13 + $0x478] sm:$0xff]  ;;  %v5392_v23 = vld [vmem:[#allocation13 + $0x4b0] sm:$0xff] }
 0x857   :  { %8002 = vmatprep.subr.bf16.mxu0 %v11617_v31  ;;  %8108 = vmatprep.subr.bf16.mxu1 %v11619_v16  ;;  %v11659_v31 = vcombine.high %v5349_v7, %v5353_v51  ;;  %v5356_v16 = vld [vmem:[#allocation13 + $0x390] sm:$0xff]  ;;  %v5389_v26 = vld [vmem:[#allocation13 + $0x498] sm:$0xff] }
 0x858   :  { %v11664_v41 = vcombine.low %v5356_v16, %v5360_v18 }
 0x85a   :  { %8003 = vmatpush1.bf16.msra.mxu0 %v11616_v27  ;;  %8109 = vmatpush1.bf16.msra.mxu1 %v11618_v28  ;;  %v11658_v27 = vcombine.low %v5349_v7, %v5353_v51  ;;  %v11665_v28 = vcombine.high %v5356_v16, %v5360_v18  ;;  %v5393_v7 = vld [vmem:[#allocation13 + $0x4b8] sm:$0xff]  ;;  %v5400_v16 = vld [vmem:[#allocation13 + $0x4f0] sm:$0xff] }
 0x85b   :  { %8004 = vmatprep.subr.bf16.mxu0 %v11625_v57  ;;  %8110 = vmatprep.subr.bf16.mxu1 %v11627_v35  ;;  %v11667_v57 = vcombine.high %v5357_v56, %v5361_v21  ;;  %v5364_v35 = vld [vmem:[#allocation13 + $0x3d0] sm:$0xff]  ;;  %v5397_v18 = vld [vmem:[#allocation13 + $0x4d8] sm:$0xff] }
 0x85c   :  { %v11672_v53 = vcombine.low %v5364_v35, %v5368_v38 }
 0x85e   :  { %8005 = vmatpush1.bf16.msra.mxu0 %v11624_v24  ;;  %8111 = vmatpush1.bf16.msra.mxu1 %v11626_v43  ;;  %v11666_v24 = vcombine.low %v5357_v56, %v5361_v21  ;;  %v11673_v43 = vcombine.high %v5364_v35, %v5368_v38  ;;  %v5401_v56 = vld [vmem:[#allocation13 + $0x4f8] sm:$0xff] }
 0x85f   :  { %8006 = vmatprep.subr.bf16.mxu0 %v11633_v33  ;;  %8112 = vmatprep.subr.bf16.mxu1 %v11635_v44  ;;  %v11675_v33 = vcombine.high %v5365_v39, %v5369_v40  ;;  %v5372_v44 = vld [vmem:[#allocation13 + $0x410] sm:$0xff]  ;;  %v5405_v35 = vld [vmem:[#allocation13 + $0x518] sm:$0xff] }
 0x860   :  { %v11680_v63 = vcombine.low %v5372_v44, %v5376_v8  ;;  %v5409_v38 = vld [vmem:[#allocation13 + $0x538] sm:$0xff] }
 0x862   :  { %8007 = vmatpush1.bf16.msra.mxu0 %v11632_v58  ;;  %8113 = vmatpush1.bf16.msra.mxu1 %v11634_v5  ;;  %v11674_v58 = vcombine.low %v5365_v39, %v5369_v40  ;;  %v11681_v5 = vcombine.high %v5372_v44, %v5376_v8  ;;  %v5417_v44 = vld [vmem:[#allocation13 + $0x578] sm:$0xff] }
 0x863   :  { %8008 = vmatprep.subr.bf16.mxu0 %v11641_v0  ;;  %8114 = vmatprep.subr.bf16.mxu1 %v11643_v1  ;;  %v11683_v0 = vcombine.high %v5373_v45, %v5377_v49  ;;  %v5380_v1 = vld [vmem:[#allocation13 + $0x450] sm:$0xff] }
 0x864   :  { %v11688_v51 = vcombine.low %v5380_v1, %v5384_v2 }
 0x866   :  { %8009 = vmatpush1.bf16.msra.mxu0 %v11640_v12  ;;  %8115 = vmatpush1.bf16.msra.mxu1 %v11642_v4  ;;  %v11682_v12 = vcombine.low %v5373_v45, %v5377_v49  ;;  %v11689_v4 = vcombine.high %v5380_v1, %v5384_v2 }
 0x867   :  { %8010 = vmatprep.subr.bf16.mxu0 %v11649_v15  ;;  %8116 = vmatprep.subr.bf16.mxu1 %v11651_v6  ;;  %v11691_v15 = vcombine.high %v5381_v50, %v5385_v3  ;;  %v5388_v6 = vld [vmem:[#allocation13 + $0x490] sm:$0xff] }
 0x868   :  { %v11696_v21 = vcombine.low %v5388_v6, %v5392_v23 }
 0x86a   :  { %8011 = vmatpush1.bf16.msra.mxu0 %v11648_v34  ;;  %8117 = vmatpush1.bf16.msra.mxu1 %v11650_v9  ;;  %v11690_v34 = vcombine.low %v5381_v50, %v5385_v3  ;;  %v11697_v9 = vcombine.high %v5388_v6, %v5392_v23  ;;  %v5432_v6 = vld [vmem:[#allocation13 + $0x5f0] sm:$0xff] }
 0x86b   :  { %8012 = vmatprep.subr.bf16.mxu0 %v11657_v10  ;;  %8118 = vmatprep.subr.bf16.mxu1 %v11659_v31  ;;  %v11699_v10 = vcombine.high %v5389_v26, %v5393_v7  ;;  %v5396_v31 = vld [vmem:[#allocation13 + $0x4d0] sm:$0xff] }
 0x86c   :  { %v11704_v39 = vcombine.low %v5396_v31, %v5400_v16 }
 0x86e   :  { %8013 = vmatpush1.bf16.msra.mxu0 %v11656_v29  ;;  %8119 = vmatpush1.bf16.msra.mxu1 %v11658_v27  ;;  %v11705_v29 = vcombine.high %v5396_v31, %v5400_v16  ;;  %v11707_v27 = vcombine.high %v5397_v18, %v5401_v56 }
 0x86f   :  { %8014 = vmatprep.subr.bf16.mxu0 %v11665_v28  ;;  %8120 = vmatprep.subr.bf16.mxu1 %v11667_v57  ;;  %v5404_v28 = vld [vmem:[#allocation13 + $0x510] sm:$0xff] }
 0x870   :  { %v5408_v57 = vld [vmem:[#allocation13 + $0x530] sm:$0xff] }
 0x871   :  { %v11713_v40 = vcombine.high %v5404_v28, %v5408_v57  ;;  %v11712_v8 = vcombine.low %v5404_v28, %v5408_v57 }
 0x872   :  { %8015 = vmatpush1.bf16.msra.mxu0 %v11664_v41  ;;  %8121 = vmatpush1.bf16.msra.mxu1 %v11666_v24  ;;  %v11715_v41 = vcombine.high %v5405_v35, %v5409_v38  ;;  %v5412_v24 = vld [vmem:[#allocation13 + $0x550] sm:$0xff] }
 0x873   :  { %8016 = vmatprep.subr.bf16.mxu0 %v11673_v43  ;;  %8122 = vmatprep.subr.bf16.mxu1 %v11675_v33  ;;  %v5416_v43 = vld [vmem:[#allocation13 + $0x570] sm:$0xff]  ;;  %v5413_v33 = vld [vmem:[#allocation13 + $0x558] sm:$0xff] }
 0x874   :  { %v11721_v45 = vcombine.high %v5412_v24, %v5416_v43  ;;  %v11723_v49 = vcombine.high %v5413_v33, %v5417_v44  ;;  %v11720_v1 = vcombine.low %v5412_v24, %v5416_v43 }
 0x876   :  { %8017 = vmatpush1.bf16.msra.mxu0 %v11672_v53  ;;  %8123 = vmatpush1.bf16.msra.mxu1 %v11674_v58  ;;  %v5420_v53 = vld [vmem:[#allocation13 + $0x590] sm:$0xff] }
 0x877   :  { %8039 = vmatprep.subr.bf16.mxu0 %v11681_v5  ;;  %8145 = vmatprep.subr.bf16.mxu1 %v11683_v0  ;;  %v5424_v58 = vld [vmem:[#allocation13 + $0x5b0] sm:$0xff]  ;;  %v5421_v5 = vld [vmem:[#allocation13 + $0x598] sm:$0xff] }
 0x878   :  { %v5425_v0 = vld [vmem:[#allocation13 + $0x5b8] sm:$0xff] }
 0x879   :  { %8019 = vmatmul.mubr.bf16.vlgmr.msra.gmra.mrb[60].mxu0 %v14383_v61  ;;  %8125 = vmatmul.mubr.bf16.vlgmr.msra.gmra.mrb[60].mxu1 %v14383_v61  ;;  %v11698_v61 = vcombine.low %v5389_v26, %v5393_v7  ;;  %v5429_v7 = vld [vmem:[#allocation13 + $0x5d8] sm:$0xff]  ;;  %v11730_v31 = vcombine.low %v5421_v5, %v5425_v0 }
 0x87a   :  { %8040 = vmatpush1.bf16.msra.mxu0 %v11680_v63  ;;  %8146 = vmatpush1.bf16.msra.mxu1 %v11682_v12  ;;  %v11729_v12 = vcombine.high %v5420_v53, %v5424_v58 }
 0x87b   :  { %8041 = vmatprep.subr.bf16.mxu0 %v11689_v4  ;;  %8147 = vmatprep.subr.bf16.mxu1 %v11691_v15  ;;  %v11731_v4 = vcombine.high %v5421_v5, %v5425_v0  ;;  %v5428_v15 = vld [vmem:[#allocation13 + $0x5d0] sm:$0xff] }
 0x87c   :  { %8028 = vmatprep.mubr.bf16.mxu0 %v14385_v14  ;;  %8134 = vmatprep.mubr.bf16.mxu1 %v14385_v14  ;;  %v11706_v14 = vcombine.low %v5397_v18, %v5401_v56  ;;  %v11737_v16 = vcombine.high %v5428_v15, %v5432_v6  ;;  %v5436_v56 = vld [vmem:[#allocation13 + $0x610] sm:$0xff] }
 0x87d   :  { %v5460_v0 = vld [vmem:[#allocation13 + $0x6d0] sm:$0xff] }
 0x87e   :  { %8042 = vmatpush1.bf16.msra.mxu0 %v11688_v51  ;;  %8148 = vmatpush1.bf16.msra.mxu1 %v11690_v34  ;;  %v5433_v51 = vld [vmem:[#allocation13 + $0x5f8] sm:$0xff] }
 0x87f   :  { %8043 = vmatprep.subr.bf16.mxu0 %v11697_v9  ;;  %8149 = vmatprep.subr.bf16.mxu1 %v11699_v10  ;;  %v11728_v10 = vcombine.low %v5420_v53, %v5424_v58  ;;  %v11739_v18 = vcombine.high %v5429_v7, %v5433_v51  ;;  %v11738_v28 = vcombine.low %v5429_v7, %v5433_v51  ;;  %v5468_v51 = vld [vmem:[#allocation13 + $0x710] sm:$0xff] }
 0x881   :  { %8029 = vmatmul.mubr.bf16.gmra.mrb[64].mxu0 %v14391_v32  ;;  %8135 = vmatmul.mubr.bf16.gmra.mrb[64].mxu1 %v14391_v32  ;;  %v11714_v32 = vcombine.low %v5405_v35, %v5409_v38  ;;  %v5444_v38 = vld [vmem:[#allocation13 + $0x650] sm:$0xff] }
 0x882   :  { %8044 = vmatpush1.bf16.msra.mxu0 %v11696_v21  ;;  %8150 = vmatpush1.bf16.msra.mxu1 %v11698_v61  ;;  %v5440_v21 = vld [vmem:[#allocation13 + $0x630] sm:$0xff]  ;;  %v5437_v61 = vld [vmem:[#allocation13 + $0x618] sm:$0xff] }
 0x883   :  { %8045 = vmatprep.subr.bf16.mxu0 %v11705_v29  ;;  %8151 = vmatprep.subr.bf16.mxu1 %v11707_v27  ;;  %v5441_v29 = vld [vmem:[#allocation13 + $0x638] sm:$0xff]  ;;  %v11736_v27 = vcombine.low %v5428_v15, %v5432_v6  ;;  %v11745_v57 = vcombine.high %v5436_v56, %v5440_v21 }
 0x884   :  { %8071 = vmatprep.mubr.bf16.mxu0 %v14393_v25  ;;  %8177 = vmatprep.mubr.bf16.mxu1 %v14393_v25  ;;  %v11722_v25 = vcombine.low %v5413_v33, %v5417_v44  ;;  %v11747_v35 = vcombine.high %v5437_v61, %v5441_v29  ;;  %v11746_v24 = vcombine.low %v5437_v61, %v5441_v29  ;;  %v5452_v44 = vld [vmem:[#allocation13 + $0x690] sm:$0xff] }
 0x885   :  { %v5476_v29 = vld [vmem:[#allocation13 + $0x750] sm:$0xff] }
 0x886   :  { %8046 = vmatpush1.bf16.msra.mxu0 %v11704_v39  ;;  %8152 = vmatpush1.bf16.msra.mxu1 %v11706_v14  ;;  %v5448_v39 = vld [vmem:[#allocation13 + $0x670] sm:$0xff]  ;;  %v5445_v14 = vld [vmem:[#allocation13 + $0x658] sm:$0xff] }
 0x887   :  { %8047 = vmatprep.subr.bf16.mxu0 %v11713_v40  ;;  %8153 = vmatprep.subr.bf16.mxu1 %v11715_v41  ;;  %v5449_v40 = vld [vmem:[#allocation13 + $0x678] sm:$0xff]  ;;  %v11744_v41 = vcombine.low %v5436_v56, %v5440_v21  ;;  %v11753_v43 = vcombine.high %v5444_v38, %v5448_v39 }
 0x888   :  { %v11755_v33 = vcombine.high %v5445_v14, %v5449_v40  ;;  %v11754_v53 = vcombine.low %v5445_v14, %v5449_v40  ;;  %v5484_v40 = vld [vmem:[#allocation13 + $0x790] sm:$0xff] }
 0x88a   :  { %8048 = vmatpush1.bf16.msra.mxu0 %v11712_v8  ;;  %8154 = vmatpush1.bf16.msra.mxu1 %v11714_v32  ;;  %v5456_v8 = vld [vmem:[#allocation13 + $0x6b0] sm:$0xff]  ;;  %v5453_v32 = vld [vmem:[#allocation13 + $0x698] sm:$0xff] }
 0x88b   :  { %v14421_v2 = vpop.f32.mrb[48].mxu0  ;;  %v14423_v50 = vpop.f32.mrb[48].mxu1  ;;  %8049 = vmatprep.subr.bf16.mxu0 %v11721_v45  ;;  %8155 = vmatprep.subr.bf16.mxu1 %v11723_v49  ;;  %v5457_v45 = vld [vmem:[#allocation13 + $0x6b8] sm:$0xff]  ;;  %v11752_v49 = vcombine.low %v5444_v38, %v5448_v39  ;;  %v11761_v58 = vcombine.high %v5452_v44, %v5456_v8 }
 0x88c   :  { %v14425_v3 = vpop.f32.mrb[49].mxu0  ;;  %v14427_v63 = vpop.f32.mrb[49].mxu1  ;;  %v11763_v5 = vcombine.high %v5453_v32, %v5457_v45  ;;  %v11762_v15 = vcombine.low %v5453_v32, %v5457_v45  ;;  %v5492_v45 = vld [vmem:[#allocation13 + $0x7d0] sm:$0xff] }
 0x88d   :  { %v14429_v23 = vpop.f32.mrb[50].mxu0  ;;  %v14431_v26 = vpop.f32.mrb[50].mxu1 }
 0x88e   :  { %v14433_v34 = vpop.f32.mrb[51].mxu0  ;;  %v14435_v9 = vpop.f32.mrb[51].mxu1  ;;  %8050 = vmatpush1.bf16.msra.mxu0 %v11720_v1  ;;  %8156 = vmatpush1.bf16.msra.mxu1 %v11722_v25  ;;  %v5464_v1 = vld [vmem:[#allocation13 + $0x6f0] sm:$0xff]  ;;  %v5461_v25 = vld [vmem:[#allocation13 + $0x6d8] sm:$0xff] }
 0x88f   :  { %8051 = vmatprep.subr.bf16.mxu0 %v11729_v12  ;;  %8157 = vmatprep.subr.bf16.mxu1 %v11731_v4  ;;  %v5465_v12 = vld [vmem:[#allocation13 + $0x6f8] sm:$0xff]  ;;  %v11760_v4 = vcombine.low %v5452_v44, %v5456_v8  ;;  %v11769_v6 = vcombine.high %v5460_v0, %v5464_v1 }
 0x890   :  { %v11771_v7 = vcombine.high %v5461_v25, %v5465_v12  ;;  %v11770_v56 = vcombine.low %v5461_v25, %v5465_v12 }
 0x892   :  { %8052 = vmatpush1.bf16.msra.mxu0 %v11728_v10  ;;  %8158 = vmatpush1.bf16.msra.mxu1 %v11730_v31  ;;  %v5472_v10 = vld [vmem:[#allocation13 + $0x730] sm:$0xff]  ;;  %v5469_v31 = vld [vmem:[#allocation13 + $0x718] sm:$0xff] }
 0x893   :  { %8053 = vmatprep.subr.bf16.mxu0 %v11737_v16  ;;  %8159 = vmatprep.subr.bf16.mxu1 %v11739_v18  ;;  %v5473_v16 = vld [vmem:[#allocation13 + $0x738] sm:$0xff]  ;;  %v11768_v18 = vcombine.low %v5460_v0, %v5464_v1  ;;  %v11777_v21 = vcombine.high %v5468_v51, %v5472_v10 }
 0x894   :  { %v11779_v61 = vcombine.high %v5469_v31, %v5473_v16  ;;  %v11778_v38 = vcombine.low %v5469_v31, %v5473_v16  ;;  %v13449_v31 = vld [vmem:[#allocation19 + $0x8] sm:$0xff] }
 0x896   :  { %8054 = vmatpush1.bf16.msra.mxu0 %v11736_v27  ;;  %8160 = vmatpush1.bf16.msra.mxu1 %v11738_v28  ;;  %v5480_v27 = vld [vmem:[#allocation13 + $0x770] sm:$0xff]  ;;  %v5477_v28 = vld [vmem:[#allocation13 + $0x758] sm:$0xff] }
 0x897   :  { %8055 = vmatprep.subr.bf16.mxu0 %v11745_v57  ;;  %8161 = vmatprep.subr.bf16.mxu1 %v11747_v35  ;;  %v5481_v57 = vld [vmem:[#allocation13 + $0x778] sm:$0xff]  ;;  %v11776_v35 = vcombine.low %v5468_v51, %v5472_v10  ;;  %v11785_v39 = vcombine.high %v5476_v29, %v5480_v27  ;;  %v13448_v51 = vld [vmem:[#allocation19 + $0x10] sm:$0xff] }
 0x898   :  { %v11787_v14 = vcombine.high %v5477_v28, %v5481_v57  ;;  %v11786_v44 = vcombine.low %v5477_v28, %v5481_v57 }
 0x89a   :  { %8056 = vmatpush1.bf16.msra.mxu0 %v11744_v41  ;;  %8162 = vmatpush1.bf16.msra.mxu1 %v11746_v24  ;;  %v5488_v41 = vld [vmem:[#allocation13 + $0x7b0] sm:$0xff]  ;;  %v5485_v24 = vld [vmem:[#allocation13 + $0x798] sm:$0xff] }
 0x89b   :  { %8057 = vmatprep.subr.bf16.mxu0 %v11753_v43  ;;  %8163 = vmatprep.subr.bf16.mxu1 %v11755_v33  ;;  %v5489_v43 = vld [vmem:[#allocation13 + $0x7b8] sm:$0xff]  ;;  %v11784_v33 = vcombine.low %v5476_v29, %v5480_v27  ;;  %v11793_v8 = vcombine.high %v5484_v40, %v5488_v41 }
 0x89c   :  { %v11795_v32 = vcombine.high %v5485_v24, %v5489_v43  ;;  %v11794_v0 = vcombine.low %v5485_v24, %v5489_v43 }
 0x89e   :  { %8058 = vmatpush1.bf16.msra.mxu0 %v11752_v49  ;;  %8164 = vmatpush1.bf16.msra.mxu1 %v11754_v53  ;;  %v5496_v49 = vld [vmem:[#allocation13 + $0x7f0] sm:$0xff]  ;;  %v5493_v53 = vld [vmem:[#allocation13 + $0x7d8] sm:$0xff] }
 0x89f   :  { %8059 = vmatprep.subr.bf16.mxu0 %v11761_v58  ;;  %8165 = vmatprep.subr.bf16.mxu1 %v11763_v5  ;;  %v5497_v58 = vld [vmem:[#allocation13 + $0x7f8] sm:$0xff]  ;;  %v11792_v5 = vcombine.low %v5484_v40, %v5488_v41  ;;  %v11801_v1 = vcombine.high %v5492_v45, %v5496_v49  ;;  %v11800_v12 = vcombine.low %v5492_v45, %v5496_v49 }
 0x8a0   :  { %v11803_v25 = vcombine.high %v5493_v53, %v5497_v58 }
 0x8a2   :  { %8060 = vmatpush1.bf16.msra.mxu0 %v11760_v4  ;;  %8166 = vmatpush1.bf16.msra.mxu1 %v11762_v15  ;;  %v11802_v4 = vcombine.low %v5493_v53, %v5497_v58  ;;  %v8200_v15 = vsub.s32 7, %v14115_v54 }
 0x8a3   :  { %8061 = vmatprep.subr.bf16.mxu0 %v11769_v6  ;;  %8167 = vmatprep.subr.bf16.mxu1 %v11771_v7  ;;  %v14451_v6 = vsub.s32 6, %v14115_v54 }
 0x8a4   :  { %v8209_v10 = vrot.slane %v13448_v51, %v8200_v15  ;;  %v8205_v16 = vrot.slane %v13449_v31, %v8200_v15 }
 0x8a6   :  { %8062 = vmatpush1.bf16.msra.mxu0 %v11768_v18  ;;  %8168 = vmatpush1.bf16.msra.mxu1 %v11770_v56 }
 0x8a7   :  { %8063 = vmatprep.subr.bf16.mxu0 %v11777_v21  ;;  %8169 = vmatprep.subr.bf16.mxu1 %v11779_v61 }
 0x8aa   :  { %8064 = vmatpush1.bf16.msra.mxu0 %v11776_v35  ;;  %8170 = vmatpush1.bf16.msra.mxu1 %v11778_v38 }
 0x8ab   :  { %8065 = vmatprep.subr.bf16.mxu0 %v11785_v39  ;;  %8171 = vmatprep.subr.bf16.mxu1 %v11787_v14 }
 0x8ae   :  { %8066 = vmatpush1.bf16.msra.mxu0 %v11784_v33  ;;  %8172 = vmatpush1.bf16.msra.mxu1 %v11786_v44 }
 0x8af   :  { %8067 = vmatprep.subr.bf16.mxu0 %v11793_v8  ;;  %8173 = vmatprep.subr.bf16.mxu1 %v11795_v32 }
 0x8b2   :  { %8068 = vmatpush1.bf16.msra.mxu0 %v11792_v5  ;;  %8174 = vmatpush1.bf16.msra.mxu1 %v11794_v0 }
 0x8b3   :  { %8069 = vmatprep.subr.bf16.mxu0 %v11801_v1  ;;  %8175 = vmatprep.subr.bf16.mxu1 %v11803_v25 }
 0x8b6   :  { %8070 = vmatpush1.bf16.msra.mxu0 %v11800_v12  ;;  %8176 = vmatpush1.bf16.msra.mxu1 %v11802_v4  ;;  %v5633_v4 = vrot.slane %v13449_v31, %v14451_v6 }
 0x8b7   :  { %12269 = vmatprep.subr.bf16.mxu0 %v13775_v52  ;;  %12275 = vmatprep.subr.bf16.mxu1 %v13775_v52 }
 0x8b9   :  { %8072 = vmatmul.mubr.bf16.vlgmr.msra.gmra.mrb[60].mxu0 %v14399_v47  ;;  %8178 = vmatmul.mubr.bf16.vlgmr.msra.gmra.mrb[60].mxu1 %v14399_v47  ;;  %v13447_v47 = vld [vmem:[#allocation19] sm:$0xff] }
 0x8ba   :  { %8081 = vmatprep.mubr.bf16.mxu0 %v14401_v62  ;;  %8187 = vmatprep.mubr.bf16.mxu1 %v14401_v62  ;;  %v8201_v7 = vrot.slane %v13447_v47, %v8200_v15  ;;  %v5629_v29 = vrot.slane %v13447_v47, %v14451_v6 }
 0x8bc   :  { %v12381_v45 = vadd.f32 %v14421_v2, %v5629_v29  ;;  %v12383_v31 = vadd.f32 %v14429_v23, %v5629_v29 }
 0x8c1   :  { %8082 = vmatmul.mubr.bf16.gmra.mrb[64].mxu0 %v14407_v48  ;;  %8188 = vmatmul.mubr.bf16.gmra.mrb[64].mxu1 %v14407_v48  ;;  %v14453_v48 = vld [vmem:[#allocation19 + $0x18] sm:$0xff] }
 0x8c2   :  { %12271 = vmatprep.mubr.msk.bf16.mxu0 %vm13776_vm0, %v13775_v52  ;;  %12277 = vmatprep.mubr.msk.bf16.mxu1 %vm13776_vm0, %v13775_v52  ;;  %v8213_v56 = vrot.slane %v14453_v48, %v8200_v15 }
 0x90b   :  { %v7861_v62 = vpop.f32.mrb[52].mxu0  ;;  %v7967_v18 = vpop.f32.mrb[52].mxu1 }
 0x90c   :  { %v7863_v21 = vpop.f32.mrb[53].mxu0  ;;  %v7969_v61 = vpop.f32.mrb[53].mxu1  ;;  %v8214_v54 = vadd.f32 %v8201_v7, %v7861_v62  ;;  %v8216_v38 = vadd.f32 %v8209_v10, %v7967_v18 }
 0x90d   :  { %v7865_v27 = vpop.f32.mrb[54].mxu0  ;;  %v7971_v28 = vpop.f32.mrb[54].mxu1  ;;  %v8215_v40 = vadd.f32 %v8205_v16, %v7863_v21  ;;  %v8217_v24 = vadd.f32 %v8213_v56, %v7969_v61  ;;  %v12049_v61 = vpack.c.bf16 %v12381_v45, %v12381_v45 }
 0x90e   :  { %v8218_v57 = vadd.f32 %v8201_v7, %v7865_v27  ;;  %v7867_v35 = vpop.f32.mrb[55].mxu0  ;;  %v8220_v39 = vadd.f32 %v8209_v10, %v7971_v28  ;;  %v7973_v14 = vpop.f32.mrb[55].mxu1 }
 0x90f   :  { %v8219_v41 = vadd.f32 %v8205_v16, %v7867_v35  ;;  %v8221_v43 = vadd.f32 %v8213_v56, %v7973_v14 }
 0x910   :  { %v8266_v33 = vpack.c.bf16 %v8218_v57, %v8214_v54  ;;  %v8268_v44 = vpack.c.bf16 %v8220_v39, %v8216_v38  ;;  %v12382_v39 = vadd.f32 %v14425_v3, %v5633_v4  ;;  %v12384_v3 = vadd.f32 %v14433_v34, %v5633_v4 }
 0x911   :  { %v8267_v8 = vpack.c.bf16 %v8219_v41, %v8215_v40  ;;  %v8269_v32 = vpack.c.bf16 %v8221_v43, %v8217_v24  ;;  %v208_v40 = vld [vmem:[#allocation19 + $0x20] sm:$0x7f]  ;;  %v210_v41 = vld [vmem:[#allocation19 + $0x30] sm:$0x7f]  ;;  %v209_v24 = vld [vmem:[#allocation19 + $0x28] sm:$0x7f] }
 0x912   :  { %12270 = vmatpush3.bf16.xpose.msra.mxu0 %v8266_v33  ;;  %v12052_v29 = vpack.c.bf16 %v12384_v3, %v12384_v3  ;;  %v211_v43 = vld [vmem:[#allocation19 + $0x38] sm:$0x7f]  ;;  %v8233_v33 = vrot.slane %v208_v40, %v14125_v19 }
 0x913   :  { %v7871_v49 = vpop.f32.mrb[56].mxu0  ;;  %12281 = vmatprep.subr.bf16.mxu0 %v13775_v52  ;;  %v7977_v53 = vpop.f32.mrb[56].mxu1 }
 0x914   :  { %v7873_v58 = vpop.f32.mrb[57].mxu0  ;;  %v8224_v5 = vadd.f32 %v8209_v10, %v7977_v53  ;;  %v7979_v0 = vpop.f32.mrb[57].mxu1  ;;  %v8222_v15 = vadd.f32 %v8201_v7, %v7871_v49 }
 0x915   :  { %v7875_v1 = vpop.f32.mrb[58].mxu0  ;;  %v8225_v25 = vadd.f32 %v8213_v56, %v7979_v0  ;;  %v7981_v12 = vpop.f32.mrb[58].mxu1  ;;  %v8223_v27 = vadd.f32 %v8205_v16, %v7873_v58 }
 0x916   :  { %v8226_v47 = vadd.f32 %v8201_v7, %v7875_v1  ;;  %v7877_v62 = vpop.f32.mrb[59].mxu0  ;;  %v8228_v18 = vadd.f32 %v8209_v10, %v7981_v12  ;;  %v7983_v21 = vpop.f32.mrb[59].mxu1  ;;  %v5637_v7 = vrot.slane %v13448_v51, %v14451_v6  ;;  %v12051_v10 = vpack.c.bf16 %v12382_v39, %v12382_v39 }
 0x917   :  { %v8227_v2 = vadd.f32 %v8205_v16, %v7877_v62  ;;  %v8229_v28 = vadd.f32 %v8213_v56, %v7983_v21  ;;  %v12050_v16 = vpack.c.bf16 %v12383_v31, %v12383_v31  ;;  %v5641_v51 = vrot.slane %v14453_v48, %v14451_v6 }
 0x918   :  { %v8270_v54 = vpack.c.bf16 %v8226_v47, %v8222_v15  ;;  %v8272_v57 = vpack.c.bf16 %v8228_v18, %v8224_v5  ;;  %v12385_v56 = vadd.f32 %v14423_v50, %v5637_v7  ;;  %v12387_v34 = vadd.f32 %v14431_v26, %v5637_v7 }
 0x919   :  { %v8271_v35 = vpack.c.bf16 %v8227_v2, %v8223_v27  ;;  %12272 = vmatmul.mubr.bf16.vlgmr.msra.gmra.mrb[68].mxu0 %v12049_v61  ;;  %v8273_v38 = vpack.c.bf16 %v8229_v28, %v8225_v25  ;;  %v12386_v50 = vadd.f32 %v14427_v63, %v5641_v51  ;;  %v12388_v63 = vadd.f32 %v14435_v9, %v5641_v51 }
 0x91a   :  { %12276 = vmatpush3.bf16.xpose.msra.mxu1 %v8270_v54  ;;  %12282 = vmatpush3.bf16.xpose.msra.mxu0 %v8267_v8  ;;  %v12053_v23 = vpack.c.bf16 %v12385_v56, %v12385_v56  ;;  %v12054_v14 = vpack.c.bf16 %v12387_v34, %v12387_v34  ;;  %v8237_v9 = vrot.slane %v209_v24, %v14125_v19 }
 0x91b   :  { %12283 = vmatprep.mubr.msk.bf16.mxu0 %vm13776_vm0, %v13775_v52  ;;  %12287 = vmatprep.subr.bf16.mxu1 %v13775_v52  ;;  %v12055_v48 = vpack.c.bf16 %v12386_v50, %v12386_v50  ;;  %v12056_v26 = vpack.c.bf16 %v12388_v63, %v12388_v63  ;;  %v8245_v8 = vrot.slane %v211_v43, %v14125_v19 }
 0x91c   :  { %12293 = vmatprep.subr.bf16.mxu0 %v13775_v52 }
 0x921   :  { %12278 = vmatmul.mubr.bf16.vlgmr.msra.gmra.mrb[68].mxu1 %v12050_v16  ;;  %12284 = vmatmul.mubr.bf16.vlgmr.msra.gmra.mrb[72].mxu0 %v12051_v10 }
 0x922   :  { %12288 = vmatpush3.bf16.xpose.msra.mxu1 %v8271_v35  ;;  %12294 = vmatpush3.bf16.xpose.msra.mxu0 %v8268_v44  ;;  %v8241_v44 = vrot.slane %v210_v41, %v14125_v19 }
 0x923   :  { %12289 = vmatprep.mubr.msk.bf16.mxu1 %vm13776_vm0, %v13775_v52  ;;  %12295 = vmatprep.mubr.msk.bf16.mxu0 %vm13776_vm0, %v13775_v52 }
 0x924   :  { %12299 = vmatprep.subr.bf16.mxu1 %v13775_v52  ;;  %12305 = vmatprep.subr.bf16.mxu0 %v13775_v52 }
 0x929   :  { %12290 = vmatmul.mubr.bf16.vlgmr.msra.gmra.mrb[72].mxu1 %v12052_v29  ;;  %12296 = vmatmul.mubr.bf16.vlgmr.msra.gmra.mrb[76].mxu0 %v12053_v23 }
 0x92a   :  { %12300 = vmatpush3.bf16.xpose.msra.mxu1 %v8272_v57  ;;  %12306 = vmatpush3.bf16.xpose.msra.mxu0 %v8269_v32 }
 0x92b   :  { %12301 = vmatprep.mubr.msk.bf16.mxu1 %vm13776_vm0, %v13775_v52  ;;  %12307 = vmatprep.mubr.msk.bf16.mxu0 %vm13776_vm0, %v13775_v52 }
 0x92c   :  { %12311 = vmatprep.subr.bf16.mxu1 %v13775_v52  ;;  %12317 = vmatprep.subr.bf16.mxu0 %v13775_v52 }
 0x931   :  { %12302 = vmatmul.mubr.bf16.vlgmr.msra.gmra.mrb[76].mxu1 %v12054_v14  ;;  %12308 = vmatmul.mubr.bf16.vlgmr.msra.gmra.mrb[80].mxu0 %v12055_v48 }
 0x932   :  { %12312 = vmatpush3.bf16.xpose.msra.mxu1 %v8273_v38  ;;  %12313 = vmatprep.mubr.msk.bf16.mxu1 %vm13776_vm0, %v13775_v52 }
 0x933   :  { %12323 = vmatprep.subr.bf16.mxu1 %v13775_v52  ;;  %12319 = vmatprep.mubr.msk.bf16.mxu0 %vm13776_vm0, %v13775_v52 }
 0x939   :  { %12314 = vmatmul.mubr.bf16.vlgmr.msra.gmra.mrb[80].mxu1 %v12056_v26 }
 0x93a   :  { %12325 = vmatprep.mubr.msk.bf16.mxu1 %vm13776_vm0, %v13775_v52 }
 0x98c   :  { %v8073_v32 = vpop.f32.mrb[60].mxu0  ;;  %v8179_v49 = vpop.f32.mrb[60].mxu1 }
 0x98d   :  { %v8246_v45 = vadd.f32 %v8233_v33, %v8073_v32  ;;  %v8075_v53 = vpop.f32.mrb[61].mxu0  ;;  %v14497_v58 = vadd.f32 %v8241_v44, %v8179_v49  ;;  %v8181_v0 = vpop.f32.mrb[61].mxu1 }
 0x98e   :  { %v14499_v5 = vadd.f32 %v8237_v9, %v8075_v53  ;;  %v8077_v1 = vpop.f32.mrb[62].mxu0  ;;  %v14501_v25 = vadd.f32 %v8245_v8, %v8181_v0  ;;  %v8183_v4 = vpop.f32.mrb[62].mxu1 }
 0x98f   :  { %v8250_v12 = vadd.f32 %v8233_v33, %v8077_v1  ;;  %v8079_v15 = vpop.f32.mrb[63].mxu0  ;;  %v14503_v47 = vadd.f32 %v8241_v44, %v8183_v4  ;;  %v8185_v19 = vpop.f32.mrb[63].mxu1 }
 0x990   :  { %v14505_v62 = vadd.f32 %v8237_v9, %v8079_v15  ;;  %v14507_v21 = vadd.f32 %v8245_v8, %v8185_v19 }
 0x991   :  { %v8274_v18 = vpack.c.bf16 %v8250_v12, %v8246_v45  ;;  %v8276_v61 = vpack.c.bf16 %v14503_v47, %v14497_v58  ;;  %v13093_v47 = vld [vmem:[#allocation14 + $0x4] ss:$16 sps:$4 sm:$0xff]  }
 0x992   :  { %v8275_v27 = vpack.c.bf16 %v14505_v62, %v14499_v5  ;;  %v8277_v2 = vpack.c.bf16 %v14507_v21, %v14501_v25  ;;  %v13099_v25 = vld [vmem:[#allocation14 + $0x24] ss:$16 sps:$4 sm:$0xff]  }
 0x993   :  { %12318 = vmatpush3.bf16.msra.mxu0 %v8274_v18 }
 0x994   :  { %v8083_v28 = vpop.f32.mrb[64].mxu0  ;;  %12329 = vmatprep.subr.bf16.mxu0 %v13775_v52  ;;  %v8189_v57 = vpop.f32.mrb[64].mxu1 }
 0x995   :  { %v8254_v54 = vadd.f32 %v8233_v33, %v8083_v28  ;;  %v8085_v35 = vpop.f32.mrb[65].mxu0  ;;  %v14516_v38 = vadd.f32 %v8241_v44, %v8189_v57  ;;  %v8191_v31 = vpop.f32.mrb[65].mxu1 }
 0x996   :  { %v14518_v39 = vadd.f32 %v8237_v9, %v8085_v35  ;;  %v8087_v7 = vpop.f32.mrb[66].mxu0  ;;  %v14520_v10 = vadd.f32 %v8245_v8, %v8191_v31  ;;  %v8193_v56 = vpop.f32.mrb[66].mxu1 }
 0x997   :  { %v8258_v16 = vadd.f32 %v8233_v33, %v8087_v7  ;;  %v8089_v3 = vpop.f32.mrb[67].mxu0  ;;  %v14522_v23 = vadd.f32 %v8241_v44, %v8193_v56  ;;  %v8195_v29 = vpop.f32.mrb[67].mxu1 }
 0x998   :  { %v14524_v51 = vadd.f32 %v8237_v9, %v8089_v3  ;;  %v14526_v34 = vadd.f32 %v8245_v8, %v8195_v29 }
 0x999   :  { %v8278_v50 = vpack.c.bf16 %v8258_v16, %v8254_v54  ;;  %v8280_v48 = vpack.c.bf16 %v14522_v23, %v14516_v38 }
 0x99a   :  { %v8279_v14 = vpack.c.bf16 %v14524_v51, %v14518_v39  ;;  %v8281_v63 = vpack.c.bf16 %v14526_v34, %v14520_v10  ;;  %v13111_v10 = vld [vmem:[#allocation14 + $0x64] ss:$16 sps:$4 sm:$0xff]   ;;  %v13100_v34 = vld [vmem:[#allocation14 + $0x28] ss:$16 sps:$4 sm:$0xff]  }
 0x99b   :  { %12324 = vmatpush3.bf16.msra.mxu1 %v8278_v50 }
 0x99c   :  { %12335 = vmatprep.subr.bf16.mxu1 %v13775_v52 }
 0x9ec   :  { %v8344_v26 = vpop.f32.mrb[68].mxu0 }
 0x9ed   :  { %v12273_v40 = vpop.f32.mrb[69].mxu0  ;;  %v8631_v41 = vsel %vm8630_vm3, %v8344_v26, -inf }
 0x9ee   :  { %8632 = vmax.xlane.f32.xlu0 %v8631_v41  ;;  %v8347_v24 = vpop.f32.mrb[70].mxu0 }
 0x9ef   :  { %v12274_v43 = vpop.f32.mrb[71].mxu0 }
 0x9f4   :  { %v8384_v33 = vpop.f32.mrb[68].mxu1  ;;  %v8424_v44 = vpop.f32.mrb[72].mxu0 }
 0x9f5   :  { %v12279_v9 = vpop.f32.mrb[69].mxu1  ;;  %v12285_v8 = vpop.f32.mrb[73].mxu0  ;;  %v8634_v32 = vsel %vm8630_vm3, %v8384_v33, -inf  ;;  %v8637_v45 = vsel %vm8630_vm3, %v8424_v44, -inf }
 0x9f6   :  { %8635 = vmax.xlane.f32.xlu1 %v8634_v32  ;;  %v8387_v49 = vpop.f32.mrb[70].mxu1  ;;  %8638 = vmax.xlane.f32.xlu0 %v8637_v45  ;;  %v8427_v53 = vpop.f32.mrb[74].mxu0 }
 0x9f7   :  { %v12280_v0 = vpop.f32.mrb[71].mxu1  ;;  %v12286_v1 = vpop.f32.mrb[75].mxu0 }
 0x9fc   :  { %v8464_v12 = vpop.f32.mrb[72].mxu1  ;;  %v8504_v4 = vpop.f32.mrb[76].mxu0 }
 0x9fd   :  { %v12291_v15 = vpop.f32.mrb[73].mxu1  ;;  %v12297_v19 = vpop.f32.mrb[77].mxu0  ;;  %v8640_v18 = vsel %vm8630_vm3, %v8464_v12, -inf  ;;  %v8643_v28 = vsel %vm8630_vm3, %v8504_v4, -inf }
 0x9fe   :  { %8641 = vmax.xlane.f32.xlu1 %v8640_v18  ;;  %v8467_v54 = vpop.f32.mrb[74].mxu1  ;;  %8644 = vmax.xlane.f32.xlu0 %v8643_v28  ;;  %v8507_v57 = vpop.f32.mrb[78].mxu0 }
 0x9ff   :  { %v12292_v35 = vpop.f32.mrb[75].mxu1  ;;  %v12298_v31 = vpop.f32.mrb[79].mxu0 }
 0xa04   :  { %v8544_v7 = vpop.f32.mrb[76].mxu1  ;;  %v8584_v16 = vpop.f32.mrb[80].mxu0 }
 0xa05   :  { %v12303_v56 = vpop.f32.mrb[77].mxu1  ;;  %v12309_v3 = vpop.f32.mrb[81].mxu0  ;;  %v8646_v29 = vsel %vm8630_vm3, %v8544_v7, -inf  ;;  %v8649_v50 = vsel %vm8630_vm3, %v8584_v16, -inf }
 0xa06   :  { %8647 = vmax.xlane.f32.xlu1 %v8646_v29  ;;  %v8547_v40 = vpop.f32.mrb[78].mxu1  ;;  %8650 = vmax.xlane.f32.xlu0 %v8649_v50  ;;  %v8587_v41 = vpop.f32.mrb[82].mxu0 }
 0xa07   :  { %v12304_v24 = vpop.f32.mrb[79].mxu1  ;;  %v12310_v43 = vpop.f32.mrb[83].mxu0 }
 0xa0c   :  { %v8624_v9 = vpop.f32.mrb[80].mxu1 }
 0xa0d   :  { %v12315_v8 = vpop.f32.mrb[81].mxu1  ;;  %v8652_v32 = vsel %vm8630_vm3, %v8624_v9, -inf }
 0xa0e   :  { %8653 = vmax.xlane.f32.xlu1 %v8652_v32  ;;  %v8627_v45 = vpop.f32.mrb[82].mxu1 }
 0xa0f   :  { %v12316_v49 = vpop.f32.mrb[83].mxu1 }
 0xa7b   :  { %v8633_v53 = vpop.xlane.xlu0 %8632 }
 0xa7c   :  { %v8655_v0 = vsub.f32 %v8344_v26, %v8633_v53 }
 0xa7e   :  { %v8663_v1 = vmul.f32 1.442695, %v8655_v0 }
 0xa80   :  { %13399 = vpow2.f32 %v8663_v1 }
 0xa83   :  { %v8636_v15 = vpop.xlane.xlu1 %8635  ;;  %v8639_v19 = vpop.xlane.xlu0 %8638 }
 0xa84   :  { %v8656_v18 = vsub.f32 %v8384_v33, %v8636_v15  ;;  %v8657_v28 = vsub.f32 %v8424_v44, %v8639_v19 }
 0xa86   :  { %v8665_v54 = vmul.f32 1.442695, %v8656_v18  ;;  %v8667_v57 = vmul.f32 1.442695, %v8657_v28 }
 0xa88   :  { %13401 = vpow2.f32 %v8665_v54 }
 0xa89   :  { %13403 = vpow2.f32 %v8667_v57 }
 0xa8a   :  { %v13400_v35 = vpop.eup %13399 }
 0xa8b   :  { %v8642_v31 = vpop.xlane.xlu1 %8641  ;;  %v8645_v56 = vpop.xlane.xlu0 %8644  ;;  %v8679_v3 = vsel %vm8630_vm3, %v13400_v35, 0.0 }
 0xa8c   :  { %v8658_v29 = vsub.f32 %v8464_v12, %v8642_v31  ;;  %v8659_v50 = vsub.f32 %v8504_v4, %v8645_v56  ;;  %8680 = vadd.xlane.f32.xlu0 %v8679_v3 }
 0xa8e   :  { %v8669_v40 = vmul.f32 1.442695, %v8658_v29  ;;  %v8671_v26 = vmul.f32 1.442695, %v8659_v50 }
 0xa90   :  { %13405 = vpow2.f32 %v8669_v40 }
 0xa91   :  { %13407 = vpow2.f32 %v8671_v26 }
 0xa92   :  { %v13402_v41 = vpop.eup %13401 }
 0xa93   :  { %v13404_v24 = vpop.eup %13403  ;;  %v8648_v33 = vpop.xlane.xlu1 %8647  ;;  %v8682_v43 = vsel %vm8630_vm3, %v13402_v41, 0.0 }
 0xa94   :  { %v8651_v44 = vpop.xlane.xlu0 %8650  ;;  %v8660_v8 = vsub.f32 %v8544_v7, %v8648_v33  ;;  %8683 = vadd.xlane.f32.xlu1 %v8682_v43  ;;  %v8685_v45 = vsel %vm8630_vm3, %v13404_v24, 0.0 }
 0xa95   :  { %v8661_v32 = vsub.f32 %v8584_v16, %v8651_v44  ;;  %8686 = vadd.xlane.f32.xlu0 %v8685_v45 }
 0xa96   :  { %v8673_v49 = vmul.f32 1.442695, %v8660_v8 }
 0xa97   :  { %v8675_v12 = vmul.f32 1.442695, %v8661_v32 }
 0xa98   :  { %13409 = vpow2.f32 %v8673_v49 }
 0xa99   :  { %13411 = vpow2.f32 %v8675_v12 }
 0xa9a   :  { %v13406_v4 = vpop.eup %13405 }
 0xa9b   :  { %v13408_v53 = vpop.eup %13407  ;;  %v8654_v0 = vpop.xlane.xlu1 %8653  ;;  %v8688_v1 = vsel %vm8630_vm3, %v13406_v4, 0.0 }
 0xa9c   :  { %v8662_v15 = vsub.f32 %v8624_v9, %v8654_v0  ;;  %8689 = vadd.xlane.f32.xlu1 %v8688_v1  ;;  %v8691_v19 = vsel %vm8630_vm3, %v13408_v53, 0.0  ;;  %v13105_v1 = vld [vmem:[#allocation14 + $0x44] ss:$16 sps:$4 sm:$0xff]  }
 0xa9d   :  { %8692 = vadd.xlane.f32.xlu0 %v8691_v19 }
 0xa9e   :  { %v8677_v7 = vmul.f32 1.442695, %v8662_v15  ;;  %v13094_v15 = vld [vmem:[#allocation14 + $0x8] ss:$16 sps:$4 sm:$0xff]  }
 0xaa0   :  { %13413 = vpow2.f32 %v8677_v7  ;;  %v13102_v7 = vld [vmem:[#allocation14 + $0x2c] ss:$16 sps:$4 sm:$0xff]  }
 0xaa2   :  { %v13410_v16 = vpop.eup %13409 }
 0xaa3   :  { %v14548_v18 = vpop.eup %13411  ;;  %v8694_v28 = vsel %vm8630_vm3, %v13410_v16, 0.0 }
 0xaa4   :  { %8695 = vadd.xlane.f32.xlu1 %v8694_v28  ;;  %v8697_v54 = vsel %vm8630_vm3, %v14548_v18, 0.0  ;;  %v13106_v28 = vld [vmem:[#allocation14 + $0x48] ss:$16 sps:$4 sm:$0xff]  }
 0xaa5   :  { %8698 = vadd.xlane.f32.xlu0 %v8697_v54  ;;  %v13114_v54 = vld [vmem:[#allocation14 + $0x6c] ss:$16 sps:$4 sm:$0xff]  }
 0xaaa   :  { %v14553_v57 = vpop.eup %13413 }
 0xaab   :  { %v8700_v9 = vsel %vm8630_vm3, %v14553_v57, 0.0 }
 0xaac   :  { %8701 = vadd.xlane.f32.xlu1 %v8700_v9  ;;  %v13123_v9 = vld [vmem:[#allocation14 + $0xa4] ss:$16 sps:$4 sm:$0xff]  }
 0xb19   :  { %v8681_v31 = vpop.xlane.xlu0 %8680 }
 0xb1a   :  { %13415 = vrcp.f32 %v8681_v31  ;;  %v13112_v31 = vld [vmem:[#allocation14 + $0x68] ss:$16 sps:$4 sm:$0xff]  }
 0xb21   :  { %v8684_v56 = vpop.xlane.xlu1 %8683 }
 0xb22   :  { %13417 = vrcp.f32 %v8684_v56  ;;  %v8687_v3 = vpop.xlane.xlu0 %8686  ;;  %v13120_v56 = vld [vmem:[#allocation14 + $0x8c] ss:$16 sps:$4 sm:$0xff]  }
 0xb23   :  { %13419 = vrcp.f32 %v8687_v3  ;;  %v13121_v3 = vld [vmem:[#allocation14 + $0xa0] ss:$16 sps:$4 sm:$0xff]  }
 0xb24   :  { %v13416_v29 = vpop.eup %13415 }
 0xb25   :  { %v8711_v50 = vmul.f32 %v13416_v29, %v13400_v35  ;;  %v13129_v29 = vld [vmem:[#allocation14 + $0xc4] ss:$16 sps:$4 sm:$0xff]  }
 0xb27   :  { %v8719_v40 = vpack.c.bf16 %v8711_v50, %v8711_v50  ;;  %v13118_v50 = vld [vmem:[#allocation14 + $0x88] ss:$16 sps:$4 sm:$0xff]  }
 0xb29   :  { %v8690_v26 = vpop.xlane.xlu1 %8689  ;;  %12320 = vmatmul.mubr.msk.bf16.vlgmr.msra.gmra.mrb[84].mxu0 %vm8630_vm3, %v8719_v40  ;;  %v13126_v40 = vld [vmem:[#allocation14 + $0xac] ss:$16 sps:$4 sm:$0xff]  }
 0xb2a   :  { %13421 = vrcp.f32 %v8690_v26  ;;  %12330 = vmatpush3.bf16.msra.mxu0 %v8275_v27  ;;  %v8693_v33 = vpop.xlane.xlu0 %8692  ;;  %12331 = vmatprep.mubr.msk.bf16.mxu0 %vm13776_vm0, %v13775_v52  ;;  %v13127_v26 = vld [vmem:[#allocation14 + $0xc0] ss:$16 sps:$4 sm:$0xff]  }
 0xb2b   :  { %13423 = vrcp.f32 %v8693_v33  ;;  %12341 = vmatprep.subr.bf16.mxu0 %v13775_v52  ;;  %v13135_v33 = vld [vmem:[#allocation14 + $0xe4] ss:$16 sps:$4 sm:$0xff]  }
 0xb2c   :  { %v13418_v44 = vpop.eup %13417 }
 0xb2d   :  { %v13420_v43 = vpop.eup %13419  ;;  %v8712_v8 = vmul.f32 %v13418_v44, %v13402_v41  ;;  %v13124_v44 = vld [vmem:[#allocation14 + $0xa8] ss:$16 sps:$4 sm:$0xff]  }
 0xb2e   :  { %v8713_v35 = vmul.f32 %v13420_v43, %v13404_v24  ;;  %v13132_v43 = vld [vmem:[#allocation14 + $0xcc] ss:$16 sps:$4 sm:$0xff]  }
 0xb2f   :  { %v8720_v32 = vpack.c.bf16 %v8712_v8, %v8712_v8  ;;  %v13133_v8 = vld [vmem:[#allocation14 + $0xe0] ss:$16 sps:$4 sm:$0xff]  }
 0xb30   :  { %v8721_v45 = vpack.c.bf16 %v8713_v35, %v8713_v35  ;;  %v13141_v35 = vld [vmem:[#allocation14 + $0x104] ss:$16 sps:$4 sm:$0xff]  }
 0xb31   :  { %12326 = vmatmul.mubr.msk.bf16.vlgmr.msra.gmra.mrb[84].mxu1 %vm8630_vm3, %v8720_v32  ;;  %v8696_v49 = vpop.xlane.xlu1 %8695  ;;  %v13130_v32 = vld [vmem:[#allocation14 + $0xc8] ss:$16 sps:$4 sm:$0xff]  }
 0xb32   :  { %12336 = vmatpush3.bf16.msra.mxu1 %v8279_v14  ;;  %13425 = vrcp.f32 %v8696_v49  ;;  %12332 = vmatmul.mubr.msk.bf16.vlgmr.msra.gmra.mrb[88].mxu0 %vm8630_vm3, %v8721_v45  ;;  %v8699_v5 = vpop.xlane.xlu0 %8698  ;;  %v13138_v45 = vld [vmem:[#allocation14 + $0xec] ss:$16 sps:$4 sm:$0xff]   ;;  %v13139_v49 = vld [vmem:[#allocation14 + $0x100] ss:$16 sps:$4 sm:$0xff]  }
 0xb33   :  { %12342 = vmatpush3.bf16.msra.mxu0 %v8276_v61  ;;  %13427 = vrcp.f32 %v8699_v5  ;;  %12337 = vmatprep.mubr.msk.bf16.mxu1 %vm13776_vm0, %v13775_v52  ;;  %v13147_v5 = vld [vmem:[#allocation14 + $0x124] ss:$16 sps:$4 sm:$0xff]  }
 0xb34   :  { %v13422_v62 = vpop.eup %13421  ;;  %12343 = vmatprep.mubr.msk.bf16.mxu0 %vm13776_vm0, %v13775_v52  ;;  %12347 = vmatprep.subr.bf16.mxu1 %v13775_v52 }
 0xb35   :  { %v13424_v27 = vpop.eup %13423  ;;  %v8714_v39 = vmul.f32 %v13422_v62, %v13406_v4  ;;  %12353 = vmatprep.subr.bf16.mxu0 %v13775_v52  ;;  %v13136_v62 = vld [vmem:[#allocation14 + $0xe8] ss:$16 sps:$4 sm:$0xff]  }
 0xb36   :  { %v8715_v51 = vmul.f32 %v13424_v27, %v13408_v53  ;;  %v13091_v53 = vld [vmem:[#allocation14] ss:$16 sps:$4 sm:$0xff]   ;;  %v13144_v27 = vld [vmem:[#allocation14 + $0x10c] ss:$16 sps:$4 sm:$0xff]  }
 0xb37   :  { %v8722_v14 = vpack.c.bf16 %v8714_v39, %v8714_v39  ;;  %v13145_v39 = vld [vmem:[#allocation14 + $0x120] ss:$16 sps:$4 sm:$0xff]  }
 0xb38   :  { %v8723_v41 = vpack.c.bf16 %v8715_v51, %v8715_v51  ;;  %v13153_v51 = vld [vmem:[#allocation14 + $0x144] ss:$16 sps:$4 sm:$0xff]  }
 0xb39   :  { %12338 = vmatmul.mubr.msk.bf16.vlgmr.msra.gmra.mrb[88].mxu1 %vm8630_vm3, %v8722_v14  ;;  %v8702_v58 = vpop.xlane.xlu1 %8701  ;;  %v13142_v14 = vld [vmem:[#allocation14 + $0x108] ss:$16 sps:$4 sm:$0xff]  }
 0xb3a   :  { %12348 = vmatpush3.bf16.msra.mxu1 %v8280_v48  ;;  %13429 = vrcp.f32 %v8702_v58  ;;  %12344 = vmatmul.mubr.msk.bf16.vlgmr.msra.gmra.mrb[92].mxu0 %vm8630_vm3, %v8723_v41  ;;  %v13096_v48 = vld [vmem:[#allocation14 + $0xc] ss:$16 sps:$4 sm:$0xff]   ;;  %v13151_v58 = vld [vmem:[#allocation14 + $0x140] ss:$16 sps:$4 sm:$0xff]  }
 0xb3b   :  { %12354 = vmatpush3.bf16.msra.mxu0 %v8277_v2  ;;  %12349 = vmatprep.mubr.msk.bf16.mxu1 %vm13776_vm0, %v13775_v52  ;;  %v13097_v2 = vld [vmem:[#allocation14 + $0x20] ss:$16 sps:$4 sm:$0xff]   ;;  %v13150_v41 = vld [vmem:[#allocation14 + $0x12c] ss:$16 sps:$4 sm:$0xff]  }
 0xb3c   :  { %v13426_v61 = vpop.eup %13425  ;;  %12355 = vmatprep.mubr.msk.bf16.mxu0 %vm13776_vm0, %v13775_v52  ;;  %12359 = vmatprep.subr.bf16.mxu1 %v13775_v52 }
 0xb3d   :  { %v13428_v24 = vpop.eup %13427  ;;  %v8716_v12 = vmul.f32 %v13426_v61, %v13410_v16  ;;  %9759 = vmatprep.subr.bf16.mxu0 %v13093_v47  ;;  %v13103_v16 = vld [vmem:[#allocation14 + $0x40] ss:$16 sps:$4 sm:$0xff]   ;;  %v13159_v47 = vld [vmem:[#allocation14 + $0x164] ss:$16 sps:$4 sm:$0xff]   ;;  %v13148_v61 = vld [vmem:[#allocation14 + $0x128] ss:$16 sps:$4 sm:$0xff]  }
 0xb3e   :  { %v8717_v38 = vmul.f32 %v13428_v24, %v14548_v18  ;;  %v13117_v18 = vld [vmem:[#allocation14 + $0x84] ss:$16 sps:$4 sm:$0xff]   ;;  %v13156_v24 = vld [vmem:[#allocation14 + $0x14c] ss:$16 sps:$4 sm:$0xff]  }
 0xb3f   :  { %v8724_v23 = vpack.c.bf16 %v8716_v12, %v8716_v12  ;;  %v13157_v12 = vld [vmem:[#allocation14 + $0x160] ss:$16 sps:$4 sm:$0xff]  }
 0xb40   :  { %v8725_v4 = vpack.c.bf16 %v8717_v38, %v8717_v38  ;;  %v13154_v38 = vld [vmem:[#allocation14 + $0x148] ss:$16 sps:$4 sm:$0xff]  }
 0xb41   :  { %12350 = vmatmul.mubr.msk.bf16.vlgmr.msra.gmra.mrb[92].mxu1 %vm8630_vm3, %v8724_v23  ;;  %v13162_v23 = vld [vmem:[#allocation14 + $0x16c] ss:$16 sps:$4 sm:$0xff]  }
 0xb42   :  { %12356 = vmatmul.mubr.msk.bf16.vlgmr.msra.gmra.mrb[96].mxu0 %vm8630_vm3, %v8725_v4  ;;  %12360 = vmatpush3.bf16.msra.mxu1 %v8281_v63  ;;  %v13109_v63 = vld [vmem:[#allocation14 + $0x60] ss:$16 sps:$4 sm:$0xff]  }
 0xb43   :  { %12361 = vmatprep.mubr.msk.bf16.mxu1 %vm13776_vm0, %v13775_v52  ;;  %9845 = vmatprep.subr.bf16.mxu1 %v13096_v48  ;;  %v13108_v52 = vld [vmem:[#allocation14 + $0x4c] ss:$16 sps:$4 sm:$0xff]   ;;  %v13160_v48 = vld [vmem:[#allocation14 + $0x168] ss:$16 sps:$4 sm:$0xff]   ;;  %v13163_v4 = vld [vmem:[#allocation14 + $0x180] ss:$16 sps:$4 sm:$0xff]  }
 0xb44   :  { %v13430_v21 = vpop.eup %13429  ;;  %9760 = vmatpush1.bf16.msra.mxu0 %v13091_v53  ;;  %v13165_v53 = vld [vmem:[#allocation14 + $0x184] ss:$16 sps:$4 sm:$0xff]  }
 0xb45   :  { %v8718_v0 = vmul.f32 %v13430_v21, %v14553_v57  ;;  %9761 = vmatprep.subr.bf16.mxu0 %v13099_v25  ;;  %v13115_v57 = vld [vmem:[#allocation14 + $0x80] ss:$16 sps:$4 sm:$0xff]   ;;  %v13166_v25 = vld [vmem:[#allocation14 + $0x188] ss:$16 sps:$4 sm:$0xff]   ;;  %v13168_v21 = vld [vmem:[#allocation14 + $0x18c] ss:$16 sps:$4 sm:$0xff]  }
 0xb47   :  { %v8726_v19 = vpack.c.bf16 %v8718_v0, %v8718_v0  ;;  %v13174_v0 = vld [vmem:[#allocation14 + $0x1ac] ss:$16 sps:$4 sm:$0xff]  }
 0xb48   :  { %9762 = vmatpush1.bf16.msra.mxu0 %v13097_v2  ;;  %v13171_v2 = vld [vmem:[#allocation14 + $0x1a4] ss:$16 sps:$4 sm:$0xff]  }
 0xb49   :  { %12362 = vmatmul.mubr.msk.bf16.vlgmr.msra.gmra.mrb[96].mxu1 %vm8630_vm3, %v8726_v19  ;;  %9763 = vmatprep.subr.bf16.mxu0 %v13105_v1  ;;  %v13169_v1 = vld [vmem:[#allocation14 + $0x1a0] ss:$16 sps:$4 sm:$0xff]   ;;  %v13177_v19 = vld [vmem:[#allocation14 + $0x1c4] ss:$16 sps:$4 sm:$0xff]  }
 0xb4a   :  { %9846 = vmatpush1.bf16.msra.mxu1 %v13094_v15  ;;  %v13172_v15 = vld [vmem:[#allocation14 + $0x1a8] ss:$16 sps:$4 sm:$0xff]  }
 0xb4b   :  { %9847 = vmatprep.subr.bf16.mxu1 %v13102_v7  ;;  %v13180_v7 = vld [vmem:[#allocation14 + $0x1cc] ss:$16 sps:$4 sm:$0xff]  }
 0xb4c   :  { %9764 = vmatpush1.bf16.msra.mxu0 %v13103_v16  ;;  %v13175_v16 = vld [vmem:[#allocation14 + $0x1c0] ss:$16 sps:$4 sm:$0xff]  }
 0xb4d   :  { %9765 = vmatprep.subr.bf16.mxu0 %v13111_v10  ;;  %v13178_v10 = vld [vmem:[#allocation14 + $0x1c8] ss:$16 sps:$4 sm:$0xff]  }
 0xb4e   :  { %9848 = vmatpush1.bf16.msra.mxu1 %v13100_v34  ;;  %v13183_v34 = vld [vmem:[#allocation14 + $0x1e4] ss:$16 sps:$4 sm:$0xff]  }
 0xb4f   :  { %9849 = vmatprep.subr.bf16.mxu1 %v13108_v52  ;;  %v13186_v52 = vld [vmem:[#allocation14 + $0x1ec] ss:$16 sps:$4 sm:$0xff]  }
 0xb50   :  { %9766 = vmatpush1.bf16.msra.mxu0 %v13109_v63  ;;  %v13181_v63 = vld [vmem:[#allocation14 + $0x1e0] ss:$16 sps:$4 sm:$0xff]  }
 0xb51   :  { %9767 = vmatprep.subr.bf16.mxu0 %v13117_v18  ;;  %v13184_v18 = vld [vmem:[#allocation14 + $0x1e8] ss:$16 sps:$4 sm:$0xff]  }
 0xb52   :  { %9850 = vmatpush1.bf16.msra.mxu1 %v13106_v28  ;;  %v13189_v28 = vld [vmem:[#allocation14 + $0x204] ss:$16 sps:$4 sm:$0xff]  }
 0xb53   :  { %9851 = vmatprep.subr.bf16.mxu1 %v13114_v54  ;;  %v13192_v54 = vld [vmem:[#allocation14 + $0x20c] ss:$16 sps:$4 sm:$0xff]  }
 0xb54   :  { %9768 = vmatpush1.bf16.msra.mxu0 %v13115_v57 }
 0xb55   :  { %9769 = vmatprep.subr.bf16.mxu0 %v13123_v9 }
 0xb56   :  { %9852 = vmatpush1.bf16.msra.mxu1 %v13112_v31 }
 0xb57   :  { %9853 = vmatprep.subr.bf16.mxu1 %v13120_v56 }
 0xb58   :  { %9770 = vmatpush1.bf16.msra.mxu0 %v13121_v3 }
 0xb59   :  { %9771 = vmatprep.subr.bf16.mxu0 %v13129_v29 }
 0xb5a   :  { %9854 = vmatpush1.bf16.msra.mxu1 %v13118_v50 }
 0xb5b   :  { %9855 = vmatprep.subr.bf16.mxu1 %v13126_v40 }
 0xb5c   :  { %9772 = vmatpush1.bf16.msra.mxu0 %v13127_v26 }
 0xb5d   :  { %9773 = vmatprep.subr.bf16.mxu0 %v13135_v33 }
 0xb5e   :  { %9856 = vmatpush1.bf16.msra.mxu1 %v13124_v44 }
 0xb5f   :  { %9857 = vmatprep.subr.bf16.mxu1 %v13132_v43 }
 0xb60   :  { %9774 = vmatpush1.bf16.msra.mxu0 %v13133_v8 }
 0xb61   :  { %9775 = vmatprep.subr.bf16.mxu0 %v13141_v35 }
 0xb62   :  { %9858 = vmatpush1.bf16.msra.mxu1 %v13130_v32 }
 0xb63   :  { %9859 = vmatprep.subr.bf16.mxu1 %v13138_v45 }
 0xb64   :  { %9776 = vmatpush1.bf16.msra.mxu0 %v13139_v49 }
 0xb65   :  { %9777 = vmatprep.subr.bf16.mxu0 %v13147_v5  ;;  %v13187_v5 = vld [vmem:[#allocation14 + $0x200] ss:$16 sps:$4 sm:$0xff]  }
 0xb66   :  { %9860 = vmatpush1.bf16.msra.mxu1 %v13136_v62  ;;  %v13190_v62 = vld [vmem:[#allocation14 + $0x208] ss:$16 sps:$4 sm:$0xff]  }
 0xb67   :  { %9861 = vmatprep.subr.bf16.mxu1 %v13144_v27 }
 0xb68   :  { %9778 = vmatpush1.bf16.msra.mxu0 %v13145_v39 }
 0xb69   :  { %9779 = vmatprep.subr.bf16.mxu0 %v13153_v51  ;;  %v13195_v51 = vld [vmem:[#allocation14 + $0x224] ss:$16 sps:$4 sm:$0xff]  }
 0xb6a   :  { %9862 = vmatpush1.bf16.msra.mxu1 %v13142_v14  ;;  %v13198_v14 = vld [vmem:[#allocation14 + $0x22c] ss:$16 sps:$4 sm:$0xff]  }
 0xb6b   :  { %9863 = vmatprep.subr.bf16.mxu1 %v13150_v41 }
 0xb6c   :  { %9780 = vmatpush1.bf16.msra.mxu0 %v13151_v58 }
 0xb6d   :  { %9781 = vmatprep.subr.bf16.mxu0 %v13159_v47 }
 0xb6e   :  { %9864 = vmatpush1.bf16.msra.mxu1 %v13148_v61  ;;  %v13193_v61 = vld [vmem:[#allocation14 + $0x220] ss:$16 sps:$4 sm:$0xff]  }
 0xb6f   :  { %9865 = vmatprep.subr.bf16.mxu1 %v13156_v24  ;;  %v13196_v24 = vld [vmem:[#allocation14 + $0x228] ss:$16 sps:$4 sm:$0xff]  }
 0xb70   :  { %9782 = vmatpush1.bf16.msra.mxu0 %v13157_v12  ;;  %v13201_v12 = vld [vmem:[#allocation14 + $0x244] ss:$16 sps:$4 sm:$0xff]  }
 0xb71   :  { %9783 = vmatprep.subr.bf16.mxu0 %v13165_v53 }
 0xb72   :  { %9866 = vmatpush1.bf16.msra.mxu1 %v13154_v38  ;;  %v13204_v38 = vld [vmem:[#allocation14 + $0x24c] ss:$16 sps:$4 sm:$0xff]  }
 0xb73   :  { %9867 = vmatprep.subr.bf16.mxu1 %v13162_v23 }
 0xb74   :  { %9784 = vmatpush1.bf16.msra.mxu0 %v13163_v4 }
 0xb75   :  { %9785 = vmatprep.subr.bf16.mxu0 %v13171_v2 }
 0xb76   :  { %9868 = vmatpush1.bf16.msra.mxu1 %v13160_v48 }
 0xb77   :  { %9869 = vmatprep.subr.bf16.mxu1 %v13168_v21  ;;  %v13202_v21 = vld [vmem:[#allocation14 + $0x248] ss:$16 sps:$4 sm:$0xff]  }
 0xb78   :  { %9786 = vmatpush1.bf16.msra.mxu0 %v13169_v1  ;;  %v13207_v1 = vld [vmem:[#allocation14 + $0x264] ss:$16 sps:$4 sm:$0xff]  }
 0xb79   :  { %9787 = vmatprep.subr.bf16.mxu0 %v13177_v19 }
 0xb7a   :  { %9870 = vmatpush1.bf16.msra.mxu1 %v13166_v25  ;;  %v13199_v25 = vld [vmem:[#allocation14 + $0x240] ss:$16 sps:$4 sm:$0xff]  }
 0xb7b   :  { %9871 = vmatprep.subr.bf16.mxu1 %v13174_v0 }
 0xb7c   :  { %9788 = vmatpush1.bf16.msra.mxu0 %v13175_v16 }
 0xb7d   :  { %9789 = vmatprep.subr.bf16.mxu0 %v13183_v34  ;;  %v13208_v34 = vld [vmem:[#allocation14 + $0x268] ss:$16 sps:$4 sm:$0xff]  }
 0xb7e   :  { %9872 = vmatpush1.bf16.msra.mxu1 %v13172_v15  ;;  %v13210_v15 = vld [vmem:[#allocation14 + $0x26c] ss:$16 sps:$4 sm:$0xff]  }
 0xb7f   :  { %9873 = vmatprep.subr.bf16.mxu1 %v13180_v7 }
 0xb80   :  { %9790 = vmatpush1.bf16.msra.mxu0 %v13181_v63  ;;  %v13216_v63 = vld [vmem:[#allocation14 + $0x28c] ss:$16 sps:$4 sm:$0xff]  }
 0xb81   :  { %9802 = vmatprep.subr.bf16.mxu0 %v13189_v28 }
 0xb82   :  { %9874 = vmatpush1.bf16.msra.mxu1 %v13178_v10  ;;  %v13205_v10 = vld [vmem:[#allocation14 + $0x260] ss:$16 sps:$4 sm:$0xff]  }
 0xb83   :  { %9875 = vmatprep.subr.bf16.mxu1 %v13186_v52  ;;  %v13213_v52 = vld [vmem:[#allocation14 + $0x284] ss:$16 sps:$4 sm:$0xff]  }
 0xb86   :  { %9876 = vmatpush1.bf16.msra.mxu1 %v13184_v18 }
 0xb87   :  { %9888 = vmatprep.subr.bf16.mxu1 %v13192_v54 }
 0xbfc   :  { %v8764_v57 = vpop.f32.mrb[84].mxu0 }
 0xbfd   :  { %v12321_v9 = vpop.f32.mrb[85].mxu0 }
 0xbfe   :  { %v8767_v31 = vpop.f32.mrb[86].mxu0  ;;  %v13214_v9 = vld [vmem:[#allocation14 + $0x288] ss:$16 sps:$4 sm:$0xff]  }
 0xbff   :  { %v12322_v56 = vpop.f32.mrb[87].mxu0 }
 0xc00   :  { %v13219_v56 = vld [vmem:[#allocation14 + $0x2a4] ss:$16 sps:$4 sm:$0xff]  }
 0xc04   :  { %v8807_v3 = vpop.f32.mrb[84].mxu1 }
 0xc05   :  { %v12057_v29 = vpack.c.bf16 %v8807_v3, %v8764_v57  ;;  %v8850_v50 = vpop.f32.mrb[88].mxu0  ;;  %v12327_v40 = vpop.f32.mrb[85].mxu1  ;;  %v13211_v57 = vld [vmem:[#allocation14 + $0x280] ss:$16 sps:$4 sm:$0xff]   ;;  %v13222_v3 = vld [vmem:[#allocation14 + $0x2ac] ss:$16 sps:$4 sm:$0xff]  }
 0xc06   :  { %v12333_v26 = vpop.f32.mrb[89].mxu0  ;;  %v8810_v33 = vpop.f32.mrb[86].mxu1  ;;  %v13220_v40 = vld [vmem:[#allocation14 + $0x2a8] ss:$16 sps:$4 sm:$0xff]  }
 0xc07   :  { %v8853_v44 = vpop.f32.mrb[90].mxu0  ;;  %v12328_v43 = vpop.f32.mrb[87].mxu1  ;;  %v13225_v26 = vld [vmem:[#allocation14 + $0x2c4] ss:$16 sps:$4 sm:$0xff]   ;;  %v13228_v33 = vld [vmem:[#allocation14 + $0x2cc] ss:$16 sps:$4 sm:$0xff]  }
 0xc08   :  { %v12334_v8 = vpop.f32.mrb[91].mxu0  ;;  %v13223_v44 = vld [vmem:[#allocation14 + $0x2c0] ss:$16 sps:$4 sm:$0xff]   ;;  %v13226_v43 = vld [vmem:[#allocation14 + $0x2c8] ss:$16 sps:$4 sm:$0xff]  }
 0xc09   :  { %v13231_v8 = vld [vmem:[#allocation14 + $0x2e4] ss:$16 sps:$4 sm:$0xff]  }
 0xc0c   :  { %v8893_v35 = vpop.f32.mrb[88].mxu1 }
 0xc0d   :  { %v12058_v32 = vpack.c.bf16 %v8893_v35, %v8850_v50  ;;  %v8936_v45 = vpop.f32.mrb[92].mxu0  ;;  %v12339_v49 = vpop.f32.mrb[89].mxu1  ;;  %v13217_v50 = vld [vmem:[#allocation14 + $0x2a0] ss:$16 sps:$4 sm:$0xff]   ;;  %v13234_v35 = vld [vmem:[#allocation14 + $0x2ec] ss:$16 sps:$4 sm:$0xff]  }
 0xc0e   :  { %v12345_v27 = vpop.f32.mrb[93].mxu0  ;;  %v8896_v39 = vpop.f32.mrb[90].mxu1  ;;  %v13237_v49 = vld [vmem:[#allocation14 + $0x304] ss:$16 sps:$4 sm:$0xff]  }
 0xc0f   :  { %v8939_v41 = vpop.f32.mrb[94].mxu0  ;;  %v12340_v58 = vpop.f32.mrb[91].mxu1  ;;  %9791 = vmatprep.mubr.bf16.mxu0 %v12058_v32  ;;  %9877 = vmatprep.mubr.bf16.mxu1 %v12058_v32  ;;  %v13229_v32 = vld [vmem:[#allocation14 + $0x2e0] ss:$16 sps:$4 sm:$0xff]   ;;  %v13238_v27 = vld [vmem:[#allocation14 + $0x308] ss:$16 sps:$4 sm:$0xff]  }
 0xc10   :  { %v12346_v47 = vpop.f32.mrb[95].mxu0  ;;  %9792 = vmatmul.mubr.bf16.vlgmr.msra.gmra.mrb[100].mxu0 %v12057_v29  ;;  %9878 = vmatmul.mubr.bf16.vlgmr.msra.gmra.mrb[100].mxu1 %v12057_v29  ;;  %v13243_v39 = vld [vmem:[#allocation14 + $0x324] ss:$16 sps:$4 sm:$0xff]   ;;  %v13244_v41 = vld [vmem:[#allocation14 + $0x328] ss:$16 sps:$4 sm:$0xff]  }
 0xc11   :  { %9803 = vmatpush1.bf16.msra.mxu0 %v13187_v5  ;;  %9889 = vmatpush1.bf16.msra.mxu1 %v13190_v62  ;;  %v13240_v5 = vld [vmem:[#allocation14 + $0x30c] ss:$16 sps:$4 sm:$0xff]   ;;  %v13235_v62 = vld [vmem:[#allocation14 + $0x300] ss:$16 sps:$4 sm:$0xff]   ;;  %v13249_v58 = vld [vmem:[#allocation14 + $0x344] ss:$16 sps:$4 sm:$0xff]  }
 0xc12   :  { %9804 = vmatprep.subr.bf16.mxu0 %v13195_v51  ;;  %9890 = vmatprep.subr.bf16.mxu1 %v13198_v14  ;;  %v13246_v51 = vld [vmem:[#allocation14 + $0x32c] ss:$16 sps:$4 sm:$0xff]   ;;  %v13241_v14 = vld [vmem:[#allocation14 + $0x320] ss:$16 sps:$4 sm:$0xff]  }
 0xc13   :  { %v13252_v47 = vld [vmem:[#allocation14 + $0x34c] ss:$16 sps:$4 sm:$0xff]  }
 0xc14   :  { %v8979_v23 = vpop.f32.mrb[92].mxu1 }
 0xc15   :  { %v14601_v48 = vpack.c.bf16 %v8979_v23, %v8936_v45  ;;  %v9022_v4 = vpop.f32.mrb[96].mxu0  ;;  %9805 = vmatpush1.bf16.msra.mxu0 %v13193_v61  ;;  %9891 = vmatpush1.bf16.msra.mxu1 %v13196_v24  ;;  %v12351_v53 = vpop.f32.mrb[93].mxu1  ;;  %v13232_v45 = vld [vmem:[#allocation14 + $0x2e8] ss:$16 sps:$4 sm:$0xff]   ;;  %v13247_v61 = vld [vmem:[#allocation14 + $0x340] ss:$16 sps:$4 sm:$0xff]  }
 0xc16   :  { %v12357_v2 = vpop.f32.mrb[97].mxu0  ;;  %v8982_v0 = vpop.f32.mrb[94].mxu1  ;;  %9806 = vmatprep.subr.bf16.mxu0 %v13201_v12  ;;  %9892 = vmatprep.subr.bf16.mxu1 %v13204_v38  ;;  %v13250_v24 = vld [vmem:[#allocation14 + $0x348] ss:$16 sps:$4 sm:$0xff]   ;;  %v13255_v12 = vld [vmem:[#allocation14 + $0x364] ss:$16 sps:$4 sm:$0xff]  }
 0xc17   :  { %v9025_v19 = vpop.f32.mrb[98].mxu0  ;;  %v12352_v7 = vpop.f32.mrb[95].mxu1  ;;  %v13258_v38 = vld [vmem:[#allocation14 + $0x36c] ss:$16 sps:$4 sm:$0xff]   ;;  %v13253_v23 = vld [vmem:[#allocation14 + $0x360] ss:$16 sps:$4 sm:$0xff]  }
 0xc18   :  { %v12358_v16 = vpop.f32.mrb[99].mxu0  ;;  %v13261_v53 = vld [vmem:[#allocation14 + $0x384] ss:$16 sps:$4 sm:$0xff]   ;;  %v13262_v2 = vld [vmem:[#allocation14 + $0x388] ss:$16 sps:$4 sm:$0xff]  }
 0xc19   :  { %9807 = vmatpush1.bf16.msra.mxu0 %v13199_v25  ;;  %9893 = vmatpush1.bf16.msra.mxu1 %v13202_v21  ;;  %v13264_v25 = vld [vmem:[#allocation14 + $0x38c] ss:$16 sps:$4 sm:$0xff]   ;;  %v13259_v21 = vld [vmem:[#allocation14 + $0x380] ss:$16 sps:$4 sm:$0xff]   ;;  %v13267_v0 = vld [vmem:[#allocation14 + $0x3a4] ss:$16 sps:$4 sm:$0xff]  }
 0xc1a   :  { %9808 = vmatprep.subr.bf16.mxu0 %v13207_v1  ;;  %9894 = vmatprep.subr.bf16.mxu1 %v13210_v15  ;;  %v13270_v1 = vld [vmem:[#allocation14 + $0x3ac] ss:$16 sps:$4 sm:$0xff]   ;;  %v13265_v15 = vld [vmem:[#allocation14 + $0x3a0] ss:$16 sps:$4 sm:$0xff]   ;;  %v13268_v19 = vld [vmem:[#allocation14 + $0x3a8] ss:$16 sps:$4 sm:$0xff]  }
 0xc1b   :  { %v13273_v7 = vld [vmem:[#allocation14 + $0x3c4] ss:$16 sps:$4 sm:$0xff]   ;;  %v13276_v16 = vld [vmem:[#allocation14 + $0x3cc] ss:$16 sps:$4 sm:$0xff]  }
 0xc1c   :  { %v9065_v18 = vpop.f32.mrb[96].mxu1 }
 0xc1d   :  { %v12060_v28 = vpack.c.bf16 %v9065_v18, %v9022_v4  ;;  %9809 = vmatpush1.bf16.msra.mxu0 %v13205_v10  ;;  %9895 = vmatpush1.bf16.msra.mxu1 %v13208_v34  ;;  %v12363_v54 = vpop.f32.mrb[97].mxu1  ;;  %v13256_v4 = vld [vmem:[#allocation14 + $0x368] ss:$16 sps:$4 sm:$0xff]   ;;  %v13271_v10 = vld [vmem:[#allocation14 + $0x3c0] ss:$16 sps:$4 sm:$0xff]  }
 0xc1e   :  { %v9068_v31 = vpop.f32.mrb[98].mxu1  ;;  %9810 = vmatprep.subr.bf16.mxu0 %v13213_v52  ;;  %9896 = vmatprep.subr.bf16.mxu1 %v13216_v63  ;;  %v13274_v34 = vld [vmem:[#allocation14 + $0x3c8] ss:$16 sps:$4 sm:$0xff]   ;;  %v13279_v52 = vld [vmem:[#allocation14 + $0x3e4] ss:$16 sps:$4 sm:$0xff]  }
 0xc1f   :  { %v12364_v29 = vpop.f32.mrb[99].mxu1  ;;  %9834 = vmatprep.mubr.bf16.mxu0 %v12060_v28  ;;  %9920 = vmatprep.mubr.bf16.mxu1 %v12060_v28  ;;  %v13282_v63 = vld [vmem:[#allocation14 + $0x3ec] ss:$16 sps:$4 sm:$0xff]   ;;  %v13277_v18 = vld [vmem:[#allocation14 + $0x3e0] ss:$16 sps:$4 sm:$0xff]  }
 0xc20   :  { %v13280_v28 = vld [vmem:[#allocation14 + $0x3e8] ss:$16 sps:$4 sm:$0xff]   ;;  %v14605_v54 = vld [vmem:[#allocation19 + $0x20] sm:$0x7f] }
 0xc21   :  { %9811 = vmatpush1.bf16.msra.mxu0 %v13211_v57  ;;  %9897 = vmatpush1.bf16.msra.mxu1 %v13214_v9  ;;  %v9106_v57 = vrot.slane %v14605_v54, %v14118_v55  ;;  %v14609_v9 = vld [vmem:[#allocation19 + $0x30] sm:$0x7f]  ;;  %v14617_v29 = vld [vmem:[#allocation19 + $0x38] sm:$0x7f] }
 0xc22   :  { %9812 = vmatprep.subr.bf16.mxu0 %v13219_v56  ;;  %9898 = vmatprep.subr.bf16.mxu1 %v13222_v3  ;;  %v9114_v31 = vrot.slane %v14609_v9, %v14118_v55  ;;  %v14613_v56 = vld [vmem:[#allocation19 + $0x28] sm:$0x7f] }
 0xc23   :  { %v9110_v3 = vrot.slane %v14613_v56, %v14118_v55 }
 0xc25   :  { %9813 = vmatpush1.bf16.msra.mxu0 %v13217_v50  ;;  %9899 = vmatpush1.bf16.msra.mxu1 %v13220_v40 }
 0xc26   :  { %9814 = vmatprep.subr.bf16.mxu0 %v13225_v26  ;;  %9900 = vmatprep.subr.bf16.mxu1 %v13228_v33 }
 0xc29   :  { %9815 = vmatpush1.bf16.msra.mxu0 %v13223_v44  ;;  %9901 = vmatpush1.bf16.msra.mxu1 %v13226_v43 }
 0xc2a   :  { %9816 = vmatprep.subr.bf16.mxu0 %v13231_v8  ;;  %9902 = vmatprep.subr.bf16.mxu1 %v13234_v35 }
 0xc2d   :  { %9817 = vmatpush1.bf16.msra.mxu0 %v13229_v32  ;;  %9903 = vmatpush1.bf16.msra.mxu1 %v13232_v45 }
 0xc2e   :  { %9818 = vmatprep.subr.bf16.mxu0 %v13237_v49  ;;  %9904 = vmatprep.subr.bf16.mxu1 %v13240_v5 }
 0xc31   :  { %9819 = vmatpush1.bf16.msra.mxu0 %v13235_v62  ;;  %9905 = vmatpush1.bf16.msra.mxu1 %v13238_v27 }
 0xc32   :  { %9820 = vmatprep.subr.bf16.mxu0 %v13243_v39  ;;  %9906 = vmatprep.subr.bf16.mxu1 %v13246_v51 }
 0xc35   :  { %9821 = vmatpush1.bf16.msra.mxu0 %v13241_v14  ;;  %9907 = vmatpush1.bf16.msra.mxu1 %v13244_v41 }
 0xc36   :  { %9822 = vmatprep.subr.bf16.mxu0 %v13249_v58  ;;  %9908 = vmatprep.subr.bf16.mxu1 %v13252_v47 }
 0xc39   :  { %9823 = vmatpush1.bf16.msra.mxu0 %v13247_v61  ;;  %9909 = vmatpush1.bf16.msra.mxu1 %v13250_v24 }
 0xc3a   :  { %9824 = vmatprep.subr.bf16.mxu0 %v13255_v12  ;;  %9910 = vmatprep.subr.bf16.mxu1 %v13258_v38 }
 0xc3d   :  { %9825 = vmatpush1.bf16.msra.mxu0 %v13253_v23  ;;  %9911 = vmatpush1.bf16.msra.mxu1 %v13256_v4 }
 0xc3e   :  { %9826 = vmatprep.subr.bf16.mxu0 %v13261_v53  ;;  %9912 = vmatprep.subr.bf16.mxu1 %v13264_v25 }
 0xc41   :  { %9827 = vmatpush1.bf16.msra.mxu0 %v13259_v21  ;;  %9913 = vmatpush1.bf16.msra.mxu1 %v13262_v2 }
 0xc42   :  { %9828 = vmatprep.subr.bf16.mxu0 %v13267_v0  ;;  %9914 = vmatprep.subr.bf16.mxu1 %v13270_v1 }
 0xc45   :  { %9829 = vmatpush1.bf16.msra.mxu0 %v13265_v15  ;;  %9915 = vmatpush1.bf16.msra.mxu1 %v13268_v19 }
 0xc46   :  { %9830 = vmatprep.subr.bf16.mxu0 %v13273_v7  ;;  %9916 = vmatprep.subr.bf16.mxu1 %v13276_v16  ;;  %v13283_v16 = vld [vmem:[#allocation16 + $0x40] sm:$0xff]  }
 0xc49   :  { %9831 = vmatpush1.bf16.msra.mxu0 %v13271_v10  ;;  %9917 = vmatpush1.bf16.msra.mxu1 %v13274_v34  ;;  %v13284_v10 = vld [vmem:[#allocation16 + $0xc0] sm:$0xff]  }
 0xc4a   :  { %9832 = vmatprep.subr.bf16.mxu0 %v13279_v52  ;;  %9918 = vmatprep.subr.bf16.mxu1 %v13282_v63  ;;  %v13285_v34 = vld [vmem:[#allocation16] sm:$0xff]   ;;  %v13287_v63 = vld [vmem:[#allocation16 + $0x48] sm:$0xff]  }
 0xc4b   :  { %v13286_v52 = vld [vmem:[#allocation16 + $0x80] sm:$0xff]  }
 0xc4d   :  { %9833 = vmatpush1.bf16.msra.mxu0 %v13277_v18  ;;  %9919 = vmatpush1.bf16.msra.mxu1 %v13280_v28  ;;  %v13288_v18 = vld [vmem:[#allocation16 + $0xc8] sm:$0xff]  }
 0xc4e   :  { %12129 = vmatprep.subr.bf16.mxu0 %v13283_v16  ;;  %12151 = vmatprep.subr.bf16.mxu1 %v13284_v10  ;;  %v13289_v28 = vld [vmem:[#allocation16 + $0x8] sm:$0xff]   ;;  %v10002_v10 = vrot.slane %v14613_v56, %v14172_v30 }
 0xc50   :  { %9835 = vmatmul.mubr.bf16.vlgmr.msra.gmra.mrb[100].mxu0 %v14601_v48  ;;  %9921 = vmatmul.mubr.bf16.vlgmr.msra.gmra.mrb[100].mxu1 %v14601_v48  ;;  %v9118_v48 = vrot.slane %v14617_v29, %v14118_v55 }
 0xc51   :  { %12130 = vmatpush3.bf16.msra.mxu0 %v13285_v34  ;;  %12152 = vmatpush3.bf16.msra.mxu1 %v13286_v52  ;;  %v10010_v34 = vrot.slane %v14617_v29, %v14172_v30  ;;  %v9998_v52 = vrot.slane %v14605_v54, %v14172_v30 }
 0xc52   :  { %12131 = vmatprep.subr.bf16.mxu0 %v13287_v63  ;;  %12153 = vmatprep.subr.bf16.mxu1 %v13288_v18  ;;  %v10006_v63 = vrot.slane %v14609_v9, %v14172_v30 }
 0xc55   :  { %12132 = vmatpush3.bf16.msra.mxu0 %v13289_v28 }
 0xd23   :  { %v9836_v50 = vpop.f32.mrb[100].mxu0  ;;  %v9922_v40 = vpop.f32.mrb[100].mxu1 }
 0xd24   :  { %v12389_v26 = vadd.f32 %v9836_v50, %v9106_v57  ;;  %v12393_v33 = vadd.f32 %v9922_v40, %v9114_v31  ;;  %v9838_v44 = vpop.f32.mrb[101].mxu0  ;;  %v9924_v43 = vpop.f32.mrb[101].mxu1  ;;  %v13294_v50 = vld [vmem:[#allocation16 + $0x90] sm:$0xff]   ;;  %v13295_v40 = vld [vmem:[#allocation16 + $0x58] sm:$0xff]  }
 0xd25   :  { %v12390_v8 = vadd.f32 %v9838_v44, %v9110_v3  ;;  %v12394_v35 = vadd.f32 %v9924_v43, %v9118_v48  ;;  %v9840_v32 = vpop.f32.mrb[102].mxu0  ;;  %v9926_v45 = vpop.f32.mrb[102].mxu1  ;;  %v13298_v44 = vld [vmem:[#allocation16 + $0x98] sm:$0xff]   ;;  %v13299_v43 = vld [vmem:[#allocation16 + $0x60] sm:$0xff]  }
 0xd26   :  { %v14622_v49 = vadd.f32 %v12389_v26, %v14353_v42  ;;  %v14625_v5 = vadd.f32 %v12393_v33, %v14375_v13  ;;  %v12391_v62 = vadd.f32 %v9840_v32, %v9106_v57  ;;  %v12395_v27 = vadd.f32 %v9926_v45, %v9114_v31  ;;  %v9842_v39 = vpop.f32.mrb[103].mxu0  ;;  %v9928_v55 = vpop.f32.mrb[103].mxu1  ;;  %v13290_v57 = vld [vmem:[#allocation16 + $0x88] sm:$0xff]   ;;  %v13291_v31 = vld [vmem:[#allocation16 + $0x50] sm:$0xff]   ;;  %v13296_v26 = vld [vmem:[#allocation16 + $0xd8] sm:$0xff]  }
 0xd27   :  { %v14628_v51 = vadd.f32 %v12390_v8, %v14349_v20  ;;  %v12392_v14 = vadd.f32 %v9842_v39, %v9110_v3  ;;  %v12396_v47 = vadd.f32 %v9928_v55, %v9118_v48  ;;  %v14646_v24 = vadd.f32 %v12394_v35, %v14363_v36  ;;  %12154 = vmatpush3.bf16.msra.mxu1 %v13290_v57  ;;  %v13292_v3 = vld [vmem:[#allocation16 + $0xd0] sm:$0xff]   ;;  %v13297_v33 = vld [vmem:[#allocation16 + $0x18] sm:$0xff]   ;;  %v13300_v8 = vld [vmem:[#allocation16 + $0xe0] sm:$0xff]  }
 0xd28   :  { %v9951_v41 = vmul.f32 %v14622_v49, %v14622_v49  ;;  %v14633_v58 = vadd.f32 %v12391_v62, %v14355_v22  ;;  %v14636_v42 = vadd.f32 %v12395_v27, %v14373_v11  ;;  %v9953_v11 = vmul.f32 %v14625_v5, %v14625_v5  ;;  %v13293_v48 = vld [vmem:[#allocation16 + $0x10] sm:$0xff]   ;;  %12133 = vmatprep.subr.bf16.mxu0 %v13291_v31  ;;  %v13301_v35 = vld [vmem:[#allocation16 + $0x20] sm:$0xff]   ;;  %v13303_v45 = vld [vmem:[#allocation16 + $0x68] sm:$0xff]  }
 0xd29   :  { %v9952_v13 = vmul.f32 %v14628_v51, %v14628_v51  ;;  %v14641_v61 = vadd.f32 %v12392_v14, %v14351_v37  ;;  %v9939_v20 = vadd.f32 %v14628_v51, %v14622_v49  ;;  %v14658_v4 = vadd.f32 %v12396_v47, %v14357_v17  ;;  %12155 = vmatprep.subr.bf16.mxu1 %v13292_v3  ;;  %v13302_v32 = vld [vmem:[#allocation16 + $0xa0] sm:$0xff]   ;;  %v13304_v62 = vld [vmem:[#allocation16 + $0xe8] sm:$0xff]   ;;  %v13307_v55 = vld [vmem:[#allocation16 + $0x70] sm:$0xff]  }
 0xd2a   :  { %v9955_v22 = vmul.f32 %v14633_v58, %v14633_v58  ;;  %v9957_v36 = vmul.f32 %v14636_v42, %v14636_v42  ;;  %v9954_v1 = vmul.f32 %v14646_v24, %v14646_v24  ;;  %12134 = vmatpush3.bf16.msra.mxu0 %v13293_v48  ;;  %v13305_v27 = vld [vmem:[#allocation16 + $0x28] sm:$0xff]   ;;  %v13308_v14 = vld [vmem:[#allocation16 + $0xf0] sm:$0xff]  }
 0xd2b   :  { %v9956_v12 = vmul.f32 %v14641_v61, %v14641_v61  ;;  %v9940_v38 = vadd.f32 %v9939_v20, %v14625_v5  ;;  %v9944_v37 = vadd.f32 %v14641_v61, %v14633_v58  ;;  %v9959_v23 = vadd.f32 %v9952_v13, %v9951_v41  ;;  %12156 = vmatpush3.bf16.msra.mxu1 %v13294_v50  ;;  %v13306_v39 = vld [vmem:[#allocation16 + $0xa8] sm:$0xff]   ;;  %v13309_v41 = vld [vmem:[#allocation16 + $0x30] sm:$0xff]   ;;  %v13311_v13 = vld [vmem:[#allocation16 + $0x78] sm:$0xff]  }
 0xd2c   :  { %v9958_v17 = vmul.f32 %v14658_v4, %v14658_v4  ;;  %12135 = vmatprep.subr.bf16.mxu0 %v13295_v40  ;;  %12157 = vmatprep.subr.bf16.mxu1 %v13296_v26  ;;  %v13310_v47 = vld [vmem:[#allocation16 + $0xb0] sm:$0xff]   ;;  %v13312_v20 = vld [vmem:[#allocation16 + $0xf8] sm:$0xff]   ;;  %v10026_v50 = vrot.slane %v14613_v56, %v14261_v46  ;;  %v10034_v26 = vrot.slane %v14617_v29, %v14261_v46 }
 0xd2d   :  { %v9941_v53 = vadd.f32 %v9940_v38, %v14646_v24  ;;  %v9945_v25 = vadd.f32 %v9944_v37, %v14636_v42  ;;  %v9960_v21 = vadd.f32 %v9959_v23, %v9953_v11  ;;  %v9964_v2 = vadd.f32 %v9956_v12, %v9955_v22  ;;  %v13313_v22 = vld [vmem:[#allocation16 + $0x38] sm:$0xff]   ;;  %v13317_v12 = vld [vmem:[#allocation17 + $0x4] ss:$16 sps:$4 sm:$0xff]  }
 0xd2e   :  { %12136 = vmatpush3.bf16.msra.mxu0 %v13297_v33  ;;  %v13314_v11 = vld [vmem:[#allocation16 + $0xb8] sm:$0xff]  }
 0xd2f   :  { %9942 = vadd.xlane.f32.xlu0 %v9941_v53  ;;  %v9946_v0 = vadd.f32 %v9945_v25, %v14658_v4  ;;  %v9965_v15 = vadd.f32 %v9964_v2, %v9957_v36  ;;  %v9961_v19 = vadd.f32 %v9960_v21, %v9954_v1  ;;  %12158 = vmatpush3.bf16.msra.mxu1 %v13298_v44  ;;  %v13320_v38 = vld [vmem:[#allocation17 + $0xc] ss:$16 sps:$4 sm:$0xff]  }
 0xd30   :  { %12137 = vmatprep.subr.bf16.mxu0 %v13299_v43  ;;  %12159 = vmatprep.subr.bf16.mxu1 %v13300_v8  ;;  %v10030_v43 = vrot.slane %v14609_v9, %v14261_v46 }
 0xd31   :  { %9947 = vadd.xlane.f32.xlu1 %v9946_v0  ;;  %v9966_v7 = vadd.f32 %v9965_v15, %v9958_v17 }
 0xd32   :  { %12138 = vmatpush3.bf16.msra.mxu0 %v13301_v35 }
 0xd33   :  { %9962 = vadd.xlane.f32.xlu0 %v9961_v19  ;;  %12160 = vmatpush3.bf16.msra.mxu1 %v13302_v32 }
 0xd34   :  { %12139 = vmatprep.subr.bf16.mxu0 %v13303_v45  ;;  %12161 = vmatprep.subr.bf16.mxu1 %v13304_v62 }
 0xd35   :  { %9967 = vadd.xlane.f32.xlu1 %v9966_v7 }
 0xd36   :  { %12140 = vmatpush3.bf16.msra.mxu0 %v13305_v27 }
 0xd37   :  { %12162 = vmatpush3.bf16.msra.mxu1 %v13306_v39  ;;  %12141 = vmatprep.subr.bf16.mxu0 %v13307_v55 }
 0xd38   :  { %12163 = vmatprep.subr.bf16.mxu1 %v13308_v14 }
 0xd3a   :  { %12142 = vmatpush3.bf16.msra.mxu0 %v13309_v41 }
 0xd3b   :  { %12164 = vmatpush3.bf16.msra.mxu1 %v13310_v47  ;;  %12143 = vmatprep.subr.bf16.mxu0 %v13311_v13 }
 0xd3c   :  { %12165 = vmatprep.subr.bf16.mxu1 %v13312_v20 }
 0xd3e   :  { %12144 = vmatpush3.bf16.msra.mxu0 %v13313_v22 }
 0xd3f   :  { %12166 = vmatpush3.bf16.msra.mxu1 %v13314_v11  ;;  %10603 = vmatprep.subr.bf16.mxu0 %v13317_v12 }
 0xd40   :  { %10646 = vmatprep.subr.bf16.mxu1 %v13320_v38 }
 0xdbc   :  { %v9943_v37 = vpop.xlane.xlu0 %9942 }
 0xdbd   :  { %v9949_v23 = vmul.f32 0.03125, %v9943_v37 }
 0xdbe   :  { %v9948_v36 = vpop.xlane.xlu1 %9947 }
 0xdbf   :  { %v9950_v53 = vmul.f32 0.03125, %v9948_v36  ;;  %v9971_v21 = vmul.f32 %v9949_v23, %v9949_v23  ;;  %v9975_v18 = vsub.f32 %v14622_v49, %v9949_v23  ;;  %v9977_v28 = vsub.f32 %v14625_v5, %v9949_v23  ;;  %v13318_v36 = vld [vmem:[#allocation17 + $0x8] ss:$16 sps:$4 sm:$0xff]  }
 0xdc0   :  { %v9963_v25 = vpop.xlane.xlu0 %9962  ;;  %v9976_v57 = vsub.f32 %v14628_v51, %v9949_v23  ;;  %v9978_v31 = vsub.f32 %v14646_v24, %v9949_v23  ;;  %v13315_v23 = vld [vmem:[#allocation17] ss:$16 sps:$4 sm:$0xff]  }
 0xdc1   :  { %v9969_v2 = vmul.f32 0.03125, %v9963_v25  ;;  %v9972_v15 = vmul.f32 %v9950_v53, %v9950_v53  ;;  %v9980_v48 = vsub.f32 %v14641_v61, %v9950_v53  ;;  %v9982_v40 = vsub.f32 %v14658_v4, %v9950_v53 }
 0xdc2   :  { %v9968_v0 = vpop.xlane.xlu1 %9967  ;;  %v9979_v51 = vsub.f32 %v14633_v58, %v9950_v53  ;;  %v9981_v24 = vsub.f32 %v14636_v42, %v9950_v53  ;;  %v10022_v61 = vrot.slane %v14605_v54, %v14261_v46 }
 0xdc3   :  { %v9973_v1 = vsub.f32 %v9969_v2, %v9971_v21  ;;  %v9970_v19 = vmul.f32 0.03125, %v9968_v0  ;;  %v13323_v21 = vld [vmem:[#allocation17 + $0x24] ss:$16 sps:$4 sm:$0xff]   ;;  %v13326_v2 = vld [vmem:[#allocation17 + $0x2c] ss:$16 sps:$4 sm:$0xff]  }
 0xdc4   :  { %v13321_v0 = vld [vmem:[#allocation17 + $0x20] ss:$16 sps:$4 sm:$0xff]  }
 0xdc5   :  { %v9983_v17 = vadd.f32 1e-05, %v9973_v1  ;;  %v9974_v7 = vsub.f32 %v9970_v19, %v9972_v15  ;;  %v13324_v1 = vld [vmem:[#allocation17 + $0x28] ss:$16 sps:$4 sm:$0xff]   ;;  %v13329_v15 = vld [vmem:[#allocation17 + $0x44] ss:$16 sps:$4 sm:$0xff]  }
 0xdc6   :  { %v13332_v19 = vld [vmem:[#allocation17 + $0x4c] ss:$16 sps:$4 sm:$0xff]  }
 0xdc7   :  { %13431 = vrsqrt.f32 %v9983_v17  ;;  %v9984_v16 = vadd.f32 1e-05, %v9974_v7  ;;  %v13327_v17 = vld [vmem:[#allocation17 + $0x40] ss:$16 sps:$4 sm:$0xff]   ;;  %v13330_v7 = vld [vmem:[#allocation17 + $0x48] ss:$16 sps:$4 sm:$0xff]  }
 0xdc9   :  { %13433 = vrsqrt.f32 %v9984_v16  ;;  %v13335_v16 = vld [vmem:[#allocation17 + $0x64] ss:$16 sps:$4 sm:$0xff]  }
 0xdd1   :  { %v13432_v3 = vpop.eup %13431 }
 0xdd2   :  { %v9988_v30 = vmul.f32 %v13432_v3, %v9976_v57  ;;  %v9990_v33 = vmul.f32 %v13432_v3, %v9978_v31  ;;  %v9987_v49 = vmul.f32 %v13432_v3, %v9975_v18  ;;  %v9989_v44 = vmul.f32 %v13432_v3, %v9977_v28  ;;  %v13344_v18 = vld [vmem:[#allocation17 + $0x8c] ss:$16 sps:$4 sm:$0xff]   ;;  %v13339_v28 = vld [vmem:[#allocation17 + $0x80] ss:$16 sps:$4 sm:$0xff]   ;;  %v13342_v57 = vld [vmem:[#allocation17 + $0x88] ss:$16 sps:$4 sm:$0xff]  }
 0xdd3   :  { %v13434_v5 = vpop.eup %13433  ;;  %v13347_v31 = vld [vmem:[#allocation17 + $0xa4] ss:$16 sps:$4 sm:$0xff]   ;;  %v13350_v3 = vld [vmem:[#allocation17 + $0xac] ss:$16 sps:$4 sm:$0xff]  }
 0xdd4   :  { %v9992_v8 = vmul.f32 %v13434_v5, %v9980_v48  ;;  %v10012_v4 = vmul.f32 %v10002_v10, %v9988_v30  ;;  %v9994_v35 = vmul.f32 %v13434_v5, %v9982_v40  ;;  %v10014_v32 = vmul.f32 %v10010_v34, %v9990_v33  ;;  %v13345_v48 = vld [vmem:[#allocation17 + $0xa0] ss:$16 sps:$4 sm:$0xff]   ;;  %v13353_v40 = vld [vmem:[#allocation17 + $0xc4] ss:$16 sps:$4 sm:$0xff]   ;;  %v13354_v33 = vld [vmem:[#allocation17 + $0xc8] ss:$16 sps:$4 sm:$0xff]  }
 0xdd5   :  { %v9991_v45 = vmul.f32 %v13434_v5, %v9979_v51  ;;  %v10011_v62 = vmul.f32 %v9998_v52, %v9987_v49  ;;  %v9993_v27 = vmul.f32 %v13434_v5, %v9981_v24  ;;  %v10013_v39 = vmul.f32 %v10006_v63, %v9989_v44  ;;  %v13351_v30 = vld [vmem:[#allocation17 + $0xc0] ss:$16 sps:$4 sm:$0xff]   ;;  %v13359_v49 = vld [vmem:[#allocation17 + $0xe4] ss:$16 sps:$4 sm:$0xff]   ;;  %v13362_v44 = vld [vmem:[#allocation17 + $0xec] ss:$16 sps:$4 sm:$0xff]  }
 0xdd6   :  { %v10016_v55 = vmul.f32 %v10002_v10, %v9992_v8  ;;  %v10018_v14 = vmul.f32 %v10010_v34, %v9994_v35  ;;  %v14693_v47 = vadd.f32 %v10026_v50, %v10012_v4  ;;  %v14697_v13 = vadd.f32 %v10034_v26, %v10014_v32  ;;  %v13338_v10 = vld [vmem:[#allocation17 + $0x6c] ss:$16 sps:$4 sm:$0xff]   ;;  %v13333_v34 = vld [vmem:[#allocation17 + $0x60] ss:$16 sps:$4 sm:$0xff]   ;;  %v13360_v51 = vld [vmem:[#allocation17 + $0xe8] ss:$16 sps:$4 sm:$0xff]  }
 0xdd7   :  { %v10015_v41 = vmul.f32 %v9998_v52, %v9991_v45  ;;  %v10017_v58 = vmul.f32 %v10006_v63, %v9993_v27  ;;  %v14701_v46 = vadd.f32 %v10022_v61, %v10011_v62  ;;  %v14705_v11 = vadd.f32 %v10030_v43, %v10013_v39  ;;  %v13336_v52 = vld [vmem:[#allocation17 + $0x68] ss:$16 sps:$4 sm:$0xff]   ;;  %v13341_v63 = vld [vmem:[#allocation17 + $0x84] ss:$16 sps:$4 sm:$0xff]   ;;  %v13357_v5 = vld [vmem:[#allocation17 + $0xe0] ss:$16 sps:$4 sm:$0xff]  }
 0xdd8   :  { %v14695_v42 = vadd.f32 %v10026_v50, %v10016_v55  ;;  %v14699_v20 = vadd.f32 %v10034_v26, %v10018_v14  ;;  %v13348_v50 = vld [vmem:[#allocation17 + $0xa8] ss:$16 sps:$4 sm:$0xff]   ;;  %v13356_v26 = vld [vmem:[#allocation17 + $0xcc] ss:$16 sps:$4 sm:$0xff]   ;;  %v13777_v24 = vmov 0  }
 0xdd9   :  { %v14703_v22 = vadd.f32 %v10022_v61, %v10015_v41  ;;  %v14707_v12 = vadd.f32 %v10030_v43, %v10017_v58  ;;  %v11952_v8 = vld [vmem:[#allocation20] ss:$0 sm:$0xff] }
 0xdda   :  { %v10044_v38 = vpack.c.bf16 %v14695_v42, %v14693_v47  ;;  %v10046_v37 = vpack.c.bf16 %v14699_v20, %v14697_v13 }
 0xddb   :  { %v10043_v53 = vpack.c.bf16 %v14703_v22, %v14701_v46  ;;  %v10045_v25 = vpack.c.bf16 %v14707_v12, %v14705_v11 }
 0xddc   :  { %10374 = vmatprep.mubr.bf16.mxu0 %v10044_v38  ;;  %10415 = vmatprep.mubr.bf16.mxu1 %v10046_v37 }
 0xddd   :  { %10375 = vmatmul.mubr.bf16.vlgmr.msra.gmra.mrb[104].mxu0 %v10043_v53  ;;  %10416 = vmatmul.mubr.bf16.vlgmr.msra.gmra.mrb[104].mxu1 %v10045_v25 }
 0xdde   :  { %10604 = vmatpush1.bf16.msra.mxu0 %v13315_v23  ;;  %10647 = vmatpush1.bf16.msra.mxu1 %v13318_v36 }
 0xddf   :  { %10605 = vmatprep.subr.bf16.mxu0 %v13323_v21  ;;  %10648 = vmatprep.subr.bf16.mxu1 %v13326_v2  ;;  %v10430_v21 = vrot.slane %v14605_v54, %v14320_v59  ;;  %v10438_v2 = vrot.slane %v14609_v9, %v14320_v59 }
 0xde0   :  { %10635 = vmatprep.mubr.bf16.mxu0 %v13777_v24  ;;  %10678 = vmatprep.mubr.bf16.mxu1 %v13777_v24 }
 0xde2   :  { %10606 = vmatpush1.bf16.msra.mxu0 %v13321_v0  ;;  %10649 = vmatpush1.bf16.msra.mxu1 %v13324_v1  ;;  %v10434_v0 = vrot.slane %v14613_v56, %v14320_v59  ;;  %v10442_v1 = vrot.slane %v14617_v29, %v14320_v59 }
 0xde3   :  { %10607 = vmatprep.subr.bf16.mxu0 %v13329_v15  ;;  %10650 = vmatprep.subr.bf16.mxu1 %v13332_v19 }
 0xde6   :  { %10608 = vmatpush1.bf16.msra.mxu0 %v13327_v17  ;;  %10651 = vmatpush1.bf16.msra.mxu1 %v13330_v7 }
 0xde7   :  { %10609 = vmatprep.subr.bf16.mxu0 %v13335_v16  ;;  %10652 = vmatprep.subr.bf16.mxu1 %v13338_v10 }
 0xdea   :  { %10610 = vmatpush1.bf16.msra.mxu0 %v13333_v34  ;;  %10653 = vmatpush1.bf16.msra.mxu1 %v13336_v52 }
 0xdeb   :  { %10611 = vmatprep.subr.bf16.mxu0 %v13341_v63  ;;  %10654 = vmatprep.subr.bf16.mxu1 %v13344_v18 }
 0xdee   :  { %10612 = vmatpush1.bf16.msra.mxu0 %v13339_v28  ;;  %10655 = vmatpush1.bf16.msra.mxu1 %v13342_v57 }
 0xdef   :  { %10613 = vmatprep.subr.bf16.mxu0 %v13347_v31  ;;  %10656 = vmatprep.subr.bf16.mxu1 %v13350_v3 }
 0xdf2   :  { %10614 = vmatpush1.bf16.msra.mxu0 %v13345_v48  ;;  %10657 = vmatpush1.bf16.msra.mxu1 %v13348_v50 }
 0xdf3   :  { %10615 = vmatprep.subr.bf16.mxu0 %v13353_v40  ;;  %10658 = vmatprep.subr.bf16.mxu1 %v13356_v26 }
 0xdf6   :  { %10616 = vmatpush1.bf16.msra.mxu0 %v13351_v30  ;;  %10659 = vmatpush1.bf16.msra.mxu1 %v13354_v33 }
 0xdf7   :  { %10617 = vmatprep.subr.bf16.mxu0 %v13359_v49  ;;  %10660 = vmatprep.subr.bf16.mxu1 %v13362_v44 }
 0xdfa   :  { %10618 = vmatpush1.bf16.msra.mxu0 %v13357_v5  ;;  %10661 = vmatpush1.bf16.msra.mxu1 %v13360_v51 }
 0xeb0   :  { %v12145_v61 = vpop.f32.mrb[104].mxu0  ;;  %v12167_v43 = vpop.f32.mrb[104].mxu1 }
 0xeb1   :  { %v12146_v4 = vpop.f32.mrb[105].mxu0  ;;  %v12168_v35 = vpop.f32.mrb[105].mxu1 }
 0xeb2   :  { %v12147_v32 = vadd.f32 %v12146_v4, %v12145_v61  ;;  %v12169_v45 = vadd.f32 %v12168_v35, %v12167_v43  ;;  %v12148_v62 = vpop.f32.mrb[106].mxu0  ;;  %v12170_v27 = vpop.f32.mrb[106].mxu1 }
 0xeb3   :  { %v12149_v39 = vpop.f32.mrb[107].mxu0  ;;  %v12171_v55 = vpop.f32.mrb[107].mxu1 }
 0xeb4   :  { %v10377_v14 = vadd.f32 %v12147_v32, %v11952_v8  ;;  %v12150_v41 = vadd.f32 %v12149_v39, %v12148_v62  ;;  %v12172_v58 = vadd.f32 %v12171_v55, %v12170_v27 }
 0xeb6   :  { %v10418_v38 = vadd.f32 %v12169_v45, %v10377_v14  ;;  %v10380_v37 = vadd.f32 %v12150_v41, %v11952_v8 }
 0xeb8   :  { %v10421_v23 = vadd.f32 %v12172_v58, %v10380_v37  ;;  %v10424_v36 = vmax.f32 %v10418_v38, 0.0 }
 0xeba   :  { %v10425_v53 = vmax.f32 %v10421_v23, 0.0 }
 0xebc   :  { %v10426_v25 = vpack.c.bf16 %v10425_v53, %v10424_v36 }
 0xebe   :  { %10636 = vmatmul.mubr.bf16.vlgmr.msra.gmra.mrb[108].mxu0 %v10426_v25  ;;  %10679 = vmatmul.mubr.bf16.vlgmr.msra.gmra.mrb[108].mxu1 %v10426_v25 }
 0xf91   :  { %v10637_v15 = vpop.f32.mrb[108].mxu0  ;;  %v10680_v19 = vpop.f32.mrb[108].mxu1 }
 0xf92   :  { %v10638_v17 = vadd.f32 %v10637_v15, %v10430_v21  ;;  %v10681_v7 = vadd.f32 %v10680_v19, %v10438_v2  ;;  %v10639_v16 = vpop.f32.mrb[109].mxu0  ;;  %v10682_v10 = vpop.f32.mrb[109].mxu1  ;;  %v10756_v15 = vrot.slane %v14605_v54, %v14323_v60  ;;  %v10760_v19 = vrot.slane %v14613_v56, %v14323_v60 }
 0xf93   :  { %v10640_v34 = vadd.f32 %v10639_v16, %v10434_v0  ;;  %v10683_v52 = vadd.f32 %v10682_v10, %v10442_v1  ;;  %v10641_v63 = vpop.f32.mrb[110].mxu0  ;;  %v10684_v18 = vpop.f32.mrb[110].mxu1 }
 0xf94   :  { %v14726_v28 = vadd.f32 %v10638_v17, %v14701_v46  ;;  %v14729_v57 = vadd.f32 %v10681_v7, %v14705_v11  ;;  %v10642_v31 = vadd.f32 %v10641_v63, %v10430_v21  ;;  %v10685_v3 = vadd.f32 %v10684_v18, %v10438_v2  ;;  %v10643_v48 = vpop.f32.mrb[111].mxu0  ;;  %v10686_v59 = vpop.f32.mrb[111].mxu1 }
 0xf95   :  { %v14732_v50 = vadd.f32 %v10640_v34, %v14693_v47  ;;  %v10644_v40 = vadd.f32 %v10643_v48, %v10434_v0  ;;  %v10687_v33 = vadd.f32 %v10686_v59, %v10442_v1  ;;  %v10692_v44 = vadd.f32 %v10683_v52, %v14697_v13 }
 0xf96   :  { %v10709_v26 = vmul.f32 %v14726_v28, %v14726_v28  ;;  %v14737_v30 = vadd.f32 %v10642_v31, %v14703_v22  ;;  %v14740_v46 = vadd.f32 %v10685_v3, %v14707_v12  ;;  %v10711_v22 = vmul.f32 %v14729_v57, %v14729_v57 }
 0xf97   :  { %v10710_v11 = vmul.f32 %v14732_v50, %v14732_v50  ;;  %v14745_v49 = vadd.f32 %v10644_v40, %v14695_v42  ;;  %v10697_v47 = vadd.f32 %v14732_v50, %v14726_v28  ;;  %v10696_v61 = vadd.f32 %v10687_v33, %v14699_v20 }
 0xf98   :  { %v10713_v5 = vmul.f32 %v14737_v30, %v14737_v30  ;;  %v10715_v13 = vmul.f32 %v14740_v46, %v14740_v46  ;;  %v10712_v45 = vmul.f32 %v10692_v44, %v10692_v44  ;;  %v10764_v17 = vrot.slane %v14609_v9, %v14323_v60 }
 0xf99   :  { %v10714_v12 = vmul.f32 %v14745_v49, %v14745_v49  ;;  %v10698_v51 = vadd.f32 %v10697_v47, %v14729_v57  ;;  %v10702_v42 = vadd.f32 %v14745_v49, %v14737_v30  ;;  %v10717_v24 = vadd.f32 %v10710_v11, %v10709_v26 }
 0xf9a   :  { %v10716_v39 = vmul.f32 %v10696_v61, %v10696_v61  ;;  %v10768_v7 = vrot.slane %v14617_v29, %v14323_v60 }
 0xf9b   :  { %v10699_v43 = vadd.f32 %v10698_v51, %v10692_v44  ;;  %v10703_v8 = vadd.f32 %v10702_v42, %v14740_v46  ;;  %v10718_v4 = vadd.f32 %v10717_v24, %v10711_v22  ;;  %v10722_v35 = vadd.f32 %v10714_v12, %v10713_v5 }
 0xf9d   :  { %10700 = vadd.xlane.f32.xlu0 %v10699_v43  ;;  %v10704_v32 = vadd.f32 %v10703_v8, %v10696_v61  ;;  %v10723_v62 = vadd.f32 %v10722_v35, %v10715_v13  ;;  %v10719_v27 = vadd.f32 %v10718_v4, %v10712_v45 }
 0xf9f   :  { %10705 = vadd.xlane.f32.xlu1 %v10704_v32  ;;  %v10724_v55 = vadd.f32 %v10723_v62, %v10716_v39 }
 0xfa1   :  { %10720 = vadd.xlane.f32.xlu0 %v10719_v27 }
 0xfa3   :  { %10725 = vadd.xlane.f32.xlu1 %v10724_v55 }
0x102a   :  { %v10701_v14 = vpop.xlane.xlu0 %10700 }
0x102b   :  { %v10707_v20 = vmul.f32 0.03125, %v10701_v14 }
0x102c   :  { %v10706_v41 = vpop.xlane.xlu1 %10705 }
0x102d   :  { %v10708_v58 = vmul.f32 0.03125, %v10706_v41  ;;  %v10729_v37 = vmul.f32 %v10707_v20, %v10707_v20  ;;  %v10733_v16 = vsub.f32 %v14726_v28, %v10707_v20  ;;  %v10734_v10 = vsub.f32 %v14732_v50, %v10707_v20 }
0x102e   :  { %v10721_v38 = vpop.xlane.xlu0 %10720  ;;  %v10735_v34 = vsub.f32 %v14729_v57, %v10707_v20  ;;  %v10736_v52 = vsub.f32 %v10692_v44, %v10707_v20  ;;  %v10780_v28 = vrot.slane %v14605_v54, %v14451_v6  ;;  %v10784_v57 = vrot.slane %v14613_v56, %v14451_v6 }
0x102f   :  { %v10727_v23 = vmul.f32 0.03125, %v10721_v38  ;;  %v10730_v25 = vmul.f32 %v10708_v58, %v10708_v58  ;;  %v10737_v18 = vsub.f32 %v14737_v30, %v10708_v58  ;;  %v10738_v31 = vsub.f32 %v14745_v49, %v10708_v58 }
0x1030   :  { %v10726_v36 = vpop.xlane.xlu1 %10725  ;;  %v10739_v3 = vsub.f32 %v14740_v46, %v10708_v58  ;;  %v10740_v48 = vsub.f32 %v10696_v61, %v10708_v58  ;;  %v10788_v50 = vrot.slane %v14609_v9, %v14451_v6  ;;  %v10792_v30 = vrot.slane %v14617_v29, %v14451_v6 }
0x1031   :  { %v10731_v53 = vsub.f32 %v10727_v23, %v10729_v37  ;;  %v10728_v21 = vmul.f32 0.03125, %v10726_v36 }
0x1033   :  { %v10741_v2 = vadd.f32 1e-05, %v10731_v53  ;;  %v10732_v0 = vsub.f32 %v10728_v21, %v10730_v25 }
0x1035   :  { %13435 = vrsqrt.f32 %v10741_v2  ;;  %v10742_v1 = vadd.f32 1e-05, %v10732_v0 }
0x1037   :  { %13437 = vrsqrt.f32 %v10742_v1 }
0x103f   :  { %v13436_v63 = vpop.eup %13435 }
0x1040   :  { %v10745_v59 = vmul.f32 %v13436_v63, %v10733_v16  ;;  %v10746_v40 = vmul.f32 %v13436_v63, %v10734_v10  ;;  %v10747_v26 = vmul.f32 %v13436_v63, %v10735_v34  ;;  %v10748_v33 = vmul.f32 %v13436_v63, %v10736_v52 }
0x1041   :  { %v13438_v60 = vpop.eup %13437 }
0x1042   :  { %v10749_v11 = vmul.f32 %v13438_v60, %v10737_v18  ;;  %v10750_v46 = vmul.f32 %v13438_v60, %v10738_v31  ;;  %v10751_v49 = vmul.f32 %v13438_v60, %v10739_v3  ;;  %v10752_v47 = vmul.f32 %v13438_v60, %v10740_v48 }
0x1043   :  { %v10769_v44 = vmul.f32 %v10756_v15, %v10745_v59  ;;  %v10770_v5 = vmul.f32 %v10760_v19, %v10746_v40  ;;  %v10771_v22 = vmul.f32 %v10764_v17, %v10747_v26  ;;  %v10772_v12 = vmul.f32 %v10768_v7, %v10748_v33 }
0x1044   :  { %v10773_v51 = vmul.f32 %v10756_v15, %v10749_v11  ;;  %v10774_v42 = vmul.f32 %v10760_v19, %v10750_v46  ;;  %v10775_v54 = vmul.f32 %v10764_v17, %v10751_v49  ;;  %v10776_v24 = vmul.f32 %v10768_v7, %v10752_v47 }
0x1045   :  { %v10793_v61 = vadd.f32 %v10780_v28, %v10769_v44  ;;  %v10794_v56 = vadd.f32 %v10784_v57, %v10770_v5  ;;  %v10795_v13 = vadd.f32 %v10788_v50, %v10771_v22  ;;  %v10796_v43 = vadd.f32 %v10792_v30, %v10772_v12 }
0x1046   :  { %v10797_v9 = vadd.f32 %v10780_v28, %v10773_v51  ;;  %v10798_v6 = vadd.f32 %v10784_v57, %v10774_v42  ;;  %v10799_v29 = vadd.f32 %v10788_v50, %v10775_v54  ;;  %v10800_v8 = vadd.f32 %v10792_v30, %v10776_v24 }
0x1047   :  { %v12061_v4 = vpack.c.bf16 %v10794_v56, %v10793_v61  ;;  %v12062_v35 = vpack.c.bf16 %v10796_v43, %v10795_v13 }
0x1048   :  { %v12063_v32 = vpack.c.bf16 %v10798_v6, %v10797_v9  ;;  %v12064_v45 = vpack.c.bf16 %v10800_v8, %v10799_v29 }
0x1049   :  { %10833 = vst [vmem:[#allocation22] sm:$0xff] %v12061_v4  ;;  %10834 = vst [vmem:[#allocation22 + $0x8] sm:$0xff] %v12062_v35 }
0x104a   :  { %10835 = vst [vmem:[#allocation22 + $0x10] sm:$0xff] %v12063_v32  ;;  %10836 = vst [vmem:[#allocation22 + $0x18] sm:$0xff] %v12064_v45 }
0x104b   :  { %13730 = shalt.err (!%p13727_p2)
}
0x104c   :  { %s13731_s5 = scalar_lea.hbm %s14812_s12, 512 }
0x104d   :  { %p13732_p3 = scmp.ne.s32.totalorder %s14812_s12, %s13731_s5  ;;  %p13735_p4 = scmp.lt.u32.totalorder %s13731_s5, %s14812_s12 }
0x104f   :  { %p13737_p5 = pnand %p13735_p4, %p13732_p3 }
0x1051   :  { %13740 = shalt.err (!%p13737_p5)
}
0x1052   :  { %10848 = dma.vmem_to_hbm [thread:$0]  %s10843_s22, 512, %s14812_s12, [#allocation4], %s13759_s15, %s13759_s15, %s13760_s16  }
0x1053   :  { %13755 = dma.done.wait [#allocation4], 512  }
0x1054   :  { %13756 = vsyncadd [#allocation4], 4294966784 }
0x1055   :  { %10852 = vsyncpa [#allocation3], 1 }
0x1056   :  { %10853 = vsyncpa [#allocation6], 1 }
0x1057   :  { %10854 = vsyncpa [#allocation9], 1 }
0x1058   :  { %10855 = vsyncpa [#allocation12], 1 }
0x1059   :  { %10856 = vsyncpa [#allocation15], 1 }
0x105a   :  { %10857 = vsyncpa [#allocation18], 1 }
0x105b   :  { %10858 = vsyncpa [#allocation21], 1 }
0x105c   :  { %10859 = vsyncpa [#allocation4], 1 }

</bundles_post_ra>
